<compile_context>
chip_gen: v7x
topology: tpu7x:2x2x1
jax: 0.10.0
libtpu: 0.0.40
codegen_flags: <defaults>
</compile_context>

<pallas_src>
import functools
import math

import jax
import jax.numpy as jnp
from jax.experimental import pallas as pl
from jax.experimental.pallas import tpu as pltpu


# ---------------------------------------------------------------------------
# Kernel 1: fused FP32 LayerNorm (no affine) + scale/shift modulation.
# ---------------------------------------------------------------------------
def _ln_modulate_kernel(x_ref, scale_ref, shift_ref, o_ref, *, eps):
    x = x_ref[...].astype(jnp.float32)                      # (1, L, D)
    mean = jnp.mean(x, axis=-1, keepdims=True)
    var = jnp.mean(jnp.square(x - mean), axis=-1, keepdims=True)
    normed = (x - mean) * jax.lax.rsqrt(var + eps)
    out = normed * (1.0 + scale_ref[...].astype(jnp.float32)) \
        + shift_ref[...].astype(jnp.float32)
    o_ref[...] = out.astype(o_ref.dtype)


def layernorm_modulate(x, scale, shift, eps):
    """x: (NB, L, D); scale/shift: (NB, 1, D).  Returns LN(x)*(1+scale)+shift."""
    NB, L, D = x.shape
    return pl.pallas_call(
        functools.partial(_ln_modulate_kernel, eps=eps),
        out_shape=jax.ShapeDtypeStruct((NB, L, D), x.dtype),
        grid_spec=pltpu.PrefetchScalarGridSpec(
            num_scalar_prefetch=0,
            grid=(NB,),
            in_specs=[
                pl.BlockSpec((1, L, D), lambda i: (i, 0, 0)),
                pl.BlockSpec((1, 1, D), lambda i: (i, 0, 0)),
                pl.BlockSpec((1, 1, D), lambda i: (i, 0, 0)),
            ],
            out_specs=pl.BlockSpec((1, L, D), lambda i: (i, 0, 0)),
        ),
        compiler_params=pltpu.CompilerParams(
            dimension_semantics=("parallel",)),
    )(x, scale, shift)


# ---------------------------------------------------------------------------
# Kernel 2: tiled matmul + bias (+ optional gelu-tanh) for the linear layers.
# ---------------------------------------------------------------------------
def _linear_kernel(x_ref, w_ref, b_ref, o_ref, acc_ref, *, activation):
    @pl.when(pl.program_id(2) == 0)
    def _():
        acc_ref[...] = jnp.zeros_like(acc_ref)

    acc_ref[...] += jnp.dot(x_ref[...], w_ref[...],
                            preferred_element_type=jnp.float32)

    @pl.when(pl.program_id(2) == pl.num_programs(2) - 1)
    def _():
        out = acc_ref[...] + b_ref[...].astype(jnp.float32)
        if activation == "gelu_tanh":
            c = math.sqrt(2.0 / math.pi)
            out = 0.5 * out * (1.0 + jnp.tanh(c * (out + 0.044715 * out * out * out)))
        o_ref[...] = out.astype(o_ref.dtype)


def _tile(n, t=128):
    return t if n % t == 0 else n


def linear(x, w, b, activation=None):
    """x: (M, K), w: (K, N), b: (N,). Returns x @ w + b (optionally gelu-tanh)."""
    M, K = x.shape
    N = w.shape[1]
    tm, tn, tk = _tile(M), _tile(N), _tile(K)
    return pl.pallas_call(
        functools.partial(_linear_kernel, activation=activation),
        out_shape=jax.ShapeDtypeStruct((M, N), x.dtype),
        grid_spec=pltpu.PrefetchScalarGridSpec(
            num_scalar_prefetch=0,
            grid=(M // tm, N // tn, K // tk),
            in_specs=[
                pl.BlockSpec((tm, tk), lambda i, j, k: (i, k)),
                pl.BlockSpec((tk, tn), lambda i, j, k: (k, j)),
                pl.BlockSpec((1, tn), lambda i, j, k: (0, j)),
            ],
            out_specs=pl.BlockSpec((tm, tn), lambda i, j, k: (i, j)),
            scratch_shapes=[pltpu.VMEM((tm, tn), jnp.float32)],
        ),
        compiler_params=pltpu.CompilerParams(
            dimension_semantics=("parallel", "parallel", "arbitrary")),
    )(x, w, b.reshape(1, N))


# ---------------------------------------------------------------------------
# Kernel 3: flash attention forward (online softmax).
# ---------------------------------------------------------------------------
def _flash_attn_kernel(q_ref, k_ref, v_ref, o_ref, m_ref, l_ref, acc_ref, *, scale):
    ki = pl.program_id(2)

    @pl.when(ki == 0)
    def _():
        m_ref[...] = jnp.full_like(m_ref, -jnp.inf)
        l_ref[...] = jnp.zeros_like(l_ref)
        acc_ref[...] = jnp.zeros_like(acc_ref)

    s = jnp.einsum("bqd,bkd->bqk", q_ref[...], k_ref[...],
                   preferred_element_type=jnp.float32) * scale      # (1, tq, tk)
    m_prev = m_ref[...]
    m_new = jnp.maximum(m_prev, jnp.max(s, axis=-1, keepdims=True))
    alpha = jnp.exp(m_prev - m_new)
    p = jnp.exp(s - m_new)
    l_ref[...] = alpha * l_ref[...] + jnp.sum(p, axis=-1, keepdims=True)
    acc_ref[...] = alpha * acc_ref[...] + jnp.einsum(
        "bqk,bkd->bqd", p, v_ref[...].astype(jnp.float32),
        preferred_element_type=jnp.float32)
    m_ref[...] = m_new

    @pl.when(ki == pl.num_programs(2) - 1)
    def _():
        o_ref[...] = (acc_ref[...] / l_ref[...]).astype(o_ref.dtype)


def flash_attention(q, k, v, *, scale):
    """q: (B, H, Sq, Dh); k, v: (B, H, Skv, Dh). Full (non-masked) attention."""
    B, H, Sq, Dh = q.shape
    Skv = k.shape[2]
    qf = q.reshape(B * H, Sq, Dh)
    kf = k.reshape(B * H, Skv, Dh)
    vf = v.reshape(B * H, Skv, Dh)
    tq = _tile(Sq)
    tk = _tile(Skv)
    out = pl.pallas_call(
        functools.partial(_flash_attn_kernel, scale=scale),
        out_shape=jax.ShapeDtypeStruct((B * H, Sq, Dh), q.dtype),
        grid_spec=pltpu.PrefetchScalarGridSpec(
            num_scalar_prefetch=0,
            grid=(B * H, Sq // tq, Skv // tk),
            in_specs=[
                pl.BlockSpec((1, tq, Dh), lambda b, qi, ki: (b, qi, 0)),
                pl.BlockSpec((1, tk, Dh), lambda b, qi, ki: (b, ki, 0)),
                pl.BlockSpec((1, tk, Dh), lambda b, qi, ki: (b, ki, 0)),
            ],
            out_specs=pl.BlockSpec((1, tq, Dh), lambda b, qi, ki: (b, qi, 0)),
            scratch_shapes=[
                pltpu.VMEM((1, tq, 1), jnp.float32),
                pltpu.VMEM((1, tq, 1), jnp.float32),
                pltpu.VMEM((1, tq, Dh), jnp.float32),
            ],
        ),
        compiler_params=pltpu.CompilerParams(
            dimension_semantics=("parallel", "parallel", "arbitrary")),
    )(qf, kf, vf)
    return out.reshape(B, H, Sq, Dh)


# ---------------------------------------------------------------------------
# Plain-JAX glue shared by the Pallas path and the reference.
# ---------------------------------------------------------------------------
def _rms_norm(x, weight, eps):
    var = jnp.mean(jnp.square(x), axis=-1, keepdims=True)
    return x * jax.lax.rsqrt(var + eps) * weight


def _apply_rope(x, cos, sin):
    # x: (B, H, S, Dh); cos/sin: (1, 1, S, Dh//2).  Complex pair rotation.
    xe = x[..., 0::2]
    xo = x[..., 1::2]
    oe = xe * cos - xo * sin
    oo = xe * sin + xo * cos
    return jnp.stack([oe, oo], axis=-1).reshape(x.shape)


# ---------------------------------------------------------------------------
# Pallas-backed block forward.
# ---------------------------------------------------------------------------
def _attention_pallas(x_q, x_kv, p, num_heads, eps, rope_cos=None, rope_sin=None):
    B, Sq, D = x_q.shape
    Skv = x_kv.shape[1]
    Dh = D // num_heads
    q = linear(x_q.reshape(B * Sq, D), p["wq"], p["bq"])
    k = linear(x_kv.reshape(B * Skv, D), p["wk"], p["bk"])
    v = linear(x_kv.reshape(B * Skv, D), p["wv"], p["bv"])
    # qk rms-norm-across-heads + rotary are cheap elementwise glue.
    # TODO(synk): fuse these into the QKV matmul epilogue.
    q = _rms_norm(q, p["nq"], eps)
    k = _rms_norm(k, p["nk"], eps)
    q = q.reshape(B, Sq, num_heads, Dh).transpose(0, 2, 1, 3)
    k = k.reshape(B, Skv, num_heads, Dh).transpose(0, 2, 1, 3)
    v = v.reshape(B, Skv, num_heads, Dh).transpose(0, 2, 1, 3)
    if rope_cos is not None:
        q = _apply_rope(q, rope_cos, rope_sin)
        k = _apply_rope(k, rope_cos, rope_sin)
    o = flash_attention(q, k, v, scale=1.0 / math.sqrt(Dh))
    o = o.transpose(0, 2, 1, 3).reshape(B * Sq, D)
    return linear(o, p["wo"], p["bo"]).reshape(B, Sq, D)


def causal_wan_block_pallas(params, hidden, enc, temb, rotary_emb, *,
                            num_heads, eps=1e-6, cross_attn_norm=True):
    B, S, D = hidden.shape
    F_ = temb.shape[1]
    L = S // F_

    mod = (params["scale_shift_table"] + temb).astype(jnp.float32)   # (B, F, 6, D)
    shift_msa, scale_msa, gate_msa, c_shift, c_scale, c_gate = jnp.split(mod, 6, axis=2)

    rope_cos = jnp.real(rotary_emb).astype(jnp.float32)
    rope_sin = jnp.imag(rotary_emb).astype(jnp.float32)

    # --- norm1 + MSA modulation (fused Pallas kernel) ---
    norm_hidden = layernorm_modulate(
        hidden.reshape(B * F_, L, D),
        scale_msa.reshape(B * F_, 1, D),
        shift_msa.reshape(B * F_, 1, D),
        eps,
    ).reshape(B, S, D)

    # --- self attention with rotary ---
    attn1 = _attention_pallas(norm_hidden, norm_hidden, params["attn1"],
                              num_heads, eps, rope_cos, rope_sin)
    hidden = hidden + (attn1.reshape(B, F_, L, D) * gate_msa).reshape(B, S, D)

    # --- norm2 (affine FP32 LayerNorm, expressed via the same fused kernel) ---
    if cross_attn_norm:
        gamma = params["norm2_gamma"]
        beta = params["norm2_beta"]
        norm2 = layernorm_modulate(
            hidden,
            jnp.broadcast_to((gamma - 1.0).reshape(1, 1, D), (B, 1, D)),
            jnp.broadcast_to(beta.reshape(1, 1, D), (B, 1, D)),
            eps,
        )
    else:
        norm2 = hidden

    # --- cross attention ---
    attn2 = _attention_pallas(norm2, enc, params["attn2"], num_heads, eps)
    hidden = hidden + attn2

    # --- norm3 + FFN modulation (fused Pallas kernel) ---
    norm3 = layernorm_modulate(
        hidden.reshape(B * F_, L, D),
        c_scale.reshape(B * F_, 1, D),
        c_shift.reshape(B * F_, 1, D),
        eps,
    ).reshape(B, S, D)

    # --- FFN: matmul + bias + gelu-tanh fused, then down projection ---
    h1 = linear(norm3.reshape(B * S, D), params["ffn_w1"], params["ffn_b1"],
                activation="gelu_tanh")
    ff = linear(h1, params["ffn_w2"], params["ffn_b2"]).reshape(B, S, D)

    hidden = hidden + (ff.reshape(B, F_, L, D) * c_gate).reshape(B, S, D)
    return hidden


# ---------------------------------------------------------------------------
# Pure-JAX reference (mirrors the PyTorch forward, all in f32).
# ---------------------------------------------------------------------------
def causal_wan_block_reference(params, hidden, enc, temb, rotary_emb, *,
                               num_heads, eps=1e-6, cross_attn_norm=True):
    B, S, D = hidden.shape
    F_ = temb.shape[1]
    L = S // F_
    Dh = D // num_heads

    mod = (params["scale_shift_table"] + temb).astype(jnp.float32)
    shift_msa, scale_msa, gate_msa, c_shift, c_scale, c_gate = jnp.split(mod, 6, axis=2)
    rope_cos = jnp.real(rotary_emb).astype(jnp.float32)
    rope_sin = jnp.imag(rotary_emb).astype(jnp.float32)

    def ln(x):
        mean = jnp.mean(x, axis=-1, keepdims=True)
        var = jnp.mean(jnp.square(x - mean), axis=-1, keepdims=True)
        return (x - mean) * jax.lax.rsqrt(var + eps)

    def attn(x_q, x_kv, p, use_rope):
        Sq = x_q.shape[1]
        Skv = x_kv.shape[1]
        q = x_q @ p["wq"] + p["bq"]
        k = x_kv @ p["wk"] + p["bk"]
        v = x_kv @ p["wv"] + p["bv"]
        q = _rms_norm(q, p["nq"], eps)
        k = _rms_norm(k, p["nk"], eps)
        q = q.reshape(B, Sq, num_heads, Dh).transpose(0, 2, 1, 3)
        k = k.reshape(B, Skv, num_heads, Dh).transpose(0, 2, 1, 3)
        v = v.reshape(B, Skv, num_heads, Dh).transpose(0, 2, 1, 3)
        if use_rope:
            q = _apply_rope(q, rope_cos, rope_sin)
            k = _apply_rope(k, rope_cos, rope_sin)
        s = jnp.einsum("bhqd,bhkd->bhqk", q, k) / math.sqrt(Dh)
        a = jax.nn.softmax(s, axis=-1)
        o = jnp.einsum("bhqk,bhkd->bhqd", a, v)
        o = o.transpose(0, 2, 1, 3).reshape(B, Sq, D)
        return o @ p["wo"] + p["bo"]

    norm1 = (ln(hidden).reshape(B, F_, L, D) * (1 + scale_msa) + shift_msa).reshape(B, S, D)
    a1 = attn(norm1, norm1, params["attn1"], True)
    hidden = hidden + (a1.reshape(B, F_, L, D) * gate_msa).reshape(B, S, D)

    if cross_attn_norm:
        norm2 = ln(hidden) * params["norm2_gamma"] + params["norm2_beta"]
    else:
        norm2 = hidden
    a2 = attn(norm2, enc, params["attn2"], False)
    hidden = hidden + a2

    norm3 = (ln(hidden).reshape(B, F_, L, D) * (1 + c_scale) + c_shift).reshape(B, S, D)
    h1 = norm3 @ params["ffn_w1"] + params["ffn_b1"]
    h1 = 0.5 * h1 * (1.0 + jnp.tanh(math.sqrt(2.0 / math.pi) * (h1 + 0.044715 * h1 ** 3)))
    ff = h1 @ params["ffn_w2"] + params["ffn_b2"]
    hidden = hidden + (ff.reshape(B, F_, L, D) * c_gate).reshape(B, S, D)
    return hidden


# ---------------------------------------------------------------------------
# Parameter construction.
# ---------------------------------------------------------------------------
def init_params(key, dim, ffn_dim):
    keys = iter(jax.random.split(key, 40))

    def w(shape, scale):
        return jax.random.normal(next(keys), shape, dtype=jnp.float32) * scale

    def attn_params():
        s = 1.0 / math.sqrt(dim)
        return {
            "wq": w((dim, dim), s), "bq": w((dim,), 0.1),
            "wk": w((dim, dim), s), "bk": w((dim,), 0.1),
            "wv": w((dim, dim), s), "bv": w((dim,), 0.1),
            "wo": w((dim, dim), s), "bo": w((dim,), 0.1),
            "nq": 1.0 + w((dim,), 0.1),
            "nk": 1.0 + w((dim,), 0.1),
        }

    return {
        "scale_shift_table": w((1, 6, dim), 1.0 / math.sqrt(dim)),
        "attn1": attn_params(),
        "attn2": attn_params(),
        "norm2_gamma": 1.0 + w((dim,), 0.1),
        "norm2_beta": w((dim,), 0.1),
        "ffn_w1": w((dim, ffn_dim), 1.0 / math.sqrt(dim)),
        "ffn_b1": w((ffn_dim,), 0.1),
        "ffn_w2": w((ffn_dim, dim), 1.0 / math.sqrt(ffn_dim)),
        "ffn_b2": w((dim,), 0.1),
    }


if __name__ == "__main__":
    key = jax.random.PRNGKey(0)
    dim, ffn_dim, num_heads = 128, 256, 4
    head_dim = dim // num_heads
    B, num_frames, frame_seqlen = 2, 2, 128
    S = num_frames * frame_seqlen
    S_enc = 128
    eps = 1e-6

    k_p, k_h, k_e, k_t = jax.random.split(key, 4)
    params = init_params(k_p, dim, ffn_dim)
    hidden = jax.random.normal(k_h, (B, S, dim), dtype=jnp.float32)
    enc = jax.random.normal(k_e, (B, S_enc, dim), dtype=jnp.float32)
    temb = jax.random.normal(k_t, (B, num_frames, 6, dim), dtype=jnp.float32)

    # Rotary table as the module receives it: complex64 (1, 1, S, head_dim // 2).
    inv_freq = 1.0 / (10000.0 ** (jnp.arange(0, head_dim, 2, dtype=jnp.float32) / head_dim))
    angles = jnp.arange(S, dtype=jnp.float32)[:, None] * inv_freq[None, :]
    rotary_emb = jax.lax.complex(jnp.cos(angles), jnp.sin(angles)).reshape(
        1, 1, S, head_dim // 2)

    fwd = jax.jit(functools.partial(causal_wan_block_pallas, num_heads=num_heads,
                                    eps=eps, cross_attn_norm=True))
    out = jax.block_until_ready(fwd(params, hidden, enc, temb, rotary_emb))

    ref = jax.block_until_ready(
        causal_wan_block_reference(params, hidden, enc, temb, rotary_emb,
                                   num_heads=num_heads, eps=eps, cross_attn_norm=True))

    assert out.shape == (B, S, dim)
    max_err = jnp.max(jnp.abs(out - ref))
    rel_err = max_err / (jnp.max(jnp.abs(ref)) + 1e-6)
    assert rel_err < 2e-2, f"mismatch vs reference: abs {max_err}, rel {rel_err}"
    print("KERNEL_OK")
</pallas_src>

<mosaic_0001>
module attributes {stable_mosaic.version = 11 : i64} {
  func.func @_ln_modulate_kernel(%arg0: i32, %arg1: memref<1x128x128xf32, #tpu.memory_space<vmem>>, %arg2: memref<1x1x128xf32, #tpu.memory_space<vmem>>, %arg3: memref<1x1x128xf32, #tpu.memory_space<vmem>>, %arg4: memref<1x128x128xf32, #tpu.memory_space<vmem>>) attributes {dimension_semantics = [#tpu.dimension_semantics<parallel>], iteration_bounds = array<i64: 4>, scalar_prefetch = 0 : i64, scratch_operands = 0 : i64, tpu.core_type = #tpu.core_type<tc>, window_params = [{transform_indices = @transform_0, window_bounds = array<i64: 1, 128, 128>}, {transform_indices = @transform_1, window_bounds = array<i64: 1, 1, 128>}, {transform_indices = @transform_2, window_bounds = array<i64: 1, 1, 128>}, {transform_indices = @transform_3, window_bounds = array<i64: 1, 128, 128>}]} {
    %c0 = arith.constant 0 : index
    %c0_0 = arith.constant 0 : index
    %c0_1 = arith.constant 0 : index
    %0 = vector.load %arg1[%c0, %c0_0, %c0_1] : memref<1x128x128xf32, #tpu.memory_space<vmem>>, vector<1x128x128xf32>
    %cst = arith.constant dense<0.000000e+00> : vector<1x128xf32>
    %1 = vector.multi_reduction <add>, %0, %cst [2] : vector<1x128x128xf32> to vector<1x128xf32>
    %2 = vector.shape_cast %1 : vector<1x128xf32> to vector<1x128x1xf32>
    %cst_2 = arith.constant 1.280000e+02 : f32
    %3 = vector.broadcast %cst_2 : f32 to vector<1x128x1xf32>
    %4 = arith.divf %2, %3 : vector<1x128x1xf32>
    %5 = vector.broadcast %4 : vector<1x128x1xf32> to vector<1x128x128xf32>
    %6 = arith.subf %0, %5 : vector<1x128x128xf32>
    %7 = arith.mulf %6, %6 : vector<1x128x128xf32>
    %cst_3 = arith.constant dense<0.000000e+00> : vector<1x128xf32>
    %8 = vector.multi_reduction <add>, %7, %cst_3 [2] : vector<1x128x128xf32> to vector<1x128xf32>
    %9 = vector.shape_cast %8 : vector<1x128xf32> to vector<1x128x1xf32>
    %cst_4 = arith.constant 1.280000e+02 : f32
    %10 = vector.broadcast %cst_4 : f32 to vector<1x128x1xf32>
    %11 = arith.divf %9, %10 : vector<1x128x1xf32>
    %12 = vector.broadcast %4 : vector<1x128x1xf32> to vector<1x128x128xf32>
    %13 = arith.subf %0, %12 : vector<1x128x128xf32>
    %cst_5 = arith.constant 9.99999997E-7 : f32
    %14 = vector.broadcast %cst_5 : f32 to vector<1x128x1xf32>
    %15 = arith.addf %11, %14 : vector<1x128x1xf32>
    %16 = math.rsqrt %15 : vector<1x128x1xf32>
    %17 = vector.broadcast %16 : vector<1x128x1xf32> to vector<1x128x128xf32>
    %18 = arith.mulf %13, %17 : vector<1x128x128xf32>
    %c0_6 = arith.constant 0 : index
    %c0_7 = arith.constant 0 : index
    %c0_8 = arith.constant 0 : index
    %19 = vector.load %arg2[%c0_6, %c0_7, %c0_8] : memref<1x1x128xf32, #tpu.memory_space<vmem>>, vector<1x1x128xf32>
    %cst_9 = arith.constant 1.000000e+00 : f32
    %20 = vector.broadcast %cst_9 : f32 to vector<1x1x128xf32>
    %21 = arith.addf %20, %19 : vector<1x1x128xf32>
    %22 = vector.broadcast %21 : vector<1x1x128xf32> to vector<1x128x128xf32>
    %23 = arith.mulf %18, %22 : vector<1x128x128xf32>
    %c0_10 = arith.constant 0 : index
    %c0_11 = arith.constant 0 : index
    %c0_12 = arith.constant 0 : index
    %24 = vector.load %arg3[%c0_10, %c0_11, %c0_12] : memref<1x1x128xf32, #tpu.memory_space<vmem>>, vector<1x1x128xf32>
    %25 = vector.broadcast %24 : vector<1x1x128xf32> to vector<1x128x128xf32>
    %26 = arith.addf %23, %25 : vector<1x128x128xf32>
    %c0_13 = arith.constant 0 : index
    %c0_14 = arith.constant 0 : index
    %c0_15 = arith.constant 0 : index
    %27 = vector.load %arg4[%c0_13, %c0_14, %c0_15] : memref<1x128x128xf32, #tpu.memory_space<vmem>>, vector<1x128x128xf32>
    tpu.vector_store %arg4[%c0_13, %c0_14, %c0_15], %26 {strides = array<i32>} : memref<1x128x128xf32, #tpu.memory_space<vmem>>, vector<1x128x128xf32>,
    return
  }
  func.func @transform_0(%arg0: i32) -> (i32, i32, i32) {
    %c0_i32 = arith.constant 0 : i32
    %c0_i32_0 = arith.constant 0 : i32
    %c0_i32_1 = arith.constant 0 : i32
    return %arg0, %c0_i32, %c0_i32_0 : i32, i32, i32
  }
  func.func @transform_1(%arg0: i32) -> (i32, i32, i32) {
    %c0_i32 = arith.constant 0 : i32
    %c0_i32_0 = arith.constant 0 : i32
    %c0_i32_1 = arith.constant 0 : i32
    return %arg0, %c0_i32, %c0_i32_0 : i32, i32, i32
  }
  func.func @transform_2(%arg0: i32) -> (i32, i32, i32) {
    %c0_i32 = arith.constant 0 : i32
    %c0_i32_0 = arith.constant 0 : i32
    %c0_i32_1 = arith.constant 0 : i32
    return %arg0, %c0_i32, %c0_i32_0 : i32, i32, i32
  }
  func.func @transform_3(%arg0: i32) -> (i32, i32, i32) {
    %c0_i32 = arith.constant 0 : i32
    %c0_i32_0 = arith.constant 0 : i32
    %c0_i32_1 = arith.constant 0 : i32
    return %arg0, %c0_i32, %c0_i32_0 : i32, i32, i32
  }
}

module attributes {stable_mosaic.version = 11 : i64} {
  func.func @_linear_kernel(%arg0: i32, %arg1: i32, %arg2: i32, %arg3: memref<128x128xf32, #tpu.memory_space<vmem>>, %arg4: memref<128x128xf32, #tpu.memory_space<vmem>>, %arg5: memref<1x128xf32, #tpu.memory_space<vmem>>, %arg6: memref<128x128xf32, #tpu.memory_space<vmem>>, %arg7: memref<128x128xf32, #tpu.memory_space<vmem>>) attributes {dimension_semantics = [#tpu.dimension_semantics<parallel>, #tpu.dimension_semantics<parallel>, #tpu.dimension_semantics<arbitrary>], iteration_bounds = array<i64: 4, 1, 1>, scalar_prefetch = 0 : i64, scratch_operands = 1 : i64, tpu.core_type = #tpu.core_type<tc>, window_params = [{transform_indices = @transform_0, window_bounds = array<i64: 128, 128>}, {transform_indices = @transform_1, window_bounds = array<i64: 128, 128>}, {transform_indices = @transform_2, window_bounds = array<i64: 1, 128>}, {transform_indices = @transform_3, window_bounds = array<i64: 128, 128>}]} {
    %c0_i32 = arith.constant 0 : i32
    %0 = arith.cmpi eq, %arg2, %c0_i32 : i32
    %1 = arith.extui %0 : i1 to i32
    %c0_i32_0 = arith.constant 0 : i32
    %2 = arith.cmpi ne, %1, %c0_i32_0 : i32
    scf.if %2 {
      %cst_10 = arith.constant 0.000000e+00 : f32
      %12 = vector.broadcast %cst_10 : f32 to vector<128x128xf32>
      %c0_11 = arith.constant 0 : index
      %c0_12 = arith.constant 0 : index
      %13 = vector.load %arg7[%c0_11, %c0_12] : memref<128x128xf32, #tpu.memory_space<vmem>>, vector<128x128xf32>
      tpu.vector_store %arg7[%c0_11, %c0_12], %12 {strides = array<i32>} : memref<128x128xf32, #tpu.memory_space<vmem>>, vector<128x128xf32>,
    } else {
    }
    %c0 = arith.constant 0 : index
    %c0_1 = arith.constant 0 : index
    %3 = vector.load %arg7[%c0, %c0_1] : memref<128x128xf32, #tpu.memory_space<vmem>>, vector<128x128xf32>
    %c0_2 = arith.constant 0 : index
    %c0_3 = arith.constant 0 : index
    %4 = vector.load %arg3[%c0_2, %c0_3] : memref<128x128xf32, #tpu.memory_space<vmem>>, vector<128x128xf32>
    %c0_4 = arith.constant 0 : index
    %c0_5 = arith.constant 0 : index
    %5 = vector.load %arg4[%c0_4, %c0_5] : memref<128x128xf32, #tpu.memory_space<vmem>>, vector<128x128xf32>
    %cst = arith.constant dense<0.000000e+00> : vector<128x128xf32>
    %6 = tpu.matmul %4, %5, %cst {dimension_numbers = #tpu.dot_dimension_numbers<[1], [0], [0], [1], [0, 0, 1, 1], [], []>} : vector<128x128xf32>, vector<128x128xf32>, vector<128x128xf32> -> vector<128x128xf32>
    %7 = arith.addf %3, %6 : vector<128x128xf32>
    %c0_6 = arith.constant 0 : index
    %c0_7 = arith.constant 0 : index
    %8 = vector.load %arg7[%c0_6, %c0_7] : memref<128x128xf32, #tpu.memory_space<vmem>>, vector<128x128xf32>
    tpu.vector_store %arg7[%c0_6, %c0_7], %7 {strides = array<i32>} : memref<128x128xf32, #tpu.memory_space<vmem>>, vector<128x128xf32>,
    %c0_i32_8 = arith.constant 0 : i32
    %9 = arith.cmpi eq, %arg2, %c0_i32_8 : i32
    %10 = arith.extui %9 : i1 to i32
    %c0_i32_9 = arith.constant 0 : i32
    %11 = arith.cmpi ne, %10, %c0_i32_9 : i32
    scf.if %11 {
      %c0_10 = arith.constant 0 : index
      %c0_11 = arith.constant 0 : index
      %12 = vector.load %arg7[%c0_10, %c0_11] : memref<128x128xf32, #tpu.memory_space<vmem>>, vector<128x128xf32>
      %c0_12 = arith.constant 0 : index
      %c0_13 = arith.constant 0 : index
      %13 = vector.load %arg5[%c0_12, %c0_13] : memref<1x128xf32, #tpu.memory_space<vmem>>, vector<1x128xf32>
      %14 = vector.broadcast %13 : vector<1x128xf32> to vector<128x128xf32>
      %15 = arith.addf %12, %14 : vector<128x128xf32>
      %c0_14 = arith.constant 0 : index
      %c0_15 = arith.constant 0 : index
      %16 = vector.load %arg6[%c0_14, %c0_15] : memref<128x128xf32, #tpu.memory_space<vmem>>, vector<128x128xf32>
      tpu.vector_store %arg6[%c0_14, %c0_15], %15 {strides = array<i32>} : memref<128x128xf32, #tpu.memory_space<vmem>>, vector<128x128xf32>,
    } else {
    }
    return
  }
  func.func @transform_0(%arg0: i32, %arg1: i32, %arg2: i32) -> (i32, i32) {
    %c0_i32 = arith.constant 0 : i32
    return %arg0, %arg2 : i32, i32
  }
  func.func @transform_1(%arg0: i32, %arg1: i32, %arg2: i32) -> (i32, i32) {
    %c0_i32 = arith.constant 0 : i32
    return %arg2, %arg1 : i32, i32
  }
  func.func @transform_2(%arg0: i32, %arg1: i32, %arg2: i32) -> (i32, i32) {
    %c0_i32 = arith.constant 0 : i32
    %c0_i32_0 = arith.constant 0 : i32
    return %c0_i32, %arg1 : i32, i32
  }
  func.func @transform_3(%arg0: i32, %arg1: i32, %arg2: i32) -> (i32, i32) {
    %c0_i32 = arith.constant 0 : i32
    return %arg0, %arg1 : i32, i32
  }
}

module attributes {stable_mosaic.version = 11 : i64} {
  func.func @_flash_attn_kernel(%arg0: i32, %arg1: i32, %arg2: i32, %arg3: memref<1x128x32xf32, #tpu.memory_space<vmem>>, %arg4: memref<1x128x32xf32, #tpu.memory_space<vmem>>, %arg5: memref<1x128x32xf32, #tpu.memory_space<vmem>>, %arg6: memref<1x128x32xf32, #tpu.memory_space<vmem>>, %arg7: memref<1x128x1xf32, #tpu.memory_space<vmem>>, %arg8: memref<1x128x1xf32, #tpu.memory_space<vmem>>, %arg9: memref<1x128x32xf32, #tpu.memory_space<vmem>>) attributes {dimension_semantics = [#tpu.dimension_semantics<parallel>, #tpu.dimension_semantics<parallel>, #tpu.dimension_semantics<arbitrary>], iteration_bounds = array<i64: 8, 2, 2>, scalar_prefetch = 0 : i64, scratch_operands = 3 : i64, tpu.core_type = #tpu.core_type<tc>, window_params = [{transform_indices = @transform_0, window_bounds = array<i64: 1, 128, 32>}, {transform_indices = @transform_1, window_bounds = array<i64: 1, 128, 32>}, {transform_indices = @transform_2, window_bounds = array<i64: 1, 128, 32>}, {transform_indices = @transform_3, window_bounds = array<i64: 1, 128, 32>}]} {
    %c0_i32 = arith.constant 0 : i32
    %0 = arith.cmpi eq, %arg2, %c0_i32 : i32
    %1 = arith.extui %0 : i1 to i32
    %c0_i32_0 = arith.constant 0 : i32
    %2 = arith.cmpi ne, %1, %c0_i32_0 : i32
    scf.if %2 {
      %cst_32 = arith.constant 0xFF800000 : f32
      %34 = vector.broadcast %cst_32 : f32 to vector<1x128x1xf32>
      %c0_33 = arith.constant 0 : index
      %c0_34 = arith.constant 0 : index
      %c0_35 = arith.constant 0 : index
      %35 = vector.load %arg7[%c0_33, %c0_34, %c0_35] : memref<1x128x1xf32, #tpu.memory_space<vmem>>, vector<1x128x1xf32>
      tpu.vector_store %arg7[%c0_33, %c0_34, %c0_35], %34 {strides = array<i32>} : memref<1x128x1xf32, #tpu.memory_space<vmem>>, vector<1x128x1xf32>,
      %cst_36 = arith.constant 0.000000e+00 : f32
      %36 = vector.broadcast %cst_36 : f32 to vector<1x128x1xf32>
      %c0_37 = arith.constant 0 : index
      %c0_38 = arith.constant 0 : index
      %c0_39 = arith.constant 0 : index
      %37 = vector.load %arg8[%c0_37, %c0_38, %c0_39] : memref<1x128x1xf32, #tpu.memory_space<vmem>>, vector<1x128x1xf32>
      tpu.vector_store %arg8[%c0_37, %c0_38, %c0_39], %36 {strides = array<i32>} : memref<1x128x1xf32, #tpu.memory_space<vmem>>, vector<1x128x1xf32>,
      %cst_40 = arith.constant 0.000000e+00 : f32
      %38 = vector.broadcast %cst_40 : f32 to vector<1x128x32xf32>
      %c0_41 = arith.constant 0 : index
      %c0_42 = arith.constant 0 : index
      %c0_43 = arith.constant 0 : index
      %39 = vector.load %arg9[%c0_41, %c0_42, %c0_43] : memref<1x128x32xf32, #tpu.memory_space<vmem>>, vector<1x128x32xf32>
      tpu.vector_store %arg9[%c0_41, %c0_42, %c0_43], %38 {strides = array<i32>} : memref<1x128x32xf32, #tpu.memory_space<vmem>>, vector<1x128x32xf32>,
    } else {
    }
    %c0 = arith.constant 0 : index
    %c0_1 = arith.constant 0 : index
    %c0_2 = arith.constant 0 : index
    %3 = vector.load %arg3[%c0, %c0_1, %c0_2] : memref<1x128x32xf32, #tpu.memory_space<vmem>>, vector<1x128x32xf32>
    %c0_3 = arith.constant 0 : index
    %c0_4 = arith.constant 0 : index
    %c0_5 = arith.constant 0 : index
    %4 = vector.load %arg4[%c0_3, %c0_4, %c0_5] : memref<1x128x32xf32, #tpu.memory_space<vmem>>, vector<1x128x32xf32>
    "tpu.trace_start"() <{level = 10 : i32, message = "bqd,bkd->bqk"}> : () -> ()
    %cst = arith.constant dense<0.000000e+00> : vector<1x128x128xf32>
    %5 = tpu.matmul %3, %4, %cst {dimension_numbers = #tpu.dot_dimension_numbers<[2], [2], [1], [1], [0, 0, 0, 1, 1, 1], [0], [0]>} : vector<1x128x32xf32>, vector<1x128x32xf32>, vector<1x128x128xf32> -> vector<1x128x128xf32>
    "tpu.trace_stop"() : () -> ()
    %cst_6 = arith.constant 0.176776692 : f32
    %6 = vector.broadcast %cst_6 : f32 to vector<1x128x128xf32>
    %7 = arith.mulf %5, %6 : vector<1x128x128xf32>
    %c0_7 = arith.constant 0 : index
    %c0_8 = arith.constant 0 : index
    %c0_9 = arith.constant 0 : index
    %8 = vector.load %arg7[%c0_7, %c0_8, %c0_9] : memref<1x128x1xf32, #tpu.memory_space<vmem>>, vector<1x128x1xf32>
    %cst_10 = arith.constant dense<0xFF800000> : vector<1x128xf32>
    %9 = vector.multi_reduction <maximumf>, %7, %cst_10 [2] : vector<1x128x128xf32> to vector<1x128xf32>
    %10 = vector.shape_cast %9 : vector<1x128xf32> to vector<1x128x1xf32>
    %11 = arith.maximumf %8, %10 : vector<1x128x1xf32>
    %12 = arith.subf %8, %11 : vector<1x128x1xf32>
    %13 = math.exp %12 : vector<1x128x1xf32>
    %14 = vector.broadcast %11 : vector<1x128x1xf32> to vector<1x128x128xf32>
    %15 = arith.subf %7, %14 : vector<1x128x128xf32>
    %16 = math.exp %15 : vector<1x128x128xf32>
    %c0_11 = arith.constant 0 : index
    %c0_12 = arith.constant 0 : index
    %c0_13 = arith.constant 0 : index
    %17 = vector.load %arg8[%c0_11, %c0_12, %c0_13] : memref<1x128x1xf32, #tpu.memory_space<vmem>>, vector<1x128x1xf32>
    %18 = arith.mulf %13, %17 : vector<1x128x1xf32>
    %cst_14 = arith.constant dense<0.000000e+00> : vector<1x128xf32>
    %19 = vector.multi_reduction <add>, %16, %cst_14 [2] : vector<1x128x128xf32> to vector<1x128xf32>
    %20 = vector.shape_cast %19 : vector<1x128xf32> to vector<1x128x1xf32>
    %21 = arith.addf %18, %20 : vector<1x128x1xf32>
    %c0_15 = arith.constant 0 : index
    %c0_16 = arith.constant 0 : index
    %c0_17 = arith.constant 0 : index
    %22 = vector.load %arg8[%c0_15, %c0_16, %c0_17] : memref<1x128x1xf32, #tpu.memory_space<vmem>>, vector<1x128x1xf32>
    tpu.vector_store %arg8[%c0_15, %c0_16, %c0_17], %21 {strides = array<i32>} : memref<1x128x1xf32, #tpu.memory_space<vmem>>, vector<1x128x1xf32>,
    %c0_18 = arith.constant 0 : index
    %c0_19 = arith.constant 0 : index
    %c0_20 = arith.constant 0 : index
    %23 = vector.load %arg9[%c0_18, %c0_19, %c0_20] : memref<1x128x32xf32, #tpu.memory_space<vmem>>, vector<1x128x32xf32>
    %24 = vector.broadcast %13 : vector<1x128x1xf32> to vector<1x128x32xf32>
    %25 = arith.mulf %24, %23 : vector<1x128x32xf32>
    %c0_21 = arith.constant 0 : index
    %c0_22 = arith.constant 0 : index
    %c0_23 = arith.constant 0 : index
    %26 = vector.load %arg5[%c0_21, %c0_22, %c0_23] : memref<1x128x32xf32, #tpu.memory_space<vmem>>, vector<1x128x32xf32>
    "tpu.trace_start"() <{level = 10 : i32, message = "bqk,bkd->bqd"}> : () -> ()
    %cst_24 = arith.constant dense<0.000000e+00> : vector<1x128x32xf32>
    %27 = tpu.matmul %16, %26, %cst_24 {dimension_numbers = #tpu.dot_dimension_numbers<[2], [1], [1], [2], [0, 0, 0, 1, 1, 2], [0], [0]>} : vector<1x128x128xf32>, vector<1x128x32xf32>, vector<1x128x32xf32> -> vector<1x128x32xf32>
    "tpu.trace_stop"() : () -> ()
    %28 = arith.addf %25, %27 : vector<1x128x32xf32>
    %c0_25 = arith.constant 0 : index
    %c0_26 = arith.constant 0 : index
    %c0_27 = arith.constant 0 : index
    %29 = vector.load %arg9[%c0_25, %c0_26, %c0_27] : memref<1x128x32xf32, #tpu.memory_space<vmem>>, vector<1x128x32xf32>
    tpu.vector_store %arg9[%c0_25, %c0_26, %c0_27], %28 {strides = array<i32>} : memref<1x128x32xf32, #tpu.memory_space<vmem>>, vector<1x128x32xf32>,
    %c0_28 = arith.constant 0 : index
    %c0_29 = arith.constant 0 : index
    %c0_30 = arith.constant 0 : index
    %30 = vector.load %arg7[%c0_28, %c0_29, %c0_30] : memref<1x128x1xf32, #tpu.memory_space<vmem>>, vector<1x128x1xf32>
    tpu.vector_store %arg7[%c0_28, %c0_29, %c0_30], %11 {strides = array<i32>} : memref<1x128x1xf32, #tpu.memory_space<vmem>>, vector<1x128x1xf32>,
    %c1_i32 = arith.constant 1 : i32
    %31 = arith.cmpi eq, %arg2, %c1_i32 : i32
    %32 = arith.extui %31 : i1 to i32
    %c0_i32_31 = arith.constant 0 : i32
    %33 = arith.cmpi ne, %32, %c0_i32_31 : i32
    scf.if %33 {
      %c0_32 = arith.constant 0 : index
      %c0_33 = arith.constant 0 : index
      %c0_34 = arith.constant 0 : index
      %34 = vector.load %arg9[%c0_32, %c0_33, %c0_34] : memref<1x128x32xf32, #tpu.memory_space<vmem>>, vector<1x128x32xf32>
      %c0_35 = arith.constant 0 : index
      %c0_36 = arith.constant 0 : index
      %c0_37 = arith.constant 0 : index
      %35 = vector.load %arg8[%c0_35, %c0_36, %c0_37] : memref<1x128x1xf32, #tpu.memory_space<vmem>>, vector<1x128x1xf32>
      %36 = vector.broadcast %35 : vector<1x128x1xf32> to vector<1x128x32xf32>
      %37 = arith.divf %34, %36 : vector<1x128x32xf32>
      %c0_38 = arith.constant 0 : index
      %c0_39 = arith.constant 0 : index
      %c0_40 = arith.constant 0 : index
      %38 = vector.load %arg6[%c0_38, %c0_39, %c0_40] : memref<1x128x32xf32, #tpu.memory_space<vmem>>, vector<1x128x32xf32>
      tpu.vector_store %arg6[%c0_38, %c0_39, %c0_40], %37 {strides = array<i32>} : memref<1x128x32xf32, #tpu.memory_space<vmem>>, vector<1x128x32xf32>,
    } else {
    }
    return
  }
  func.func @transform_0(%arg0: i32, %arg1: i32, %arg2: i32) -> (i32, i32, i32) {
    %c0_i32 = arith.constant 0 : i32
    %c0_i32_0 = arith.constant 0 : i32
    return %arg0, %arg1, %c0_i32 : i32, i32, i32
  }
  func.func @transform_1(%arg0: i32, %arg1: i32, %arg2: i32) -> (i32, i32, i32) {
    %c0_i32 = arith.constant 0 : i32
    %c0_i32_0 = arith.constant 0 : i32
    return %arg0, %arg2, %c0_i32 : i32, i32, i32
  }
  func.func @transform_2(%arg0: i32, %arg1: i32, %arg2: i32) -> (i32, i32, i32) {
    %c0_i32 = arith.constant 0 : i32
    %c0_i32_0 = arith.constant 0 : i32
    return %arg0, %arg2, %c0_i32 : i32, i32, i32
  }
  func.func @transform_3(%arg0: i32, %arg1: i32, %arg2: i32) -> (i32, i32, i32) {
    %c0_i32 = arith.constant 0 : i32
    %c0_i32_0 = arith.constant 0 : i32
    return %arg0, %arg1, %c0_i32 : i32, i32, i32
  }
}

module attributes {stable_mosaic.version = 11 : i64} {
  func.func @_linear_kernel(%arg0: i32, %arg1: i32, %arg2: i32, %arg3: memref<128x128xf32, #tpu.memory_space<vmem>>, %arg4: memref<128x128xf32, #tpu.memory_space<vmem>>, %arg5: memref<1x128xf32, #tpu.memory_space<vmem>>, %arg6: memref<128x128xf32, #tpu.memory_space<vmem>>, %arg7: memref<128x128xf32, #tpu.memory_space<vmem>>) attributes {dimension_semantics = [#tpu.dimension_semantics<parallel>, #tpu.dimension_semantics<parallel>, #tpu.dimension_semantics<arbitrary>], iteration_bounds = array<i64: 2, 1, 1>, scalar_prefetch = 0 : i64, scratch_operands = 1 : i64, tpu.core_type = #tpu.core_type<tc>, window_params = [{transform_indices = @transform_0, window_bounds = array<i64: 128, 128>}, {transform_indices = @transform_1, window_bounds = array<i64: 128, 128>}, {transform_indices = @transform_2, window_bounds = array<i64: 1, 128>}, {transform_indices = @transform_3, window_bounds = array<i64: 128, 128>}]} {
    %c0_i32 = arith.constant 0 : i32
    %0 = arith.cmpi eq, %arg2, %c0_i32 : i32
    %1 = arith.extui %0 : i1 to i32
    %c0_i32_0 = arith.constant 0 : i32
    %2 = arith.cmpi ne, %1, %c0_i32_0 : i32
    scf.if %2 {
      %cst_10 = arith.constant 0.000000e+00 : f32
      %12 = vector.broadcast %cst_10 : f32 to vector<128x128xf32>
      %c0_11 = arith.constant 0 : index
      %c0_12 = arith.constant 0 : index
      %13 = vector.load %arg7[%c0_11, %c0_12] : memref<128x128xf32, #tpu.memory_space<vmem>>, vector<128x128xf32>
      tpu.vector_store %arg7[%c0_11, %c0_12], %12 {strides = array<i32>} : memref<128x128xf32, #tpu.memory_space<vmem>>, vector<128x128xf32>,
    } else {
    }
    %c0 = arith.constant 0 : index
    %c0_1 = arith.constant 0 : index
    %3 = vector.load %arg7[%c0, %c0_1] : memref<128x128xf32, #tpu.memory_space<vmem>>, vector<128x128xf32>
    %c0_2 = arith.constant 0 : index
    %c0_3 = arith.constant 0 : index
    %4 = vector.load %arg3[%c0_2, %c0_3] : memref<128x128xf32, #tpu.memory_space<vmem>>, vector<128x128xf32>
    %c0_4 = arith.constant 0 : index
    %c0_5 = arith.constant 0 : index
    %5 = vector.load %arg4[%c0_4, %c0_5] : memref<128x128xf32, #tpu.memory_space<vmem>>, vector<128x128xf32>
    %cst = arith.constant dense<0.000000e+00> : vector<128x128xf32>
    %6 = tpu.matmul %4, %5, %cst {dimension_numbers = #tpu.dot_dimension_numbers<[1], [0], [0], [1], [0, 0, 1, 1], [], []>} : vector<128x128xf32>, vector<128x128xf32>, vector<128x128xf32> -> vector<128x128xf32>
    %7 = arith.addf %3, %6 : vector<128x128xf32>
    %c0_6 = arith.constant 0 : index
    %c0_7 = arith.constant 0 : index
    %8 = vector.load %arg7[%c0_6, %c0_7] : memref<128x128xf32, #tpu.memory_space<vmem>>, vector<128x128xf32>
    tpu.vector_store %arg7[%c0_6, %c0_7], %7 {strides = array<i32>} : memref<128x128xf32, #tpu.memory_space<vmem>>, vector<128x128xf32>,
    %c0_i32_8 = arith.constant 0 : i32
    %9 = arith.cmpi eq, %arg2, %c0_i32_8 : i32
    %10 = arith.extui %9 : i1 to i32
    %c0_i32_9 = arith.constant 0 : i32
    %11 = arith.cmpi ne, %10, %c0_i32_9 : i32
    scf.if %11 {
      %c0_10 = arith.constant 0 : index
      %c0_11 = arith.constant 0 : index
      %12 = vector.load %arg7[%c0_10, %c0_11] : memref<128x128xf32, #tpu.memory_space<vmem>>, vector<128x128xf32>
      %c0_12 = arith.constant 0 : index
      %c0_13 = arith.constant 0 : index
      %13 = vector.load %arg5[%c0_12, %c0_13] : memref<1x128xf32, #tpu.memory_space<vmem>>, vector<1x128xf32>
      %14 = vector.broadcast %13 : vector<1x128xf32> to vector<128x128xf32>
      %15 = arith.addf %12, %14 : vector<128x128xf32>
      %c0_14 = arith.constant 0 : index
      %c0_15 = arith.constant 0 : index
      %16 = vector.load %arg6[%c0_14, %c0_15] : memref<128x128xf32, #tpu.memory_space<vmem>>, vector<128x128xf32>
      tpu.vector_store %arg6[%c0_14, %c0_15], %15 {strides = array<i32>} : memref<128x128xf32, #tpu.memory_space<vmem>>, vector<128x128xf32>,
    } else {
    }
    return
  }
  func.func @transform_0(%arg0: i32, %arg1: i32, %arg2: i32) -> (i32, i32) {
    %c0_i32 = arith.constant 0 : i32
    return %arg0, %arg2 : i32, i32
  }
  func.func @transform_1(%arg0: i32, %arg1: i32, %arg2: i32) -> (i32, i32) {
    %c0_i32 = arith.constant 0 : i32
    return %arg2, %arg1 : i32, i32
  }
  func.func @transform_2(%arg0: i32, %arg1: i32, %arg2: i32) -> (i32, i32) {
    %c0_i32 = arith.constant 0 : i32
    %c0_i32_0 = arith.constant 0 : i32
    return %c0_i32, %arg1 : i32, i32
  }
  func.func @transform_3(%arg0: i32, %arg1: i32, %arg2: i32) -> (i32, i32) {
    %c0_i32 = arith.constant 0 : i32
    return %arg0, %arg1 : i32, i32
  }
}

module attributes {stable_mosaic.version = 11 : i64} {
  func.func @_ln_modulate_kernel(%arg0: i32, %arg1: memref<1x256x128xf32, #tpu.memory_space<vmem>>, %arg2: memref<1x1x128xf32, #tpu.memory_space<vmem>>, %arg3: memref<1x1x128xf32, #tpu.memory_space<vmem>>, %arg4: memref<1x256x128xf32, #tpu.memory_space<vmem>>) attributes {dimension_semantics = [#tpu.dimension_semantics<parallel>], iteration_bounds = array<i64: 2>, scalar_prefetch = 0 : i64, scratch_operands = 0 : i64, tpu.core_type = #tpu.core_type<tc>, window_params = [{transform_indices = @transform_0, window_bounds = array<i64: 1, 256, 128>}, {transform_indices = @transform_1, window_bounds = array<i64: 1, 1, 128>}, {transform_indices = @transform_2, window_bounds = array<i64: 1, 1, 128>}, {transform_indices = @transform_3, window_bounds = array<i64: 1, 256, 128>}]} {
    %c0 = arith.constant 0 : index
    %c0_0 = arith.constant 0 : index
    %c0_1 = arith.constant 0 : index
    %0 = vector.load %arg1[%c0, %c0_0, %c0_1] : memref<1x256x128xf32, #tpu.memory_space<vmem>>, vector<1x256x128xf32>
    %cst = arith.constant dense<0.000000e+00> : vector<1x256xf32>
    %1 = vector.multi_reduction <add>, %0, %cst [2] : vector<1x256x128xf32> to vector<1x256xf32>
    %2 = vector.shape_cast %1 : vector<1x256xf32> to vector<1x256x1xf32>
    %cst_2 = arith.constant 1.280000e+02 : f32
    %3 = vector.broadcast %cst_2 : f32 to vector<1x256x1xf32>
    %4 = arith.divf %2, %3 : vector<1x256x1xf32>
    %5 = vector.broadcast %4 : vector<1x256x1xf32> to vector<1x256x128xf32>
    %6 = arith.subf %0, %5 : vector<1x256x128xf32>
    %7 = arith.mulf %6, %6 : vector<1x256x128xf32>
    %cst_3 = arith.constant dense<0.000000e+00> : vector<1x256xf32>
    %8 = vector.multi_reduction <add>, %7, %cst_3 [2] : vector<1x256x128xf32> to vector<1x256xf32>
    %9 = vector.shape_cast %8 : vector<1x256xf32> to vector<1x256x1xf32>
    %cst_4 = arith.constant 1.280000e+02 : f32
    %10 = vector.broadcast %cst_4 : f32 to vector<1x256x1xf32>
    %11 = arith.divf %9, %10 : vector<1x256x1xf32>
    %12 = vector.broadcast %4 : vector<1x256x1xf32> to vector<1x256x128xf32>
    %13 = arith.subf %0, %12 : vector<1x256x128xf32>
    %cst_5 = arith.constant 9.99999997E-7 : f32
    %14 = vector.broadcast %cst_5 : f32 to vector<1x256x1xf32>
    %15 = arith.addf %11, %14 : vector<1x256x1xf32>
    %16 = math.rsqrt %15 : vector<1x256x1xf32>
    %17 = vector.broadcast %16 : vector<1x256x1xf32> to vector<1x256x128xf32>
    %18 = arith.mulf %13, %17 : vector<1x256x128xf32>
    %c0_6 = arith.constant 0 : index
    %c0_7 = arith.constant 0 : index
    %c0_8 = arith.constant 0 : index
    %19 = vector.load %arg2[%c0_6, %c0_7, %c0_8] : memref<1x1x128xf32, #tpu.memory_space<vmem>>, vector<1x1x128xf32>
    %cst_9 = arith.constant 1.000000e+00 : f32
    %20 = vector.broadcast %cst_9 : f32 to vector<1x1x128xf32>
    %21 = arith.addf %20, %19 : vector<1x1x128xf32>
    %22 = vector.broadcast %21 : vector<1x1x128xf32> to vector<1x256x128xf32>
    %23 = arith.mulf %18, %22 : vector<1x256x128xf32>
    %c0_10 = arith.constant 0 : index
    %c0_11 = arith.constant 0 : index
    %c0_12 = arith.constant 0 : index
    %24 = vector.load %arg3[%c0_10, %c0_11, %c0_12] : memref<1x1x128xf32, #tpu.memory_space<vmem>>, vector<1x1x128xf32>
    %25 = vector.broadcast %24 : vector<1x1x128xf32> to vector<1x256x128xf32>
    %26 = arith.addf %23, %25 : vector<1x256x128xf32>
    %c0_13 = arith.constant 0 : index
    %c0_14 = arith.constant 0 : index
    %c0_15 = arith.constant 0 : index
    %27 = vector.load %arg4[%c0_13, %c0_14, %c0_15] : memref<1x256x128xf32, #tpu.memory_space<vmem>>, vector<1x256x128xf32>
    tpu.vector_store %arg4[%c0_13, %c0_14, %c0_15], %26 {strides = array<i32>} : memref<1x256x128xf32, #tpu.memory_space<vmem>>, vector<1x256x128xf32>,
    return
  }
  func.func @transform_0(%arg0: i32) -> (i32, i32, i32) {
    %c0_i32 = arith.constant 0 : i32
    %c0_i32_0 = arith.constant 0 : i32
    %c0_i32_1 = arith.constant 0 : i32
    return %arg0, %c0_i32, %c0_i32_0 : i32, i32, i32
  }
  func.func @transform_1(%arg0: i32) -> (i32, i32, i32) {
    %c0_i32 = arith.constant 0 : i32
    %c0_i32_0 = arith.constant 0 : i32
    %c0_i32_1 = arith.constant 0 : i32
    return %arg0, %c0_i32, %c0_i32_0 : i32, i32, i32
  }
  func.func @transform_2(%arg0: i32) -> (i32, i32, i32) {
    %c0_i32 = arith.constant 0 : i32
    %c0_i32_0 = arith.constant 0 : i32
    %c0_i32_1 = arith.constant 0 : i32
    return %arg0, %c0_i32, %c0_i32_0 : i32, i32, i32
  }
  func.func @transform_3(%arg0: i32) -> (i32, i32, i32) {
    %c0_i32 = arith.constant 0 : i32
    %c0_i32_0 = arith.constant 0 : i32
    %c0_i32_1 = arith.constant 0 : i32
    return %arg0, %c0_i32, %c0_i32_0 : i32, i32, i32
  }
}

module attributes {stable_mosaic.version = 11 : i64} {
  func.func @_flash_attn_kernel(%arg0: i32, %arg1: i32, %arg2: i32, %arg3: memref<1x128x32xf32, #tpu.memory_space<vmem>>, %arg4: memref<1x128x32xf32, #tpu.memory_space<vmem>>, %arg5: memref<1x128x32xf32, #tpu.memory_space<vmem>>, %arg6: memref<1x128x32xf32, #tpu.memory_space<vmem>>, %arg7: memref<1x128x1xf32, #tpu.memory_space<vmem>>, %arg8: memref<1x128x1xf32, #tpu.memory_space<vmem>>, %arg9: memref<1x128x32xf32, #tpu.memory_space<vmem>>) attributes {dimension_semantics = [#tpu.dimension_semantics<parallel>, #tpu.dimension_semantics<parallel>, #tpu.dimension_semantics<arbitrary>], iteration_bounds = array<i64: 8, 2, 1>, scalar_prefetch = 0 : i64, scratch_operands = 3 : i64, tpu.core_type = #tpu.core_type<tc>, window_params = [{transform_indices = @transform_0, window_bounds = array<i64: 1, 128, 32>}, {transform_indices = @transform_1, window_bounds = array<i64: 1, 128, 32>}, {transform_indices = @transform_2, window_bounds = array<i64: 1, 128, 32>}, {transform_indices = @transform_3, window_bounds = array<i64: 1, 128, 32>}]} {
    %c0_i32 = arith.constant 0 : i32
    %0 = arith.cmpi eq, %arg2, %c0_i32 : i32
    %1 = arith.extui %0 : i1 to i32
    %c0_i32_0 = arith.constant 0 : i32
    %2 = arith.cmpi ne, %1, %c0_i32_0 : i32
    scf.if %2 {
      %cst_33 = arith.constant 0xFF800000 : f32
      %34 = vector.broadcast %cst_33 : f32 to vector<1x128x1xf32>
      %c0_34 = arith.constant 0 : index
      %c0_35 = arith.constant 0 : index
      %c0_36 = arith.constant 0 : index
      %35 = vector.load %arg7[%c0_34, %c0_35, %c0_36] : memref<1x128x1xf32, #tpu.memory_space<vmem>>, vector<1x128x1xf32>
      tpu.vector_store %arg7[%c0_34, %c0_35, %c0_36], %34 {strides = array<i32>} : memref<1x128x1xf32, #tpu.memory_space<vmem>>, vector<1x128x1xf32>,
      %cst_37 = arith.constant 0.000000e+00 : f32
      %36 = vector.broadcast %cst_37 : f32 to vector<1x128x1xf32>
      %c0_38 = arith.constant 0 : index
      %c0_39 = arith.constant 0 : index
      %c0_40 = arith.constant 0 : index
      %37 = vector.load %arg8[%c0_38, %c0_39, %c0_40] : memref<1x128x1xf32, #tpu.memory_space<vmem>>, vector<1x128x1xf32>
      tpu.vector_store %arg8[%c0_38, %c0_39, %c0_40], %36 {strides = array<i32>} : memref<1x128x1xf32, #tpu.memory_space<vmem>>, vector<1x128x1xf32>,
      %cst_41 = arith.constant 0.000000e+00 : f32
      %38 = vector.broadcast %cst_41 : f32 to vector<1x128x32xf32>
      %c0_42 = arith.constant 0 : index
      %c0_43 = arith.constant 0 : index
      %c0_44 = arith.constant 0 : index
      %39 = vector.load %arg9[%c0_42, %c0_43, %c0_44] : memref<1x128x32xf32, #tpu.memory_space<vmem>>, vector<1x128x32xf32>
      tpu.vector_store %arg9[%c0_42, %c0_43, %c0_44], %38 {strides = array<i32>} : memref<1x128x32xf32, #tpu.memory_space<vmem>>, vector<1x128x32xf32>,
    } else {
    }
    %c0 = arith.constant 0 : index
    %c0_1 = arith.constant 0 : index
    %c0_2 = arith.constant 0 : index
    %3 = vector.load %arg3[%c0, %c0_1, %c0_2] : memref<1x128x32xf32, #tpu.memory_space<vmem>>, vector<1x128x32xf32>
    %c0_3 = arith.constant 0 : index
    %c0_4 = arith.constant 0 : index
    %c0_5 = arith.constant 0 : index
    %4 = vector.load %arg4[%c0_3, %c0_4, %c0_5] : memref<1x128x32xf32, #tpu.memory_space<vmem>>, vector<1x128x32xf32>
    "tpu.trace_start"() <{level = 10 : i32, message = "bqd,bkd->bqk"}> : () -> ()
    %cst = arith.constant dense<0.000000e+00> : vector<1x128x128xf32>
    %5 = tpu.matmul %3, %4, %cst {dimension_numbers = #tpu.dot_dimension_numbers<[2], [2], [1], [1], [0, 0, 0, 1, 1, 1], [0], [0]>} : vector<1x128x32xf32>, vector<1x128x32xf32>, vector<1x128x128xf32> -> vector<1x128x128xf32>
    "tpu.trace_stop"() : () -> ()
    %cst_6 = arith.constant 0.176776692 : f32
    %6 = vector.broadcast %cst_6 : f32 to vector<1x128x128xf32>
    %7 = arith.mulf %5, %6 : vector<1x128x128xf32>
    %c0_7 = arith.constant 0 : index
    %c0_8 = arith.constant 0 : index
    %c0_9 = arith.constant 0 : index
    %8 = vector.load %arg7[%c0_7, %c0_8, %c0_9] : memref<1x128x1xf32, #tpu.memory_space<vmem>>, vector<1x128x1xf32>
    %cst_10 = arith.constant dense<0xFF800000> : vector<1x128xf32>
    %9 = vector.multi_reduction <maximumf>, %7, %cst_10 [2] : vector<1x128x128xf32> to vector<1x128xf32>
    %10 = vector.shape_cast %9 : vector<1x128xf32> to vector<1x128x1xf32>
    %11 = arith.maximumf %8, %10 : vector<1x128x1xf32>
    %12 = arith.subf %8, %11 : vector<1x128x1xf32>
    %13 = math.exp %12 : vector<1x128x1xf32>
    %14 = vector.broadcast %11 : vector<1x128x1xf32> to vector<1x128x128xf32>
    %15 = arith.subf %7, %14 : vector<1x128x128xf32>
    %16 = math.exp %15 : vector<1x128x128xf32>
    %c0_11 = arith.constant 0 : index
    %c0_12 = arith.constant 0 : index
    %c0_13 = arith.constant 0 : index
    %17 = vector.load %arg8[%c0_11, %c0_12, %c0_13] : memref<1x128x1xf32, #tpu.memory_space<vmem>>, vector<1x128x1xf32>
    %18 = arith.mulf %13, %17 : vector<1x128x1xf32>
    %cst_14 = arith.constant dense<0.000000e+00> : vector<1x128xf32>
    %19 = vector.multi_reduction <add>, %16, %cst_14 [2] : vector<1x128x128xf32> to vector<1x128xf32>
    %20 = vector.shape_cast %19 : vector<1x128xf32> to vector<1x128x1xf32>
    %21 = arith.addf %18, %20 : vector<1x128x1xf32>
    %c0_15 = arith.constant 0 : index
    %c0_16 = arith.constant 0 : index
    %c0_17 = arith.constant 0 : index
    %22 = vector.load %arg8[%c0_15, %c0_16, %c0_17] : memref<1x128x1xf32, #tpu.memory_space<vmem>>, vector<1x128x1xf32>
    tpu.vector_store %arg8[%c0_15, %c0_16, %c0_17], %21 {strides = array<i32>} : memref<1x128x1xf32, #tpu.memory_space<vmem>>, vector<1x128x1xf32>,
    %c0_18 = arith.constant 0 : index
    %c0_19 = arith.constant 0 : index
    %c0_20 = arith.constant 0 : index
    %23 = vector.load %arg9[%c0_18, %c0_19, %c0_20] : memref<1x128x32xf32, #tpu.memory_space<vmem>>, vector<1x128x32xf32>
    %24 = vector.broadcast %13 : vector<1x128x1xf32> to vector<1x128x32xf32>
    %25 = arith.mulf %24, %23 : vector<1x128x32xf32>
    %c0_21 = arith.constant 0 : index
    %c0_22 = arith.constant 0 : index
    %c0_23 = arith.constant 0 : index
    %26 = vector.load %arg5[%c0_21, %c0_22, %c0_23] : memref<1x128x32xf32, #tpu.memory_space<vmem>>, vector<1x128x32xf32>
    "tpu.trace_start"() <{level = 10 : i32, message = "bqk,bkd->bqd"}> : () -> ()
    %cst_24 = arith.constant dense<0.000000e+00> : vector<1x128x32xf32>
    %27 = tpu.matmul %16, %26, %cst_24 {dimension_numbers = #tpu.dot_dimension_numbers<[2], [1], [1], [2], [0, 0, 0, 1, 1, 2], [0], [0]>} : vector<1x128x128xf32>, vector<1x128x32xf32>, vector<1x128x32xf32> -> vector<1x128x32xf32>
    "tpu.trace_stop"() : () -> ()
    %28 = arith.addf %25, %27 : vector<1x128x32xf32>
    %c0_25 = arith.constant 0 : index
    %c0_26 = arith.constant 0 : index
    %c0_27 = arith.constant 0 : index
    %29 = vector.load %arg9[%c0_25, %c0_26, %c0_27] : memref<1x128x32xf32, #tpu.memory_space<vmem>>, vector<1x128x32xf32>
    tpu.vector_store %arg9[%c0_25, %c0_26, %c0_27], %28 {strides = array<i32>} : memref<1x128x32xf32, #tpu.memory_space<vmem>>, vector<1x128x32xf32>,
    %c0_28 = arith.constant 0 : index
    %c0_29 = arith.constant 0 : index
    %c0_30 = arith.constant 0 : index
    %30 = vector.load %arg7[%c0_28, %c0_29, %c0_30] : memref<1x128x1xf32, #tpu.memory_space<vmem>>, vector<1x128x1xf32>
    tpu.vector_store %arg7[%c0_28, %c0_29, %c0_30], %11 {strides = array<i32>} : memref<1x128x1xf32, #tpu.memory_space<vmem>>, vector<1x128x1xf32>,
    %c0_i32_31 = arith.constant 0 : i32
    %31 = arith.cmpi eq, %arg2, %c0_i32_31 : i32
    %32 = arith.extui %31 : i1 to i32
    %c0_i32_32 = arith.constant 0 : i32
    %33 = arith.cmpi ne, %32, %c0_i32_32 : i32
    scf.if %33 {
      %c0_33 = arith.constant 0 : index
      %c0_34 = arith.constant 0 : index
      %c0_35 = arith.constant 0 : index
      %34 = vector.load %arg9[%c0_33, %c0_34, %c0_35] : memref<1x128x32xf32, #tpu.memory_space<vmem>>, vector<1x128x32xf32>
      %c0_36 = arith.constant 0 : index
      %c0_37 = arith.constant 0 : index
      %c0_38 = arith.constant 0 : index
      %35 = vector.load %arg8[%c0_36, %c0_37, %c0_38] : memref<1x128x1xf32, #tpu.memory_space<vmem>>, vector<1x128x1xf32>
      %36 = vector.broadcast %35 : vector<1x128x1xf32> to vector<1x128x32xf32>
      %37 = arith.divf %34, %36 : vector<1x128x32xf32>
      %c0_39 = arith.constant 0 : index
      %c0_40 = arith.constant 0 : index
      %c0_41 = arith.constant 0 : index
      %38 = vector.load %arg6[%c0_39, %c0_40, %c0_41] : memref<1x128x32xf32, #tpu.memory_space<vmem>>, vector<1x128x32xf32>
      tpu.vector_store %arg6[%c0_39, %c0_40, %c0_41], %37 {strides = array<i32>} : memref<1x128x32xf32, #tpu.memory_space<vmem>>, vector<1x128x32xf32>,
    } else {
    }
    return
  }
  func.func @transform_0(%arg0: i32, %arg1: i32, %arg2: i32) -> (i32, i32, i32) {
    %c0_i32 = arith.constant 0 : i32
    %c0_i32_0 = arith.constant 0 : i32
    return %arg0, %arg1, %c0_i32 : i32, i32, i32
  }
  func.func @transform_1(%arg0: i32, %arg1: i32, %arg2: i32) -> (i32, i32, i32) {
    %c0_i32 = arith.constant 0 : i32
    %c0_i32_0 = arith.constant 0 : i32
    return %arg0, %arg2, %c0_i32 : i32, i32, i32
  }
  func.func @transform_2(%arg0: i32, %arg1: i32, %arg2: i32) -> (i32, i32, i32) {
    %c0_i32 = arith.constant 0 : i32
    %c0_i32_0 = arith.constant 0 : i32
    return %arg0, %arg2, %c0_i32 : i32, i32, i32
  }
  func.func @transform_3(%arg0: i32, %arg1: i32, %arg2: i32) -> (i32, i32, i32) {
    %c0_i32 = arith.constant 0 : i32
    %c0_i32_0 = arith.constant 0 : i32
    return %arg0, %arg1, %c0_i32 : i32, i32, i32
  }
}

module attributes {stable_mosaic.version = 11 : i64} {
  func.func @_linear_kernel(%arg0: i32, %arg1: i32, %arg2: i32, %arg3: memref<128x128xf32, #tpu.memory_space<vmem>>, %arg4: memref<128x128xf32, #tpu.memory_space<vmem>>, %arg5: memref<1x128xf32, #tpu.memory_space<vmem>>, %arg6: memref<128x128xf32, #tpu.memory_space<vmem>>, %arg7: memref<128x128xf32, #tpu.memory_space<vmem>>) attributes {dimension_semantics = [#tpu.dimension_semantics<parallel>, #tpu.dimension_semantics<parallel>, #tpu.dimension_semantics<arbitrary>], iteration_bounds = array<i64: 4, 2, 1>, scalar_prefetch = 0 : i64, scratch_operands = 1 : i64, tpu.core_type = #tpu.core_type<tc>, window_params = [{transform_indices = @transform_0, window_bounds = array<i64: 128, 128>}, {transform_indices = @transform_1, window_bounds = array<i64: 128, 128>}, {transform_indices = @transform_2, window_bounds = array<i64: 1, 128>}, {transform_indices = @transform_3, window_bounds = array<i64: 128, 128>}]} {
    %c0_i32 = arith.constant 0 : i32
    %0 = arith.cmpi eq, %arg2, %c0_i32 : i32
    %1 = arith.extui %0 : i1 to i32
    %c0_i32_0 = arith.constant 0 : i32
    %2 = arith.cmpi ne, %1, %c0_i32_0 : i32
    scf.if %2 {
      %cst_10 = arith.constant 0.000000e+00 : f32
      %12 = vector.broadcast %cst_10 : f32 to vector<128x128xf32>
      %c0_11 = arith.constant 0 : index
      %c0_12 = arith.constant 0 : index
      %13 = vector.load %arg7[%c0_11, %c0_12] : memref<128x128xf32, #tpu.memory_space<vmem>>, vector<128x128xf32>
      tpu.vector_store %arg7[%c0_11, %c0_12], %12 {strides = array<i32>} : memref<128x128xf32, #tpu.memory_space<vmem>>, vector<128x128xf32>,
    } else {
    }
    %c0 = arith.constant 0 : index
    %c0_1 = arith.constant 0 : index
    %3 = vector.load %arg7[%c0, %c0_1] : memref<128x128xf32, #tpu.memory_space<vmem>>, vector<128x128xf32>
    %c0_2 = arith.constant 0 : index
    %c0_3 = arith.constant 0 : index
    %4 = vector.load %arg3[%c0_2, %c0_3] : memref<128x128xf32, #tpu.memory_space<vmem>>, vector<128x128xf32>
    %c0_4 = arith.constant 0 : index
    %c0_5 = arith.constant 0 : index
    %5 = vector.load %arg4[%c0_4, %c0_5] : memref<128x128xf32, #tpu.memory_space<vmem>>, vector<128x128xf32>
    %cst = arith.constant dense<0.000000e+00> : vector<128x128xf32>
    %6 = tpu.matmul %4, %5, %cst {dimension_numbers = #tpu.dot_dimension_numbers<[1], [0], [0], [1], [0, 0, 1, 1], [], []>} : vector<128x128xf32>, vector<128x128xf32>, vector<128x128xf32> -> vector<128x128xf32>
    %7 = arith.addf %3, %6 : vector<128x128xf32>
    %c0_6 = arith.constant 0 : index
    %c0_7 = arith.constant 0 : index
    %8 = vector.load %arg7[%c0_6, %c0_7] : memref<128x128xf32, #tpu.memory_space<vmem>>, vector<128x128xf32>
    tpu.vector_store %arg7[%c0_6, %c0_7], %7 {strides = array<i32>} : memref<128x128xf32, #tpu.memory_space<vmem>>, vector<128x128xf32>,
    %c0_i32_8 = arith.constant 0 : i32
    %9 = arith.cmpi eq, %arg2, %c0_i32_8 : i32
    %10 = arith.extui %9 : i1 to i32
    %c0_i32_9 = arith.constant 0 : i32
    %11 = arith.cmpi ne, %10, %c0_i32_9 : i32
    scf.if %11 {
      %c0_10 = arith.constant 0 : index
      %c0_11 = arith.constant 0 : index
      %12 = vector.load %arg7[%c0_10, %c0_11] : memref<128x128xf32, #tpu.memory_space<vmem>>, vector<128x128xf32>
      %c0_12 = arith.constant 0 : index
      %c0_13 = arith.constant 0 : index
      %13 = vector.load %arg5[%c0_12, %c0_13] : memref<1x128xf32, #tpu.memory_space<vmem>>, vector<1x128xf32>
      %14 = vector.broadcast %13 : vector<1x128xf32> to vector<128x128xf32>
      %15 = arith.addf %12, %14 : vector<128x128xf32>
      %cst_14 = arith.constant 5.000000e-01 : f32
      %16 = vector.broadcast %cst_14 : f32 to vector<128x128xf32>
      %17 = arith.mulf %16, %15 : vector<128x128xf32>
      %cst_15 = arith.constant 4.471500e-02 : f32
      %18 = vector.broadcast %cst_15 : f32 to vector<128x128xf32>
      %19 = arith.mulf %18, %15 : vector<128x128xf32>
      %20 = arith.mulf %19, %15 : vector<128x128xf32>
      %21 = arith.mulf %20, %15 : vector<128x128xf32>
      %22 = arith.addf %15, %21 : vector<128x128xf32>
      %cst_16 = arith.constant 0.797884583 : f32
      %23 = vector.broadcast %cst_16 : f32 to vector<128x128xf32>
      %24 = arith.mulf %23, %22 : vector<128x128xf32>
      %25 = math.tanh %24 : vector<128x128xf32>
      %cst_17 = arith.constant 1.000000e+00 : f32
      %26 = vector.broadcast %cst_17 : f32 to vector<128x128xf32>
      %27 = arith.addf %26, %25 : vector<128x128xf32>
      %28 = arith.mulf %17, %27 : vector<128x128xf32>
      %c0_18 = arith.constant 0 : index
      %c0_19 = arith.constant 0 : index
      %29 = vector.load %arg6[%c0_18, %c0_19] : memref<128x128xf32, #tpu.memory_space<vmem>>, vector<128x128xf32>
      tpu.vector_store %arg6[%c0_18, %c0_19], %28 {strides = array<i32>} : memref<128x128xf32, #tpu.memory_space<vmem>>, vector<128x128xf32>,
    } else {
    }
    return
  }
  func.func @transform_0(%arg0: i32, %arg1: i32, %arg2: i32) -> (i32, i32) {
    %c0_i32 = arith.constant 0 : i32
    return %arg0, %arg2 : i32, i32
  }
  func.func @transform_1(%arg0: i32, %arg1: i32, %arg2: i32) -> (i32, i32) {
    %c0_i32 = arith.constant 0 : i32
    return %arg2, %arg1 : i32, i32
  }
  func.func @transform_2(%arg0: i32, %arg1: i32, %arg2: i32) -> (i32, i32) {
    %c0_i32 = arith.constant 0 : i32
    %c0_i32_0 = arith.constant 0 : i32
    return %c0_i32, %arg1 : i32, i32
  }
  func.func @transform_3(%arg0: i32, %arg1: i32, %arg2: i32) -> (i32, i32) {
    %c0_i32 = arith.constant 0 : i32
    return %arg0, %arg1 : i32, i32
  }
}

module attributes {stable_mosaic.version = 11 : i64} {
  func.func @_ln_modulate_kernel(%arg0: i32, %arg1: memref<1x128x128xf32, #tpu.memory_space<vmem>>, %arg2: memref<1x1x128xf32, #tpu.memory_space<vmem>>, %arg3: memref<1x1x128xf32, #tpu.memory_space<vmem>>, %arg4: memref<1x128x128xf32, #tpu.memory_space<vmem>>) attributes {dimension_semantics = [#tpu.dimension_semantics<parallel>], iteration_bounds = array<i64: 4>, scalar_prefetch = 0 : i64, scratch_operands = 0 : i64, tpu.core_type = #tpu.core_type<tc>, window_params = [{transform_indices = @transform_0, window_bounds = array<i64: 1, 128, 128>}, {transform_indices = @transform_1, window_bounds = array<i64: 1, 1, 128>}, {transform_indices = @transform_2, window_bounds = array<i64: 1, 1, 128>}, {transform_indices = @transform_3, window_bounds = array<i64: 1, 128, 128>}]} {
    %c0 = arith.constant 0 : index
    %c0_0 = arith.constant 0 : index
    %c0_1 = arith.constant 0 : index
    %0 = vector.load %arg1[%c0, %c0_0, %c0_1] : memref<1x128x128xf32, #tpu.memory_space<vmem>>, vector<1x128x128xf32>
    %cst = arith.constant dense<0.000000e+00> : vector<1x128xf32>
    %1 = vector.multi_reduction <add>, %0, %cst [2] : vector<1x128x128xf32> to vector<1x128xf32>
    %2 = vector.shape_cast %1 : vector<1x128xf32> to vector<1x128x1xf32>
    %cst_2 = arith.constant 1.280000e+02 : f32
    %3 = vector.broadcast %cst_2 : f32 to vector<1x128x1xf32>
    %4 = arith.divf %2, %3 : vector<1x128x1xf32>
    %5 = vector.broadcast %4 : vector<1x128x1xf32> to vector<1x128x128xf32>
    %6 = arith.subf %0, %5 : vector<1x128x128xf32>
    %7 = arith.mulf %6, %6 : vector<1x128x128xf32>
    %cst_3 = arith.constant dense<0.000000e+00> : vector<1x128xf32>
    %8 = vector.multi_reduction <add>, %7, %cst_3 [2] : vector<1x128x128xf32> to vector<1x128xf32>
    %9 = vector.shape_cast %8 : vector<1x128xf32> to vector<1x128x1xf32>
    %cst_4 = arith.constant 1.280000e+02 : f32
    %10 = vector.broadcast %cst_4 : f32 to vector<1x128x1xf32>
    %11 = arith.divf %9, %10 : vector<1x128x1xf32>
    %12 = vector.broadcast %4 : vector<1x128x1xf32> to vector<1x128x128xf32>
    %13 = arith.subf %0, %12 : vector<1x128x128xf32>
    %cst_5 = arith.constant 9.99999997E-7 : f32
    %14 = vector.broadcast %cst_5 : f32 to vector<1x128x1xf32>
    %15 = arith.addf %11, %14 : vector<1x128x1xf32>
    %16 = math.rsqrt %15 : vector<1x128x1xf32>
    %17 = vector.broadcast %16 : vector<1x128x1xf32> to vector<1x128x128xf32>
    %18 = arith.mulf %13, %17 : vector<1x128x128xf32>
    %c0_6 = arith.constant 0 : index
    %c0_7 = arith.constant 0 : index
    %c0_8 = arith.constant 0 : index
    %19 = vector.load %arg2[%c0_6, %c0_7, %c0_8] : memref<1x1x128xf32, #tpu.memory_space<vmem>>, vector<1x1x128xf32>
    %cst_9 = arith.constant 1.000000e+00 : f32
    %20 = vector.broadcast %cst_9 : f32 to vector<1x1x128xf32>
    %21 = arith.addf %20, %19 : vector<1x1x128xf32>
    %22 = vector.broadcast %21 : vector<1x1x128xf32> to vector<1x128x128xf32>
    %23 = arith.mulf %18, %22 : vector<1x128x128xf32>
    %c0_10 = arith.constant 0 : index
    %c0_11 = arith.constant 0 : index
    %c0_12 = arith.constant 0 : index
    %24 = vector.load %arg3[%c0_10, %c0_11, %c0_12] : memref<1x1x128xf32, #tpu.memory_space<vmem>>, vector<1x1x128xf32>
    %25 = vector.broadcast %24 : vector<1x1x128xf32> to vector<1x128x128xf32>
    %26 = arith.addf %23, %25 : vector<1x128x128xf32>
    %c0_13 = arith.constant 0 : index
    %c0_14 = arith.constant 0 : index
    %c0_15 = arith.constant 0 : index
    %27 = vector.load %arg4[%c0_13, %c0_14, %c0_15] : memref<1x128x128xf32, #tpu.memory_space<vmem>>, vector<1x128x128xf32>
    tpu.vector_store %arg4[%c0_13, %c0_14, %c0_15], %26 {strides = array<i32>} : memref<1x128x128xf32, #tpu.memory_space<vmem>>, vector<1x128x128xf32>,
    return
  }
  func.func @transform_0(%arg0: i32) -> (i32, i32, i32) {
    %c0_i32 = arith.constant 0 : i32
    %c0_i32_0 = arith.constant 0 : i32
    %c0_i32_1 = arith.constant 0 : i32
    return %arg0, %c0_i32, %c0_i32_0 : i32, i32, i32
  }
  func.func @transform_1(%arg0: i32) -> (i32, i32, i32) {
    %c0_i32 = arith.constant 0 : i32
    %c0_i32_0 = arith.constant 0 : i32
    %c0_i32_1 = arith.constant 0 : i32
    return %arg0, %c0_i32, %c0_i32_0 : i32, i32, i32
  }
  func.func @transform_2(%arg0: i32) -> (i32, i32, i32) {
    %c0_i32 = arith.constant 0 : i32
    %c0_i32_0 = arith.constant 0 : i32
    %c0_i32_1 = arith.constant 0 : i32
    return %arg0, %c0_i32, %c0_i32_0 : i32, i32, i32
  }
  func.func @transform_3(%arg0: i32) -> (i32, i32, i32) {
    %c0_i32 = arith.constant 0 : i32
    %c0_i32_0 = arith.constant 0 : i32
    %c0_i32_1 = arith.constant 0 : i32
    return %arg0, %c0_i32, %c0_i32_0 : i32, i32, i32
  }
}

module attributes {stable_mosaic.version = 11 : i64} {
  func.func @_linear_kernel(%arg0: i32, %arg1: i32, %arg2: i32, %arg3: memref<128x128xf32, #tpu.memory_space<vmem>>, %arg4: memref<128x128xf32, #tpu.memory_space<vmem>>, %arg5: memref<1x128xf32, #tpu.memory_space<vmem>>, %arg6: memref<128x128xf32, #tpu.memory_space<vmem>>, %arg7: memref<128x128xf32, #tpu.memory_space<vmem>>) attributes {dimension_semantics = [#tpu.dimension_semantics<parallel>, #tpu.dimension_semantics<parallel>, #tpu.dimension_semantics<arbitrary>], iteration_bounds = array<i64: 4, 1, 2>, scalar_prefetch = 0 : i64, scratch_operands = 1 : i64, tpu.core_type = #tpu.core_type<tc>, window_params = [{transform_indices = @transform_0, window_bounds = array<i64: 128, 128>}, {transform_indices = @transform_1, window_bounds = array<i64: 128, 128>}, {transform_indices = @transform_2, window_bounds = array<i64: 1, 128>}, {transform_indices = @transform_3, window_bounds = array<i64: 128, 128>}]} {
    %c0_i32 = arith.constant 0 : i32
    %0 = arith.cmpi eq, %arg2, %c0_i32 : i32
    %1 = arith.extui %0 : i1 to i32
    %c0_i32_0 = arith.constant 0 : i32
    %2 = arith.cmpi ne, %1, %c0_i32_0 : i32
    scf.if %2 {
      %cst_9 = arith.constant 0.000000e+00 : f32
      %12 = vector.broadcast %cst_9 : f32 to vector<128x128xf32>
      %c0_10 = arith.constant 0 : index
      %c0_11 = arith.constant 0 : index
      %13 = vector.load %arg7[%c0_10, %c0_11] : memref<128x128xf32, #tpu.memory_space<vmem>>, vector<128x128xf32>
      tpu.vector_store %arg7[%c0_10, %c0_11], %12 {strides = array<i32>} : memref<128x128xf32, #tpu.memory_space<vmem>>, vector<128x128xf32>,
    } else {
    }
    %c0 = arith.constant 0 : index
    %c0_1 = arith.constant 0 : index
    %3 = vector.load %arg7[%c0, %c0_1] : memref<128x128xf32, #tpu.memory_space<vmem>>, vector<128x128xf32>
    %c0_2 = arith.constant 0 : index
    %c0_3 = arith.constant 0 : index
    %4 = vector.load %arg3[%c0_2, %c0_3] : memref<128x128xf32, #tpu.memory_space<vmem>>, vector<128x128xf32>
    %c0_4 = arith.constant 0 : index
    %c0_5 = arith.constant 0 : index
    %5 = vector.load %arg4[%c0_4, %c0_5] : memref<128x128xf32, #tpu.memory_space<vmem>>, vector<128x128xf32>
    %cst = arith.constant dense<0.000000e+00> : vector<128x128xf32>
    %6 = tpu.matmul %4, %5, %cst {dimension_numbers = #tpu.dot_dimension_numbers<[1], [0], [0], [1], [0, 0, 1, 1], [], []>} : vector<128x128xf32>, vector<128x128xf32>, vector<128x128xf32> -> vector<128x128xf32>
    %7 = arith.addf %3, %6 : vector<128x128xf32>
    %c0_6 = arith.constant 0 : index
    %c0_7 = arith.constant 0 : index
    %8 = vector.load %arg7[%c0_6, %c0_7] : memref<128x128xf32, #tpu.memory_space<vmem>>, vector<128x128xf32>
    tpu.vector_store %arg7[%c0_6, %c0_7], %7 {strides = array<i32>} : memref<128x128xf32, #tpu.memory_space<vmem>>, vector<128x128xf32>,
    %c1_i32 = arith.constant 1 : i32
    %9 = arith.cmpi eq, %arg2, %c1_i32 : i32
    %10 = arith.extui %9 : i1 to i32
    %c0_i32_8 = arith.constant 0 : i32
    %11 = arith.cmpi ne, %10, %c0_i32_8 : i32
    scf.if %11 {
      %c0_9 = arith.constant 0 : index
      %c0_10 = arith.constant 0 : index
      %12 = vector.load %arg7[%c0_9, %c0_10] : memref<128x128xf32, #tpu.memory_space<vmem>>, vector<128x128xf32>
      %c0_11 = arith.constant 0 : index
      %c0_12 = arith.constant 0 : index
      %13 = vector.load %arg5[%c0_11, %c0_12] : memref<1x128xf32, #tpu.memory_space<vmem>>, vector<1x128xf32>
      %14 = vector.broadcast %13 : vector<1x128xf32> to vector<128x128xf32>
      %15 = arith.addf %12, %14 : vector<128x128xf32>
      %c0_13 = arith.constant 0 : index
      %c0_14 = arith.constant 0 : index
      %16 = vector.load %arg6[%c0_13, %c0_14] : memref<128x128xf32, #tpu.memory_space<vmem>>, vector<128x128xf32>
      tpu.vector_store %arg6[%c0_13, %c0_14], %15 {strides = array<i32>} : memref<128x128xf32, #tpu.memory_space<vmem>>, vector<128x128xf32>,
    } else {
    }
    return
  }
  func.func @transform_0(%arg0: i32, %arg1: i32, %arg2: i32) -> (i32, i32) {
    %c0_i32 = arith.constant 0 : i32
    return %arg0, %arg2 : i32, i32
  }
  func.func @transform_1(%arg0: i32, %arg1: i32, %arg2: i32) -> (i32, i32) {
    %c0_i32 = arith.constant 0 : i32
    return %arg2, %arg1 : i32, i32
  }
  func.func @transform_2(%arg0: i32, %arg1: i32, %arg2: i32) -> (i32, i32) {
    %c0_i32 = arith.constant 0 : i32
    %c0_i32_0 = arith.constant 0 : i32
    return %c0_i32, %arg1 : i32, i32
  }
  func.func @transform_3(%arg0: i32, %arg1: i32, %arg2: i32) -> (i32, i32) {
    %c0_i32 = arith.constant 0 : i32
    return %arg0, %arg1 : i32, i32
  }
}

</mosaic_0001>

<bundles_post_ra>
// kernel: causal_wan_block_pallas.15
= control target key start
LH: loop header
LB: loop body
LE: loop exit
PB: predicated region body
PF: predicated region fallthrough
CT: control target
= control target key end

     0   :  { %8 = vsyncpa [#allocation3], 0  ;;  %s1028_s0 = inlined_call_operand.hbm [shape: f32[4,128,128], index: 0, kind: input, shape index: {}]   ;;  %s1029_s1 = inlined_call_operand.vmem [shape: f32[4,1,128], index: 1, kind: input, shape index: {}]   ;;  %s1030_s2 = inlined_call_operand.vmem [shape: f32[4,1,128], index: 2, kind: input, shape index: {}]   ;;  %s1031_s3 = inlined_call_operand.vmem [shape: f32[4,128,128], index: 3, kind: output, shape index: {}]  }
   0x1   :  { %10 = vsyncpa [#allocation3 + $0x1], 0  ;;  %s737_s12 = smov 0   ;;  %s739_s13 = smov 0  }
   0x2   :  { %s741_s14 = smov 0   ;;  %s743_s15 = smov 0  }
   0x3 LB: > { %s756_s16 = sadd.s32 4294967295, %s712_s15   ;;  %s759_s17 = sadd.s32 1, %s712_s15   ;;  %s712_s15 = sphi %s743_s15, %s1038_s15   ;;  %s708_s14 = sphi %s741_s14, %s1037_s14   ;;  %s704_s13 = sphi %s739_s13, %s1036_s13   ;;  %s700_s12 = sphi %s737_s12, %s1035_s12  }
   0x4   : > { %s20_s18 = ssub.s32 %s712_s15, %s759_s17  ;;  %s23_s19 = sadd.s32 1, %s708_s14 }
   0x5   : > { %p21_p0 = scmp.eq.s32.totalorder %s20_s18, 0  ;;  %p30_p1 = scmp.ne.s32.totalorder %s708_s14, %s704_s13 }
   0x6   : > { %p31_p2 = scmp.eq.s32.totalorder %s712_s15, 0  ;;  %p36_p3 = scmp.ne.s32.totalorder %s704_s13, %s700_s12 }
   0x7   : > { %s769_s20 = scalar_select %p21_p0, %s708_s14, %s23_s19  }
   0x8   : > { %p32_p4 = por %p31_p2, %p30_p1  ;;  %p37_p5 = scmp.eq.s32.totalorder %s756_s16, 0 }
   0x9   : > { %p581_p6 = scmp.lt.s32.totalorder %s712_s15, 4  ;;  %s138_s22 = sand.u32 1, %s708_s14  }
   0xa   : > { %p773_p7 = por %p37_p5, %p36_p3  ;;  %s563_s23 = sshll.u32 %s138_s22, 7 }
   0xb   : > { %s573_s24 = sshll.u32 %s712_s15, 11  ;;  %s142_s28 = scalar_lea.vmem [#allocation2], %s563_s23 }
   0xc   : > { %s782_s27 = scalar_lea.hbm %s1028_s0, %s573_s24  ;;  %s149_s29 = sshll.u32 %s142_s28, 4  ;;  %s784_s29 = int_to_ptr.vmem [resolvable:$true] %s149_s29 }
   0xd   : > { %p786_p8 = pnand %p581_p6, %p32_p4  ;;  %s791_s4 = scalar_lea.sflag [#allocation3], %s138_s22 }
   0xe   : > { %s648_s5 = scalar_lea.hbm %s782_s27, 2048  ;;  %s653_s8 = scalar_lea.hbm %s1028_s0, 8192 }
   0xf   : > { %p649_p10 = scmp.ne.s32.totalorder %s782_s27, %s648_s5  ;;  %p650_p11 = pneg %p786_p8 }
  0x10   : > { %p654_p0 = scmp.lt.u32.totalorder %s782_s27, %s1028_s0  ;;  %p655_p1 = scmp.lt.u32.totalorder %s653_s8, %s648_s5 }
  0x11   : > { %p651_p12 = pnand %p650_p11, %p649_p10  ;;  %p657_p3 = scmp.lt.u32.totalorder %s648_s5, %s782_s27 }
  0x12   : > { %p656_p2 = por %p655_p1, %p654_p0 }
  0x13   : > { %p652_p13 = pneg %p651_p12 }
  0x14   : > { %p658_p4 = por %p657_p3, %p656_p2 }
  0x16   : > { %p659_p5 = pnand %p658_p4, %p652_p13 }
  0x18   : > { %662 = shalt.err (!%p659_p5)
}
  0x19   : > { %s663_s11 = scalar_lea.vmem %s784_s29, 2048  ;;  %s714_s12 = smov [#allocation2]  }
  0x1a   : > { %p664_p6 = scmp.ne.s32.totalorder %s784_s29, %s663_s11  ;;  %s668_s18 = sshll.u32 %s714_s12, 4  ;;  %s669_s18 = int_to_ptr.vmem [resolvable:$false] %s668_s18 }
  0x1b   : > { %s670_s19 = scalar_lea.vmem %s669_s18, 4096  ;;  %p671_p9 = scmp.lt.s32.totalorder %s784_s29, %s669_s18 }
  0x1c   : > { %p666_p10 = pnand %p664_p6, %p650_p11  ;;  %p672_p0 = scmp.lt.s32.totalorder %s670_s19, %s663_s11 }
  0x1e   : > { %p667_p12 = pneg %p666_p10  ;;  %p673_p1 = por %p672_p0, %p671_p9 }
  0x20   : > { %p674_p2 = pnand %p673_p1, %p667_p12 }
  0x22   : > { %677 = shalt.err (!%p674_p2)
}
  0x23   : > { %s715_s22 = smov 128   ;;  %s716_s23 = smov 8  }
  0x24   : > { %580 = dma.hbm_to_vmem [thread:$0]  (!%p786_p8), %s782_s27, 2048, %s784_s29, %s791_s4, %s715_s22, %s715_s22, %s716_s23  }
  0x25   : > { %p169_p11 = scmp.lt.s32.totalorder %s712_s15, 5  ;;  %p1034_p13 = scmp.ge.s32.totalorder %s712_s15, 1 }
  0x27   : > { %p170_p3 = pnand %p1034_p13, %p169_p11 }
  0x28   : > { %s175_s24 = sand.u32 (!%p170_p3), 1, %s704_s13  }
  0x29   : > { %173 = sbr.rel (%p170_p3) target bundleno = 394 (0x18a), region = 32  ;;  %s567_s25 = sshll.u32 (!%p170_p3), %s175_s24, 7 }
  0x2a   : > { %s176_s26 = scalar_lea.sflag (!%p170_p3), [#allocation3], %s175_s24  ;;  %s823_s28 = scalar_lea.vmem (!%p170_p3), [#allocation2], %s567_s25 }
  0x30   : > { %695 = dma.done.wait (%p773_p7), %s176_s26, 2048  }
  0x31   : > { %697 = vsyncadd (%p773_p7), %s176_s26, 4294965248  ;;  %v219_v0 = vld [vmem:[%s823_s28] sm:$0xff]  ;;  %v221_v1 = vld [vmem:[%s823_s28 + $0x10] sm:$0xff]  ;;  %p208_p7 = scmp.lt.s32.totalorder %s756_s16, 3 }
  0x32   : > { %235 = vadd.xlane.f32.xlu0 %v219_v0  ;;  %239 = vadd.xlane.f32.xlu1 %v221_v1  ;;  %v220_v2 = vld [vmem:[%s823_s28 + $0x8] sm:$0xff]  ;;  %v222_v3 = vld [vmem:[%s823_s28 + $0x18] sm:$0xff]  ;;  %v223_v4 = vld [vmem:[%s823_s28 + $0x20] sm:$0xff] }
  0x33   : > { %v224_v5 = vld [vmem:[%s823_s28 + $0x28] sm:$0xff]  ;;  %v225_v6 = vld [vmem:[%s823_s28 + $0x30] sm:$0xff]  ;;  %v226_v7 = vld [vmem:[%s823_s28 + $0x38] sm:$0xff]  ;;  %s1040_s16 = smov (!%p208_p7, %s756_s16), 3 }
  0x34   : > { %v227_v8 = vld [vmem:[%s823_s28 + $0x40] sm:$0xff]  ;;  %v228_v9 = vld [vmem:[%s823_s28 + $0x48] sm:$0xff]  ;;  %v229_v10 = vld [vmem:[%s823_s28 + $0x50] sm:$0xff]  ;;  %s210_s27 = scalar_lea.vmem %s1029_s1, %s1040_s16  ;;  %s213_s4 = scalar_lea.vmem %s1030_s2, %s1040_s16 }
  0x35   : > { %v841_v11 = vld [vmem:[%s823_s28 + $0x58] sm:$0xff]  ;;  %v845_v12 = vld [vmem:[%s823_s28 + $0x60] sm:$0xff]  ;;  %v848_v13 = vld [vmem:[%s823_s28 + $0x68] sm:$0xff]  ;;  %s574_s5 = sshll.u32 %s1040_s16, 7 }
  0x36   : > { %237 = vadd.xlane.f32.xlu0 %v220_v2  ;;  %241 = vadd.xlane.f32.xlu1 %v222_v3  ;;  %v853_v14 = vld [vmem:[%s823_s28 + $0x70] sm:$0xff]  ;;  %v856_v15 = vld [vmem:[%s823_s28 + $0x78] sm:$0xff]  ;;  %s951_s8 = scalar_lea.vmem %s1031_s3, %s574_s5 }
  0x3a   : > { %243 = vadd.xlane.f32.xlu0 %v223_v4  ;;  %245 = vadd.xlane.f32.xlu1 %v224_v5 }
  0x3e   : > { %247 = vadd.xlane.f32.xlu0 %v225_v6  ;;  %249 = vadd.xlane.f32.xlu1 %v226_v7 }
  0x42   : > { %251 = vadd.xlane.f32.xlu0 %v227_v8  ;;  %253 = vadd.xlane.f32.xlu1 %v228_v9 }
  0x46   : > { %255 = vadd.xlane.f32.xlu0 %v229_v10  ;;  %257 = vadd.xlane.f32.xlu1 %v841_v11 }
  0x4a   : > { %259 = vadd.xlane.f32.xlu0 %v845_v12  ;;  %261 = vadd.xlane.f32.xlu1 %v848_v13 }
  0x4e   : > { %263 = vadd.xlane.f32.xlu0 %v853_v14  ;;  %265 = vadd.xlane.f32.xlu1 %v856_v15 }
  0xbf   : > { %v236_v16 = vpop.xlane.xlu0 %235  ;;  %v240_v17 = vpop.xlane.xlu1 %239 }
  0xc0   : > { %v268_v18 = vmul.f32 0.0078125, %v236_v16  ;;  %v270_v19 = vmul.f32 0.0078125, %v240_v17 }
  0xc2   : > { %v860_v20 = vsub.f32 %v219_v0, %v268_v18  ;;  %v862_v21 = vsub.f32 %v221_v1, %v270_v19 }
  0xc3   : > { %v238_v22 = vpop.xlane.xlu0 %237  ;;  %v242_v23 = vpop.xlane.xlu1 %241 }
  0xc4   : > { %v269_v24 = vmul.f32 0.0078125, %v238_v22  ;;  %v300_v25 = vmul.f32 %v860_v20, %v860_v20  ;;  %v271_v26 = vmul.f32 0.0078125, %v242_v23  ;;  %v302_v29 = vmul.f32 %v862_v21, %v862_v21 }
  0xc6   : > { %v866_v27 = vsub.f32 %v220_v2, %v269_v24  ;;  %316 = vadd.xlane.f32.xlu0 %v300_v25  ;;  %v868_v28 = vsub.f32 %v222_v3, %v271_v26 }
  0xc7   : > { %v244_v30 = vpop.xlane.xlu0 %243  ;;  %v246_v31 = vpop.xlane.xlu1 %245 }
  0xc8   : > { %v272_v32 = vmul.f32 0.0078125, %v244_v30  ;;  %v301_v33 = vmul.f32 %v866_v27, %v866_v27  ;;  %v273_v34 = vmul.f32 0.0078125, %v246_v31  ;;  %v303_v37 = vmul.f32 %v868_v28, %v868_v28 }
  0xca   : > { %v874_v35 = vsub.f32 %v223_v4, %v272_v32  ;;  %320 = vadd.xlane.f32.xlu0 %v302_v29  ;;  %318 = vadd.xlane.f32.xlu1 %v301_v33  ;;  %v876_v36 = vsub.f32 %v224_v5, %v273_v34  ;;  %v412_v29 = vld [vmem:[%s210_s27] sm:$0x1] }
  0xcb   : > { %v248_v38 = vpop.xlane.xlu0 %247  ;;  %v250_v39 = vpop.xlane.xlu1 %249 }
  0xcc   : > { %v274_v40 = vmul.f32 0.0078125, %v248_v38  ;;  %v304_v41 = vmul.f32 %v874_v35, %v874_v35  ;;  %v275_v42 = vmul.f32 0.0078125, %v250_v39  ;;  %v305_v45 = vmul.f32 %v876_v36, %v876_v36 }
  0xcd   : > { %v413_v38 = vadd.f32 1.0, %v412_v29 }
  0xce   : > { %v882_v43 = vsub.f32 %v225_v6, %v274_v40  ;;  %322 = vadd.xlane.f32.xlu1 %v303_v37  ;;  %324 = vadd.xlane.f32.xlu0 %v304_v41  ;;  %v884_v44 = vsub.f32 %v226_v7, %v275_v42 }
  0xcf   : > { %v252_v46 = vpop.xlane.xlu0 %251  ;;  %v254_v47 = vpop.xlane.xlu1 %253 }
  0xd0   : > { %v276_v48 = vmul.f32 0.0078125, %v252_v46  ;;  %v306_v49 = vmul.f32 %v882_v43, %v882_v43  ;;  %v277_v50 = vmul.f32 0.0078125, %v254_v47  ;;  %v307_v53 = vmul.f32 %v884_v44, %v884_v44 }
  0xd2   : > { %v890_v51 = vsub.f32 %v227_v8, %v276_v48  ;;  %326 = vadd.xlane.f32.xlu1 %v305_v45  ;;  %328 = vadd.xlane.f32.xlu0 %v306_v49  ;;  %v892_v52 = vsub.f32 %v228_v9, %v277_v50 }
  0xd3   : > { %v256_v54 = vpop.xlane.xlu0 %255  ;;  %v258_v55 = vpop.xlane.xlu1 %257 }
  0xd4   : > { %v278_v56 = vmul.f32 0.0078125, %v256_v54  ;;  %v308_v57 = vmul.f32 %v890_v51, %v890_v51  ;;  %v279_v58 = vmul.f32 0.0078125, %v258_v55  ;;  %v309_v61 = vmul.f32 %v892_v52, %v892_v52 }
  0xd6   : > { %v898_v59 = vsub.f32 %v229_v10, %v278_v56  ;;  %330 = vadd.xlane.f32.xlu1 %v307_v53  ;;  %332 = vadd.xlane.f32.xlu0 %v308_v57  ;;  %v901_v60 = vsub.f32 %v841_v11, %v279_v58  ;;  %v945_v57 = vld [vmem:[%s213_s4] ss:$0 sm:$0xff] }
  0xd7   : > { %v260_v62 = vpop.xlane.xlu0 %259  ;;  %v262_v63 = vpop.xlane.xlu1 %261 }
  0xd8   : > { %v280_v0 = vmul.f32 0.0078125, %v260_v62  ;;  %v310_v1 = vmul.f32 %v898_v59, %v898_v59  ;;  %v281_v2 = vmul.f32 0.0078125, %v262_v63  ;;  %v311_v5 = vmul.f32 %v901_v60, %v901_v60 }
  0xda   : > { %v908_v3 = vsub.f32 %v845_v12, %v280_v0  ;;  %334 = vadd.xlane.f32.xlu1 %v309_v61  ;;  %336 = vadd.xlane.f32.xlu0 %v310_v1  ;;  %v911_v4 = vsub.f32 %v848_v13, %v281_v2 }
  0xdb   : > { %v264_v6 = vpop.xlane.xlu0 %263  ;;  %v266_v7 = vpop.xlane.xlu1 %265 }
  0xdc   : > { %v282_v8 = vmul.f32 0.0078125, %v264_v6  ;;  %v312_v9 = vmul.f32 %v908_v3, %v908_v3  ;;  %v283_v10 = vmul.f32 0.0078125, %v266_v7  ;;  %v313_v13 = vmul.f32 %v911_v4, %v911_v4 }
  0xde   : > { %v918_v11 = vsub.f32 %v853_v14, %v282_v8  ;;  %338 = vadd.xlane.f32.xlu1 %v311_v5  ;;  %340 = vadd.xlane.f32.xlu0 %v312_v9  ;;  %v921_v12 = vsub.f32 %v856_v15, %v283_v10  ;;  %v415_v15 = vlaneseq }
  0xe0   : > { %v314_v16 = vmul.f32 %v918_v11, %v918_v11  ;;  %v315_v17 = vmul.f32 %v921_v12, %v921_v12  ;;  %v416_v26 = vshrl.u32 %v415_v15, 7 }
  0xe2   : > { %342 = vadd.xlane.f32.xlu1 %v313_v13  ;;  %344 = vadd.xlane.f32.xlu0 %v314_v16  ;;  %v417_v39 = vsub.s32 0, %v416_v26 }
  0xe4   : > { %v941_v48 = vrot.slane %v413_v38, %v417_v39 }
  0xe6   : > { %346 = vadd.xlane.f32.xlu1 %v315_v17 }
 0x153   : > { %v317_v14 = vpop.xlane.xlu0 %316 }
 0x154   : > { %v348_v18 = vmul.f32 0.0078125, %v317_v14 }
 0x156   : > { %v364_v19 = vadd.f32 1e-06, %v348_v18 }
 0x157   : > { %v319_v22 = vpop.xlane.xlu1 %318  ;;  %v321_v23 = vpop.xlane.xlu0 %320 }
 0x158   : > { %616 = vrsqrt.f32 %v364_v19  ;;  %v349_v24 = vmul.f32 0.0078125, %v319_v22  ;;  %v350_v25 = vmul.f32 0.0078125, %v321_v23 }
 0x15a   : > { %v365_v30 = vadd.f32 1e-06, %v349_v24  ;;  %v366_v31 = vadd.f32 1e-06, %v350_v25 }
 0x15b   : > { %v323_v32 = vpop.xlane.xlu1 %322  ;;  %v325_v33 = vpop.xlane.xlu0 %324 }
 0x15c   : > { %618 = vrsqrt.f32 %v365_v30  ;;  %v351_v34 = vmul.f32 0.0078125, %v323_v32  ;;  %v352_v37 = vmul.f32 0.0078125, %v325_v33 }
 0x15d   : > { %620 = vrsqrt.f32 %v366_v31 }
 0x15e   : > { %v367_v40 = vadd.f32 1e-06, %v351_v34  ;;  %v368_v41 = vadd.f32 1e-06, %v352_v37 }
 0x15f   : > { %v327_v42 = vpop.xlane.xlu1 %326  ;;  %v329_v45 = vpop.xlane.xlu0 %328 }
 0x160   : > { %622 = vrsqrt.f32 %v367_v40  ;;  %v353_v46 = vmul.f32 0.0078125, %v327_v42  ;;  %v354_v47 = vmul.f32 0.0078125, %v329_v45 }
 0x161   : > { %624 = vrsqrt.f32 %v368_v41 }
 0x162   : > { %v617_v49 = vpop.eup %616  ;;  %v369_v50 = vadd.f32 1e-06, %v353_v46  ;;  %v370_v53 = vadd.f32 1e-06, %v354_v47 }
 0x163   : > { %v396_v54 = vmul.f32 %v617_v49, %v860_v20  ;;  %v331_v55 = vpop.xlane.xlu1 %330  ;;  %v333_v56 = vpop.xlane.xlu0 %332 }
 0x164   : > { %626 = vrsqrt.f32 %v369_v50  ;;  %v355_v58 = vmul.f32 0.0078125, %v331_v55  ;;  %v356_v61 = vmul.f32 0.0078125, %v333_v56 }
 0x165   : > { %v420_v62 = vmul.f32 %v941_v48, %v396_v54  ;;  %628 = vrsqrt.f32 %v370_v53 }
 0x166   : > { %v619_v63 = vpop.eup %618  ;;  %v371_v0 = vadd.f32 1e-06, %v355_v58  ;;  %v372_v1 = vadd.f32 1e-06, %v356_v61 }
 0x167   : > { %v621_v20 = vpop.eup %620  ;;  %v443_v2 = vadd.f32 %v945_v57, %v420_v62  ;;  %v397_v5 = vmul.f32 %v619_v63, %v866_v27  ;;  %v335_v6 = vpop.xlane.xlu1 %334 }
 0x168   : > { %v337_v7 = vpop.xlane.xlu0 %336  ;;  %v398_v8 = vmul.f32 %v621_v20, %v862_v21  ;;  %630 = vrsqrt.f32 %v371_v0  ;;  %v357_v9 = vmul.f32 0.0078125, %v335_v6 }
 0x169   : > { %v358_v10 = vmul.f32 0.0078125, %v337_v7  ;;  %459 = vst [vmem:[%s951_s8] sm:$0xff] %v443_v2  ;;  %v421_v13 = vmul.f32 %v941_v48, %v397_v5  ;;  %632 = vrsqrt.f32 %v372_v1 }
 0x16a   : > { %v623_v16 = vpop.eup %622  ;;  %v422_v17 = vmul.f32 %v941_v48, %v398_v8  ;;  %v373_v14 = vadd.f32 1e-06, %v357_v9 }
 0x16b   : > { %v374_v18 = vadd.f32 1e-06, %v358_v10  ;;  %v625_v15 = vpop.eup %624  ;;  %v444_v27 = vadd.f32 %v945_v57, %v421_v13  ;;  %v399_v19 = vmul.f32 %v623_v16, %v868_v28  ;;  %v339_v21 = vpop.xlane.xlu1 %338 }
 0x16c   : > { %v341_v22 = vpop.xlane.xlu0 %340  ;;  %v445_v23 = vadd.f32 %v945_v57, %v422_v17  ;;  %v400_v24 = vmul.f32 %v625_v15, %v874_v35  ;;  %634 = vrsqrt.f32 %v373_v14  ;;  %v359_v25 = vmul.f32 0.0078125, %v339_v21 }
 0x16d   : > { %460 = vst [vmem:[%s951_s8 + $0x8] sm:$0xff] %v444_v27  ;;  %v423_v26 = vmul.f32 %v941_v48, %v399_v19  ;;  %636 = vrsqrt.f32 %v374_v18  ;;  %v360_v29 = vmul.f32 0.0078125, %v341_v22 }
 0x16e   : > { %v627_v30 = vpop.eup %626  ;;  %461 = vst [vmem:[%s951_s8 + $0x10] sm:$0xff] %v445_v23  ;;  %v424_v31 = vmul.f32 %v941_v48, %v400_v24  ;;  %v375_v32 = vadd.f32 1e-06, %v359_v25 }
 0x16f   : > { %v629_v28 = vpop.eup %628  ;;  %v446_v33 = vadd.f32 %v945_v57, %v423_v26  ;;  %v401_v34 = vmul.f32 %v627_v30, %v876_v36  ;;  %v376_v35 = vadd.f32 1e-06, %v360_v29  ;;  %v343_v37 = vpop.xlane.xlu1 %342 }
 0x170   : > { %v345_v38 = vpop.xlane.xlu0 %344  ;;  %v447_v39 = vadd.f32 %v945_v57, %v424_v31  ;;  %v402_v40 = vmul.f32 %v629_v28, %v882_v43  ;;  %638 = vrsqrt.f32 %v375_v32  ;;  %v361_v41 = vmul.f32 0.0078125, %v343_v37 }
 0x171   : > { %462 = vst [vmem:[%s951_s8 + $0x18] sm:$0xff] %v446_v33  ;;  %v425_v42 = vmul.f32 %v941_v48, %v401_v34  ;;  %640 = vrsqrt.f32 %v376_v35  ;;  %v362_v45 = vmul.f32 0.0078125, %v345_v38 }
 0x172   : > { %v631_v46 = vpop.eup %630  ;;  %463 = vst [vmem:[%s951_s8 + $0x20] sm:$0xff] %v447_v39  ;;  %v426_v36 = vmul.f32 %v941_v48, %v402_v40  ;;  %v377_v47 = vadd.f32 1e-06, %v361_v41 }
 0x173   : > { %v633_v49 = vpop.eup %632  ;;  %v448_v50 = vadd.f32 %v945_v57, %v425_v42  ;;  %v403_v53 = vmul.f32 %v631_v46, %v884_v44  ;;  %v378_v43 = vadd.f32 1e-06, %v362_v45  ;;  %v347_v54 = vpop.xlane.xlu1 %346 }
 0x174   : > { %v449_v55 = vadd.f32 %v945_v57, %v426_v36  ;;  %v404_v56 = vmul.f32 %v633_v49, %v890_v51  ;;  %642 = vrsqrt.f32 %v377_v47  ;;  %v363_v58 = vmul.f32 0.0078125, %v347_v54 }
 0x175   : > { %464 = vst [vmem:[%s951_s8 + $0x28] sm:$0xff] %v448_v50  ;;  %v427_v61 = vmul.f32 %v941_v48, %v403_v53  ;;  %644 = vrsqrt.f32 %v378_v43 }
 0x176   : > { %v635_v62 = vpop.eup %634  ;;  %465 = vst [vmem:[%s951_s8 + $0x30] sm:$0xff] %v449_v55  ;;  %v428_v63 = vmul.f32 %v941_v48, %v404_v56  ;;  %v379_v0 = vadd.f32 1e-06, %v363_v58 }
 0x177   : > { %v637_v44 = vpop.eup %636  ;;  %v450_v1 = vadd.f32 %v945_v57, %v427_v61  ;;  %v405_v20 = vmul.f32 %v635_v62, %v892_v52 }
 0x178   : > { %v451_v51 = vadd.f32 %v945_v57, %v428_v63  ;;  %v406_v2 = vmul.f32 %v637_v44, %v898_v59  ;;  %646 = vrsqrt.f32 %v379_v0 }
 0x179   : > { %466 = vst [vmem:[%s951_s8 + $0x38] sm:$0xff] %v450_v1  ;;  %v429_v5 = vmul.f32 %v941_v48, %v405_v20 }
 0x17a   : > { %v639_v6 = vpop.eup %638  ;;  %467 = vst [vmem:[%s951_s8 + $0x40] sm:$0xff] %v451_v51  ;;  %v430_v7 = vmul.f32 %v941_v48, %v406_v2 }
 0x17b   : > { %v641_v8 = vpop.eup %640  ;;  %v452_v9 = vadd.f32 %v945_v57, %v429_v5  ;;  %v407_v10 = vmul.f32 %v639_v6, %v901_v60 }
 0x17c   : > { %v453_v52 = vadd.f32 %v945_v57, %v430_v7  ;;  %v408_v13 = vmul.f32 %v641_v8, %v908_v3 }
 0x17d   : > { %468 = vst [vmem:[%s951_s8 + $0x48] sm:$0xff] %v452_v9  ;;  %v431_v59 = vmul.f32 %v941_v48, %v407_v10 }
 0x17e   : > { %v643_v16 = vpop.eup %642  ;;  %469 = vst [vmem:[%s951_s8 + $0x50] sm:$0xff] %v453_v52  ;;  %v432_v17 = vmul.f32 %v941_v48, %v408_v13 }
 0x17f   : > { %v645_v14 = vpop.eup %644  ;;  %v454_v18 = vadd.f32 %v945_v57, %v431_v59  ;;  %v409_v60 = vmul.f32 %v643_v16, %v911_v4 }
 0x180   : > { %v455_v15 = vadd.f32 %v945_v57, %v432_v17  ;;  %v410_v27 = vmul.f32 %v645_v14, %v918_v11 }
 0x181   : > { %470 = vst [vmem:[%s951_s8 + $0x58] sm:$0xff] %v454_v18  ;;  %v433_v3 = vmul.f32 %v941_v48, %v409_v60 }
 0x182   : > { %v647_v19 = vpop.eup %646  ;;  %471 = vst [vmem:[%s951_s8 + $0x60] sm:$0xff] %v455_v15  ;;  %v434_v21 = vmul.f32 %v941_v48, %v410_v27 }
 0x183   : > { %v456_v22 = vadd.f32 %v945_v57, %v433_v3  ;;  %v411_v23 = vmul.f32 %v647_v19, %v921_v12 }
 0x184   : > { %v457_v24 = vadd.f32 %v945_v57, %v434_v21 }
 0x185   : > { %472 = vst [vmem:[%s951_s8 + $0x68] sm:$0xff] %v456_v22  ;;  %v435_v4 = vmul.f32 %v941_v48, %v411_v23 }
 0x186   : > { %473 = vst [vmem:[%s951_s8 + $0x70] sm:$0xff] %v457_v24 }
 0x187   : > { %v458_v25 = vadd.f32 %v945_v57, %v435_v4 }
 0x189   : > { %474 = vst [vmem:[%s951_s8 + $0x78] sm:$0xff] %v458_v25 }
 0x18a PF: > { %p13_p8 = scmp.ge.s32.totalorder %s759_s17, 6   ;;  %s1035_s12 = smov %s704_s13 }
 0x18b   : > { %s1036_s13 = smov %s708_s14  ;;  %s1037_s14 = smov %s769_s20 }
 0x18c   : > { %s1038_s15 = smov %s759_s17  ;;  %15 = sbr.rel (!%p13_p8) target bundleno = 3 (0x3), region = 78 }
 0x193   :  { %496 = vsyncpa [#allocation3], 1 }
 0x194   :  { %498 = vsyncpa [#allocation3 + $0x1], 1 }

// kernel: causal_wan_block_pallas.16
= control target key start
LH: loop header
LB: loop body
LE: loop exit
PB: predicated region body
PF: predicated region fallthrough
CT: control target
= control target key end

     0   :  { %s891_s12 = smov 0   ;;  %s893_s13 = smov 0   ;;  %s1018_s0 = inlined_call_operand.vmem [shape: f32[512,128], index: 0, kind: input, shape index: {}]   ;;  %s1019_s1 = inlined_call_operand.vmem [shape: f32[128,128], index: 1, kind: input, shape index: {}]   ;;  %s1020_s2 = inlined_call_operand.vmem [shape: f32[1,128], index: 2, kind: input, shape index: {}]   ;;  %s1021_s3 = inlined_call_operand.vmem [shape: f32[512,128], index: 3, kind: output, shape index: {}]  }
   0x1   :  { %s895_s14 = smov 0  }
   0x2 LB: > { %s32_s15 = sadd.s32 1, %s865_s13  ;;  %p679_p0 = scmp.ge.s32.totalorder %s869_s14, 1  ;;  %s869_s14 = sphi %s895_s14, %s13_s14   ;;  %s865_s13 = sphi %s893_s13, %s1023_s13   ;;  %s861_s12 = sphi %s891_s12, %s1022_s12  }
   0x3   : > { %p34_p1 = scmp.ge.s32.totalorder %s32_s15, 4  ;;  %p188_p2 = scmp.lt.s32.totalorder %s869_s14, 5 }
   0x5   : > { %s1025_s15 = smov (%p34_p1, %s32_s15), 0  ;;  %p189_p3 = pnand %p679_p0, %p188_p2 }
   0x6   : > { %v311_v0 = vld [vmem:[%s1019_s1] sm:$0xff] (!%p189_p3)  ;;  %v312_v1 = vld [vmem:[%s1019_s1 + $0x8] sm:$0xff] (!%p189_p3)  ;;  %v313_v2 = vld [vmem:[%s1019_s1 + $0x10] sm:$0xff] (!%p189_p3)  ;;  %s680_s22 = sshll.u32 (!%p189_p3), %s861_s12, 4 }
   0x7   : > { %192 = sbr.rel (%p189_p3) target bundleno = 270 (0x10e), region = 32  ;;  %v775_v3 = vpack.c.bf16 (!%p189_p3), %v312_v1, %v311_v0  ;;  %v314_v4 = vld [vmem:[%s1019_s1 + $0x18] sm:$0xff] (!%p189_p3)  ;;  %p230_p4 = scmp.lt.s32.totalorder (!%p189_p3), %s680_s22, 63  ;;  %v315_v6 = vld [vmem:[%s1019_s1 + $0x20] sm:$0xff] (!%p189_p3)  ;;  %v316_v7 = vld [vmem:[%s1019_s1 + $0x28] sm:$0xff] (!%p189_p3) }
   0x8   : > { %v779_v5 = vpack.c.bf16 (!%p189_p3), %v314_v4, %v313_v2  ;;  %v783_v8 = vpack.c.bf16 (!%p189_p3), %v316_v7, %v315_v6  ;;  %v317_v9 = vld [vmem:[%s1019_s1 + $0x30] sm:$0xff] (!%p189_p3)  ;;  %v318_v10 = vld [vmem:[%s1019_s1 + $0x38] sm:$0xff] (!%p189_p3)  ;;  %v319_v14 = vld [vmem:[%s1019_s1 + $0x40] sm:$0xff] (!%p189_p3) }
   0x9   : > { %776 = vmatprep.subr.bf16.mxu0 (!%p189_p3), %v775_v3  ;;  %807 = vmatprep.subr.bf16.mxu1 (!%p189_p3), %v775_v3  ;;  %v787_v13 = vpack.c.bf16 (!%p189_p3), %v318_v10, %v317_v9  ;;  %v320_v15 = vld [vmem:[%s1019_s1 + $0x48] sm:$0xff] (!%p189_p3)  ;;  %v321_v17 = vld [vmem:[%s1019_s1 + $0x50] sm:$0xff] (!%p189_p3)  ;;  %v322_v18 = vld [vmem:[%s1019_s1 + $0x58] sm:$0xff] (!%p189_p3) }
   0xa   : > { %778 = vmatpush3.bf16.msra.mxu0 (!%p189_p3), %v775_v3  ;;  %815 = vmatpush3.bf16.msra.mxu1 (!%p189_p3), %v775_v3  ;;  %v791_v16 = vpack.c.bf16 (!%p189_p3), %v320_v15, %v319_v14  ;;  %v795_v19 = vpack.c.bf16 (!%p189_p3), %v322_v18, %v321_v17  ;;  %v323_v20 = vld [vmem:[%s1019_s1 + $0x60] sm:$0xff] (!%p189_p3)  ;;  %v324_v21 = vld [vmem:[%s1019_s1 + $0x68] sm:$0xff] (!%p189_p3)  ;;  %v325_v23 = vld [vmem:[%s1019_s1 + $0x70] sm:$0xff] (!%p189_p3) }
   0xb   : > { %780 = vmatprep.subr.bf16.mxu0 (!%p189_p3), %v779_v5  ;;  %808 = vmatprep.subr.bf16.mxu1 (!%p189_p3), %v779_v5  ;;  %v799_v22 = vpack.c.bf16 (!%p189_p3), %v324_v21, %v323_v20  ;;  %v326_v24 = vld [vmem:[%s1019_s1 + $0x78] sm:$0xff] (!%p189_p3)  ;;  %v684_v40 = vld [vmem:[%s1020_s2] ss:$0 sm:$0xff] (!%p189_p3) }
   0xc   : > { %v803_v25 = vpack.c.bf16 (!%p189_p3), %v326_v24, %v325_v23 }
   0xe   : > { %s1027_s22 = smov (!%p230_p4, %s680_s22), 63  ;;  %782 = vmatpush3.bf16.msra.mxu0 %v779_v5  ;;  %816 = vmatpush3.bf16.msra.mxu1 %v779_v5 }
   0xf   : > { %s681_s29 = sshll.u32 %s1027_s22, 3  ;;  %784 = vmatprep.subr.bf16.mxu0 %v783_v8  ;;  %809 = vmatprep.subr.bf16.mxu1 %v783_v8 }
  0x10   : > { %s941_s9 = scalar_lea.vmem %s1018_s0, %s681_s29  ;;  %s991_s8 = scalar_lea.vmem %s1021_s3, %s681_s29 }
  0x11   : > { %v295_v11 = vld [vmem:[%s941_s9] sm:$0xff]  ;;  %v296_v26 = vld [vmem:[%s941_s9 + $0x8] sm:$0xff]  ;;  %v297_v28 = vld [vmem:[%s941_s9 + $0x10] sm:$0xff] }
  0x12   : > { %v303_v12 = vld [vmem:[%s941_s9 + $0x40] sm:$0xff]  ;;  %751 = vmatprep.mubr.f32.mxu0 %v295_v11  ;;  %786 = vmatpush3.bf16.msra.mxu0 %v783_v8  ;;  %v304_v27 = vld [vmem:[%s941_s9 + $0x48] sm:$0xff]  ;;  %v305_v29 = vld [vmem:[%s941_s9 + $0x50] sm:$0xff] }
  0x13   : > { %763 = vmatprep.mubr.f32.mxu1 %v303_v12  ;;  %817 = vmatpush3.bf16.msra.mxu1 %v783_v8  ;;  %v298_v30 = vld [vmem:[%s941_s9 + $0x18] sm:$0xff]  ;;  %v299_v32 = vld [vmem:[%s941_s9 + $0x20] sm:$0xff]  ;;  %v300_v34 = vld [vmem:[%s941_s9 + $0x28] sm:$0xff] }
  0x14   : > { %788 = vmatprep.subr.bf16.mxu0 %v787_v13  ;;  %810 = vmatprep.subr.bf16.mxu1 %v787_v13  ;;  %v306_v31 = vld [vmem:[%s941_s9 + $0x58] sm:$0xff]  ;;  %v307_v33 = vld [vmem:[%s941_s9 + $0x60] sm:$0xff]  ;;  %v308_v35 = vld [vmem:[%s941_s9 + $0x68] sm:$0xff] }
  0x15   : > { %v301_v36 = vld [vmem:[%s941_s9 + $0x30] sm:$0xff]  ;;  %v302_v38 = vld [vmem:[%s941_s9 + $0x38] sm:$0xff] }
  0x16   : > { %790 = vmatpush3.bf16.msra.mxu0 %v787_v13  ;;  %v309_v37 = vld [vmem:[%s941_s9 + $0x70] sm:$0xff]  ;;  %v310_v39 = vld [vmem:[%s941_s9 + $0x78] sm:$0xff] }
  0x17   : > { %818 = vmatpush3.bf16.msra.mxu1 %v787_v13  ;;  %792 = vmatprep.subr.bf16.mxu0 %v791_v16 }
  0x18   : > { %811 = vmatprep.subr.bf16.mxu1 %v791_v16 }
  0x1a   : > { %794 = vmatpush3.bf16.msra.mxu0 %v791_v16 }
  0x1b   : > { %819 = vmatpush3.bf16.msra.mxu1 %v791_v16  ;;  %796 = vmatprep.subr.bf16.mxu0 %v795_v19 }
  0x1c   : > { %812 = vmatprep.subr.bf16.mxu1 %v795_v19 }
  0x1e   : > { %798 = vmatpush3.bf16.msra.mxu0 %v795_v19 }
  0x1f   : > { %820 = vmatpush3.bf16.msra.mxu1 %v795_v19  ;;  %800 = vmatprep.subr.bf16.mxu0 %v799_v22 }
  0x20   : > { %813 = vmatprep.subr.bf16.mxu1 %v799_v22 }
  0x22   : > { %802 = vmatpush3.bf16.msra.mxu0 %v799_v22 }
  0x23   : > { %821 = vmatpush3.bf16.msra.mxu1 %v799_v22  ;;  %804 = vmatprep.subr.bf16.mxu0 %v803_v25 }
  0x24   : > { %814 = vmatprep.subr.bf16.mxu1 %v803_v25 }
  0x26   : > { %806 = vmatpush3.bf16.msra.mxu0 %v803_v25 }
  0x27   : > { %822 = vmatpush3.bf16.msra.mxu1 %v803_v25 }
  0x29   : > { %752 = vmatmul.mubr.f32.vlgmr.msra.gmra.mrb[0].mxu0 %v296_v26 }
  0x2a   : > { %764 = vmatmul.mubr.f32.vlgmr.msra.gmra.mrb[0].mxu1 %v304_v27  ;;  %754 = vmatprep.mubr.f32.mxu0 %v297_v28 }
  0x2b   : > { %766 = vmatprep.mubr.f32.mxu1 %v305_v29 }
  0x2d   : > { %755 = vmatmul.mubr.f32.gmra.mrb[2].mxu0 %v298_v30 }
  0x2e   : > { %767 = vmatmul.mubr.f32.gmra.mrb[2].mxu1 %v306_v31  ;;  %757 = vmatprep.mubr.f32.mxu0 %v299_v32 }
  0x2f   : > { %769 = vmatprep.mubr.f32.mxu1 %v307_v33 }
  0x31   : > { %758 = vmatmul.mubr.f32.gmra.mrb[4].mxu0 %v300_v34 }
  0x32   : > { %770 = vmatmul.mubr.f32.gmra.mrb[4].mxu1 %v308_v35  ;;  %760 = vmatprep.mubr.f32.mxu0 %v301_v36 }
  0x33   : > { %772 = vmatprep.mubr.f32.mxu1 %v309_v37 }
  0x35   : > { %761 = vmatmul.mubr.f32.gmra.mrb[6].mxu0 %v302_v38 }
  0x36   : > { %773 = vmatmul.mubr.f32.gmra.mrb[6].mxu1 %v310_v39 }
  0xfc   : > { %v753_v41 = vpop.f32.mrb[0].mxu0 }
  0xfd   : > { %v765_v42 = vpop.f32.mrb[0].mxu1  ;;  %v531_v43 = vadd.f32 %v753_v41, %v684_v40  ;;  %v393_v45 = vpop.f32.mrb[1].mxu0 }
  0xfe   : > { %v539_v44 = vadd.f32 %v765_v42, %v684_v40  ;;  %v433_v46 = vpop.f32.mrb[1].mxu1  ;;  %v530_v47 = vadd.f32 %v684_v40, %v393_v45 }
  0xff   : > { %v538_v48 = vadd.f32 %v684_v40, %v433_v46  ;;  %547 = vst [vmem:[%s991_s8 + $0x8] sm:$0xff] %v531_v43 }
 0x100   : > { %555 = vst [vmem:[%s991_s8 + $0x48] sm:$0xff] %v539_v44  ;;  %546 = vst [vmem:[%s991_s8] sm:$0xff] %v530_v47  ;;  %v756_v49 = vpop.f32.mrb[2].mxu0 }
 0x101   : > { %554 = vst [vmem:[%s991_s8 + $0x40] sm:$0xff] %v538_v48  ;;  %v768_v50 = vpop.f32.mrb[2].mxu1  ;;  %v533_v51 = vadd.f32 %v756_v49, %v684_v40  ;;  %v403_v53 = vpop.f32.mrb[3].mxu0 }
 0x102   : > { %v541_v52 = vadd.f32 %v768_v50, %v684_v40  ;;  %v443_v54 = vpop.f32.mrb[3].mxu1  ;;  %v532_v55 = vadd.f32 %v684_v40, %v403_v53 }
 0x103   : > { %v540_v56 = vadd.f32 %v684_v40, %v443_v54  ;;  %549 = vst [vmem:[%s991_s8 + $0x18] sm:$0xff] %v533_v51 }
 0x104   : > { %557 = vst [vmem:[%s991_s8 + $0x58] sm:$0xff] %v541_v52  ;;  %548 = vst [vmem:[%s991_s8 + $0x10] sm:$0xff] %v532_v55  ;;  %v759_v57 = vpop.f32.mrb[4].mxu0 }
 0x105   : > { %556 = vst [vmem:[%s991_s8 + $0x50] sm:$0xff] %v540_v56  ;;  %v771_v58 = vpop.f32.mrb[4].mxu1  ;;  %v535_v59 = vadd.f32 %v759_v57, %v684_v40  ;;  %v413_v61 = vpop.f32.mrb[5].mxu0 }
 0x106   : > { %v543_v60 = vadd.f32 %v771_v58, %v684_v40  ;;  %v453_v62 = vpop.f32.mrb[5].mxu1  ;;  %v534_v63 = vadd.f32 %v684_v40, %v413_v61 }
 0x107   : > { %v542_v0 = vadd.f32 %v684_v40, %v453_v62  ;;  %551 = vst [vmem:[%s991_s8 + $0x28] sm:$0xff] %v535_v59 }
 0x108   : > { %559 = vst [vmem:[%s991_s8 + $0x68] sm:$0xff] %v543_v60  ;;  %550 = vst [vmem:[%s991_s8 + $0x20] sm:$0xff] %v534_v63  ;;  %v762_v1 = vpop.f32.mrb[6].mxu0 }
 0x109   : > { %558 = vst [vmem:[%s991_s8 + $0x60] sm:$0xff] %v542_v0  ;;  %v774_v2 = vpop.f32.mrb[6].mxu1  ;;  %v537_v3 = vadd.f32 %v762_v1, %v684_v40  ;;  %v423_v5 = vpop.f32.mrb[7].mxu0 }
 0x10a   : > { %v545_v4 = vadd.f32 %v774_v2, %v684_v40  ;;  %v463_v6 = vpop.f32.mrb[7].mxu1  ;;  %v536_v7 = vadd.f32 %v684_v40, %v423_v5 }
 0x10b   : > { %v544_v8 = vadd.f32 %v684_v40, %v463_v6  ;;  %553 = vst [vmem:[%s991_s8 + $0x38] sm:$0xff] %v537_v3 }
 0x10c   : > { %561 = vst [vmem:[%s991_s8 + $0x78] sm:$0xff] %v545_v4  ;;  %552 = vst [vmem:[%s991_s8 + $0x30] sm:$0xff] %v536_v7 }
 0x10d   : > { %560 = vst [vmem:[%s991_s8 + $0x70] sm:$0xff] %v544_v8 }
 0x10e PF: > { %s13_s14 = sadd.s32 1, %s869_s14   ;;  %s1022_s12 = smov %s865_s13 }
 0x10f   : > { %p10_p5 = scmp.ge.s32.totalorder %s13_s14, 6   ;;  %s1023_s13 = smov %s1025_s15 }
 0x111   :  { %12 = sbr.rel (!%p10_p5) target bundleno = 2 (0x2), region = 76 }

// kernel: custom-call
= control target key start
LH: loop header
LB: loop body
LE: loop exit
PB: predicated region body
PF: predicated region fallthrough
CT: control target
= control target key end

     0   :  { %2 = vsyncpa [#allocation0], 0  ;;  %s61_s0 = inlined_call_operand.hbm [shape: c64[1,1,256,16], index: 0, kind: input, shape index: {}]   ;;  %s62_s1 = inlined_call_operand.vmem [shape: f32[1,1,256,16], index: 1, kind: output, shape index: {}]  }
   0x1   :  { %s3_s8 = sshll.u32 %s62_s1, 4  ;;  %s9_s11 = scalar_lea.hbm %s61_s0, 512  ;;  %s4_s8 = int_to_ptr.vmem [resolvable:$true] %s3_s8 }
   0x2   :  { %p10_p0 = scmp.ne.s32.totalorder %s61_s0, %s9_s11  ;;  %s11_s16 = scalar_lea.hbm %s61_s0, 1024 }
   0x3   :  { %p12_p1 = scmp.lt.u32.totalorder %s11_s16, %s9_s11  ;;  %p13_p2 = scmp.lt.u32.totalorder %s9_s11, %s61_s0 }
   0x5   :  { %p14_p3 = por %p13_p2, %p12_p1 }
   0x7   :  { %p15_p4 = pnand %p14_p3, %p10_p0 }
   0x9   :  { %18 = shalt.err (!%p15_p4)  }
   0xa   :  { %s19_s1 = scalar_lea.vmem %s4_s8, 512  ;;  %p24_p6 = scmp.lt.s32.totalorder %s4_s8, %s4_s8 }
   0xb   :  { %p20_p5 = scmp.ne.s32.totalorder %s4_s8, %s19_s1  ;;  %p25_p7 = scmp.lt.s32.totalorder %s19_s1, %s19_s1 }
   0xd   :  { %p26_p8 = por %p25_p7, %p24_p6 }
   0xf   :  { %p27_p9 = pnand %p26_p8, %p20_p5 }
  0x11   :  { %30 = shalt.err (!%p27_p9)  }
  0x12   :  { %6 = dma.hbm_to_vmem [thread:$0]  %s61_s0, 512, %s4_s8, [#allocation0] }
  0x13   :  { %31 = dma.done.wait [#allocation0], 512  }
  0x14   :  { %32 = vsyncadd [#allocation0], 4294966784 }
  0x15   :  { %8 = vsyncpa [#allocation0], 1 }

// kernel: custom-call.1
= control target key start
LH: loop header
LB: loop body
LE: loop exit
PB: predicated region body
PF: predicated region fallthrough
CT: control target
= control target key end

     0   :  { %s59_s0 = inlined_call_operand.hbm [shape: c64[1,1,256,16], index: 0, kind: input, shape index: {}]   ;;  %s60_s1 = inlined_call_operand.vmem [shape: f32[1,1,256,16], index: 1, kind: output, shape index: {}]  }
   0x1   :  { %s2_s8 = scalar_lea.hbm %s59_s0, 512 }
   0x2   :  { %3 = vsyncpa [#allocation0], 0  ;;  %s4_s11 = sshll.u32 %s60_s1, 4  ;;  %s34_s14 = scalar_lea.hbm %s59_s0, 1024  ;;  %s5_s11 = int_to_ptr.vmem [resolvable:$true] %s4_s11 }
   0x3   :  { %p11_p0 = scmp.ne.s32.totalorder %s2_s8, %s34_s14  ;;  %p13_p1 = scmp.lt.u32.totalorder %s2_s8, %s59_s0 }
   0x4   :  { %p14_p2 = scmp.lt.u32.totalorder %s34_s14, %s34_s14  ;;  %p16_p4 = scmp.lt.u32.totalorder %s34_s14, %s2_s8 }
   0x6   :  { %p15_p3 = por %p14_p2, %p13_p1 }
   0x8   :  { %p17_p5 = por %p16_p4, %p15_p3 }
   0xa   :  { %p18_p6 = pnand %p17_p5, %p11_p0 }
   0xc   :  { %21 = shalt.err (!%p18_p6)  }
   0xd   :  { %s22_s17 = scalar_lea.vmem %s5_s11, 512  ;;  %p27_p8 = scmp.lt.s32.totalorder %s5_s11, %s5_s11 }
   0xe   :  { %p23_p7 = scmp.ne.s32.totalorder %s5_s11, %s22_s17  ;;  %p28_p9 = scmp.lt.s32.totalorder %s22_s17, %s22_s17 }
  0x10   :  { %p29_p10 = por %p28_p9, %p27_p8 }
  0x12   :  { %p30_p11 = pnand %p29_p10, %p23_p7 }
  0x14   :  { %33 = shalt.err (!%p30_p11)  }
  0x15   :  { %7 = dma.hbm_to_vmem [thread:$0]  %s2_s8, 512, %s5_s11, [#allocation0] }
  0x16   :  { %35 = dma.done.wait [#allocation0], 512  }
  0x17   :  { %36 = vsyncadd [#allocation0], 4294966784 }
  0x18   :  { %9 = vsyncpa [#allocation0], 1 }

// kernel: causal_wan_block_pallas.19
= control target key start
LH: loop header
LB: loop body
LE: loop exit
PB: predicated region body
PF: predicated region fallthrough
CT: control target
= control target key end

     0   :  { %s2136_s12 = smov 0   ;;  %s2138_s13 = smov 0   ;;  %s2737_s0 = inlined_call_operand.vmem [shape: f32[8,256,32], index: 0, kind: input, shape index: {}]   ;;  %s2738_s1 = inlined_call_operand.vmem [shape: f32[8,256,32], index: 1, kind: input, shape index: {}]   ;;  %s2739_s2 = inlined_call_operand.vmem [shape: f32[8,256,32], index: 2, kind: input, shape index: {}]   ;;  %s2740_s3 = inlined_call_operand.vmem [shape: f32[8,256,32], index: 3, kind: output, shape index: {}]  }
   0x1   :  { %s2140_s14 = smov 0   ;;  %s2142_s15 = smov 0  }
   0x2   :  { %s2144_s16 = smov 0   ;;  %s2146_s17 = smov 0  }
   0x3   :  { %s2148_s18 = smov 0  }
   0x4 LB: > { %s25_s19 = sadd.s32 1, %s2098_s15  ;;  %s28_s20 = sadd.s32 1, %s2102_s16  ;;  %s2110_s18 = sphi %s2148_s18, %s13_s18   ;;  %s2106_s17 = sphi %s2146_s17, %s2748_s17   ;;  %s2102_s16 = sphi %s2144_s16, %s2747_s16   ;;  %s2098_s15 = sphi %s2142_s15, %s2746_s15   ;;  %s2094_s14 = sphi %s2140_s14, %s2745_s14   ;;  %s2090_s13 = sphi %s2138_s13, %s2744_s13   ;;  %s2086_s12 = sphi %s2136_s12, %s2743_s12  }
   0x5   : > { %p26_p0 = scmp.ge.s32.totalorder %s25_s19, 2  ;;  %p1591_p1 = scmp.ge.s32.totalorder %s2110_s18, 1 }
   0x6   : > { %p199_p2 = scmp.lt.s32.totalorder %s2110_s18, 33  ;;  %s32_s21 = sadd.s32 1, %s2106_s17 }
   0x7   : > { %s2750_s19 = smov (%p26_p0, %s25_s19), 0  ;;  %s2752_s20 = smov (!%p26_p0, %s28_s20), %s2102_s16 }
   0x8   : > { %p200_p3 = pnand %p1591_p1, %p199_p2  ;;  %p30_p4 = scmp.ge.s32.totalorder %s2752_s20, 2 }
   0x9   : > { %s1592_s22 = sshll.u32 (!%p200_p3), %s2090_s13, 4  ;;  %p250_p6 = scmp.lt.s32.totalorder (!%p200_p3), %s2094_s14, 7 }
   0xa   : > { %s2754_s20 = smov (%p30_p4, %s2752_s20), 0  ;;  %s2756_s21 = smov (!%p30_p4, %s32_s21), %s2106_s17 }
   0xb   : > { %p34_p5 = scmp.ge.s32.totalorder %s2756_s21, 8  ;;  %203 = sbr.rel (%p200_p3) target bundleno = 1002 (0x3ea), region = 32 }
   0xc   : > { %p252_p7 = scmp.lt.s32.totalorder (!%p200_p3), %s1592_s22, 31  ;;  %s1595_s23 = sshll.u32 (!%p200_p3), %s2086_s12, 4 }
   0xd   : > { %s2758_s21 = smov (%p34_p5, %s2756_s21), 0  ;;  %p262_p8 = scmp.lt.s32.totalorder (!%p200_p3), %s1595_s23, 31 }
   0xe   : > { %p1604_p9 = scmp.ne.s32.totalorder (!%p200_p3), %s2086_s12, 0 }
  0x12   : > { %s2760_s14 = smov (!%p250_p6, %s2094_s14), 7  ;;  %s2762_s22 = smov (!%p252_p7, %s1592_s22), 31 }
  0x13   : > { %s1593_s24 = sshll.u32 %s2760_s14, 5  ;;  %s2764_s23 = smov (!%p262_p8, %s1595_s23), 31  ;;  %vm293_vm0 = vcmask (!%p1604_p9), 7168   ;;  %vm326_vm1 = vcmask (!%p1604_p9), 261120   ;;  %v2112_v0 = vmov (!%p1604_p9), -inf   ;;  %v2113_v1 = vmov (!%p1604_p9), 0.0  }
  0x14   : > { %s255_s25 = sadd.s32 %s1593_s24, %s2762_s22  ;;  %s265_s6 = sadd.s32 %s1593_s24, %s2764_s23  ;;  %294 = vst.msk [vmem:[#allocation2] sm:$0xff] (!%p1604_p9), %vm293_vm0, %v2112_v0  ;;  %295 = vst.msk [vmem:[#allocation2 + $0x8] sm:$0xff] (!%p1604_p9), %vm293_vm0, %v2112_v0 }
  0x15   : > { %s1594_s26 = sshll.u32 %s255_s25, 3  ;;  %s1597_s7 = sshll.u32 %s265_s6, 3  ;;  %296 = vst.msk [vmem:[#allocation2 + $0x10] sm:$0xff] (!%p1604_p9), %vm293_vm0, %v2112_v0  ;;  %297 = vst.msk [vmem:[#allocation2 + $0x18] sm:$0xff] (!%p1604_p9), %vm293_vm0, %v2112_v0 }
  0x16   : > { %s2184_s29 = scalar_lea.vmem %s2737_s0, %s1594_s26  ;;  %s2189_s5 = scalar_lea.vmem %s2740_s3, %s1594_s26  ;;  %298 = vst.msk [vmem:[#allocation2 + $0x20] sm:$0xff] (!%p1604_p9), %vm293_vm0, %v2112_v0  ;;  %299 = vst.msk [vmem:[#allocation2 + $0x28] sm:$0xff] (!%p1604_p9), %vm293_vm0, %v2112_v0 }
  0x17   : > { %s2194_s10 = scalar_lea.vmem %s2738_s1, %s1597_s7  ;;  %s2199_s14 = scalar_lea.vmem %s2739_s2, %s1597_s7  ;;  %300 = vst.msk [vmem:[#allocation2 + $0x30] sm:$0xff] (!%p1604_p9), %vm293_vm0, %v2112_v0  ;;  %301 = vst.msk [vmem:[#allocation2 + $0x38] sm:$0xff] (!%p1604_p9), %vm293_vm0, %v2112_v0 }
  0x18   : > { %292 = sbr.rel (%p1604_p9) target bundleno = 44 (0x2c), region = 36  ;;  %302 = vst.msk [vmem:[#allocation2 + $0x40] sm:$0xff] (!%p1604_p9), %vm293_vm0, %v2112_v0  ;;  %303 = vst.msk [vmem:[#allocation2 + $0x48] sm:$0xff] (!%p1604_p9), %vm293_vm0, %v2112_v0 }
  0x19   : > { %304 = vst.msk [vmem:[#allocation2 + $0x50] sm:$0xff] (!%p1604_p9), %vm293_vm0, %v2112_v0  ;;  %305 = vst.msk [vmem:[#allocation2 + $0x58] sm:$0xff] (!%p1604_p9), %vm293_vm0, %v2112_v0 }
  0x1a   : > { %306 = vst.msk [vmem:[#allocation2 + $0x60] sm:$0xff] (!%p1604_p9), %vm293_vm0, %v2112_v0  ;;  %307 = vst.msk [vmem:[#allocation2 + $0x68] sm:$0xff] (!%p1604_p9), %vm293_vm0, %v2112_v0 }
  0x1b   : > { %308 = vst.msk [vmem:[#allocation2 + $0x70] sm:$0xff] (!%p1604_p9), %vm293_vm0, %v2112_v0  ;;  %309 = vst.msk [vmem:[#allocation2 + $0x78] sm:$0xff] (!%p1604_p9), %vm293_vm0, %v2112_v0 }
  0x1c   : > { %310 = vst.msk [vmem:[#allocation3] sm:$0xff] (!%p1604_p9), %vm293_vm0, %v2113_v1  ;;  %311 = vst.msk [vmem:[#allocation3 + $0x8] sm:$0xff] (!%p1604_p9), %vm293_vm0, %v2113_v1 }
  0x1d   : > { %312 = vst.msk [vmem:[#allocation3 + $0x10] sm:$0xff] (!%p1604_p9), %vm293_vm0, %v2113_v1  ;;  %313 = vst.msk [vmem:[#allocation3 + $0x18] sm:$0xff] (!%p1604_p9), %vm293_vm0, %v2113_v1 }
  0x1e   : > { %314 = vst.msk [vmem:[#allocation3 + $0x20] sm:$0xff] (!%p1604_p9), %vm293_vm0, %v2113_v1  ;;  %315 = vst.msk [vmem:[#allocation3 + $0x28] sm:$0xff] (!%p1604_p9), %vm293_vm0, %v2113_v1 }
  0x1f   : > { %316 = vst.msk [vmem:[#allocation3 + $0x30] sm:$0xff] %vm293_vm0, %v2113_v1  ;;  %317 = vst.msk [vmem:[#allocation3 + $0x38] sm:$0xff] %vm293_vm0, %v2113_v1 }
  0x20   : > { %318 = vst.msk [vmem:[#allocation3 + $0x40] sm:$0xff] %vm293_vm0, %v2113_v1  ;;  %319 = vst.msk [vmem:[#allocation3 + $0x48] sm:$0xff] %vm293_vm0, %v2113_v1 }
  0x21   : > { %320 = vst.msk [vmem:[#allocation3 + $0x50] sm:$0xff] %vm293_vm0, %v2113_v1  ;;  %321 = vst.msk [vmem:[#allocation3 + $0x58] sm:$0xff] %vm293_vm0, %v2113_v1 }
  0x22   : > { %322 = vst.msk [vmem:[#allocation3 + $0x60] sm:$0xff] %vm293_vm0, %v2113_v1  ;;  %323 = vst.msk [vmem:[#allocation3 + $0x68] sm:$0xff] %vm293_vm0, %v2113_v1 }
  0x23   : > { %324 = vst.msk [vmem:[#allocation3 + $0x70] sm:$0xff] %vm293_vm0, %v2113_v1  ;;  %325 = vst.msk [vmem:[#allocation3 + $0x78] sm:$0xff] %vm293_vm0, %v2113_v1 }
  0x24   : > { %327 = vst.msk [vmem:[#allocation4] sm:$0xff] %vm326_vm1, %v2113_v1  ;;  %328 = vst.msk [vmem:[#allocation4 + $0x8] sm:$0xff] %vm326_vm1, %v2113_v1 }
  0x25   : > { %329 = vst.msk [vmem:[#allocation4 + $0x10] sm:$0xff] %vm326_vm1, %v2113_v1  ;;  %330 = vst.msk [vmem:[#allocation4 + $0x18] sm:$0xff] %vm326_vm1, %v2113_v1 }
  0x26   : > { %331 = vst.msk [vmem:[#allocation4 + $0x20] sm:$0xff] %vm326_vm1, %v2113_v1  ;;  %332 = vst.msk [vmem:[#allocation4 + $0x28] sm:$0xff] %vm326_vm1, %v2113_v1 }
  0x27   : > { %333 = vst.msk [vmem:[#allocation4 + $0x30] sm:$0xff] %vm326_vm1, %v2113_v1  ;;  %334 = vst.msk [vmem:[#allocation4 + $0x38] sm:$0xff] %vm326_vm1, %v2113_v1 }
  0x28   : > { %335 = vst.msk [vmem:[#allocation4 + $0x40] sm:$0xff] %vm326_vm1, %v2113_v1  ;;  %336 = vst.msk [vmem:[#allocation4 + $0x48] sm:$0xff] %vm326_vm1, %v2113_v1 }
  0x29   : > { %337 = vst.msk [vmem:[#allocation4 + $0x50] sm:$0xff] %vm326_vm1, %v2113_v1  ;;  %338 = vst.msk [vmem:[#allocation4 + $0x58] sm:$0xff] %vm326_vm1, %v2113_v1 }
  0x2a   : > { %339 = vst.msk [vmem:[#allocation4 + $0x60] sm:$0xff] %vm326_vm1, %v2113_v1  ;;  %340 = vst.msk [vmem:[#allocation4 + $0x68] sm:$0xff] %vm326_vm1, %v2113_v1 }
  0x2b   : > { %341 = vst.msk [vmem:[#allocation4 + $0x70] sm:$0xff] %vm326_vm1, %v2113_v1  ;;  %342 = vst.msk [vmem:[#allocation4 + $0x78] sm:$0xff] %vm326_vm1, %v2113_v1 }
  0x2c PF: > { %v359_v2 = vld [vmem:[%s2194_s10] sm:$0xff]  ;;  %v360_v3 = vld [vmem:[%s2194_s10 + $0x8] sm:$0xff]  ;;  %vm375_vm2 = vcmask 261120   ;;  %v361_v4 = vld [vmem:[%s2194_s10 + $0x10] sm:$0xff]  ;;  %v2114_v63 = vmov 0   ;;  %vm953_vm4 = vcmask 7168  }
  0x2d   : > { %v1816_v5 = vpack.c.bf16 %v360_v3, %v359_v2  ;;  %vm2255_vm3 = vmpackc.low %vm375_vm2, %vm375_vm2  ;;  %v362_v7 = vld [vmem:[%s2194_s10 + $0x18] sm:$0xff]  ;;  %v343_v9 = vld [vmem:[%s2184_s29] sm:$0xff]  ;;  %1956 = vset.pattern.permute.xlu0 %v2114_v63  ;;  %1957 = vset.pattern.permute.xlu1 %v2114_v63  ;;  %p1637_p10 = scmp.ne.s32.totalorder %s2086_s12, 1 }
  0x2e   : > { %v1822_v8 = vpack.c.bf16 %v362_v7, %v361_v4  ;;  %v363_v10 = vld [vmem:[%s2194_s10 + $0x20] sm:$0xff]  ;;  %v364_v11 = vld [vmem:[%s2194_s10 + $0x28] sm:$0xff]  ;;  %1736 = vmatprep.mubr.msk.f32.mxu0 %vm375_vm2, %v343_v9  ;;  %v365_v13 = vld [vmem:[%s2194_s10 + $0x30] sm:$0xff] }
  0x2f   : > { %1818 = vmatprep.subr.msk.bf16.mxu0 %vm2255_vm3, %v1816_v5  ;;  %v1828_v12 = vpack.c.bf16 %v364_v11, %v363_v10  ;;  %v366_v14 = vld [vmem:[%s2194_s10 + $0x38] sm:$0xff]  ;;  %v367_v16 = vld [vmem:[%s2194_s10 + $0x40] sm:$0xff]  ;;  %v368_v17 = vld [vmem:[%s2194_s10 + $0x48] sm:$0xff] }
  0x30   : > { %1821 = vmatpush3.bf16.xpose.msk.msra.mxu0 %vm2255_vm3, %v1816_v5  ;;  %v1834_v15 = vpack.c.bf16 %v366_v14, %v365_v13  ;;  %v1840_v18 = vpack.c.bf16 %v368_v17, %v367_v16  ;;  %v369_v19 = vld [vmem:[%s2194_s10 + $0x50] sm:$0xff]  ;;  %v370_v20 = vld [vmem:[%s2194_s10 + $0x58] sm:$0xff]  ;;  %v371_v22 = vld [vmem:[%s2194_s10 + $0x60] sm:$0xff] }
  0x31   : > { %1824 = vmatprep.subr.msk.bf16.mxu0 %vm2255_vm3, %v1822_v8  ;;  %v1846_v21 = vpack.c.bf16 %v370_v20, %v369_v19  ;;  %v372_v23 = vld [vmem:[%s2194_s10 + $0x68] sm:$0xff]  ;;  %v373_v25 = vld [vmem:[%s2194_s10 + $0x70] sm:$0xff]  ;;  %v374_v26 = vld [vmem:[%s2194_s10 + $0x78] sm:$0xff] }
  0x32   : > { %v1852_v24 = vpack.c.bf16 %v372_v23, %v371_v22  ;;  %v1858_v27 = vpack.c.bf16 %v374_v26, %v373_v25  ;;  %v344_v28 = vld [vmem:[%s2184_s29 + $0x8] sm:$0xff]  ;;  %v345_v29 = vld [vmem:[%s2184_s29 + $0x10] sm:$0xff]  ;;  %v346_v30 = vld [vmem:[%s2184_s29 + $0x18] sm:$0xff] }
  0x33   : > { %v347_v31 = vld [vmem:[%s2184_s29 + $0x20] sm:$0xff]  ;;  %v348_v32 = vld [vmem:[%s2184_s29 + $0x28] sm:$0xff]  ;;  %v349_v33 = vld [vmem:[%s2184_s29 + $0x30] sm:$0xff] }
  0x34   : > { %v350_v34 = vld [vmem:[%s2184_s29 + $0x38] sm:$0xff]  ;;  %v351_v35 = vld [vmem:[%s2184_s29 + $0x40] sm:$0xff]  ;;  %v352_v36 = vld [vmem:[%s2184_s29 + $0x48] sm:$0xff] }
  0x35   : > { %v353_v37 = vld [vmem:[%s2184_s29 + $0x50] sm:$0xff]  ;;  %v354_v38 = vld [vmem:[%s2184_s29 + $0x58] sm:$0xff]  ;;  %v355_v39 = vld [vmem:[%s2184_s29 + $0x60] sm:$0xff] }
  0x36   : > { %v356_v40 = vld [vmem:[%s2184_s29 + $0x68] sm:$0xff]  ;;  %v357_v41 = vld [vmem:[%s2184_s29 + $0x70] sm:$0xff]  ;;  %v358_v42 = vld [vmem:[%s2184_s29 + $0x78] sm:$0xff] }
  0x37   : > { %v1083_v13 = vld [vmem:[%s2199_s14 + $0x8] sm:$0xff]  ;;  %v1084_v14 = vld [vmem:[%s2199_s14 + $0x10] sm:$0xff]  ;;  %v1085_v16 = vld [vmem:[%s2199_s14 + $0x18] sm:$0xff] }
  0x38   : > { %1827 = vmatpush3.bf16.xpose.msk.msra.mxu0 %vm2255_vm3, %v1822_v8  ;;  %v1868_v17 = vpack.c.bf16 %v1085_v16, %v1084_v14  ;;  %v1087_v19 = vld [vmem:[%s2199_s14 + $0x28] sm:$0xff]  ;;  %v1089_v22 = vld [vmem:[%s2199_s14 + $0x38] sm:$0xff]  ;;  %v2459_v16 = vld [vmem:[#allocation2 + $0x50] sm:$0xff] }
  0x39   : > { %1830 = vmatprep.subr.msk.bf16.mxu0 %vm2255_vm3, %v1828_v12  ;;  %v2441_v63 = vld [vmem:[#allocation2 + $0x38] sm:$0xff]  ;;  %v642_v14 = vld [vmem:[#allocation2 + $0x48] sm:$0xff] }
  0x40   : > { %1833 = vmatpush3.bf16.xpose.msk.msra.mxu0 %vm2255_vm3, %v1828_v12  ;;  %v1082_v12 = vld [vmem:[%s2199_s14] sm:$0xff] }
  0x41   : > { %1836 = vmatprep.subr.msk.bf16.mxu0 %vm2255_vm3, %v1834_v15 }
  0x48   : > { %1839 = vmatpush3.bf16.xpose.msk.msra.mxu0 %vm2255_vm3, %v1834_v15  ;;  %v1864_v15 = vpack.c.bf16 %v1083_v13, %v1082_v12 }
  0x49   : > { %1842 = vmatprep.subr.msk.bf16.mxu0 %vm2255_vm3, %v1840_v18 }
  0x4a   : > { %1865 = vmatprep.subr.bf16.mxu1 %v1864_v15 }
  0x4b   : > { %1867 = vmatpush3.bf16.msra.mxu1 %v1864_v15 }
  0x4c   : > { %1869 = vmatprep.subr.bf16.mxu1 %v1868_v17 }
  0x4f   : > { %1871 = vmatpush3.bf16.msra.mxu1 %v1868_v17 }
  0x50   : > { %1845 = vmatpush3.bf16.xpose.msk.msra.mxu0 %vm2255_vm3, %v1840_v18  ;;  %v1086_v18 = vld [vmem:[%s2199_s14 + $0x20] sm:$0xff] }
  0x51   : > { %1848 = vmatprep.subr.msk.bf16.mxu0 %vm2255_vm3, %v1846_v21  ;;  %v1872_v20 = vpack.c.bf16 %v1087_v19, %v1086_v18 }
  0x53   : > { %1873 = vmatprep.subr.bf16.mxu1 %v1872_v20 }
  0x54   : > { %1875 = vmatpush3.bf16.msra.mxu1 %v1872_v20 }
  0x58   : > { %1851 = vmatpush3.bf16.xpose.msk.msra.mxu0 %vm2255_vm3, %v1846_v21  ;;  %v1088_v21 = vld [vmem:[%s2199_s14 + $0x30] sm:$0xff] }
  0x59   : > { %1854 = vmatprep.subr.msk.bf16.mxu0 %vm2255_vm3, %v1852_v24  ;;  %v1876_v23 = vpack.c.bf16 %v1089_v22, %v1088_v21  ;;  %v644_v21 = vld [vmem:[#allocation2 + $0x58] sm:$0xff] }
  0x5b   : > { %1877 = vmatprep.subr.bf16.mxu1 %v1876_v23 }
  0x5c   : > { %1879 = vmatpush3.bf16.msra.mxu1 %v1876_v23  ;;  %v2469_v23 = vld [vmem:[#allocation2 + $0x60] sm:$0xff] }
  0x60   : > { %1857 = vmatpush3.bf16.xpose.msk.msra.mxu0 %vm2255_vm3, %v1852_v24  ;;  %v2392_v24 = vld [vmem:[#allocation2] sm:$0xff] }
  0x61   : > { %1860 = vmatprep.subr.msk.bf16.mxu0 %vm2255_vm3, %v1858_v27 }
  0x68   : > { %1863 = vmatpush3.bf16.xpose.msk.msra.mxu0 %vm2255_vm3, %v1858_v27  ;;  %v2397_v27 = vld [vmem:[#allocation2 + $0x18] sm:$0xff] }
  0x6f   : > { %1737 = vmatmul.mubr.msk.f32.vlgmr.msra.gmra.mrb[0].mxu0 %vm375_vm2, %v344_v28  ;;  %v2399_v28 = vld [vmem:[#allocation2 + $0x8] sm:$0xff] }
  0x70   : > { %1739 = vmatprep.mubr.msk.f32.mxu0 %vm375_vm2, %v345_v29 }
  0x73   : > { %1740 = vmatmul.mubr.msk.f32.gmra.mrb[2].mxu0 %vm375_vm2, %v346_v30  ;;  %v1090_v30 = vld [vmem:[%s2199_s14 + $0x40] sm:$0xff] }
  0x74   : > { %1742 = vmatprep.mubr.msk.f32.mxu0 %vm375_vm2, %v347_v31  ;;  %v1091_v31 = vld [vmem:[%s2199_s14 + $0x48] sm:$0xff] }
  0x77   : > { %1743 = vmatmul.mubr.msk.f32.gmra.mrb[4].mxu0 %vm375_vm2, %v348_v32 }
  0x78   : > { %1745 = vmatprep.mubr.msk.f32.mxu0 %vm375_vm2, %v349_v33 }
  0x7b   : > { %1746 = vmatmul.mubr.msk.f32.gmra.mrb[6].mxu0 %vm375_vm2, %v350_v34  ;;  %v1880_v34 = vpack.c.bf16 %v1091_v31, %v1090_v30  ;;  %v646_v31 = vld [vmem:[#allocation2 + $0x68] sm:$0xff] }
  0x7c   : > { %1748 = vmatprep.mubr.msk.f32.mxu0 %vm375_vm2, %v351_v35 }
  0x7d   : > { %1881 = vmatprep.subr.bf16.mxu1 %v1880_v34 }
  0x7e   : > { %1883 = vmatpush3.bf16.msra.mxu1 %v1880_v34  ;;  %v2480_v34 = vld [vmem:[#allocation2 + $0x70] sm:$0xff] }
  0x7f   : > { %1749 = vmatmul.mubr.msk.f32.gmra.mrb[8].mxu0 %vm375_vm2, %v352_v36  ;;  %v2412_v36 = vld [vmem:[#allocation2 + $0x10] sm:$0xff] }
  0x80   : > { %1751 = vmatprep.mubr.msk.f32.mxu0 %vm375_vm2, %v353_v37  ;;  %v2416_v37 = vld [vmem:[#allocation2 + $0x20] sm:$0xff] }
  0x83   : > { %1752 = vmatmul.mubr.msk.f32.gmra.mrb[10].mxu0 %vm375_vm2, %v354_v38 }
  0x84   : > { %1754 = vmatprep.mubr.msk.f32.mxu0 %vm375_vm2, %v355_v39  ;;  %v1092_v39 = vld [vmem:[%s2199_s14 + $0x50] sm:$0xff] }
  0x87   : > { %1755 = vmatmul.mubr.msk.f32.gmra.mrb[12].mxu0 %vm375_vm2, %v356_v40  ;;  %v1093_v40 = vld [vmem:[%s2199_s14 + $0x58] sm:$0xff] }
  0x88   : > { %1757 = vmatprep.mubr.msk.f32.mxu0 %vm375_vm2, %v357_v41 }
  0x8b   : > { %1758 = vmatmul.mubr.msk.f32.gmra.mrb[14].mxu0 %vm375_vm2, %v358_v42 }
 0x142   : > { %v1738_v43 = vpop.f32.mrb[0].mxu0 }
 0x143   : > { %v538_v44 = vpop.f32.mrb[1].mxu0  ;;  %v2341_v49 = vmul.f32 0.17677669, %v1738_v43  ;;  %v1884_v43 = vpack.c.bf16 %v1093_v40, %v1092_v39 }
 0x144   : > { %v2336_v45 = vmul.f32 0.17677669, %v538_v44  ;;  %v2426_v44 = vld [vmem:[#allocation2 + $0x28] sm:$0xff] }
 0x145   : > { %1885 = vmatprep.subr.bf16.mxu1 %v1884_v43 }
 0x146   : > { %649 = vmax.xlane.f32.xlu0 %v2336_v45  ;;  %v1741_v46 = vpop.f32.mrb[2].mxu0  ;;  %1887 = vmatpush3.bf16.msra.mxu1 %v1884_v43 }
 0x147   : > { %v2339_v47 = vmul.f32 0.17677669, %v1741_v46  ;;  %v548_v48 = vpop.f32.mrb[3].mxu0 }
 0x148   : > { %v2344_v50 = vmul.f32 0.17677669, %v548_v48  ;;  %v2433_v48 = vld [vmem:[#allocation2 + $0x30] sm:$0xff] }
 0x149   : > { %655 = vmax.xlane.f32.xlu1 %v2339_v47 }
 0x14a   : > { %651 = vmax.xlane.f32.xlu0 %v2341_v49  ;;  %v1744_v51 = vpop.f32.mrb[4].mxu0 }
 0x14b   : > { %v558_v52 = vpop.f32.mrb[5].mxu0  ;;  %v2350_v54 = vmul.f32 0.17677669, %v1744_v51 }
 0x14c   : > { %v2347_v53 = vmul.f32 0.17677669, %v558_v52  ;;  %v1094_v52 = vld [vmem:[%s2199_s14 + $0x60] sm:$0xff] }
 0x14d   : > { %653 = vmax.xlane.f32.xlu1 %v2344_v50 }
 0x14e   : > { %v1747_v55 = vpop.f32.mrb[6].mxu0  ;;  %657 = vmax.xlane.f32.xlu0 %v2347_v53 }
 0x14f   : > { %v568_v56 = vpop.f32.mrb[7].mxu0  ;;  %v2356_v58 = vmul.f32 0.17677669, %v1747_v55  ;;  %v1095_v55 = vld [vmem:[%s2199_s14 + $0x68] sm:$0xff] }
 0x150   : > { %v2353_v57 = vmul.f32 0.17677669, %v568_v56 }
 0x151   : > { %659 = vmax.xlane.f32.xlu1 %v2350_v54 }
 0x152   : > { %v1750_v59 = vpop.f32.mrb[8].mxu0  ;;  %661 = vmax.xlane.f32.xlu0 %v2353_v57 }
 0x153   : > { %v578_v60 = vpop.f32.mrb[9].mxu0  ;;  %v2362_v62 = vmul.f32 0.17677669, %v1750_v59 }
 0x154   : > { %v2359_v61 = vmul.f32 0.17677669, %v578_v60  ;;  %v1888_v60 = vpack.c.bf16 %v1095_v55, %v1094_v52 }
 0x155   : > { %663 = vmax.xlane.f32.xlu1 %v2356_v58 }
 0x156   : > { %v1753_v0 = vpop.f32.mrb[10].mxu0  ;;  %665 = vmax.xlane.f32.xlu0 %v2359_v61  ;;  %1889 = vmatprep.subr.bf16.mxu1 %v1888_v60 }
 0x157   : > { %v588_v1 = vpop.f32.mrb[11].mxu0  ;;  %v2368_v3 = vmul.f32 0.17677669, %v1753_v0  ;;  %1891 = vmatpush3.bf16.msra.mxu1 %v1888_v60 }
 0x158   : > { %v2365_v2 = vmul.f32 0.17677669, %v588_v1  ;;  %v2447_v1 = vld [vmem:[#allocation2 + $0x40] sm:$0xff] }
 0x159   : > { %667 = vmax.xlane.f32.xlu1 %v2362_v62 }
 0x15a   : > { %v1756_v4 = vpop.f32.mrb[12].mxu0  ;;  %669 = vmax.xlane.f32.xlu0 %v2365_v2 }
 0x15b   : > { %v598_v5 = vpop.f32.mrb[13].mxu0  ;;  %v2374_v7 = vmul.f32 0.17677669, %v1756_v4 }
 0x15c   : > { %v2371_v6 = vmul.f32 0.17677669, %v598_v5  ;;  %v1096_v5 = vld [vmem:[%s2199_s14 + $0x70] sm:$0xff] }
 0x15d   : > { %671 = vmax.xlane.f32.xlu1 %v2368_v3 }
 0x15e   : > { %v1759_v8 = vpop.f32.mrb[14].mxu0  ;;  %673 = vmax.xlane.f32.xlu0 %v2371_v6 }
 0x15f   : > { %v608_v9 = vpop.f32.mrb[15].mxu0  ;;  %v2380_v11 = vmul.f32 0.17677669, %v1759_v8  ;;  %v1097_v8 = vld [vmem:[%s2199_s14 + $0x78] sm:$0xff] }
 0x160   : > { %v2377_v10 = vmul.f32 0.17677669, %v608_v9  ;;  %v1892_v13 = vpack.c.bf16 %v1097_v8, %v1096_v5 }
 0x161   : > { %675 = vmax.xlane.f32.xlu1 %v2374_v7 }
 0x162   : > { %677 = vmax.xlane.f32.xlu0 %v2377_v10  ;;  %1893 = vmatprep.subr.bf16.mxu1 %v1892_v13 }
 0x163   : > { %1895 = vmatpush3.bf16.msra.mxu1 %v1892_v13 }
 0x165   : > { %679 = vmax.xlane.f32.xlu1 %v2380_v11 }
 0x1d3   : > { %v650_v25 = vpop.xlane.xlu0 %649 }
 0x1d4   : > { %v2395_v26 = vmax.f32 %v2392_v24, %v650_v25 }
 0x1d6   : > { %1275 = vst.msk [vmem:[#allocation2] sm:$0xff] %vm953_vm4, %v2395_v26  ;;  %v656_v29 = vpop.xlane.xlu1 %655  ;;  %747 = vperm.xlu0 %1956, %v2395_v26   ;;  %v697_v17 = vsub.f32 %v2392_v24, %v2395_v26 }
 0x1d7   : > { %v2407_v32 = vmax.f32 %v2397_v27, %v656_v29  ;;  %v652_v33 = vpop.xlane.xlu0 %651 }
 0x1d8   : > { %v2410_v35 = vmax.f32 %v2399_v28, %v652_v33  ;;  %v713_v25 = vmul.f32 1.442695, %v697_v17 }
 0x1d9   : > { %1278 = vst.msk [vmem:[#allocation2 + $0x18] sm:$0xff] %vm953_vm4, %v2407_v32  ;;  %v700_v24 = vsub.f32 %v2397_v27, %v2407_v32 }
 0x1da   : > { %1276 = vst.msk [vmem:[#allocation2 + $0x8] sm:$0xff] %vm953_vm4, %v2410_v35  ;;  %v654_v38 = vpop.xlane.xlu1 %653  ;;  %752 = vperm.xlu1 %1957, %v2410_v35   ;;  %1958 = vpow2.f32 %v713_v25 }
 0x1db   : > { %v2424_v41 = vmax.f32 %v2412_v36, %v654_v38  ;;  %v658_v42 = vpop.xlane.xlu0 %657  ;;  %v719_v38 = vmul.f32 1.442695, %v700_v24 }
 0x1dc   : > { %v2429_v46 = vmax.f32 %v2416_v37, %v658_v42  ;;  %v2485_v42 = vld [vmem:[#allocation2 + $0x78] sm:$0xff] }
 0x1dd   : > { %1277 = vst.msk [vmem:[#allocation2 + $0x10] sm:$0xff] %vm953_vm4, %v2424_v41  ;;  %1960 = vpow2.f32 %v719_v38 }
 0x1de   : > { %v660_v51 = vpop.xlane.xlu1 %659  ;;  %762 = vperm.xlu1 %1957, %v2407_v32   ;;  %1279 = vst.msk [vmem:[#allocation2 + $0x20] sm:$0xff] %vm953_vm4, %v2429_v46  ;;  %v701_v13 = vsub.f32 %v2416_v37, %v2429_v46 }
 0x1df   : > { %v686_v56 = vmax.f32 %v2426_v44, %v660_v51  ;;  %v662_v59 = vpop.xlane.xlu0 %661 }
 0x1e0   : > { %v2444_v0 = vmax.f32 %v2433_v48, %v662_v59  ;;  %v721_v17 = vmul.f32 1.442695, %v701_v13 }
 0x1e1   : > { %1280 = vst.msk [vmem:[#allocation2 + $0x28] sm:$0xff] %vm953_vm4, %v686_v56  ;;  %v702_v27 = vsub.f32 %v2426_v44, %v686_v56 }
 0x1e2   : > { %v664_v4 = vpop.xlane.xlu1 %663  ;;  %757 = vperm.xlu1 %1957, %v2424_v41   ;;  %1281 = vst.msk [vmem:[#allocation2 + $0x30] sm:$0xff] %vm953_vm4, %v2444_v0 }
 0x1e3   : > { %v688_v9 = vmax.f32 %v2441_v63, %v664_v4  ;;  %v666_v12 = vpop.xlane.xlu0 %665  ;;  %v723_v51 = vmul.f32 1.442695, %v702_v27 }
 0x1e4   : > { %v2456_v15 = vmax.f32 %v2447_v1, %v666_v12 }
 0x1e5   : > { %1282 = vst.msk [vmem:[#allocation2 + $0x38] sm:$0xff] %vm953_vm4, %v688_v9  ;;  %v704_v52 = vsub.f32 %v2441_v63, %v688_v9  ;;  %1962 = vpow2.f32 %v723_v51 }
 0x1e6   : > { %v668_v18 = vpop.xlane.xlu1 %667  ;;  %772 = vperm.xlu1 %1957, %v686_v56   ;;  %1283 = vst.msk [vmem:[#allocation2 + $0x40] sm:$0xff] %vm953_vm4, %v2456_v15  ;;  %v698_v56 = vsub.f32 %v2399_v28, %v2410_v35  ;;  %v699_v28 = vsub.f32 %v2412_v36, %v2424_v41  ;;  %v2510_v35 = vpop.eup %1958 }
 0x1e7   : > { %v690_v19 = vmax.f32 %v642_v14, %v668_v18  ;;  %v670_v20 = vpop.xlane.xlu0 %669  ;;  %v727_v63 = vmul.f32 1.442695, %v704_v52  ;;  %v703_v18 = vsub.f32 %v2433_v48, %v2444_v0 }
 0x1e8   : > { %v2466_v22 = vmax.f32 %v2459_v16, %v670_v20  ;;  %v715_v5 = vmul.f32 1.442695, %v698_v56  ;;  %v717_v12 = vmul.f32 1.442695, %v699_v28  ;;  %v705_v20 = vsub.f32 %v2447_v1, %v2456_v15 }
 0x1e9   : > { %1284 = vst.msk [vmem:[#allocation2 + $0x48] sm:$0xff] %vm953_vm4, %v690_v19  ;;  %792 = vperm.xlu0 %1956, %v690_v19   ;;  %v706_v4 = vsub.f32 %v642_v14, %v690_v19  ;;  %1964 = vpow2.f32 %v727_v63  ;;  %v2516_v14 = vpop.eup %1960 }
 0x1ea   : > { %v672_v26 = vpop.xlane.xlu1 %671  ;;  %767 = vperm.xlu1 %1957, %v2429_v46   ;;  %1285 = vst.msk [vmem:[#allocation2 + $0x50] sm:$0xff] %vm953_vm4, %v2466_v22  ;;  %1966 = vpow2.f32 %v715_v5  ;;  %v725_v46 = vmul.f32 1.442695, %v703_v18  ;;  %v729_v48 = vmul.f32 1.442695, %v705_v20 }
 0x1eb   : > { %v692_v29 = vmax.f32 %v644_v21, %v672_v26  ;;  %v674_v30 = vpop.xlane.xlu0 %673  ;;  %v731_v8 = vmul.f32 1.442695, %v706_v4 }
 0x1ec   : > { %v2477_v33 = vmax.f32 %v2469_v23, %v674_v30 }
 0x1ed   : > { %1286 = vst.msk [vmem:[#allocation2 + $0x58] sm:$0xff] %vm953_vm4, %v692_v29  ;;  %802 = vperm.xlu0 %1956, %v692_v29   ;;  %1968 = vpow2.f32 %v731_v8 }
 0x1ee   : > { %v676_v32 = vpop.xlane.xlu1 %675  ;;  %782 = vperm.xlu1 %1957, %v688_v9   ;;  %1287 = vst.msk [vmem:[#allocation2 + $0x60] sm:$0xff] %vm953_vm4, %v2477_v33  ;;  %v708_v9 = vsub.f32 %v644_v21, %v692_v29  ;;  %1970 = vpow2.f32 %v717_v12 }
 0x1ef   : > { %v694_v39 = vmax.f32 %v646_v31, %v676_v32  ;;  %v678_v40 = vpop.xlane.xlu0 %677  ;;  %v2522_v19 = vpop.eup %1962 }
 0x1f0   : > { %v2488_v43 = vmax.f32 %v2480_v34, %v678_v40  ;;  %v735_v36 = vmul.f32 1.442695, %v708_v9 }
 0x1f1   : > { %1288 = vst.msk [vmem:[#allocation2 + $0x68] sm:$0xff] %vm953_vm4, %v694_v39  ;;  %812 = vperm.xlu0 %1956, %v694_v39   ;;  %v710_v41 = vsub.f32 %v646_v31, %v694_v39 }
 0x1f2   : > { %777 = vperm.xlu1 %1957, %v2444_v0   ;;  %v680_v44 = vpop.xlane.xlu1 %679  ;;  %v711_v55 = vsub.f32 %v2480_v34, %v2488_v43  ;;  %1289 = vst.msk [vmem:[#allocation2 + $0x70] sm:$0xff] %vm953_vm4, %v2488_v43  ;;  %1972 = vpow2.f32 %v735_v36  ;;  %v707_v0 = vsub.f32 %v2459_v16, %v2466_v22 }
 0x1f3   : > { %v2500_v59 = vmax.f32 %v2485_v42, %v680_v44  ;;  %v739_v37 = vmul.f32 1.442695, %v710_v41  ;;  %1974 = vpow2.f32 %v721_v17  ;;  %v2528_v21 = vpop.eup %1964 }
 0x1f4   : > { %v2530_v25 = vpop.eup %1966  ;;  %v733_v1 = vmul.f32 1.442695, %v707_v0 }
 0x1f5   : > { %v712_v60 = vsub.f32 %v2485_v42, %v2500_v59  ;;  %1290 = vst.msk [vmem:[#allocation2 + $0x78] sm:$0xff] %vm953_vm4, %v2500_v59  ;;  %822 = vperm.xlu0 %1956, %v2500_v59   ;;  %1976 = vpow2.f32 %v739_v37 }
 0x1f6   : > { %787 = vperm.xlu1 %1957, %v2456_v15   ;;  %1978 = vpow2.f32 %v725_v46  ;;  %v709_v15 = vsub.f32 %v2469_v23, %v2477_v33 }
 0x1f7   : > { %v2536_v24 = vpop.eup %1968  ;;  %1980 = vpow2.f32 %v729_v48 }
 0x1f8   : > { %v2538_v26 = vpop.eup %1970  ;;  %1982 = vpow2.f32 %v733_v1  ;;  %v737_v16 = vmul.f32 1.442695, %v709_v15 }
 0x1f9   : > { %988 = vperm.xlu0 %1956, %v2510_v35  }
 0x1fa   : > { %797 = vperm.xlu1 %1957, %v2466_v22   ;;  %1984 = vpow2.f32 %v737_v16 }
 0x1fc   : > { %v2544_v29 = vpop.eup %1972 }
 0x1fd   : > { %1003 = vperm.xlu0 %1956, %v2516_v14   ;;  %v2546_v30 = vpop.eup %1974 }
 0x1fe   : > { %807 = vperm.xlu1 %1957, %v2477_v33  }
 0x1ff   : > { %v2550_v22 = vpop.eup %1976 }
 0x200   : > { %v2552_v31 = vpop.eup %1978 }
 0x201   : > { %1013 = vperm.xlu0 %1956, %v2522_v19   ;;  %v2556_v23 = vpop.eup %1980 }
 0x202   : > { %817 = vperm.xlu1 %1957, %v2488_v43   ;;  %v2559_v33 = vpop.eup %1982 }
 0x204   : > { %v2562_v38 = vpop.eup %1984 }
 0x205   : > { %1023 = vperm.xlu0 %1956, %v2528_v21  }
 0x206   : > { %993 = vperm.xlu1 %1957, %v2530_v25  }
 0x209   : > { %1033 = vperm.xlu0 %1956, %v2536_v24  }
 0x20a   : > { %998 = vperm.xlu1 %1957, %v2538_v26  }
 0x20d   : > { %1043 = vperm.xlu0 %1956, %v2544_v29  }
 0x20e   : > { %1008 = vperm.xlu1 %1957, %v2546_v30  }
 0x211   : > { %1053 = vperm.xlu0 %1956, %v2550_v22  }
 0x212   : > { %1018 = vperm.xlu1 %1957, %v2552_v31  }
 0x216   : > { %1028 = vperm.xlu1 %1957, %v2556_v23  }
 0x21a   : > { %1038 = vperm.xlu1 %1957, %v2559_v33  }
 0x21e   : > { %1048 = vperm.xlu1 %1957, %v2562_v38  }
 0x255   : > { %v748_v27 = vpop.permute.xlu0 %747 }
 0x256   : > { %v825_v32 = vsub.f32 %v2336_v45, %v748_v27 }
 0x258   : > { %v841_v39 = vmul.f32 1.442695, %v825_v32 }
 0x259   : > { %v753_v40 = vpop.permute.xlu1 %752 }
 0x25a   : > { %1986 = vpow2.f32 %v841_v39  ;;  %v826_v51 = vsub.f32 %v2341_v49, %v753_v40 }
 0x25c   : > { %v843_v52 = vmul.f32 1.442695, %v826_v51 }
 0x25d   : > { %v763_v44 = vpop.permute.xlu1 %762 }
 0x25e   : > { %1988 = vpow2.f32 %v843_v52  ;;  %v828_v56 = vsub.f32 %v2339_v47, %v763_v44 }
 0x260   : > { %v847_v63 = vmul.f32 1.442695, %v828_v56 }
 0x261   : > { %v758_v4 = vpop.permute.xlu1 %757 }
 0x262   : > { %1990 = vpow2.f32 %v847_v63  ;;  %v827_v5 = vsub.f32 %v2344_v50, %v758_v4 }
 0x264   : > { %v1987_v28 = vpop.eup %1986  ;;  %v845_v8 = vmul.f32 1.442695, %v827_v5 }
 0x265   : > { %v773_v9 = vpop.permute.xlu1 %772  ;;  %905 = vadd.xlane.f32.xlu1 %v1987_v28  ;;  %1792 = vmatprep.mubr.f32.mxu1 %v1987_v28 }
 0x266   : > { %1992 = vpow2.f32 %v845_v8  ;;  %v830_v45 = vsub.f32 %v2350_v54, %v773_v9 }
 0x268   : > { %v1989_v12 = vpop.eup %1988  ;;  %v851_v49 = vmul.f32 1.442695, %v830_v45  ;;  %v793_v13 = vpop.permute.xlu0 %792 }
 0x269   : > { %v768_v36 = vpop.permute.xlu1 %767  ;;  %907 = vadd.xlane.f32.xlu0 %v1989_v12  ;;  %1793 = vmatmul.mubr.f32.vlgmr.msra.gmra.mrb[0].mxu1 %v1989_v12  ;;  %v834_v46 = vsub.f32 %v2362_v62, %v793_v13 }
 0x26a   : > { %1994 = vpow2.f32 %v851_v49  ;;  %v829_v47 = vsub.f32 %v2347_v53, %v768_v36 }
 0x26b   : > { %v859_v53 = vmul.f32 1.442695, %v834_v46 }
 0x26c   : > { %v1991_v41 = vpop.eup %1990  ;;  %v849_v17 = vmul.f32 1.442695, %v829_v47  ;;  %v803_v50 = vpop.permute.xlu0 %802 }
 0x26d   : > { %v783_v18 = vpop.permute.xlu1 %782  ;;  %911 = vadd.xlane.f32.xlu1 %v1991_v41  ;;  %v836_v15 = vsub.f32 %v2368_v3, %v803_v50 }
 0x26e   : > { %1996 = vpow2.f32 %v849_v17  ;;  %v832_v37 = vsub.f32 %v2356_v58, %v783_v18  ;;  %v743_v17 = vmul.f32 1.442695, %v712_v60 }
 0x26f   : > { %v863_v62 = vmul.f32 1.442695, %v836_v15 }
 0x270   : > { %v1993_v54 = vpop.eup %1992  ;;  %v855_v20 = vmul.f32 1.442695, %v832_v37  ;;  %v813_v0 = vpop.permute.xlu0 %812 }
 0x271   : > { %v778_v48 = vpop.permute.xlu1 %777  ;;  %909 = vadd.xlane.f32.xlu0 %v1993_v54  ;;  %1795 = vmatprep.mubr.f32.mxu1 %v1993_v54  ;;  %v838_v39 = vsub.f32 %v2374_v7, %v813_v0 }
 0x272   : > { %1998 = vpow2.f32 %v855_v20  ;;  %v831_v1 = vsub.f32 %v2353_v57, %v778_v48  ;;  %1796 = vmatmul.mubr.f32.gmra.mrb[2].mxu1 %v1991_v41  ;;  %v741_v41 = vmul.f32 1.442695, %v711_v55 }
 0x273   : > { %v867_v3 = vmul.f32 1.442695, %v838_v39 }
 0x274   : > { %v1995_v16 = vpop.eup %1994  ;;  %v853_v27 = vmul.f32 1.442695, %v831_v1  ;;  %v823_v51 = vpop.permute.xlu0 %822 }
 0x275   : > { %v788_v32 = vpop.permute.xlu1 %787  ;;  %915 = vadd.xlane.f32.xlu1 %v1995_v16  ;;  %v840_v56 = vsub.f32 %v2380_v11, %v823_v51 }
 0x276   : > { %2000 = vpow2.f32 %v853_v27  ;;  %v833_v58 = vsub.f32 %v2359_v61, %v788_v32  ;;  %v874_v32 = vld [vmem:[#allocation3 + $0x8] sm:$0xff] }
 0x277   : > { %2002 = vpow2.f32 %v859_v53  ;;  %v871_v5 = vmul.f32 1.442695, %v840_v56  ;;  %v873_v53 = vld [vmem:[#allocation3] sm:$0xff] }
 0x278   : > { %v1997_v40 = vpop.eup %1996  ;;  %v857_v52 = vmul.f32 1.442695, %v833_v58  ;;  %v2595_v34 = vpop.permute.xlu0 %988  ;;  %v889_v15 = vmul.f32 %v2510_v35, %v873_v53  ;;  %v883_v53 = vld [vmem:[#allocation3 + $0x50] sm:$0xff] }
 0x279   : > { %v798_v44 = vpop.permute.xlu1 %797  ;;  %913 = vadd.xlane.f32.xlu0 %v1997_v40  ;;  %1798 = vmatprep.mubr.f32.mxu1 %v1997_v40  ;;  %v876_v40 = vld [vmem:[#allocation3 + $0x18] sm:$0xff] }
 0x27a   : > { %2004 = vpow2.f32 %v857_v52  ;;  %v835_v57 = vsub.f32 %v2365_v2, %v798_v44  ;;  %1799 = vmatmul.mubr.f32.gmra.mrb[4].mxu1 %v1995_v16  ;;  %v892_v52 = vmul.f32 %v2516_v14, %v876_v40 }
 0x27b   : > { %2006 = vpow2.f32 %v863_v62  ;;  %v890_v62 = vmul.f32 %v2530_v25, %v874_v32  ;;  %v899_v32 = vmul.f32 %v2559_v33, %v883_v53  ;;  %v887_v33 = vld [vmem:[#allocation3 + $0x70] sm:$0xff] }
 0x27c   : > { %v1999_v63 = vpop.eup %1998  ;;  %v861_v61 = vmul.f32 1.442695, %v835_v57  ;;  %v2599_v55 = vpop.permute.xlu0 %1003  ;;  %v875_v57 = vld [vmem:[#allocation3 + $0x10] sm:$0xff] }
 0x27d   : > { %v808_v4 = vpop.permute.xlu1 %807  ;;  %919 = vadd.xlane.f32.xlu1 %v1999_v63  ;;  %v891_v35 = vmul.f32 %v2538_v26, %v875_v57 }
 0x27e   : > { %2008 = vpow2.f32 %v861_v61  ;;  %v837_v7 = vsub.f32 %v2371_v6, %v808_v4 }
 0x27f   : > { %2010 = vpow2.f32 %v867_v3 }
 0x280   : > { %v2001_v28 = vpop.eup %2000  ;;  %v865_v8 = vmul.f32 1.442695, %v837_v7  ;;  %v2603_v42 = vpop.permute.xlu0 %1013  ;;  %v877_v7 = vld [vmem:[#allocation3 + $0x20] sm:$0xff] }
 0x281   : > { %v2003_v9 = vpop.eup %2002  ;;  %917 = vadd.xlane.f32.xlu0 %v2001_v28  ;;  %v818_v45 = vpop.permute.xlu1 %817  ;;  %1801 = vmatprep.mubr.f32.mxu1 %v2001_v28  ;;  %v893_v14 = vmul.f32 %v2546_v30, %v877_v7 }
 0x282   : > { %2012 = vpow2.f32 %v865_v8  ;;  %v839_v2 = vsub.f32 %v2377_v10, %v818_v45  ;;  %923 = vadd.xlane.f32.xlu1 %v2003_v9  ;;  %1802 = vmatmul.mubr.f32.gmra.mrb[6].mxu1 %v1999_v63  ;;  %v878_v63 = vld [vmem:[#allocation3 + $0x28] sm:$0xff]  ;;  %v880_v8 = vld [vmem:[#allocation3 + $0x38] sm:$0xff] }
 0x283   : > { %2014 = vpow2.f32 %v871_v5  ;;  %v894_v25 = vmul.f32 %v2522_v19, %v878_v63  ;;  %v896_v26 = vmul.f32 %v2528_v21, %v880_v8  ;;  %v972_v8 = vld [vmem:[#allocation4 + $0x10] sm:$0xff] }
 0x284   : > { %v2005_v11 = vpop.eup %2004  ;;  %v869_v12 = vmul.f32 1.442695, %v839_v2  ;;  %v2607_v60 = vpop.permute.xlu0 %1023  ;;  %v879_v2 = vld [vmem:[#allocation3 + $0x30] sm:$0xff] }
 0x285   : > { %v2007_v49 = vpop.eup %2006  ;;  %921 = vadd.xlane.f32.xlu0 %v2005_v11  ;;  %1804 = vmatprep.mubr.f32.mxu1 %v2005_v11  ;;  %v2593_v37 = vpop.permute.xlu1 %993  ;;  %v895_v19 = vmul.f32 %v2552_v31, %v879_v2 }
 0x286   : > { %2016 = vpow2.f32 %v869_v12  ;;  %927 = vadd.xlane.f32.xlu1 %v2007_v49  ;;  %1805 = vmatmul.mubr.f32.gmra.mrb[8].mxu1 %v2003_v9  ;;  %v882_v12 = vld [vmem:[#allocation3 + $0x48] sm:$0xff] }
 0x287   : > { %2018 = vpow2.f32 %v741_v41 }
 0x288   : > { %v2009_v6 = vpop.eup %2008  ;;  %2020 = vpow2.f32 %v743_v17  ;;  %v2611_v20 = vpop.permute.xlu0 %1033 }
 0x289   : > { %v2011_v13 = vpop.eup %2010  ;;  %925 = vadd.xlane.f32.xlu0 %v2009_v6  ;;  %1807 = vmatprep.mubr.f32.mxu1 %v2009_v6  ;;  %v2597_v43 = vpop.permute.xlu1 %998 }
 0x28a   : > { %931 = vadd.xlane.f32.xlu1 %v2011_v13  ;;  %1808 = vmatmul.mubr.f32.gmra.mrb[10].mxu1 %v2007_v49  ;;  %v898_v49 = vmul.f32 %v2536_v24, %v882_v12  ;;  %v974_v12 = vld [vmem:[#allocation4 + $0x20] sm:$0xff] }
 0x28c   : > { %v2013_v36 = vpop.eup %2012  ;;  %v2615_v0 = vpop.permute.xlu0 %1043 }
 0x28d   : > { %v2015_v47 = vpop.eup %2014  ;;  %929 = vadd.xlane.f32.xlu0 %v2013_v36  ;;  %1810 = vmatprep.mubr.f32.mxu1 %v2013_v36  ;;  %v2601_v46 = vpop.permute.xlu1 %1008 }
 0x28e   : > { %935 = vadd.xlane.f32.xlu1 %v2015_v47  ;;  %1811 = vmatmul.mubr.f32.gmra.mrb[12].mxu1 %v2011_v13  ;;  %v881_v13 = vld [vmem:[#allocation3 + $0x40] sm:$0xff] }
 0x28f   : > { %v897_v21 = vmul.f32 %v2556_v23, %v881_v13  ;;  %v885_v23 = vld [vmem:[#allocation3 + $0x60] sm:$0xff] }
 0x290   : > { %v2017_v10 = vpop.eup %2016  ;;  %v2620_v16 = vpop.permute.xlu0 %1053 }
 0x291   : > { %933 = vadd.xlane.f32.xlu0 %v2017_v10  ;;  %1813 = vmatprep.mubr.f32.mxu1 %v2017_v10  ;;  %v2587_v50 = vpop.eup %2018  ;;  %v2605_v59 = vpop.permute.xlu1 %1018 }
 0x292   : > { %1814 = vmatmul.mubr.f32.gmra.mrb[14].mxu1 %v2015_v47  ;;  %v2590_v18 = vpop.eup %2020  ;;  %v884_v47 = vld [vmem:[#allocation3 + $0x58] sm:$0xff] }
 0x293   : > { %v900_v41 = vmul.f32 %v2544_v29, %v884_v47 }
 0x295   : > { %v2609_v54 = vpop.permute.xlu1 %1028 }
 0x299   : > { %v2613_v48 = vpop.permute.xlu1 %1038 }
 0x29d   : > { %v2617_v1 = vpop.permute.xlu1 %1048 }
 0x29f   : > { %1058 = vperm.xlu1 %1957, %v2587_v50  }
 0x2a7   : > { %1063 = vperm.xlu0 %1956, %v2590_v18  }
 0x2f2   : > { %v906_v27 = vpop.xlane.xlu1 %905 }
 0x2f3   : > { %v937_v58 = vadd.f32 %v906_v27, %v889_v15  ;;  %v886_v27 = vld [vmem:[#allocation3 + $0x68] sm:$0xff] }
 0x2f5   : > { %954 = vst.msk [vmem:[#allocation3] sm:$0xff] %vm953_vm4, %v937_v58  ;;  %v902_v58 = vmul.f32 %v2550_v22, %v886_v27  ;;  %v903_v22 = vmul.f32 %v2587_v50, %v887_v33  ;;  %v973_v50 = vld [vmem:[#allocation4 + $0x18] sm:$0xff] }
 0x2f6   : > { %v908_v39 = vpop.xlane.xlu0 %907 }
 0x2f7   : > { %v938_v51 = vadd.f32 %v908_v39, %v890_v62 }
 0x2f9   : > { %955 = vst.msk [vmem:[#allocation3 + $0x8] sm:$0xff] %vm953_vm4, %v938_v51  ;;  %v888_v51 = vld [vmem:[#allocation3 + $0x78] sm:$0xff] }
 0x2fa   : > { %v912_v44 = vpop.xlane.xlu1 %911 }
 0x2fb   : > { %v940_v3 = vadd.f32 %v912_v44, %v892_v52  ;;  %v901_v52 = vmul.f32 %v2562_v38, %v885_v23  ;;  %v904_v44 = vmul.f32 %v2590_v18, %v888_v51  ;;  %v971_v38 = vld [vmem:[#allocation4 + $0x8] sm:$0xff] }
 0x2fc   : > { %v983_v23 = vld [vmem:[#allocation4 + $0x68] sm:$0xff] }
 0x2fd   : > { %957 = vst.msk [vmem:[#allocation3 + $0x18] sm:$0xff] %vm953_vm4, %v940_v3 }
 0x2fe   : > { %v910_v56 = vpop.xlane.xlu0 %909 }
 0x2ff   : > { %v939_v61 = vadd.f32 %v910_v56, %v891_v35 }
 0x301   : > { %956 = vst.msk [vmem:[#allocation3 + $0x10] sm:$0xff] %vm953_vm4, %v939_v61 }
 0x302   : > { %v916_v4 = vpop.xlane.xlu1 %915 }
 0x303   : > { %v942_v5 = vadd.f32 %v916_v4, %v894_v25  ;;  %v970_v25 = vld [vmem:[#allocation4] sm:$0xff]  ;;  %v1067_v4 = vmul.f32 %v2593_v37, %v971_v38 }
 0x304   : > { %v1066_v18 = vmul.f32 %v2595_v34, %v970_v25  ;;  %v975_v34 = vld [vmem:[#allocation4 + $0x28] sm:$0xff] }
 0x305   : > { %959 = vst.msk [vmem:[#allocation3 + $0x28] sm:$0xff] %vm953_vm4, %v942_v5 }
 0x306   : > { %v914_v28 = vpop.xlane.xlu0 %913 }
 0x307   : > { %v941_v9 = vadd.f32 %v914_v28, %v893_v14 }
 0x309   : > { %958 = vst.msk [vmem:[#allocation3 + $0x20] sm:$0xff] %vm953_vm4, %v941_v9  ;;  %v1069_v9 = vmul.f32 %v2599_v55, %v973_v50 }
 0x30a   : > { %v920_v45 = vpop.xlane.xlu1 %919 }
 0x30b   : > { %v944_v11 = vadd.f32 %v920_v45, %v896_v26  ;;  %v1068_v26 = vmul.f32 %v2597_v43, %v972_v8  ;;  %v977_v43 = vld [vmem:[#allocation4 + $0x38] sm:$0xff] }
 0x30c   : > { %v1073_v47 = vmul.f32 %v2607_v60, %v977_v43 }
 0x30d   : > { %961 = vst.msk [vmem:[#allocation3 + $0x38] sm:$0xff] %vm953_vm4, %v944_v11 }
 0x30e   : > { %v918_v6 = vpop.xlane.xlu0 %917 }
 0x30f   : > { %v924_v30 = vpop.xlane.xlu1 %923  ;;  %v943_v36 = vadd.f32 %v918_v6, %v895_v19  ;;  %v1071_v19 = vmul.f32 %v2603_v42, %v975_v34 }
 0x310   : > { %v946_v10 = vadd.f32 %v924_v30, %v898_v49  ;;  %v1070_v49 = vmul.f32 %v2601_v46, %v974_v12  ;;  %v1315_v50 = vld [vmem:[#allocation3 + $0x20] sm:$0xff] (!%p1637_p10) }
 0x311   : > { %960 = vst.msk [vmem:[#allocation3 + $0x30] sm:$0xff] %vm953_vm4, %v943_v36  ;;  %v976_v36 = vld [vmem:[#allocation4 + $0x30] sm:$0xff] }
 0x312   : > { %963 = vst.msk [vmem:[#allocation3 + $0x48] sm:$0xff] %vm953_vm4, %v946_v10  ;;  %v922_v17 = vpop.xlane.xlu0 %921  ;;  %v979_v10 = vld [vmem:[#allocation4 + $0x48] sm:$0xff] }
 0x313   : > { %v928_v15 = vpop.xlane.xlu1 %927  ;;  %v945_v31 = vadd.f32 %v922_v17, %v897_v21  ;;  %v1072_v21 = vmul.f32 %v2605_v59, %v976_v36  ;;  %v978_v17 = vld [vmem:[#allocation4 + $0x40] sm:$0xff] }
 0x314   : > { %v948_v24 = vadd.f32 %v928_v15, %v900_v41  ;;  %v1075_v15 = vmul.f32 %v2611_v20, %v979_v10  ;;  %v1074_v27 = vmul.f32 %v2609_v54, %v978_v17  ;;  %v1318_v8 = vld [vmem:[#allocation3 + $0x38] sm:$0xff] (!%p1637_p10) }
 0x315   : > { %962 = vst.msk [vmem:[#allocation3 + $0x40] sm:$0xff] %vm953_vm4, %v945_v31  ;;  %v981_v31 = vld [vmem:[#allocation4 + $0x58] sm:$0xff] }
 0x316   : > { %965 = vst.msk [vmem:[#allocation3 + $0x58] sm:$0xff] %vm953_vm4, %v948_v24  ;;  %v926_v62 = vpop.xlane.xlu0 %925  ;;  %v1077_v59 = vmul.f32 %v2615_v0, %v981_v31 }
 0x317   : > { %v932_v39 = vpop.xlane.xlu1 %931  ;;  %v947_v40 = vadd.f32 %v926_v62, %v899_v32  ;;  %v980_v32 = vld [vmem:[#allocation4 + $0x50] sm:$0xff] }
 0x318   : > { %v950_v29 = vadd.f32 %v932_v39, %v902_v58  ;;  %v1076_v39 = vmul.f32 %v2613_v48, %v980_v32 }
 0x319   : > { %964 = vst.msk [vmem:[#allocation3 + $0x50] sm:$0xff] %vm953_vm4, %v947_v40  ;;  %v982_v40 = vld [vmem:[#allocation4 + $0x60] sm:$0xff] }
 0x31a   : > { %967 = vst.msk [vmem:[#allocation3 + $0x68] sm:$0xff] %vm953_vm4, %v950_v29  ;;  %v930_v57 = vpop.xlane.xlu0 %929 }
 0x31b   : > { %v936_v3 = vpop.xlane.xlu1 %935  ;;  %v949_v35 = vadd.f32 %v930_v57, %v901_v52  ;;  %v1079_v52 = vmul.f32 %v2620_v16, %v983_v23  ;;  %v985_v57 = vld [vmem:[#allocation4 + $0x78] sm:$0xff] }
 0x31c   : > { %v952_v56 = vadd.f32 %v936_v3, %v904_v44  ;;  %v1078_v44 = vmul.f32 %v2617_v1, %v982_v40  ;;  %v984_v3 = vld [vmem:[#allocation4 + $0x70] sm:$0xff] }
 0x31d   : > { %966 = vst.msk [vmem:[#allocation3 + $0x60] sm:$0xff] %vm953_vm4, %v949_v35 }
 0x31e   : > { %969 = vst.msk [vmem:[#allocation3 + $0x78] sm:$0xff] %vm953_vm4, %v952_v56  ;;  %v934_v63 = vpop.xlane.xlu0 %933 }
 0x31f   : > { %v951_v61 = vadd.f32 %v934_v63, %v903_v22  ;;  %v1059_v48 = vpop.permute.xlu1 %1058 }
 0x321   : > { %968 = vst.msk [vmem:[#allocation3 + $0x70] sm:$0xff] %vm953_vm4, %v951_v61  ;;  %v1080_v61 = vmul.f32 %v1059_v48, %v984_v3 }
 0x324   : > { %v1323_v34 = vld [vmem:[#allocation3 + $0x60] sm:$0xff] (!%p1637_p10) }
 0x325   : > { %v1326_v12 = vld [vmem:[#allocation3 + $0x78] sm:$0xff] (!%p1637_p10) }
 0x326   : > { %v1064_v0 = vpop.permute.xlu0 %1063 }
 0x327   : > { %v1081_v63 = vmul.f32 %v1064_v0, %v985_v57 }
 0x33c   : > { %v1794_v7 = vpop.f32.mrb[0].mxu1 }
 0x33d   : > { %v1244_v5 = vadd.f32 %v1794_v7, %v1067_v4  ;;  %v1164_v14 = vpop.f32.mrb[1].mxu1  ;;  %v1313_v4 = vld [vmem:[#allocation3 + $0x10] sm:$0xff] (!%p1637_p10)  ;;  %v2115_v7 = vmov (!%p1637_p10), 0  }
 0x33e   : > { %v1243_v28 = vadd.f32 %v1164_v14, %v1066_v18  ;;  %v1311_v18 = vld [vmem:[#allocation3] sm:$0xff] (!%p1637_p10)  ;;  %2023 = vset.pattern.permute.xlu1 (!%p1637_p10), %v2115_v7  ;;  %2022 = vset.pattern.permute.xlu0 (!%p1637_p10), %v2115_v7  ;;  %v1312_v14 = vld [vmem:[#allocation3 + $0x8] sm:$0xff] (!%p1637_p10) }
 0x33f   : > { %1260 = vst.msk [vmem:[#allocation4 + $0x8] sm:$0xff] %vm375_vm2, %v1244_v5  ;;  %1339 = vperm.xlu1 (!%p1637_p10), %2023, %v1313_v4   ;;  %1329 = vperm.xlu0 (!%p1637_p10), %2022, %v1311_v18   ;;  %v1314_v5 = vld [vmem:[#allocation3 + $0x18] sm:$0xff] (!%p1637_p10) }
 0x340   : > { %1259 = vst.msk [vmem:[#allocation4] sm:$0xff] %vm375_vm2, %v1243_v28  ;;  %v1316_v28 = vld [vmem:[#allocation3 + $0x28] sm:$0xff] (!%p1637_p10) }
 0x343   : > { %1344 = vperm.xlu1 (!%p1637_p10), %2023, %v1314_v5   ;;  %1334 = vperm.xlu0 (!%p1637_p10), %2022, %v1312_v14  }
 0x345   : > { %v1797_v45 = vpop.f32.mrb[2].mxu1 }
 0x346   : > { %v1246_v2 = vadd.f32 %v1797_v45, %v1069_v9  ;;  %v1174_v11 = vpop.f32.mrb[3].mxu1  ;;  %v1317_v9 = vld [vmem:[#allocation3 + $0x30] sm:$0xff] (!%p1637_p10)  ;;  %v1319_v45 = vld [vmem:[#allocation3 + $0x40] sm:$0xff] (!%p1637_p10) }
 0x347   : > { %v1245_v37 = vadd.f32 %v1174_v11, %v1068_v26  ;;  %1354 = vperm.xlu1 (!%p1637_p10), %2023, %v1316_v28   ;;  %1349 = vperm.xlu0 (!%p1637_p10), %2022, %v1315_v50   ;;  %v1320_v26 = vld [vmem:[#allocation3 + $0x48] sm:$0xff] (!%p1637_p10)  ;;  %v1321_v11 = vld [vmem:[#allocation3 + $0x50] sm:$0xff] (!%p1637_p10) }
 0x348   : > { %1262 = vst.msk [vmem:[#allocation4 + $0x18] sm:$0xff] %vm375_vm2, %v1246_v2  ;;  %v1322_v2 = vld [vmem:[#allocation3 + $0x58] sm:$0xff] (!%p1637_p10) }
 0x349   : > { %1261 = vst.msk [vmem:[#allocation4 + $0x10] sm:$0xff] %vm375_vm2, %v1245_v37  ;;  %v1324_v37 = vld [vmem:[#allocation3 + $0x68] sm:$0xff] (!%p1637_p10) }
 0x34b   : > { %1364 = vperm.xlu1 (!%p1637_p10), %2023, %v1318_v8   ;;  %1359 = vperm.xlu0 (!%p1637_p10), %2022, %v1317_v9  }
 0x34d   : > { %v1800_v6 = vpop.f32.mrb[4].mxu1 }
 0x34e   : > { %v1248_v13 = vadd.f32 %v1800_v6, %v1071_v19  ;;  %v1184_v30 = vpop.f32.mrb[5].mxu1  ;;  %v1325_v19 = vld [vmem:[#allocation3 + $0x70] sm:$0xff] (!%p1637_p10) }
 0x34f   : > { %v1247_v55 = vadd.f32 %v1184_v30, %v1070_v49  ;;  %1374 = vperm.xlu1 (!%p1637_p10), %2023, %v1320_v26   ;;  %1369 = vperm.xlu0 (!%p1637_p10), %2022, %v1319_v45  }
 0x350   : > { %1264 = vst.msk [vmem:[#allocation4 + $0x28] sm:$0xff] %vm375_vm2, %v1248_v13  ;;  %v1297_v36 = vld [vmem:[#allocation4 + $0x10] sm:$0xff] (!%p1637_p10) }
 0x351   : > { %1263 = vst.msk [vmem:[#allocation4 + $0x20] sm:$0xff] %vm375_vm2, %v1247_v55 }
 0x353   : > { %1384 = vperm.xlu1 (!%p1637_p10), %2023, %v1322_v2   ;;  %1379 = vperm.xlu0 (!%p1637_p10), %2022, %v1321_v11  }
 0x355   : > { %v1803_v41 = vpop.f32.mrb[6].mxu1 }
 0x356   : > { %v1250_v42 = vadd.f32 %v1803_v41, %v1073_v47  ;;  %v1194_v53 = vpop.f32.mrb[7].mxu1  ;;  %v1295_v47 = vld [vmem:[#allocation4] sm:$0xff] (!%p1637_p10) }
 0x357   : > { %v1249_v46 = vadd.f32 %v1194_v53, %v1072_v21  ;;  %1394 = vperm.xlu1 (!%p1637_p10), %2023, %v1324_v37   ;;  %1389 = vperm.xlu0 (!%p1637_p10), %2022, %v1323_v34  }
 0x358   : > { %1266 = vst.msk [vmem:[#allocation4 + $0x38] sm:$0xff] %vm375_vm2, %v1250_v42 }
 0x359   : > { %1265 = vst.msk [vmem:[#allocation4 + $0x30] sm:$0xff] %vm375_vm2, %v1249_v46  ;;  %v1806_v24 = vpop.f32.mrb[8].mxu1  ;;  %v1298_v46 = vld [vmem:[#allocation4 + $0x18] sm:$0xff] (!%p1637_p10) }
 0x35a   : > { %v1252_v60 = vadd.f32 %v1806_v24, %v1075_v15  ;;  %v1204_v58 = vpop.f32.mrb[9].mxu1  ;;  %v1296_v15 = vld [vmem:[#allocation4 + $0x8] sm:$0xff] (!%p1637_p10) }
 0x35b   : > { %v1251_v62 = vadd.f32 %v1204_v58, %v1074_v27  ;;  %1404 = vperm.xlu1 (!%p1637_p10), %2023, %v1326_v12   ;;  %1399 = vperm.xlu0 (!%p1637_p10), %2022, %v1325_v19  }
 0x35c   : > { %1268 = vst.msk [vmem:[#allocation4 + $0x48] sm:$0xff] %vm375_vm2, %v1252_v60 }
 0x35d   : > { %1267 = vst.msk [vmem:[#allocation4 + $0x40] sm:$0xff] %vm375_vm2, %v1251_v62  ;;  %v1809_v20 = vpop.f32.mrb[10].mxu1  ;;  %v1300_v62 = vld [vmem:[#allocation4 + $0x28] sm:$0xff] (!%p1637_p10) }
 0x35e   : > { %v1254_v51 = vadd.f32 %v1809_v20, %v1077_v59  ;;  %v1214_v54 = vpop.f32.mrb[11].mxu1  ;;  %v1299_v59 = vld [vmem:[#allocation4 + $0x20] sm:$0xff] (!%p1637_p10) }
 0x35f   : > { %v1253_v29 = vadd.f32 %v1214_v54, %v1076_v39 }
 0x360   : > { %1270 = vst.msk [vmem:[#allocation4 + $0x58] sm:$0xff] %vm375_vm2, %v1254_v51 }
 0x361   : > { %1269 = vst.msk [vmem:[#allocation4 + $0x50] sm:$0xff] %vm375_vm2, %v1253_v29  ;;  %v1812_v33 = vpop.f32.mrb[12].mxu1  ;;  %v1302_v29 = vld [vmem:[#allocation4 + $0x38] sm:$0xff] (!%p1637_p10) }
 0x362   : > { %v1256_v35 = vadd.f32 %v1812_v33, %v1079_v52  ;;  %v1224_v56 = vpop.f32.mrb[13].mxu1  ;;  %v1301_v52 = vld [vmem:[#allocation4 + $0x30] sm:$0xff] (!%p1637_p10) }
 0x363   : > { %v1255_v22 = vadd.f32 %v1224_v56, %v1078_v44  ;;  %1294 = sbr.rel (%p1637_p10) target bundleno = 1002 (0x3ea), region = 40 }
 0x364   : > { %1272 = vst.msk [vmem:[#allocation4 + $0x68] sm:$0xff] %vm375_vm2, %v1256_v35  ;;  %v1304_v35 = vld [vmem:[#allocation4 + $0x48] sm:$0xff] (!%p1637_p10)  ;;  %v1303_v56 = vld [vmem:[#allocation4 + $0x40] sm:$0xff] (!%p1637_p10) }
 0x365   : > { %1271 = vst.msk [vmem:[#allocation4 + $0x60] sm:$0xff] %vm375_vm2, %v1255_v22  ;;  %v1815_v16 = vpop.f32.mrb[14].mxu1 }
 0x366   : > { %v1258_v38 = vadd.f32 %v1815_v16, %v1081_v63  ;;  %v1234_v25 = vpop.f32.mrb[15].mxu1 }
 0x367   : > { %v1257_v1 = vadd.f32 %v1234_v25, %v1080_v61 }
 0x368   : > { %1274 = vst.msk [vmem:[#allocation4 + $0x78] sm:$0xff] %vm375_vm2, %v1258_v38  ;;  %v1305_v4 = vld [vmem:[#allocation4 + $0x50] sm:$0xff] (!%p1637_p10) }
 0x369   : > { %1273 = vst.msk [vmem:[#allocation4 + $0x70] sm:$0xff] %vm375_vm2, %v1257_v1  ;;  %v1306_v1 = vld [vmem:[#allocation4 + $0x58] sm:$0xff] (!%p1637_p10) }
 0x36b   : > { %v1308_v28 = vld [vmem:[#allocation4 + $0x68] sm:$0xff] }
 0x36c   : > { %v1307_v50 = vld [vmem:[#allocation4 + $0x60] sm:$0xff] }
 0x36f   : > { %v1310_v2 = vld [vmem:[#allocation4 + $0x78] sm:$0xff] }
 0x370   : > { %v1309_v11 = vld [vmem:[#allocation4 + $0x70] sm:$0xff] }
 0x3be   : > { %v1340_v49 = vpop.permute.xlu1 %1339  ;;  %v1330_v6 = vpop.permute.xlu0 %1329 }
 0x3bf   : > { %2024 = vrcp.f32 %v1340_v49 }
 0x3c0   : > { %2026 = vrcp.f32 %v1330_v6 }
 0x3c2   : > { %v1345_v13 = vpop.permute.xlu1 %1344  ;;  %v1335_v30 = vpop.permute.xlu0 %1334 }
 0x3c3   : > { %2028 = vrcp.f32 %v1345_v13 }
 0x3c4   : > { %2030 = vrcp.f32 %v1335_v30 }
 0x3c6   : > { %v1355_v55 = vpop.permute.xlu1 %1354  ;;  %v1350_v43 = vpop.permute.xlu0 %1349 }
 0x3c7   : > { %2032 = vrcp.f32 %v1355_v55 }
 0x3c8   : > { %2034 = vrcp.f32 %v1350_v43 }
 0x3c9   : > { %v2025_v10 = vpop.eup %2024 }
 0x3ca   : > { %v2027_v21 = vpop.eup %2026  ;;  %v1412_v41 = vmul.f32 %v2025_v10, %v1297_v36  ;;  %v1365_v17 = vpop.permute.xlu1 %1364 }
 0x3cb   : > { %v1360_v42 = vpop.permute.xlu0 %1359  ;;  %v1408_v53 = vmul.f32 %v2027_v21, %v1295_v47  ;;  %2036 = vrcp.f32 %v1365_v17 }
 0x3cc   : > { %1441 = vst.msk [vmem:[%s2189_s5 + $0x10] sm:$0xff] %vm375_vm2, %v1412_v41  ;;  %2038 = vrcp.f32 %v1360_v42 }
 0x3cd   : > { %v2029_v31 = vpop.eup %2028  ;;  %1439 = vst.msk [vmem:[%s2189_s5] sm:$0xff] %vm375_vm2, %v1408_v53 }
 0x3ce   : > { %v2031_v27 = vpop.eup %2030  ;;  %v1414_v24 = vmul.f32 %v2029_v31, %v1298_v46  ;;  %v1375_v32 = vpop.permute.xlu1 %1374 }
 0x3cf   : > { %v1370_v60 = vpop.permute.xlu0 %1369  ;;  %v1410_v58 = vmul.f32 %v2031_v27, %v1296_v15  ;;  %2040 = vrcp.f32 %v1375_v32 }
 0x3d0   : > { %1442 = vst.msk [vmem:[%s2189_s5 + $0x18] sm:$0xff] %vm375_vm2, %v1414_v24  ;;  %2042 = vrcp.f32 %v1370_v60 }
 0x3d1   : > { %v2033_v23 = vpop.eup %2032  ;;  %1440 = vst.msk [vmem:[%s2189_s5 + $0x8] sm:$0xff] %vm375_vm2, %v1410_v58 }
 0x3d2   : > { %v2035_v39 = vpop.eup %2034  ;;  %v1418_v20 = vmul.f32 %v2033_v23, %v1300_v62  ;;  %v1385_v40 = vpop.permute.xlu1 %1384 }
 0x3d3   : > { %v1380_v51 = vpop.permute.xlu0 %1379  ;;  %v1416_v54 = vmul.f32 %v2035_v39, %v1299_v59  ;;  %2044 = vrcp.f32 %v1385_v40 }
 0x3d4   : > { %1444 = vst.msk [vmem:[%s2189_s5 + $0x28] sm:$0xff] %vm375_vm2, %v1418_v20  ;;  %2046 = vrcp.f32 %v1380_v51 }
 0x3d5   : > { %v2037_v44 = vpop.eup %2036  ;;  %1443 = vst.msk [vmem:[%s2189_s5 + $0x20] sm:$0xff] %vm375_vm2, %v1416_v54 }
 0x3d6   : > { %v2039_v57 = vpop.eup %2038  ;;  %v1422_v0 = vmul.f32 %v2037_v44, %v1302_v29  ;;  %v1395_v33 = vpop.permute.xlu1 %1394 }
 0x3d7   : > { %v1390_v3 = vpop.permute.xlu0 %1389  ;;  %v1420_v48 = vmul.f32 %v2039_v57, %v1301_v52  ;;  %2048 = vrcp.f32 %v1395_v33 }
 0x3d8   : > { %1446 = vst.msk [vmem:[%s2189_s5 + $0x38] sm:$0xff] %vm375_vm2, %v1422_v0  ;;  %2050 = vrcp.f32 %v1390_v3 }
 0x3d9   : > { %v2041_v22 = vpop.eup %2040  ;;  %1445 = vst.msk [vmem:[%s2189_s5 + $0x30] sm:$0xff] %vm375_vm2, %v1420_v48 }
 0x3da   : > { %v2043_v63 = vpop.eup %2042  ;;  %v1426_v61 = vmul.f32 %v2041_v22, %v1304_v35  ;;  %v1405_v16 = vpop.permute.xlu1 %1404 }
 0x3db   : > { %v1400_v38 = vpop.permute.xlu0 %1399  ;;  %v1424_v25 = vmul.f32 %v2043_v63, %v1303_v56  ;;  %2052 = vrcp.f32 %v1405_v16 }
 0x3dc   : > { %1448 = vst.msk [vmem:[%s2189_s5 + $0x48] sm:$0xff] %vm375_vm2, %v1426_v61  ;;  %2054 = vrcp.f32 %v1400_v38 }
 0x3dd   : > { %v2045_v18 = vpop.eup %2044  ;;  %1447 = vst.msk [vmem:[%s2189_s5 + $0x40] sm:$0xff] %vm375_vm2, %v1424_v25 }
 0x3de   : > { %v2047_v7 = vpop.eup %2046  ;;  %v1430_v5 = vmul.f32 %v2045_v18, %v1306_v1 }
 0x3df   : > { %v1428_v14 = vmul.f32 %v2047_v7, %v1305_v4 }
 0x3e0   : > { %1450 = vst.msk [vmem:[%s2189_s5 + $0x58] sm:$0xff] %vm375_vm2, %v1430_v5 }
 0x3e1   : > { %v2049_v8 = vpop.eup %2048  ;;  %1449 = vst.msk [vmem:[%s2189_s5 + $0x50] sm:$0xff] %vm375_vm2, %v1428_v14 }
 0x3e2   : > { %v2051_v9 = vpop.eup %2050  ;;  %v1434_v26 = vmul.f32 %v2049_v8, %v1308_v28 }
 0x3e3   : > { %v1432_v45 = vmul.f32 %v2051_v9, %v1307_v50 }
 0x3e4   : > { %1452 = vst.msk [vmem:[%s2189_s5 + $0x68] sm:$0xff] %vm375_vm2, %v1434_v26 }
 0x3e5   : > { %v2053_v37 = vpop.eup %2052  ;;  %1451 = vst.msk [vmem:[%s2189_s5 + $0x60] sm:$0xff] %vm375_vm2, %v1432_v45 }
 0x3e6   : > { %v2055_v34 = vpop.eup %2054  ;;  %v1438_v12 = vmul.f32 %v2053_v37, %v1310_v2 }
 0x3e7   : > { %v1436_v19 = vmul.f32 %v2055_v34, %v1309_v11 }
 0x3e8   : > { %1454 = vst.msk [vmem:[%s2189_s5 + $0x78] sm:$0xff] %vm375_vm2, %v1438_v12 }
 0x3e9   : > { %1453 = vst.msk [vmem:[%s2189_s5 + $0x70] sm:$0xff] %vm375_vm2, %v1436_v19 }
 0x3ea PF: > { %s13_s18 = sadd.s32 1, %s2110_s18   ;;  %s2743_s12 = smov %s2098_s15 }
 0x3eb   : > { %p10_p11 = scmp.ge.s32.totalorder %s13_s18, 34   ;;  %s2744_s13 = smov %s2102_s16 }
 0x3ec   : > { %s2745_s14 = smov %s2106_s17  ;;  %s2746_s15 = smov %s2750_s19 }
 0x3ed   : > { %s2747_s16 = smov %s2754_s20  ;;  %s2748_s17 = smov %s2758_s21 }
 0x3ee   :  { %12 = sbr.rel (!%p10_p11) target bundleno = 4 (0x4), region = 76 }

// kernel: causal_wan_block_pallas.23
= control target key start
LH: loop header
LB: loop body
LE: loop exit
PB: predicated region body
PF: predicated region fallthrough
CT: control target
= control target key end

     0   :  { %s891_s12 = smov 0   ;;  %s893_s13 = smov 0   ;;  %s1018_s0 = inlined_call_operand.vmem [shape: f32[256,128], index: 0, kind: input, shape index: {}]   ;;  %s1019_s1 = inlined_call_operand.vmem [shape: f32[128,128], index: 1, kind: input, shape index: {}]   ;;  %s1020_s2 = inlined_call_operand.vmem [shape: f32[1,128], index: 2, kind: input, shape index: {}]   ;;  %s1021_s3 = inlined_call_operand.vmem [shape: f32[256,128], index: 3, kind: output, shape index: {}]  }
   0x1   :  { %s895_s14 = smov 0  }
   0x2 LB: > { %s32_s15 = sadd.s32 1, %s865_s13  ;;  %p679_p0 = scmp.ge.s32.totalorder %s869_s14, 1  ;;  %s869_s14 = sphi %s895_s14, %s13_s14   ;;  %s865_s13 = sphi %s893_s13, %s1023_s13   ;;  %s861_s12 = sphi %s891_s12, %s1022_s12  }
   0x3   : > { %p34_p1 = scmp.ge.s32.totalorder %s32_s15, 2  ;;  %p188_p2 = scmp.lt.s32.totalorder %s869_s14, 3 }
   0x5   : > { %s1025_s15 = smov (%p34_p1, %s32_s15), 0  ;;  %p189_p3 = pnand %p679_p0, %p188_p2 }
   0x6   : > { %v311_v0 = vld [vmem:[%s1019_s1] sm:$0xff] (!%p189_p3)  ;;  %v312_v1 = vld [vmem:[%s1019_s1 + $0x8] sm:$0xff] (!%p189_p3)  ;;  %v313_v2 = vld [vmem:[%s1019_s1 + $0x10] sm:$0xff] (!%p189_p3)  ;;  %s680_s22 = sshll.u32 (!%p189_p3), %s861_s12, 4 }
   0x7   : > { %192 = sbr.rel (%p189_p3) target bundleno = 270 (0x10e), region = 32  ;;  %v775_v3 = vpack.c.bf16 (!%p189_p3), %v312_v1, %v311_v0  ;;  %v314_v4 = vld [vmem:[%s1019_s1 + $0x18] sm:$0xff] (!%p189_p3)  ;;  %p230_p4 = scmp.lt.s32.totalorder (!%p189_p3), %s680_s22, 31  ;;  %v315_v6 = vld [vmem:[%s1019_s1 + $0x20] sm:$0xff] (!%p189_p3)  ;;  %v316_v7 = vld [vmem:[%s1019_s1 + $0x28] sm:$0xff] (!%p189_p3) }
   0x8   : > { %v779_v5 = vpack.c.bf16 (!%p189_p3), %v314_v4, %v313_v2  ;;  %v783_v8 = vpack.c.bf16 (!%p189_p3), %v316_v7, %v315_v6  ;;  %v317_v9 = vld [vmem:[%s1019_s1 + $0x30] sm:$0xff] (!%p189_p3)  ;;  %v318_v10 = vld [vmem:[%s1019_s1 + $0x38] sm:$0xff] (!%p189_p3)  ;;  %v319_v14 = vld [vmem:[%s1019_s1 + $0x40] sm:$0xff] (!%p189_p3) }
   0x9   : > { %776 = vmatprep.subr.bf16.mxu0 (!%p189_p3), %v775_v3  ;;  %807 = vmatprep.subr.bf16.mxu1 (!%p189_p3), %v775_v3  ;;  %v787_v13 = vpack.c.bf16 (!%p189_p3), %v318_v10, %v317_v9  ;;  %v320_v15 = vld [vmem:[%s1019_s1 + $0x48] sm:$0xff] (!%p189_p3)  ;;  %v321_v17 = vld [vmem:[%s1019_s1 + $0x50] sm:$0xff] (!%p189_p3)  ;;  %v322_v18 = vld [vmem:[%s1019_s1 + $0x58] sm:$0xff] (!%p189_p3) }
   0xa   : > { %778 = vmatpush3.bf16.msra.mxu0 (!%p189_p3), %v775_v3  ;;  %815 = vmatpush3.bf16.msra.mxu1 (!%p189_p3), %v775_v3  ;;  %v791_v16 = vpack.c.bf16 (!%p189_p3), %v320_v15, %v319_v14  ;;  %v795_v19 = vpack.c.bf16 (!%p189_p3), %v322_v18, %v321_v17  ;;  %v323_v20 = vld [vmem:[%s1019_s1 + $0x60] sm:$0xff] (!%p189_p3)  ;;  %v324_v21 = vld [vmem:[%s1019_s1 + $0x68] sm:$0xff] (!%p189_p3)  ;;  %v325_v23 = vld [vmem:[%s1019_s1 + $0x70] sm:$0xff] (!%p189_p3) }
   0xb   : > { %780 = vmatprep.subr.bf16.mxu0 (!%p189_p3), %v779_v5  ;;  %808 = vmatprep.subr.bf16.mxu1 (!%p189_p3), %v779_v5  ;;  %v799_v22 = vpack.c.bf16 (!%p189_p3), %v324_v21, %v323_v20  ;;  %v326_v24 = vld [vmem:[%s1019_s1 + $0x78] sm:$0xff] (!%p189_p3)  ;;  %v684_v40 = vld [vmem:[%s1020_s2] ss:$0 sm:$0xff] (!%p189_p3) }
   0xc   : > { %v803_v25 = vpack.c.bf16 (!%p189_p3), %v326_v24, %v325_v23 }
   0xe   : > { %s1027_s22 = smov (!%p230_p4, %s680_s22), 31  ;;  %782 = vmatpush3.bf16.msra.mxu0 %v779_v5  ;;  %816 = vmatpush3.bf16.msra.mxu1 %v779_v5 }
   0xf   : > { %s681_s29 = sshll.u32 %s1027_s22, 3  ;;  %784 = vmatprep.subr.bf16.mxu0 %v783_v8  ;;  %809 = vmatprep.subr.bf16.mxu1 %v783_v8 }
  0x10   : > { %s941_s9 = scalar_lea.vmem %s1018_s0, %s681_s29  ;;  %s991_s8 = scalar_lea.vmem %s1021_s3, %s681_s29 }
  0x11   : > { %v295_v11 = vld [vmem:[%s941_s9] sm:$0xff]  ;;  %v296_v26 = vld [vmem:[%s941_s9 + $0x8] sm:$0xff]  ;;  %v297_v28 = vld [vmem:[%s941_s9 + $0x10] sm:$0xff] }
  0x12   : > { %v303_v12 = vld [vmem:[%s941_s9 + $0x40] sm:$0xff]  ;;  %751 = vmatprep.mubr.f32.mxu0 %v295_v11  ;;  %786 = vmatpush3.bf16.msra.mxu0 %v783_v8  ;;  %v304_v27 = vld [vmem:[%s941_s9 + $0x48] sm:$0xff]  ;;  %v305_v29 = vld [vmem:[%s941_s9 + $0x50] sm:$0xff] }
  0x13   : > { %763 = vmatprep.mubr.f32.mxu1 %v303_v12  ;;  %817 = vmatpush3.bf16.msra.mxu1 %v783_v8  ;;  %v298_v30 = vld [vmem:[%s941_s9 + $0x18] sm:$0xff]  ;;  %v299_v32 = vld [vmem:[%s941_s9 + $0x20] sm:$0xff]  ;;  %v300_v34 = vld [vmem:[%s941_s9 + $0x28] sm:$0xff] }
  0x14   : > { %788 = vmatprep.subr.bf16.mxu0 %v787_v13  ;;  %810 = vmatprep.subr.bf16.mxu1 %v787_v13  ;;  %v306_v31 = vld [vmem:[%s941_s9 + $0x58] sm:$0xff]  ;;  %v307_v33 = vld [vmem:[%s941_s9 + $0x60] sm:$0xff]  ;;  %v308_v35 = vld [vmem:[%s941_s9 + $0x68] sm:$0xff] }
  0x15   : > { %v301_v36 = vld [vmem:[%s941_s9 + $0x30] sm:$0xff]  ;;  %v302_v38 = vld [vmem:[%s941_s9 + $0x38] sm:$0xff] }
  0x16   : > { %790 = vmatpush3.bf16.msra.mxu0 %v787_v13  ;;  %v309_v37 = vld [vmem:[%s941_s9 + $0x70] sm:$0xff]  ;;  %v310_v39 = vld [vmem:[%s941_s9 + $0x78] sm:$0xff] }
  0x17   : > { %818 = vmatpush3.bf16.msra.mxu1 %v787_v13  ;;  %792 = vmatprep.subr.bf16.mxu0 %v791_v16 }
  0x18   : > { %811 = vmatprep.subr.bf16.mxu1 %v791_v16 }
  0x1a   : > { %794 = vmatpush3.bf16.msra.mxu0 %v791_v16 }
  0x1b   : > { %819 = vmatpush3.bf16.msra.mxu1 %v791_v16  ;;  %796 = vmatprep.subr.bf16.mxu0 %v795_v19 }
  0x1c   : > { %812 = vmatprep.subr.bf16.mxu1 %v795_v19 }
  0x1e   : > { %798 = vmatpush3.bf16.msra.mxu0 %v795_v19 }
  0x1f   : > { %820 = vmatpush3.bf16.msra.mxu1 %v795_v19  ;;  %800 = vmatprep.subr.bf16.mxu0 %v799_v22 }
  0x20   : > { %813 = vmatprep.subr.bf16.mxu1 %v799_v22 }
  0x22   : > { %802 = vmatpush3.bf16.msra.mxu0 %v799_v22 }
  0x23   : > { %821 = vmatpush3.bf16.msra.mxu1 %v799_v22  ;;  %804 = vmatprep.subr.bf16.mxu0 %v803_v25 }
  0x24   : > { %814 = vmatprep.subr.bf16.mxu1 %v803_v25 }
  0x26   : > { %806 = vmatpush3.bf16.msra.mxu0 %v803_v25 }
  0x27   : > { %822 = vmatpush3.bf16.msra.mxu1 %v803_v25 }
  0x29   : > { %752 = vmatmul.mubr.f32.vlgmr.msra.gmra.mrb[0].mxu0 %v296_v26 }
  0x2a   : > { %764 = vmatmul.mubr.f32.vlgmr.msra.gmra.mrb[0].mxu1 %v304_v27  ;;  %754 = vmatprep.mubr.f32.mxu0 %v297_v28 }
  0x2b   : > { %766 = vmatprep.mubr.f32.mxu1 %v305_v29 }
  0x2d   : > { %755 = vmatmul.mubr.f32.gmra.mrb[2].mxu0 %v298_v30 }
  0x2e   : > { %767 = vmatmul.mubr.f32.gmra.mrb[2].mxu1 %v306_v31  ;;  %757 = vmatprep.mubr.f32.mxu0 %v299_v32 }
  0x2f   : > { %769 = vmatprep.mubr.f32.mxu1 %v307_v33 }
  0x31   : > { %758 = vmatmul.mubr.f32.gmra.mrb[4].mxu0 %v300_v34 }
  0x32   : > { %770 = vmatmul.mubr.f32.gmra.mrb[4].mxu1 %v308_v35  ;;  %760 = vmatprep.mubr.f32.mxu0 %v301_v36 }
  0x33   : > { %772 = vmatprep.mubr.f32.mxu1 %v309_v37 }
  0x35   : > { %761 = vmatmul.mubr.f32.gmra.mrb[6].mxu0 %v302_v38 }
  0x36   : > { %773 = vmatmul.mubr.f32.gmra.mrb[6].mxu1 %v310_v39 }
  0xfc   : > { %v753_v41 = vpop.f32.mrb[0].mxu0 }
  0xfd   : > { %v765_v42 = vpop.f32.mrb[0].mxu1  ;;  %v531_v43 = vadd.f32 %v753_v41, %v684_v40  ;;  %v393_v45 = vpop.f32.mrb[1].mxu0 }
  0xfe   : > { %v539_v44 = vadd.f32 %v765_v42, %v684_v40  ;;  %v433_v46 = vpop.f32.mrb[1].mxu1  ;;  %v530_v47 = vadd.f32 %v684_v40, %v393_v45 }
  0xff   : > { %v538_v48 = vadd.f32 %v684_v40, %v433_v46  ;;  %547 = vst [vmem:[%s991_s8 + $0x8] sm:$0xff] %v531_v43 }
 0x100   : > { %555 = vst [vmem:[%s991_s8 + $0x48] sm:$0xff] %v539_v44  ;;  %546 = vst [vmem:[%s991_s8] sm:$0xff] %v530_v47  ;;  %v756_v49 = vpop.f32.mrb[2].mxu0 }
 0x101   : > { %554 = vst [vmem:[%s991_s8 + $0x40] sm:$0xff] %v538_v48  ;;  %v768_v50 = vpop.f32.mrb[2].mxu1  ;;  %v533_v51 = vadd.f32 %v756_v49, %v684_v40  ;;  %v403_v53 = vpop.f32.mrb[3].mxu0 }
 0x102   : > { %v541_v52 = vadd.f32 %v768_v50, %v684_v40  ;;  %v443_v54 = vpop.f32.mrb[3].mxu1  ;;  %v532_v55 = vadd.f32 %v684_v40, %v403_v53 }
 0x103   : > { %v540_v56 = vadd.f32 %v684_v40, %v443_v54  ;;  %549 = vst [vmem:[%s991_s8 + $0x18] sm:$0xff] %v533_v51 }
 0x104   : > { %557 = vst [vmem:[%s991_s8 + $0x58] sm:$0xff] %v541_v52  ;;  %548 = vst [vmem:[%s991_s8 + $0x10] sm:$0xff] %v532_v55  ;;  %v759_v57 = vpop.f32.mrb[4].mxu0 }
 0x105   : > { %556 = vst [vmem:[%s991_s8 + $0x50] sm:$0xff] %v540_v56  ;;  %v771_v58 = vpop.f32.mrb[4].mxu1  ;;  %v535_v59 = vadd.f32 %v759_v57, %v684_v40  ;;  %v413_v61 = vpop.f32.mrb[5].mxu0 }
 0x106   : > { %v543_v60 = vadd.f32 %v771_v58, %v684_v40  ;;  %v453_v62 = vpop.f32.mrb[5].mxu1  ;;  %v534_v63 = vadd.f32 %v684_v40, %v413_v61 }
 0x107   : > { %v542_v0 = vadd.f32 %v684_v40, %v453_v62  ;;  %551 = vst [vmem:[%s991_s8 + $0x28] sm:$0xff] %v535_v59 }
 0x108   : > { %559 = vst [vmem:[%s991_s8 + $0x68] sm:$0xff] %v543_v60  ;;  %550 = vst [vmem:[%s991_s8 + $0x20] sm:$0xff] %v534_v63  ;;  %v762_v1 = vpop.f32.mrb[6].mxu0 }
 0x109   : > { %558 = vst [vmem:[%s991_s8 + $0x60] sm:$0xff] %v542_v0  ;;  %v774_v2 = vpop.f32.mrb[6].mxu1  ;;  %v537_v3 = vadd.f32 %v762_v1, %v684_v40  ;;  %v423_v5 = vpop.f32.mrb[7].mxu0 }
 0x10a   : > { %v545_v4 = vadd.f32 %v774_v2, %v684_v40  ;;  %v463_v6 = vpop.f32.mrb[7].mxu1  ;;  %v536_v7 = vadd.f32 %v684_v40, %v423_v5 }
 0x10b   : > { %v544_v8 = vadd.f32 %v684_v40, %v463_v6  ;;  %553 = vst [vmem:[%s991_s8 + $0x38] sm:$0xff] %v537_v3 }
 0x10c   : > { %561 = vst [vmem:[%s991_s8 + $0x78] sm:$0xff] %v545_v4  ;;  %552 = vst [vmem:[%s991_s8 + $0x30] sm:$0xff] %v536_v7 }
 0x10d   : > { %560 = vst [vmem:[%s991_s8 + $0x70] sm:$0xff] %v544_v8 }
 0x10e PF: > { %s13_s14 = sadd.s32 1, %s869_s14   ;;  %s1022_s12 = smov %s865_s13 }
 0x10f   : > { %p10_p5 = scmp.ge.s32.totalorder %s13_s14, 4   ;;  %s1023_s13 = smov %s1025_s15 }
 0x111   :  { %12 = sbr.rel (!%p10_p5) target bundleno = 2 (0x2), region = 76 }

// kernel: causal_wan_block_pallas.21
= control target key start
LH: loop header
LB: loop body
LE: loop exit
PB: predicated region body
PF: predicated region fallthrough
CT: control target
= control target key end

     0   :  { %s882_s12 = smov 0   ;;  %s1338_s0 = inlined_call_operand.vmem [shape: f32[2,256,128], index: 0, kind: input, shape index: {}]   ;;  %s1339_s1 = inlined_call_operand.vmem [shape: f32[2,1,128], index: 1, kind: input, shape index: {}]   ;;  %s1340_s2 = inlined_call_operand.vmem [shape: f32[2,1,128], index: 2, kind: input, shape index: {}]   ;;  %s1341_s3 = inlined_call_operand.vmem [shape: f32[2,256,128], index: 3, kind: output, shape index: {}]  }
   0x1 LB: > { %s768_s13 = sadd.s32 4294967295, %s860_s12   ;;  %p772_p0 = scmp.ge.s32.totalorder %s860_s12, 1  ;;  %s860_s12 = sphi %s882_s12, %s13_s12  }
   0x2   : > { %p153_p1 = scmp.lt.s32.totalorder %s860_s12, 3 }
   0x4   : > { %p154_p2 = pnand %p772_p0, %p153_p1 }
   0x5   : > { %p183_p3 = scmp.lt.s32.totalorder (!%p154_p2), %s768_s13, 1 }
   0x6   : > { %157 = sbr.rel (%p154_p2) target bundleno = 393 (0x189), region = 32 }
   0xd   : > { %s1343_s13 = smov (!%p183_p3, %s768_s13), 1 }
   0xe   : > { %s780_s14 = sshll.u32 %s1343_s13, 8  ;;  %s190_s20 = scalar_lea.vmem %s1339_s1, %s1343_s13 }
   0xf   : > { %s898_s17 = scalar_lea.vmem %s1338_s0, %s780_s14  ;;  %s193_s23 = scalar_lea.vmem %s1340_s2, %s1343_s13 }
  0x10   : > { %v901_v0 = vld [vmem:[%s898_s17] sm:$0xff]  ;;  %v904_v1 = vld [vmem:[%s898_s17 + $0x10] sm:$0xff]  ;;  %v909_v2 = vld [vmem:[%s898_s17 + $0x8] sm:$0xff]  ;;  %s1207_s26 = scalar_lea.vmem %s1341_s3, %s780_s14 }
  0x11   : > { %231 = vadd.xlane.f32.xlu0 %v901_v0  ;;  %235 = vadd.xlane.f32.xlu1 %v904_v1  ;;  %v912_v3 = vld [vmem:[%s898_s17 + $0x18] sm:$0xff]  ;;  %v917_v4 = vld [vmem:[%s898_s17 + $0x20] sm:$0xff]  ;;  %v920_v5 = vld [vmem:[%s898_s17 + $0x28] sm:$0xff] }
  0x12   : > { %v925_v6 = vld [vmem:[%s898_s17 + $0x30] sm:$0xff]  ;;  %v928_v7 = vld [vmem:[%s898_s17 + $0x38] sm:$0xff]  ;;  %v933_v8 = vld [vmem:[%s898_s17 + $0x40] sm:$0xff] }
  0x13   : > { %v936_v9 = vld [vmem:[%s898_s17 + $0x48] sm:$0xff]  ;;  %v941_v10 = vld [vmem:[%s898_s17 + $0x50] sm:$0xff]  ;;  %v944_v11 = vld [vmem:[%s898_s17 + $0x58] sm:$0xff] }
  0x14   : > { %v949_v12 = vld [vmem:[%s898_s17 + $0x60] sm:$0xff]  ;;  %v952_v13 = vld [vmem:[%s898_s17 + $0x68] sm:$0xff]  ;;  %v957_v14 = vld [vmem:[%s898_s17 + $0x70] sm:$0xff] }
  0x15   : > { %233 = vadd.xlane.f32.xlu0 %v909_v2  ;;  %237 = vadd.xlane.f32.xlu1 %v912_v3  ;;  %v960_v15 = vld [vmem:[%s898_s17 + $0x78] sm:$0xff]  ;;  %v965_v16 = vld [vmem:[%s898_s17 + $0x80] sm:$0xff]  ;;  %v968_v17 = vld [vmem:[%s898_s17 + $0x88] sm:$0xff] }
  0x16   : > { %v973_v18 = vld [vmem:[%s898_s17 + $0x90] sm:$0xff]  ;;  %v976_v19 = vld [vmem:[%s898_s17 + $0x98] sm:$0xff]  ;;  %v981_v20 = vld [vmem:[%s898_s17 + $0xa0] sm:$0xff] }
  0x17   : > { %v984_v21 = vld [vmem:[%s898_s17 + $0xa8] sm:$0xff]  ;;  %v989_v22 = vld [vmem:[%s898_s17 + $0xb0] sm:$0xff]  ;;  %v992_v23 = vld [vmem:[%s898_s17 + $0xb8] sm:$0xff] }
  0x18   : > { %v997_v24 = vld [vmem:[%s898_s17 + $0xc0] sm:$0xff]  ;;  %v1000_v25 = vld [vmem:[%s898_s17 + $0xc8] sm:$0xff]  ;;  %v1005_v26 = vld [vmem:[%s898_s17 + $0xd0] sm:$0xff] }
  0x19   : > { %239 = vadd.xlane.f32.xlu0 %v917_v4  ;;  %241 = vadd.xlane.f32.xlu1 %v920_v5  ;;  %v1008_v27 = vld [vmem:[%s898_s17 + $0xd8] sm:$0xff]  ;;  %v1013_v28 = vld [vmem:[%s898_s17 + $0xe0] sm:$0xff]  ;;  %v1016_v29 = vld [vmem:[%s898_s17 + $0xe8] sm:$0xff] }
  0x1a   : > { %v1021_v30 = vld [vmem:[%s898_s17 + $0xf0] sm:$0xff]  ;;  %v1024_v31 = vld [vmem:[%s898_s17 + $0xf8] sm:$0xff] }
  0x1d   : > { %243 = vadd.xlane.f32.xlu0 %v925_v6  ;;  %245 = vadd.xlane.f32.xlu1 %v928_v7 }
  0x21   : > { %247 = vadd.xlane.f32.xlu0 %v933_v8  ;;  %249 = vadd.xlane.f32.xlu1 %v936_v9 }
  0x25   : > { %251 = vadd.xlane.f32.xlu0 %v941_v10  ;;  %253 = vadd.xlane.f32.xlu1 %v944_v11 }
  0x29   : > { %255 = vadd.xlane.f32.xlu0 %v949_v12  ;;  %257 = vadd.xlane.f32.xlu1 %v952_v13 }
  0x2d   : > { %259 = vadd.xlane.f32.xlu0 %v957_v14  ;;  %261 = vadd.xlane.f32.xlu1 %v960_v15 }
  0x31   : > { %263 = vadd.xlane.f32.xlu0 %v965_v16  ;;  %265 = vadd.xlane.f32.xlu1 %v968_v17 }
  0x35   : > { %267 = vadd.xlane.f32.xlu0 %v973_v18  ;;  %269 = vadd.xlane.f32.xlu1 %v976_v19 }
  0x39   : > { %271 = vadd.xlane.f32.xlu0 %v981_v20  ;;  %273 = vadd.xlane.f32.xlu1 %v984_v21 }
  0x3d   : > { %275 = vadd.xlane.f32.xlu0 %v989_v22  ;;  %277 = vadd.xlane.f32.xlu1 %v992_v23 }
  0x41   : > { %279 = vadd.xlane.f32.xlu0 %v997_v24  ;;  %281 = vadd.xlane.f32.xlu1 %v1000_v25 }
  0x45   : > { %283 = vadd.xlane.f32.xlu0 %v1005_v26  ;;  %285 = vadd.xlane.f32.xlu1 %v1008_v27 }
  0x49   : > { %287 = vadd.xlane.f32.xlu0 %v1013_v28  ;;  %289 = vadd.xlane.f32.xlu1 %v1016_v29 }
  0x4d   : > { %291 = vadd.xlane.f32.xlu0 %v1021_v30  ;;  %293 = vadd.xlane.f32.xlu1 %v1024_v31 }
  0x9e   : > { %v232_v32 = vpop.xlane.xlu0 %231  ;;  %v236_v33 = vpop.xlane.xlu1 %235 }
  0x9f   : > { %v296_v34 = vmul.f32 0.0078125, %v232_v32  ;;  %v298_v35 = vmul.f32 0.0078125, %v236_v33 }
  0xa1   : > { %v1029_v36 = vsub.f32 %v901_v0, %v296_v34  ;;  %v1032_v37 = vsub.f32 %v904_v1, %v298_v35 }
  0xa2   : > { %v234_v38 = vpop.xlane.xlu0 %233  ;;  %v238_v39 = vpop.xlane.xlu1 %237 }
  0xa3   : > { %v297_v40 = vmul.f32 0.0078125, %v234_v38  ;;  %v360_v41 = vmul.f32 %v1029_v36, %v1029_v36  ;;  %v299_v42 = vmul.f32 0.0078125, %v238_v39  ;;  %v362_v45 = vmul.f32 %v1032_v37, %v1032_v37 }
  0xa5   : > { %v1037_v43 = vsub.f32 %v909_v2, %v297_v40  ;;  %392 = vadd.xlane.f32.xlu0 %v360_v41  ;;  %v1040_v44 = vsub.f32 %v912_v3, %v299_v42 }
  0xa6   : > { %v240_v46 = vpop.xlane.xlu0 %239  ;;  %v242_v47 = vpop.xlane.xlu1 %241 }
  0xa7   : > { %v300_v48 = vmul.f32 0.0078125, %v240_v46  ;;  %v361_v49 = vmul.f32 %v1037_v43, %v1037_v43  ;;  %v301_v50 = vmul.f32 0.0078125, %v242_v47  ;;  %v363_v53 = vmul.f32 %v1040_v44, %v1040_v44 }
  0xa9   : > { %v1047_v51 = vsub.f32 %v917_v4, %v300_v48  ;;  %396 = vadd.xlane.f32.xlu0 %v362_v45  ;;  %394 = vadd.xlane.f32.xlu1 %v361_v49  ;;  %v1050_v52 = vsub.f32 %v920_v5, %v301_v50 }
  0xaa   : > { %v244_v54 = vpop.xlane.xlu0 %243  ;;  %v246_v55 = vpop.xlane.xlu1 %245 }
  0xab   : > { %v302_v56 = vmul.f32 0.0078125, %v244_v54  ;;  %v364_v57 = vmul.f32 %v1047_v51, %v1047_v51  ;;  %v303_v58 = vmul.f32 0.0078125, %v246_v55  ;;  %v365_v61 = vmul.f32 %v1050_v52, %v1050_v52 }
  0xad   : > { %v1057_v59 = vsub.f32 %v925_v6, %v302_v56  ;;  %398 = vadd.xlane.f32.xlu1 %v363_v53  ;;  %400 = vadd.xlane.f32.xlu0 %v364_v57  ;;  %v1060_v60 = vsub.f32 %v928_v7, %v303_v58 }
  0xae   : > { %v248_v62 = vpop.xlane.xlu0 %247  ;;  %v250_v63 = vpop.xlane.xlu1 %249 }
  0xaf   : > { %v304_v0 = vmul.f32 0.0078125, %v248_v62  ;;  %v366_v1 = vmul.f32 %v1057_v59, %v1057_v59  ;;  %v305_v2 = vmul.f32 0.0078125, %v250_v63  ;;  %v367_v5 = vmul.f32 %v1060_v60, %v1060_v60 }
  0xb1   : > { %v1067_v3 = vsub.f32 %v933_v8, %v304_v0  ;;  %402 = vadd.xlane.f32.xlu1 %v365_v61  ;;  %404 = vadd.xlane.f32.xlu0 %v366_v1  ;;  %v1070_v4 = vsub.f32 %v936_v9, %v305_v2 }
  0xb2   : > { %v252_v6 = vpop.xlane.xlu0 %251  ;;  %v254_v7 = vpop.xlane.xlu1 %253 }
  0xb3   : > { %v306_v32 = vmul.f32 0.0078125, %v252_v6  ;;  %v368_v33 = vmul.f32 %v1067_v3, %v1067_v3  ;;  %v307_v34 = vmul.f32 0.0078125, %v254_v7  ;;  %v369_v9 = vmul.f32 %v1070_v4, %v1070_v4 }
  0xb5   : > { %v1077_v35 = vsub.f32 %v941_v10, %v306_v32  ;;  %406 = vadd.xlane.f32.xlu1 %v367_v5  ;;  %408 = vadd.xlane.f32.xlu0 %v368_v33  ;;  %v1080_v8 = vsub.f32 %v944_v11, %v307_v34 }
  0xb6   : > { %v256_v38 = vpop.xlane.xlu0 %255  ;;  %v258_v39 = vpop.xlane.xlu1 %257 }
  0xb7   : > { %v308_v40 = vmul.f32 0.0078125, %v256_v38  ;;  %v370_v41 = vmul.f32 %v1077_v35, %v1077_v35  ;;  %v309_v42 = vmul.f32 0.0078125, %v258_v39  ;;  %v371_v11 = vmul.f32 %v1080_v8, %v1080_v8 }
  0xb9   : > { %v1087_v45 = vsub.f32 %v949_v12, %v308_v40  ;;  %410 = vadd.xlane.f32.xlu1 %v369_v9  ;;  %412 = vadd.xlane.f32.xlu0 %v370_v41  ;;  %v1090_v10 = vsub.f32 %v952_v13, %v309_v42 }
  0xba   : > { %v260_v46 = vpop.xlane.xlu0 %259  ;;  %v262_v47 = vpop.xlane.xlu1 %261 }
  0xbb   : > { %v310_v48 = vmul.f32 0.0078125, %v260_v46  ;;  %v372_v49 = vmul.f32 %v1087_v45, %v1087_v45  ;;  %v311_v50 = vmul.f32 0.0078125, %v262_v47  ;;  %v373_v13 = vmul.f32 %v1090_v10, %v1090_v10 }
  0xbd   : > { %v1097_v53 = vsub.f32 %v957_v14, %v310_v48  ;;  %414 = vadd.xlane.f32.xlu1 %v371_v11  ;;  %416 = vadd.xlane.f32.xlu0 %v372_v49  ;;  %v1100_v12 = vsub.f32 %v960_v15, %v311_v50 }
  0xbe   : > { %v264_v54 = vpop.xlane.xlu0 %263  ;;  %v266_v55 = vpop.xlane.xlu1 %265 }
  0xbf   : > { %v312_v56 = vmul.f32 0.0078125, %v264_v54  ;;  %v374_v57 = vmul.f32 %v1097_v53, %v1097_v53  ;;  %v313_v58 = vmul.f32 0.0078125, %v266_v55  ;;  %v375_v15 = vmul.f32 %v1100_v12, %v1100_v12 }
  0xc1   : > { %v1107_v61 = vsub.f32 %v965_v16, %v312_v56  ;;  %418 = vadd.xlane.f32.xlu1 %v373_v13  ;;  %420 = vadd.xlane.f32.xlu0 %v374_v57  ;;  %v1110_v14 = vsub.f32 %v968_v17, %v313_v58 }
  0xc2   : > { %v268_v62 = vpop.xlane.xlu0 %267  ;;  %v270_v63 = vpop.xlane.xlu1 %269 }
  0xc3   : > { %v314_v0 = vmul.f32 0.0078125, %v268_v62  ;;  %v376_v1 = vmul.f32 %v1107_v61, %v1107_v61  ;;  %v315_v2 = vmul.f32 0.0078125, %v270_v63  ;;  %v377_v17 = vmul.f32 %v1110_v14, %v1110_v14 }
  0xc5   : > { %v1117_v5 = vsub.f32 %v973_v18, %v314_v0  ;;  %422 = vadd.xlane.f32.xlu1 %v375_v15  ;;  %424 = vadd.xlane.f32.xlu0 %v376_v1  ;;  %v1120_v16 = vsub.f32 %v976_v19, %v315_v2 }
  0xc6   : > { %v272_v6 = vpop.xlane.xlu0 %271  ;;  %v274_v7 = vpop.xlane.xlu1 %273 }
  0xc7   : > { %v316_v32 = vmul.f32 0.0078125, %v272_v6  ;;  %v378_v33 = vmul.f32 %v1117_v5, %v1117_v5  ;;  %v317_v34 = vmul.f32 0.0078125, %v274_v7  ;;  %v379_v19 = vmul.f32 %v1120_v16, %v1120_v16 }
  0xc9   : > { %v1127_v9 = vsub.f32 %v981_v20, %v316_v32  ;;  %426 = vadd.xlane.f32.xlu1 %v377_v17  ;;  %428 = vadd.xlane.f32.xlu0 %v378_v33  ;;  %v1130_v18 = vsub.f32 %v984_v21, %v317_v34 }
  0xca   : > { %v276_v38 = vpop.xlane.xlu0 %275  ;;  %v278_v39 = vpop.xlane.xlu1 %277 }
  0xcb   : > { %v318_v40 = vmul.f32 0.0078125, %v276_v38  ;;  %v380_v41 = vmul.f32 %v1127_v9, %v1127_v9  ;;  %v319_v42 = vmul.f32 0.0078125, %v278_v39  ;;  %v381_v21 = vmul.f32 %v1130_v18, %v1130_v18 }
  0xcd   : > { %v1137_v11 = vsub.f32 %v989_v22, %v318_v40  ;;  %430 = vadd.xlane.f32.xlu1 %v379_v19  ;;  %432 = vadd.xlane.f32.xlu0 %v380_v41  ;;  %v1140_v20 = vsub.f32 %v992_v23, %v319_v42  ;;  %v587_v41 = vlaneseq }
  0xce   : > { %v280_v46 = vpop.xlane.xlu0 %279  ;;  %v282_v47 = vpop.xlane.xlu1 %281 }
  0xcf   : > { %v320_v48 = vmul.f32 0.0078125, %v280_v46  ;;  %v382_v49 = vmul.f32 %v1137_v11, %v1137_v11  ;;  %v321_v50 = vmul.f32 0.0078125, %v282_v47  ;;  %v383_v23 = vmul.f32 %v1140_v20, %v1140_v20 }
  0xd1   : > { %v1147_v13 = vsub.f32 %v997_v24, %v320_v48  ;;  %434 = vadd.xlane.f32.xlu1 %v381_v21  ;;  %436 = vadd.xlane.f32.xlu0 %v382_v49  ;;  %v1150_v22 = vsub.f32 %v1000_v25, %v321_v50  ;;  %v588_v48 = vshrl.u32 %v587_v41, 7  ;;  %v584_v49 = vld [vmem:[%s190_s20] sm:$0x1] }
  0xd2   : > { %v284_v54 = vpop.xlane.xlu0 %283  ;;  %v286_v55 = vpop.xlane.xlu1 %285 }
  0xd3   : > { %v322_v56 = vmul.f32 0.0078125, %v284_v54  ;;  %v384_v57 = vmul.f32 %v1147_v13, %v1147_v13  ;;  %v323_v58 = vmul.f32 0.0078125, %v286_v55  ;;  %v385_v25 = vmul.f32 %v1150_v22, %v1150_v22 }
  0xd5   : > { %v1157_v15 = vsub.f32 %v1005_v26, %v322_v56  ;;  %438 = vadd.xlane.f32.xlu1 %v383_v23  ;;  %440 = vadd.xlane.f32.xlu0 %v384_v57  ;;  %v1160_v24 = vsub.f32 %v1008_v27, %v323_v58  ;;  %v585_v58 = vadd.f32 1.0, %v584_v49 }
  0xd6   : > { %v288_v62 = vpop.xlane.xlu0 %287  ;;  %v290_v63 = vpop.xlane.xlu1 %289 }
  0xd7   : > { %v324_v0 = vmul.f32 0.0078125, %v288_v62  ;;  %v386_v1 = vmul.f32 %v1157_v15, %v1157_v15  ;;  %v325_v2 = vmul.f32 0.0078125, %v290_v63  ;;  %v387_v27 = vmul.f32 %v1160_v24, %v1160_v24 }
  0xd9   : > { %v1167_v17 = vsub.f32 %v1013_v28, %v324_v0  ;;  %442 = vadd.xlane.f32.xlu1 %v385_v25  ;;  %444 = vadd.xlane.f32.xlu0 %v386_v1  ;;  %v1170_v26 = vsub.f32 %v1016_v29, %v325_v2  ;;  %v589_v25 = vsub.s32 0, %v588_v48 }
  0xda   : > { %v292_v6 = vpop.xlane.xlu0 %291  ;;  %v294_v7 = vpop.xlane.xlu1 %293 }
  0xdb   : > { %v326_v32 = vmul.f32 0.0078125, %v292_v6  ;;  %v388_v33 = vmul.f32 %v1167_v17, %v1167_v17  ;;  %v327_v34 = vmul.f32 0.0078125, %v294_v7  ;;  %v389_v29 = vmul.f32 %v1170_v26, %v1170_v26 }
  0xdc   : > { %v1196_v6 = vrot.slane %v585_v58, %v589_v25 }
  0xdd   : > { %v1177_v19 = vsub.f32 %v1021_v30, %v326_v32  ;;  %446 = vadd.xlane.f32.xlu1 %v387_v27  ;;  %448 = vadd.xlane.f32.xlu0 %v388_v33  ;;  %v1180_v28 = vsub.f32 %v1024_v31, %v327_v34 }
  0xdf   : > { %v390_v38 = vmul.f32 %v1177_v19, %v1177_v19  ;;  %v391_v39 = vmul.f32 %v1180_v28, %v1180_v28 }
  0xe1   : > { %450 = vadd.xlane.f32.xlu1 %v389_v29  ;;  %452 = vadd.xlane.f32.xlu0 %v390_v38 }
  0xe5   : > { %454 = vadd.xlane.f32.xlu1 %v391_v39  ;;  %v1199_v39 = vld [vmem:[%s193_s23] ss:$0 sm:$0xff] }
 0x132   : > { %v393_v40 = vpop.xlane.xlu0 %392 }
 0x133   : > { %v456_v30 = vmul.f32 0.0078125, %v393_v40 }
 0x135   : > { %v488_v42 = vadd.f32 1e-06, %v456_v30 }
 0x136   : > { %v395_v31 = vpop.xlane.xlu1 %394  ;;  %v397_v21 = vpop.xlane.xlu0 %396 }
 0x137   : > { %790 = vrsqrt.f32 %v488_v42  ;;  %v457_v46 = vmul.f32 0.0078125, %v395_v31  ;;  %v458_v47 = vmul.f32 0.0078125, %v397_v21 }
 0x139   : > { %v489_v50 = vadd.f32 1e-06, %v457_v46  ;;  %v490_v23 = vadd.f32 1e-06, %v458_v47 }
 0x13a   : > { %v399_v54 = vpop.xlane.xlu1 %398  ;;  %v401_v55 = vpop.xlane.xlu0 %400 }
 0x13b   : > { %792 = vrsqrt.f32 %v489_v50  ;;  %v459_v56 = vmul.f32 0.0078125, %v399_v54  ;;  %v460_v57 = vmul.f32 0.0078125, %v401_v55 }
 0x13c   : > { %794 = vrsqrt.f32 %v490_v23 }
 0x13d   : > { %v491_v62 = vadd.f32 1e-06, %v459_v56  ;;  %v492_v63 = vadd.f32 1e-06, %v460_v57 }
 0x13e   : > { %v403_v0 = vpop.xlane.xlu1 %402  ;;  %v405_v1 = vpop.xlane.xlu0 %404 }
 0x13f   : > { %796 = vrsqrt.f32 %v491_v62  ;;  %v461_v2 = vmul.f32 0.0078125, %v403_v0  ;;  %v462_v27 = vmul.f32 0.0078125, %v405_v1 }
 0x140   : > { %798 = vrsqrt.f32 %v492_v63 }
 0x141   : > { %v791_v7 = vpop.eup %790  ;;  %v493_v32 = vadd.f32 1e-06, %v461_v2  ;;  %v494_v33 = vadd.f32 1e-06, %v462_v27 }
 0x142   : > { %v552_v34 = vmul.f32 %v791_v7, %v1029_v36  ;;  %v407_v29 = vpop.xlane.xlu1 %406  ;;  %v409_v38 = vpop.xlane.xlu0 %408 }
 0x143   : > { %800 = vrsqrt.f32 %v493_v32  ;;  %v463_v40 = vmul.f32 0.0078125, %v407_v29  ;;  %v464_v30 = vmul.f32 0.0078125, %v409_v38 }
 0x144   : > { %v592_v41 = vmul.f32 %v1196_v6, %v552_v34  ;;  %802 = vrsqrt.f32 %v494_v33 }
 0x145   : > { %v793_v42 = vpop.eup %792  ;;  %v495_v31 = vadd.f32 1e-06, %v463_v40  ;;  %v496_v36 = vadd.f32 1e-06, %v464_v30 }
 0x146   : > { %v795_v21 = vpop.eup %794  ;;  %v631_v46 = vadd.f32 %v1199_v39, %v592_v41  ;;  %v553_v47 = vmul.f32 %v793_v42, %v1037_v43  ;;  %v411_v48 = vpop.xlane.xlu1 %410 }
 0x147   : > { %v413_v49 = vpop.xlane.xlu0 %412  ;;  %v554_v50 = vmul.f32 %v795_v21, %v1032_v37  ;;  %804 = vrsqrt.f32 %v495_v31  ;;  %v465_v23 = vmul.f32 0.0078125, %v411_v48 }
 0x148   : > { %v466_v54 = vmul.f32 0.0078125, %v413_v49  ;;  %663 = vst [vmem:[%s1207_s26] sm:$0xff] %v631_v46  ;;  %v593_v55 = vmul.f32 %v1196_v6, %v553_v47  ;;  %806 = vrsqrt.f32 %v496_v36 }
 0x149   : > { %v797_v56 = vpop.eup %796  ;;  %v594_v57 = vmul.f32 %v1196_v6, %v554_v50  ;;  %v497_v58 = vadd.f32 1e-06, %v465_v23 }
 0x14a   : > { %v498_v25 = vadd.f32 1e-06, %v466_v54  ;;  %v799_v62 = vpop.eup %798  ;;  %v632_v43 = vadd.f32 %v1199_v39, %v593_v55  ;;  %v555_v63 = vmul.f32 %v797_v56, %v1040_v44  ;;  %v415_v37 = vpop.xlane.xlu1 %414 }
 0x14b   : > { %v417_v0 = vpop.xlane.xlu0 %416  ;;  %v633_v1 = vadd.f32 %v1199_v39, %v594_v57  ;;  %v556_v2 = vmul.f32 %v799_v62, %v1047_v51  ;;  %808 = vrsqrt.f32 %v497_v58  ;;  %v467_v27 = vmul.f32 0.0078125, %v415_v37 }
 0x14c   : > { %664 = vst [vmem:[%s1207_s26 + $0x8] sm:$0xff] %v632_v43  ;;  %v595_v7 = vmul.f32 %v1196_v6, %v555_v63  ;;  %810 = vrsqrt.f32 %v498_v25  ;;  %v468_v32 = vmul.f32 0.0078125, %v417_v0 }
 0x14d   : > { %v801_v33 = vpop.eup %800  ;;  %665 = vst [vmem:[%s1207_s26 + $0x10] sm:$0xff] %v633_v1  ;;  %v596_v34 = vmul.f32 %v1196_v6, %v556_v2  ;;  %v499_v29 = vadd.f32 1e-06, %v467_v27 }
 0x14e   : > { %v803_v44 = vpop.eup %802  ;;  %v634_v38 = vadd.f32 %v1199_v39, %v595_v7  ;;  %v557_v40 = vmul.f32 %v801_v33, %v1050_v52  ;;  %v500_v51 = vadd.f32 1e-06, %v468_v32  ;;  %v419_v30 = vpop.xlane.xlu1 %418 }
 0x14f   : > { %v421_v41 = vpop.xlane.xlu0 %420  ;;  %v635_v42 = vadd.f32 %v1199_v39, %v596_v34  ;;  %v558_v31 = vmul.f32 %v803_v44, %v1057_v59  ;;  %812 = vrsqrt.f32 %v499_v29  ;;  %v469_v36 = vmul.f32 0.0078125, %v419_v30 }
 0x150   : > { %666 = vst [vmem:[%s1207_s26 + $0x18] sm:$0xff] %v634_v38  ;;  %v597_v21 = vmul.f32 %v1196_v6, %v557_v40  ;;  %814 = vrsqrt.f32 %v500_v51  ;;  %v470_v46 = vmul.f32 0.0078125, %v421_v41 }
 0x151   : > { %v805_v47 = vpop.eup %804  ;;  %667 = vst [vmem:[%s1207_s26 + $0x20] sm:$0xff] %v635_v42  ;;  %v598_v48 = vmul.f32 %v1196_v6, %v558_v31  ;;  %v501_v52 = vadd.f32 1e-06, %v469_v36 }
 0x152   : > { %v807_v49 = vpop.eup %806  ;;  %v636_v50 = vadd.f32 %v1199_v39, %v597_v21  ;;  %v559_v23 = vmul.f32 %v805_v47, %v1060_v60  ;;  %v502_v59 = vadd.f32 1e-06, %v470_v46  ;;  %v423_v54 = vpop.xlane.xlu1 %422 }
 0x153   : > { %v425_v55 = vpop.xlane.xlu0 %424  ;;  %v637_v56 = vadd.f32 %v1199_v39, %v598_v48  ;;  %v560_v57 = vmul.f32 %v807_v49, %v1067_v3  ;;  %816 = vrsqrt.f32 %v501_v52  ;;  %v471_v58 = vmul.f32 0.0078125, %v423_v54 }
 0x154   : > { %668 = vst [vmem:[%s1207_s26 + $0x28] sm:$0xff] %v636_v50  ;;  %v599_v25 = vmul.f32 %v1196_v6, %v559_v23  ;;  %818 = vrsqrt.f32 %v502_v59  ;;  %v472_v62 = vmul.f32 0.0078125, %v425_v55 }
 0x155   : > { %v809_v43 = vpop.eup %808  ;;  %669 = vst [vmem:[%s1207_s26 + $0x30] sm:$0xff] %v637_v56  ;;  %v600_v63 = vmul.f32 %v1196_v6, %v560_v57  ;;  %v503_v60 = vadd.f32 1e-06, %v471_v58 }
 0x156   : > { %v811_v37 = vpop.eup %810  ;;  %v638_v0 = vadd.f32 %v1199_v39, %v599_v25  ;;  %v561_v1 = vmul.f32 %v809_v43, %v1070_v4  ;;  %v504_v3 = vadd.f32 1e-06, %v472_v62  ;;  %v427_v2 = vpop.xlane.xlu1 %426 }
 0x157   : > { %v429_v27 = vpop.xlane.xlu0 %428  ;;  %v639_v7 = vadd.f32 %v1199_v39, %v600_v63  ;;  %v562_v32 = vmul.f32 %v811_v37, %v1077_v35  ;;  %820 = vrsqrt.f32 %v503_v60  ;;  %v473_v33 = vmul.f32 0.0078125, %v427_v2 }
 0x158   : > { %670 = vst [vmem:[%s1207_s26 + $0x38] sm:$0xff] %v638_v0  ;;  %v601_v34 = vmul.f32 %v1196_v6, %v561_v1  ;;  %822 = vrsqrt.f32 %v504_v3  ;;  %v474_v29 = vmul.f32 0.0078125, %v429_v27 }
 0x159   : > { %v813_v44 = vpop.eup %812  ;;  %671 = vst [vmem:[%s1207_s26 + $0x40] sm:$0xff] %v639_v7  ;;  %v602_v38 = vmul.f32 %v1196_v6, %v562_v32  ;;  %v505_v4 = vadd.f32 1e-06, %v473_v33 }
 0x15a   : > { %v815_v40 = vpop.eup %814  ;;  %v640_v51 = vadd.f32 %v1199_v39, %v601_v34  ;;  %v563_v30 = vmul.f32 %v813_v44, %v1080_v8  ;;  %v506_v35 = vadd.f32 1e-06, %v474_v29  ;;  %v431_v41 = vpop.xlane.xlu1 %430 }
 0x15b   : > { %v433_v42 = vpop.xlane.xlu0 %432  ;;  %v641_v31 = vadd.f32 %v1199_v39, %v602_v38  ;;  %v564_v36 = vmul.f32 %v815_v40, %v1087_v45  ;;  %824 = vrsqrt.f32 %v505_v4  ;;  %v475_v21 = vmul.f32 0.0078125, %v431_v41 }
 0x15c   : > { %672 = vst [vmem:[%s1207_s26 + $0x48] sm:$0xff] %v640_v51  ;;  %v603_v46 = vmul.f32 %v1196_v6, %v563_v30  ;;  %826 = vrsqrt.f32 %v506_v35  ;;  %v476_v47 = vmul.f32 0.0078125, %v433_v42 }
 0x15d   : > { %v817_v48 = vpop.eup %816  ;;  %673 = vst [vmem:[%s1207_s26 + $0x50] sm:$0xff] %v641_v31  ;;  %v604_v52 = vmul.f32 %v1196_v6, %v564_v36  ;;  %v507_v8 = vadd.f32 1e-06, %v475_v21 }
 0x15e   : > { %v819_v49 = vpop.eup %818  ;;  %v642_v50 = vadd.f32 %v1199_v39, %v603_v46  ;;  %v565_v23 = vmul.f32 %v817_v48, %v1090_v10  ;;  %v508_v45 = vadd.f32 1e-06, %v476_v47  ;;  %v435_v59 = vpop.xlane.xlu1 %434 }
 0x15f   : > { %v437_v54 = vpop.xlane.xlu0 %436  ;;  %v643_v55 = vadd.f32 %v1199_v39, %v604_v52  ;;  %v566_v56 = vmul.f32 %v819_v49, %v1097_v53  ;;  %828 = vrsqrt.f32 %v507_v8  ;;  %v477_v57 = vmul.f32 0.0078125, %v435_v59 }
 0x160   : > { %674 = vst [vmem:[%s1207_s26 + $0x58] sm:$0xff] %v642_v50  ;;  %v605_v58 = vmul.f32 %v1196_v6, %v565_v23  ;;  %830 = vrsqrt.f32 %v508_v45  ;;  %v478_v25 = vmul.f32 0.0078125, %v437_v54 }
 0x161   : > { %v821_v62 = vpop.eup %820  ;;  %675 = vst [vmem:[%s1207_s26 + $0x60] sm:$0xff] %v643_v55  ;;  %v606_v43 = vmul.f32 %v1196_v6, %v566_v56  ;;  %v509_v10 = vadd.f32 1e-06, %v477_v57 }
 0x162   : > { %v823_v63 = vpop.eup %822  ;;  %v644_v60 = vadd.f32 %v1199_v39, %v605_v58  ;;  %v567_v37 = vmul.f32 %v821_v62, %v1100_v12  ;;  %v510_v53 = vadd.f32 1e-06, %v478_v25  ;;  %v439_v0 = vpop.xlane.xlu1 %438 }
 0x163   : > { %v441_v1 = vpop.xlane.xlu0 %440  ;;  %v645_v3 = vadd.f32 %v1199_v39, %v606_v43  ;;  %v568_v2 = vmul.f32 %v823_v63, %v1107_v61  ;;  %832 = vrsqrt.f32 %v509_v10  ;;  %v479_v27 = vmul.f32 0.0078125, %v439_v0 }
 0x164   : > { %676 = vst [vmem:[%s1207_s26 + $0x68] sm:$0xff] %v644_v60  ;;  %v607_v7 = vmul.f32 %v1196_v6, %v567_v37  ;;  %834 = vrsqrt.f32 %v510_v53  ;;  %v480_v32 = vmul.f32 0.0078125, %v441_v1 }
 0x165   : > { %v825_v33 = vpop.eup %824  ;;  %677 = vst [vmem:[%s1207_s26 + $0x70] sm:$0xff] %v645_v3  ;;  %v608_v34 = vmul.f32 %v1196_v6, %v568_v2  ;;  %v511_v12 = vadd.f32 1e-06, %v479_v27 }
 0x166   : > { %v827_v29 = vpop.eup %826  ;;  %v646_v44 = vadd.f32 %v1199_v39, %v607_v7  ;;  %v569_v38 = vmul.f32 %v825_v33, %v1110_v14  ;;  %v512_v61 = vadd.f32 1e-06, %v480_v32  ;;  %v443_v4 = vpop.xlane.xlu1 %442 }
 0x167   : > { %v445_v40 = vpop.xlane.xlu0 %444  ;;  %v647_v51 = vadd.f32 %v1199_v39, %v608_v34  ;;  %v570_v30 = vmul.f32 %v827_v29, %v1117_v5  ;;  %836 = vrsqrt.f32 %v511_v12  ;;  %v481_v35 = vmul.f32 0.0078125, %v443_v4 }
 0x168   : > { %678 = vst [vmem:[%s1207_s26 + $0x78] sm:$0xff] %v646_v44  ;;  %v609_v41 = vmul.f32 %v1196_v6, %v569_v38  ;;  %838 = vrsqrt.f32 %v512_v61  ;;  %v482_v42 = vmul.f32 0.0078125, %v445_v40 }
 0x169   : > { %v829_v31 = vpop.eup %828  ;;  %679 = vst [vmem:[%s1207_s26 + $0x80] sm:$0xff] %v647_v51  ;;  %v610_v36 = vmul.f32 %v1196_v6, %v570_v30  ;;  %v513_v14 = vadd.f32 1e-06, %v481_v35 }
 0x16a   : > { %v831_v21 = vpop.eup %830  ;;  %v648_v46 = vadd.f32 %v1199_v39, %v609_v41  ;;  %v571_v47 = vmul.f32 %v829_v31, %v1120_v16  ;;  %v514_v5 = vadd.f32 1e-06, %v482_v42  ;;  %v447_v48 = vpop.xlane.xlu1 %446 }
 0x16b   : > { %v449_v52 = vpop.xlane.xlu0 %448  ;;  %v649_v8 = vadd.f32 %v1199_v39, %v610_v36  ;;  %v572_v49 = vmul.f32 %v831_v21, %v1127_v9  ;;  %840 = vrsqrt.f32 %v513_v14  ;;  %v483_v50 = vmul.f32 0.0078125, %v447_v48 }
 0x16c   : > { %680 = vst [vmem:[%s1207_s26 + $0x88] sm:$0xff] %v648_v46  ;;  %v611_v23 = vmul.f32 %v1196_v6, %v571_v47  ;;  %842 = vrsqrt.f32 %v514_v5  ;;  %v484_v45 = vmul.f32 0.0078125, %v449_v52 }
 0x16d   : > { %v833_v59 = vpop.eup %832  ;;  %681 = vst [vmem:[%s1207_s26 + $0x90] sm:$0xff] %v649_v8  ;;  %v612_v54 = vmul.f32 %v1196_v6, %v572_v49  ;;  %v515_v16 = vadd.f32 1e-06, %v483_v50 }
 0x16e   : > { %v835_v55 = vpop.eup %834  ;;  %v650_v56 = vadd.f32 %v1199_v39, %v611_v23  ;;  %v573_v57 = vmul.f32 %v833_v59, %v1130_v18  ;;  %v516_v9 = vadd.f32 1e-06, %v484_v45  ;;  %v451_v58 = vpop.xlane.xlu1 %450 }
 0x16f   : > { %v453_v25 = vpop.xlane.xlu0 %452  ;;  %v651_v62 = vadd.f32 %v1199_v39, %v612_v54  ;;  %v574_v43 = vmul.f32 %v835_v55, %v1137_v11  ;;  %844 = vrsqrt.f32 %v515_v16  ;;  %v485_v10 = vmul.f32 0.0078125, %v451_v58 }
 0x170   : > { %682 = vst [vmem:[%s1207_s26 + $0x98] sm:$0xff] %v650_v56  ;;  %v613_v63 = vmul.f32 %v1196_v6, %v573_v57  ;;  %846 = vrsqrt.f32 %v516_v9  ;;  %v486_v60 = vmul.f32 0.0078125, %v453_v25 }
 0x171   : > { %v837_v37 = vpop.eup %836  ;;  %683 = vst [vmem:[%s1207_s26 + $0xa0] sm:$0xff] %v651_v62  ;;  %v614_v18 = vmul.f32 %v1196_v6, %v574_v43  ;;  %v517_v53 = vadd.f32 1e-06, %v485_v10 }
 0x172   : > { %v839_v0 = vpop.eup %838  ;;  %v652_v1 = vadd.f32 %v1199_v39, %v613_v63  ;;  %v575_v3 = vmul.f32 %v837_v37, %v1140_v20  ;;  %v518_v11 = vadd.f32 1e-06, %v486_v60  ;;  %v455_v2 = vpop.xlane.xlu1 %454 }
 0x173   : > { %v653_v27 = vadd.f32 %v1199_v39, %v614_v18  ;;  %v576_v7 = vmul.f32 %v839_v0, %v1147_v13  ;;  %848 = vrsqrt.f32 %v517_v53  ;;  %v487_v32 = vmul.f32 0.0078125, %v455_v2 }
 0x174   : > { %684 = vst [vmem:[%s1207_s26 + $0xa8] sm:$0xff] %v652_v1  ;;  %v615_v33 = vmul.f32 %v1196_v6, %v575_v3  ;;  %850 = vrsqrt.f32 %v518_v11 }
 0x175   : > { %v841_v34 = vpop.eup %840  ;;  %685 = vst [vmem:[%s1207_s26 + $0xb0] sm:$0xff] %v653_v27  ;;  %v616_v12 = vmul.f32 %v1196_v6, %v576_v7  ;;  %v519_v29 = vadd.f32 1e-06, %v487_v32 }
 0x176   : > { %v843_v20 = vpop.eup %842  ;;  %v654_v44 = vadd.f32 %v1199_v39, %v615_v33  ;;  %v577_v38 = vmul.f32 %v841_v34, %v1150_v22 }
 0x177   : > { %v655_v13 = vadd.f32 %v1199_v39, %v616_v12  ;;  %v578_v61 = vmul.f32 %v843_v20, %v1157_v15  ;;  %852 = vrsqrt.f32 %v519_v29 }
 0x178   : > { %686 = vst [vmem:[%s1207_s26 + $0xb8] sm:$0xff] %v654_v44  ;;  %v617_v4 = vmul.f32 %v1196_v6, %v577_v38 }
 0x179   : > { %v845_v40 = vpop.eup %844  ;;  %687 = vst [vmem:[%s1207_s26 + $0xc0] sm:$0xff] %v655_v13  ;;  %v618_v51 = vmul.f32 %v1196_v6, %v578_v61 }
 0x17a   : > { %v847_v30 = vpop.eup %846  ;;  %v656_v35 = vadd.f32 %v1199_v39, %v617_v4  ;;  %v579_v41 = vmul.f32 %v845_v40, %v1160_v24 }
 0x17b   : > { %v657_v22 = vadd.f32 %v1199_v39, %v618_v51  ;;  %v580_v42 = vmul.f32 %v847_v30, %v1167_v17 }
 0x17c   : > { %688 = vst [vmem:[%s1207_s26 + $0xc8] sm:$0xff] %v656_v35  ;;  %v619_v15 = vmul.f32 %v1196_v6, %v579_v41 }
 0x17d   : > { %v849_v31 = vpop.eup %848  ;;  %689 = vst [vmem:[%s1207_s26 + $0xd0] sm:$0xff] %v657_v22  ;;  %v620_v36 = vmul.f32 %v1196_v6, %v580_v42 }
 0x17e   : > { %v851_v14 = vpop.eup %850  ;;  %v658_v21 = vadd.f32 %v1199_v39, %v619_v15  ;;  %v581_v24 = vmul.f32 %v849_v31, %v1170_v26 }
 0x17f   : > { %v659_v46 = vadd.f32 %v1199_v39, %v620_v36  ;;  %v582_v47 = vmul.f32 %v851_v14, %v1177_v19 }
 0x180   : > { %690 = vst [vmem:[%s1207_s26 + $0xd8] sm:$0xff] %v658_v21  ;;  %v621_v17 = vmul.f32 %v1196_v6, %v581_v24 }
 0x181   : > { %v853_v5 = vpop.eup %852  ;;  %691 = vst [vmem:[%s1207_s26 + $0xe0] sm:$0xff] %v659_v46  ;;  %v622_v48 = vmul.f32 %v1196_v6, %v582_v47 }
 0x182   : > { %v660_v52 = vadd.f32 %v1199_v39, %v621_v17  ;;  %v583_v8 = vmul.f32 %v853_v5, %v1180_v28 }
 0x183   : > { %v661_v49 = vadd.f32 %v1199_v39, %v622_v48 }
 0x184   : > { %692 = vst [vmem:[%s1207_s26 + $0xe8] sm:$0xff] %v660_v52  ;;  %v623_v26 = vmul.f32 %v1196_v6, %v583_v8 }
 0x185   : > { %693 = vst [vmem:[%s1207_s26 + $0xf0] sm:$0xff] %v661_v49 }
 0x186   : > { %v662_v50 = vadd.f32 %v1199_v39, %v623_v26 }
 0x188   : > { %694 = vst [vmem:[%s1207_s26 + $0xf8] sm:$0xff] %v662_v50 }
 0x189 PF: > { %s13_s12 = sadd.s32 1, %s860_s12  }
 0x18a   : > { %p10_p4 = scmp.ge.s32.totalorder %s13_s12, 4  }
 0x18c   :  { %12 = sbr.rel (!%p10_p4) target bundleno = 1 (0x1), region = 68 }

// kernel: causal_wan_block_pallas.27
= control target key start
LH: loop header
LB: loop body
LE: loop exit
PB: predicated region body
PF: predicated region fallthrough
CT: control target
= control target key end

     0   :  { %s610_s12 = smov 0   ;;  %s796_s0 = inlined_call_operand.vmem [shape: f32[4,128,128], index: 0, kind: input, shape index: {}]   ;;  %s797_s1 = inlined_call_operand.vmem [shape: f32[4,1,128], index: 1, kind: input, shape index: {}]   ;;  %s798_s2 = inlined_call_operand.vmem [shape: f32[4,1,128], index: 2, kind: input, shape index: {}]   ;;  %s799_s3 = inlined_call_operand.vmem [shape: f32[4,128,128], index: 3, kind: output, shape index: {}]  }
   0x1 LB: > { %s528_s13 = sadd.s32 4294967295, %s588_s12   ;;  %p532_p0 = scmp.ge.s32.totalorder %s588_s12, 1  ;;  %s588_s12 = sphi %s610_s12, %s13_s12  }
   0x2   : > { %p153_p1 = scmp.lt.s32.totalorder %s588_s12, 5 }
   0x4   : > { %p154_p2 = pnand %p532_p0, %p153_p1 }
   0x5   : > { %p183_p3 = scmp.lt.s32.totalorder (!%p154_p2), %s528_s13, 3 }
   0x6   : > { %157 = sbr.rel (%p154_p2) target bundleno = 361 (0x169), region = 32 }
   0xd   : > { %s801_s13 = smov (!%p183_p3, %s528_s13), 3 }
   0xe   : > { %s540_s14 = sshll.u32 %s801_s13, 7  ;;  %s190_s20 = scalar_lea.vmem %s797_s1, %s801_s13 }
   0xf   : > { %s187_s17 = scalar_lea.vmem %s796_s0, %s540_s14  ;;  %s193_s23 = scalar_lea.vmem %s798_s2, %s801_s13 }
  0x10   : > { %v199_v0 = vld [vmem:[%s187_s17] sm:$0xff]  ;;  %v201_v1 = vld [vmem:[%s187_s17 + $0x10] sm:$0xff]  ;;  %v200_v2 = vld [vmem:[%s187_s17 + $0x8] sm:$0xff]  ;;  %s729_s26 = scalar_lea.vmem %s799_s3, %s540_s14 }
  0x11   : > { %215 = vadd.xlane.f32.xlu0 %v199_v0  ;;  %219 = vadd.xlane.f32.xlu1 %v201_v1  ;;  %v202_v3 = vld [vmem:[%s187_s17 + $0x18] sm:$0xff]  ;;  %v203_v4 = vld [vmem:[%s187_s17 + $0x20] sm:$0xff]  ;;  %v204_v5 = vld [vmem:[%s187_s17 + $0x28] sm:$0xff] }
  0x12   : > { %v205_v6 = vld [vmem:[%s187_s17 + $0x30] sm:$0xff]  ;;  %v206_v7 = vld [vmem:[%s187_s17 + $0x38] sm:$0xff]  ;;  %v207_v8 = vld [vmem:[%s187_s17 + $0x40] sm:$0xff] }
  0x13   : > { %v208_v9 = vld [vmem:[%s187_s17 + $0x48] sm:$0xff]  ;;  %v209_v10 = vld [vmem:[%s187_s17 + $0x50] sm:$0xff]  ;;  %v626_v11 = vld [vmem:[%s187_s17 + $0x58] sm:$0xff] }
  0x14   : > { %v629_v12 = vld [vmem:[%s187_s17 + $0x60] sm:$0xff]  ;;  %v631_v13 = vld [vmem:[%s187_s17 + $0x68] sm:$0xff]  ;;  %v635_v14 = vld [vmem:[%s187_s17 + $0x70] sm:$0xff] }
  0x15   : > { %217 = vadd.xlane.f32.xlu0 %v200_v2  ;;  %221 = vadd.xlane.f32.xlu1 %v202_v3  ;;  %v637_v15 = vld [vmem:[%s187_s17 + $0x78] sm:$0xff] }
  0x19   : > { %223 = vadd.xlane.f32.xlu0 %v203_v4  ;;  %225 = vadd.xlane.f32.xlu1 %v204_v5 }
  0x1d   : > { %227 = vadd.xlane.f32.xlu0 %v205_v6  ;;  %229 = vadd.xlane.f32.xlu1 %v206_v7 }
  0x21   : > { %231 = vadd.xlane.f32.xlu0 %v207_v8  ;;  %233 = vadd.xlane.f32.xlu1 %v208_v9 }
  0x25   : > { %235 = vadd.xlane.f32.xlu0 %v209_v10  ;;  %237 = vadd.xlane.f32.xlu1 %v626_v11 }
  0x29   : > { %239 = vadd.xlane.f32.xlu0 %v629_v12  ;;  %241 = vadd.xlane.f32.xlu1 %v631_v13 }
  0x2d   : > { %243 = vadd.xlane.f32.xlu0 %v635_v14  ;;  %245 = vadd.xlane.f32.xlu1 %v637_v15 }
  0x9e   : > { %v216_v16 = vpop.xlane.xlu0 %215  ;;  %v220_v17 = vpop.xlane.xlu1 %219 }
  0x9f   : > { %v248_v18 = vmul.f32 0.0078125, %v216_v16  ;;  %v250_v19 = vmul.f32 0.0078125, %v220_v17 }
  0xa1   : > { %v641_v20 = vsub.f32 %v199_v0, %v248_v18  ;;  %v643_v21 = vsub.f32 %v201_v1, %v250_v19  ;;  %v395_v19 = vlaneseq }
  0xa2   : > { %v218_v22 = vpop.xlane.xlu0 %217  ;;  %v222_v23 = vpop.xlane.xlu1 %221 }
  0xa3   : > { %v249_v24 = vmul.f32 0.0078125, %v218_v22  ;;  %v280_v25 = vmul.f32 %v641_v20, %v641_v20  ;;  %v251_v26 = vmul.f32 0.0078125, %v222_v23  ;;  %v282_v29 = vmul.f32 %v643_v21, %v643_v21 }
  0xa5   : > { %v647_v27 = vsub.f32 %v200_v2, %v249_v24  ;;  %296 = vadd.xlane.f32.xlu0 %v280_v25  ;;  %v649_v28 = vsub.f32 %v202_v3, %v251_v26  ;;  %v396_v26 = vshrl.u32 %v395_v19, 7 }
  0xa6   : > { %v224_v30 = vpop.xlane.xlu0 %223  ;;  %v226_v31 = vpop.xlane.xlu1 %225 }
  0xa7   : > { %v252_v32 = vmul.f32 0.0078125, %v224_v30  ;;  %v281_v33 = vmul.f32 %v647_v27, %v647_v27  ;;  %v253_v34 = vmul.f32 0.0078125, %v226_v31  ;;  %v283_v37 = vmul.f32 %v649_v28, %v649_v28 }
  0xa9   : > { %v655_v35 = vsub.f32 %v203_v4, %v252_v32  ;;  %300 = vadd.xlane.f32.xlu0 %v282_v29  ;;  %298 = vadd.xlane.f32.xlu1 %v281_v33  ;;  %v657_v36 = vsub.f32 %v204_v5, %v253_v34  ;;  %v392_v29 = vld [vmem:[%s190_s20] sm:$0x1] }
  0xaa   : > { %v228_v38 = vpop.xlane.xlu0 %227  ;;  %v230_v39 = vpop.xlane.xlu1 %229 }
  0xab   : > { %v254_v40 = vmul.f32 0.0078125, %v228_v38  ;;  %v284_v41 = vmul.f32 %v655_v35, %v655_v35  ;;  %v255_v42 = vmul.f32 0.0078125, %v230_v39  ;;  %v285_v45 = vmul.f32 %v657_v36, %v657_v36 }
  0xac   : > { %v393_v38 = vadd.f32 1.0, %v392_v29  ;;  %v397_v39 = vsub.s32 0, %v396_v26 }
  0xad   : > { %v663_v43 = vsub.f32 %v205_v6, %v254_v40  ;;  %302 = vadd.xlane.f32.xlu1 %v283_v37  ;;  %304 = vadd.xlane.f32.xlu0 %v284_v41  ;;  %v665_v44 = vsub.f32 %v206_v7, %v255_v42 }
  0xae   : > { %v232_v46 = vpop.xlane.xlu0 %231  ;;  %v234_v47 = vpop.xlane.xlu1 %233 }
  0xaf   : > { %v256_v48 = vmul.f32 0.0078125, %v232_v46  ;;  %v286_v49 = vmul.f32 %v663_v43, %v663_v43  ;;  %v257_v50 = vmul.f32 0.0078125, %v234_v47  ;;  %v287_v53 = vmul.f32 %v665_v44, %v665_v44 }
  0xb1   : > { %v671_v51 = vsub.f32 %v207_v8, %v256_v48  ;;  %306 = vadd.xlane.f32.xlu1 %v285_v45  ;;  %308 = vadd.xlane.f32.xlu0 %v286_v49  ;;  %v673_v52 = vsub.f32 %v208_v9, %v257_v50  ;;  %v718_v48 = vrot.slane %v393_v38, %v397_v39 }
  0xb2   : > { %v236_v54 = vpop.xlane.xlu0 %235  ;;  %v238_v55 = vpop.xlane.xlu1 %237 }
  0xb3   : > { %v258_v56 = vmul.f32 0.0078125, %v236_v54  ;;  %v288_v57 = vmul.f32 %v671_v51, %v671_v51  ;;  %v259_v58 = vmul.f32 0.0078125, %v238_v55  ;;  %v289_v61 = vmul.f32 %v673_v52, %v673_v52 }
  0xb5   : > { %v679_v59 = vsub.f32 %v209_v10, %v258_v56  ;;  %310 = vadd.xlane.f32.xlu1 %v287_v53  ;;  %312 = vadd.xlane.f32.xlu0 %v288_v57  ;;  %v682_v60 = vsub.f32 %v626_v11, %v259_v58  ;;  %v721_v57 = vld [vmem:[%s193_s23] ss:$0 sm:$0xff] }
  0xb6   : > { %v240_v62 = vpop.xlane.xlu0 %239  ;;  %v242_v63 = vpop.xlane.xlu1 %241 }
  0xb7   : > { %v260_v0 = vmul.f32 0.0078125, %v240_v62  ;;  %v290_v1 = vmul.f32 %v679_v59, %v679_v59  ;;  %v261_v2 = vmul.f32 0.0078125, %v242_v63  ;;  %v291_v5 = vmul.f32 %v682_v60, %v682_v60 }
  0xb9   : > { %v689_v3 = vsub.f32 %v629_v12, %v260_v0  ;;  %314 = vadd.xlane.f32.xlu1 %v289_v61  ;;  %316 = vadd.xlane.f32.xlu0 %v290_v1  ;;  %v692_v4 = vsub.f32 %v631_v13, %v261_v2 }
  0xba   : > { %v244_v6 = vpop.xlane.xlu0 %243  ;;  %v246_v7 = vpop.xlane.xlu1 %245 }
  0xbb   : > { %v262_v8 = vmul.f32 0.0078125, %v244_v6  ;;  %v292_v9 = vmul.f32 %v689_v3, %v689_v3  ;;  %v263_v10 = vmul.f32 0.0078125, %v246_v7  ;;  %v293_v13 = vmul.f32 %v692_v4, %v692_v4 }
  0xbd   : > { %v699_v11 = vsub.f32 %v635_v14, %v262_v8  ;;  %318 = vadd.xlane.f32.xlu1 %v291_v5  ;;  %320 = vadd.xlane.f32.xlu0 %v292_v9  ;;  %v702_v12 = vsub.f32 %v637_v15, %v263_v10 }
  0xbf   : > { %v294_v16 = vmul.f32 %v699_v11, %v699_v11  ;;  %v295_v17 = vmul.f32 %v702_v12, %v702_v12 }
  0xc1   : > { %322 = vadd.xlane.f32.xlu1 %v293_v13  ;;  %324 = vadd.xlane.f32.xlu0 %v294_v16 }
  0xc5   : > { %326 = vadd.xlane.f32.xlu1 %v295_v17 }
 0x132   : > { %v297_v18 = vpop.xlane.xlu0 %296 }
 0x133   : > { %v328_v14 = vmul.f32 0.0078125, %v297_v18 }
 0x135   : > { %v344_v22 = vadd.f32 1e-06, %v328_v14 }
 0x136   : > { %v299_v15 = vpop.xlane.xlu1 %298  ;;  %v301_v23 = vpop.xlane.xlu0 %300 }
 0x137   : > { %550 = vrsqrt.f32 %v344_v22  ;;  %v329_v24 = vmul.f32 0.0078125, %v299_v15  ;;  %v330_v25 = vmul.f32 0.0078125, %v301_v23 }
 0x139   : > { %v345_v30 = vadd.f32 1e-06, %v329_v24  ;;  %v346_v31 = vadd.f32 1e-06, %v330_v25 }
 0x13a   : > { %v303_v32 = vpop.xlane.xlu1 %302  ;;  %v305_v33 = vpop.xlane.xlu0 %304 }
 0x13b   : > { %552 = vrsqrt.f32 %v345_v30  ;;  %v331_v34 = vmul.f32 0.0078125, %v303_v32  ;;  %v332_v37 = vmul.f32 0.0078125, %v305_v33 }
 0x13c   : > { %554 = vrsqrt.f32 %v346_v31 }
 0x13d   : > { %v347_v40 = vadd.f32 1e-06, %v331_v34  ;;  %v348_v41 = vadd.f32 1e-06, %v332_v37 }
 0x13e   : > { %v307_v42 = vpop.xlane.xlu1 %306  ;;  %v309_v45 = vpop.xlane.xlu0 %308 }
 0x13f   : > { %556 = vrsqrt.f32 %v347_v40  ;;  %v333_v46 = vmul.f32 0.0078125, %v307_v42  ;;  %v334_v47 = vmul.f32 0.0078125, %v309_v45 }
 0x140   : > { %558 = vrsqrt.f32 %v348_v41 }
 0x141   : > { %v551_v49 = vpop.eup %550  ;;  %v349_v50 = vadd.f32 1e-06, %v333_v46  ;;  %v350_v53 = vadd.f32 1e-06, %v334_v47 }
 0x142   : > { %v376_v54 = vmul.f32 %v551_v49, %v641_v20  ;;  %v311_v55 = vpop.xlane.xlu1 %310  ;;  %v313_v56 = vpop.xlane.xlu0 %312 }
 0x143   : > { %560 = vrsqrt.f32 %v349_v50  ;;  %v335_v58 = vmul.f32 0.0078125, %v311_v55  ;;  %v336_v61 = vmul.f32 0.0078125, %v313_v56 }
 0x144   : > { %v400_v62 = vmul.f32 %v718_v48, %v376_v54  ;;  %562 = vrsqrt.f32 %v350_v53 }
 0x145   : > { %v553_v63 = vpop.eup %552  ;;  %v351_v0 = vadd.f32 1e-06, %v335_v58  ;;  %v352_v20 = vadd.f32 1e-06, %v336_v61 }
 0x146   : > { %v555_v1 = vpop.eup %554  ;;  %v423_v2 = vadd.f32 %v721_v57, %v400_v62  ;;  %v377_v5 = vmul.f32 %v553_v63, %v647_v27  ;;  %v315_v6 = vpop.xlane.xlu1 %314 }
 0x147   : > { %v317_v7 = vpop.xlane.xlu0 %316  ;;  %v378_v8 = vmul.f32 %v555_v1, %v643_v21  ;;  %564 = vrsqrt.f32 %v351_v0  ;;  %v337_v9 = vmul.f32 0.0078125, %v315_v6 }
 0x148   : > { %v338_v10 = vmul.f32 0.0078125, %v317_v7  ;;  %439 = vst [vmem:[%s729_s26] sm:$0xff] %v423_v2  ;;  %v401_v13 = vmul.f32 %v718_v48, %v377_v5  ;;  %566 = vrsqrt.f32 %v352_v20 }
 0x149   : > { %v557_v16 = vpop.eup %556  ;;  %v402_v17 = vmul.f32 %v718_v48, %v378_v8  ;;  %v353_v18 = vadd.f32 1e-06, %v337_v9 }
 0x14a   : > { %v354_v14 = vadd.f32 1e-06, %v338_v10  ;;  %v559_v19 = vpop.eup %558  ;;  %v424_v27 = vadd.f32 %v721_v57, %v401_v13  ;;  %v379_v22 = vmul.f32 %v557_v16, %v649_v28  ;;  %v319_v21 = vpop.xlane.xlu1 %318 }
 0x14b   : > { %v321_v15 = vpop.xlane.xlu0 %320  ;;  %v425_v23 = vadd.f32 %v721_v57, %v402_v17  ;;  %v380_v24 = vmul.f32 %v559_v19, %v655_v35  ;;  %568 = vrsqrt.f32 %v353_v18  ;;  %v339_v25 = vmul.f32 0.0078125, %v319_v21 }
 0x14c   : > { %440 = vst [vmem:[%s729_s26 + $0x8] sm:$0xff] %v424_v27  ;;  %v403_v26 = vmul.f32 %v718_v48, %v379_v22  ;;  %570 = vrsqrt.f32 %v354_v14  ;;  %v340_v29 = vmul.f32 0.0078125, %v321_v15 }
 0x14d   : > { %v561_v30 = vpop.eup %560  ;;  %441 = vst [vmem:[%s729_s26 + $0x10] sm:$0xff] %v425_v23  ;;  %v404_v31 = vmul.f32 %v718_v48, %v380_v24  ;;  %v355_v32 = vadd.f32 1e-06, %v339_v25 }
 0x14e   : > { %v563_v28 = vpop.eup %562  ;;  %v426_v33 = vadd.f32 %v721_v57, %v403_v26  ;;  %v381_v34 = vmul.f32 %v561_v30, %v657_v36  ;;  %v356_v35 = vadd.f32 1e-06, %v340_v29  ;;  %v323_v37 = vpop.xlane.xlu1 %322 }
 0x14f   : > { %v325_v38 = vpop.xlane.xlu0 %324  ;;  %v427_v39 = vadd.f32 %v721_v57, %v404_v31  ;;  %v382_v40 = vmul.f32 %v563_v28, %v663_v43  ;;  %572 = vrsqrt.f32 %v355_v32  ;;  %v341_v41 = vmul.f32 0.0078125, %v323_v37 }
 0x150   : > { %442 = vst [vmem:[%s729_s26 + $0x18] sm:$0xff] %v426_v33  ;;  %v405_v42 = vmul.f32 %v718_v48, %v381_v34  ;;  %574 = vrsqrt.f32 %v356_v35  ;;  %v342_v45 = vmul.f32 0.0078125, %v325_v38 }
 0x151   : > { %v565_v46 = vpop.eup %564  ;;  %443 = vst [vmem:[%s729_s26 + $0x20] sm:$0xff] %v427_v39  ;;  %v406_v36 = vmul.f32 %v718_v48, %v382_v40  ;;  %v357_v47 = vadd.f32 1e-06, %v341_v41 }
 0x152   : > { %v567_v49 = vpop.eup %566  ;;  %v428_v50 = vadd.f32 %v721_v57, %v405_v42  ;;  %v383_v53 = vmul.f32 %v565_v46, %v665_v44  ;;  %v358_v43 = vadd.f32 1e-06, %v342_v45  ;;  %v327_v54 = vpop.xlane.xlu1 %326 }
 0x153   : > { %v429_v55 = vadd.f32 %v721_v57, %v406_v36  ;;  %v384_v56 = vmul.f32 %v567_v49, %v671_v51  ;;  %576 = vrsqrt.f32 %v357_v47  ;;  %v343_v58 = vmul.f32 0.0078125, %v327_v54 }
 0x154   : > { %444 = vst [vmem:[%s729_s26 + $0x28] sm:$0xff] %v428_v50  ;;  %v407_v61 = vmul.f32 %v718_v48, %v383_v53  ;;  %578 = vrsqrt.f32 %v358_v43 }
 0x155   : > { %v569_v62 = vpop.eup %568  ;;  %445 = vst [vmem:[%s729_s26 + $0x30] sm:$0xff] %v429_v55  ;;  %v408_v63 = vmul.f32 %v718_v48, %v384_v56  ;;  %v359_v0 = vadd.f32 1e-06, %v343_v58 }
 0x156   : > { %v571_v44 = vpop.eup %570  ;;  %v430_v20 = vadd.f32 %v721_v57, %v407_v61  ;;  %v385_v1 = vmul.f32 %v569_v62, %v673_v52 }
 0x157   : > { %v431_v51 = vadd.f32 %v721_v57, %v408_v63  ;;  %v386_v2 = vmul.f32 %v571_v44, %v679_v59  ;;  %580 = vrsqrt.f32 %v359_v0 }
 0x158   : > { %446 = vst [vmem:[%s729_s26 + $0x38] sm:$0xff] %v430_v20  ;;  %v409_v5 = vmul.f32 %v718_v48, %v385_v1 }
 0x159   : > { %v573_v6 = vpop.eup %572  ;;  %447 = vst [vmem:[%s729_s26 + $0x40] sm:$0xff] %v431_v51  ;;  %v410_v7 = vmul.f32 %v718_v48, %v386_v2 }
 0x15a   : > { %v575_v8 = vpop.eup %574  ;;  %v432_v9 = vadd.f32 %v721_v57, %v409_v5  ;;  %v387_v10 = vmul.f32 %v573_v6, %v682_v60 }
 0x15b   : > { %v433_v52 = vadd.f32 %v721_v57, %v410_v7  ;;  %v388_v13 = vmul.f32 %v575_v8, %v689_v3 }
 0x15c   : > { %448 = vst [vmem:[%s729_s26 + $0x48] sm:$0xff] %v432_v9  ;;  %v411_v59 = vmul.f32 %v718_v48, %v387_v10 }
 0x15d   : > { %v577_v16 = vpop.eup %576  ;;  %449 = vst [vmem:[%s729_s26 + $0x50] sm:$0xff] %v433_v52  ;;  %v412_v17 = vmul.f32 %v718_v48, %v388_v13 }
 0x15e   : > { %v579_v18 = vpop.eup %578  ;;  %v434_v14 = vadd.f32 %v721_v57, %v411_v59  ;;  %v389_v60 = vmul.f32 %v577_v16, %v692_v4 }
 0x15f   : > { %v435_v19 = vadd.f32 %v721_v57, %v412_v17  ;;  %v390_v27 = vmul.f32 %v579_v18, %v699_v11 }
 0x160   : > { %450 = vst [vmem:[%s729_s26 + $0x58] sm:$0xff] %v434_v14  ;;  %v413_v3 = vmul.f32 %v718_v48, %v389_v60 }
 0x161   : > { %v581_v22 = vpop.eup %580  ;;  %451 = vst [vmem:[%s729_s26 + $0x60] sm:$0xff] %v435_v19  ;;  %v414_v21 = vmul.f32 %v718_v48, %v390_v27 }
 0x162   : > { %v436_v15 = vadd.f32 %v721_v57, %v413_v3  ;;  %v391_v23 = vmul.f32 %v581_v22, %v702_v12 }
 0x163   : > { %v437_v24 = vadd.f32 %v721_v57, %v414_v21 }
 0x164   : > { %452 = vst [vmem:[%s729_s26 + $0x68] sm:$0xff] %v436_v15  ;;  %v415_v4 = vmul.f32 %v718_v48, %v391_v23 }
 0x165   : > { %453 = vst [vmem:[%s729_s26 + $0x70] sm:$0xff] %v437_v24 }
 0x166   : > { %v438_v25 = vadd.f32 %v721_v57, %v415_v4 }
 0x168   : > { %454 = vst [vmem:[%s729_s26 + $0x78] sm:$0xff] %v438_v25 }
 0x169 PF: > { %s13_s12 = sadd.s32 1, %s588_s12  }
 0x16a   : > { %p10_p4 = scmp.ge.s32.totalorder %s13_s12, 6  }
 0x16c   :  { %12 = sbr.rel (!%p10_p4) target bundleno = 1 (0x1), region = 68 }

// kernel: causal_wan_block_pallas.29
= control target key start
LH: loop header
LB: loop body
LE: loop exit
PB: predicated region body
PF: predicated region fallthrough
CT: control target
= control target key end

     0   :  { %s1057_s12 = smov 0   ;;  %s1059_s13 = smov 0   ;;  %s1226_s0 = inlined_call_operand.vmem [shape: f32[512,256], index: 0, kind: input, shape index: {}]   ;;  %s1227_s1 = inlined_call_operand.vmem [shape: f32[256,128], index: 1, kind: input, shape index: {}]   ;;  %s1228_s2 = inlined_call_operand.vmem [shape: f32[1,128], index: 2, kind: input, shape index: {}]   ;;  %s1229_s3 = inlined_call_operand.vmem [shape: f32[512,128], index: 3, kind: output, shape index: {}]  }
   0x1   :  { %s1061_s14 = smov 0   ;;  %s1063_s15 = smov 0  }
   0x2   :  { %s1065_s16 = smov 0   ;;  %s1067_s17 = smov 0  }
   0x3   :  { %s1069_s18 = smov 0  }
   0x4 LB: > { %s25_s19 = sadd.s32 1, %s1026_s16  ;;  %s32_s20 = sadd.s32 1, %s1030_s17  ;;  %s1034_s18 = sphi %s1069_s18, %s13_s18   ;;  %s1030_s17 = sphi %s1067_s17, %s1235_s17   ;;  %s1026_s16 = sphi %s1065_s16, %s1234_s16   ;;  %s1022_s15 = sphi %s1063_s15, %s1233_s15   ;;  %s1018_s14 = sphi %s1061_s14, %s1232_s14   ;;  %s1014_s13 = sphi %s1059_s13, %s1231_s13   ;;  %s1010_s12 = sphi %s1057_s12, %s1230_s12  }
   0x5   : > { %p26_p0 = scmp.ge.s32.totalorder %s25_s19, 2  ;;  %p48_p1 = scmp.ne.s32.totalorder %s1014_s13, %s1010_s12 }
   0x6   : > { %p49_p2 = scmp.eq.s32.totalorder %s1034_s18, 0  ;;  %s41_s24 = sadd.s32 1, %s1014_s13 }
   0x7   : > { %s1237_s19 = smov (%p26_p0, %s25_s19), 0  ;;  %s1239_s20 = smov (!%p26_p0, %s32_s20), %s1030_s17 }
   0x8   : > { %p50_p3 = por %p49_p2, %p48_p1  ;;  %p34_p4 = scmp.ge.s32.totalorder %s1239_s20, 4 }
   0x9   : > { %s37_s21 = ssub.s32 %s1026_s16, %s1237_s19  ;;  %p770_p6 = scmp.ge.s32.totalorder %s1034_s18, 8 }
   0xa   : > { %s1241_s20 = smov (%p34_p4, %s1239_s20), 0 }
   0xb   : > { %s36_s22 = ssub.s32 %s1030_s17, %s1241_s20  ;;  %162 = sbr.rel (%p770_p6) target bundleno = 32 (0x20), region = 20 }
   0xc   : > { %s38_s23 = sor.u32 %s37_s21, %s36_s22 }
   0xd   : > { %p39_p5 = scmp.eq.s32.totalorder %s38_s23, 0 }
   0xf   : > { %s1108_s25 = scalar_select %p39_p5, %s1014_s13, %s41_s24  }
  0x12   : > { %165 = sbr.rel (!%p50_p3) target bundleno = 32 (0x20), region = 24  ;;  %s167_s26 = sand.u32 (%p50_p3), 1, %s1014_s13  }
  0x13   : > { %s786_s27 = sshll.u32 (%p50_p3), %s1030_s17, 5  ;;  %s771_s28 = sshll.u32 (%p50_p3), %s167_s26, 7 }
  0x14   : > { %s172_s29 = sadd.s32 (%p50_p3), %s1026_s16, %s786_s27  ;;  %s169_s7 = scalar_lea.vmem (%p50_p3), [#allocation3], %s771_s28 }
  0x15   : > { %s774_s30 = sshll.u32 (%p50_p3), %s172_s29, 3 }
  0x16   : > { %s1117_s6 = scalar_lea.vmem (%p50_p3), %s1226_s0, %s774_s30 }
  0x17   : > { %v232_v0 = vld [vmem:[%s1117_s6] sm:$0xff] (%p50_p3)  ;;  %v234_v1 = vld [vmem:[%s1117_s6 + $0x10] sm:$0xff] (%p50_p3) }
  0x18   : > { %v236_v2 = vld [vmem:[%s1117_s6 + $0x20] sm:$0xff] (%p50_p3)  ;;  %233 = vst [vmem:[%s169_s7] sm:$0xff] (%p50_p3), %v232_v0  ;;  %235 = vst [vmem:[%s169_s7 + $0x8] sm:$0xff] (%p50_p3), %v234_v1  ;;  %v238_v3 = vld [vmem:[%s1117_s6 + $0x30] sm:$0xff] (%p50_p3) }
  0x19   : > { %237 = vst [vmem:[%s169_s7 + $0x10] sm:$0xff] %v236_v2  ;;  %v240_v4 = vld [vmem:[%s1117_s6 + $0x40] sm:$0xff]  ;;  %v242_v5 = vld [vmem:[%s1117_s6 + $0x50] sm:$0xff]  ;;  %239 = vst [vmem:[%s169_s7 + $0x18] sm:$0xff] %v238_v3 }
  0x1a   : > { %241 = vst [vmem:[%s169_s7 + $0x20] sm:$0xff] %v240_v4  ;;  %243 = vst [vmem:[%s169_s7 + $0x28] sm:$0xff] %v242_v5  ;;  %v244_v6 = vld [vmem:[%s1117_s6 + $0x60] sm:$0xff]  ;;  %v246_v7 = vld [vmem:[%s1117_s6 + $0x70] sm:$0xff] }
  0x1b   : > { %v248_v8 = vld [vmem:[%s1117_s6 + $0x80] sm:$0xff]  ;;  %245 = vst [vmem:[%s169_s7 + $0x30] sm:$0xff] %v244_v6  ;;  %247 = vst [vmem:[%s169_s7 + $0x38] sm:$0xff] %v246_v7  ;;  %v250_v9 = vld [vmem:[%s1117_s6 + $0x90] sm:$0xff] }
  0x1c   : > { %249 = vst [vmem:[%s169_s7 + $0x40] sm:$0xff] %v248_v8  ;;  %v252_v10 = vld [vmem:[%s1117_s6 + $0xa0] sm:$0xff]  ;;  %v254_v11 = vld [vmem:[%s1117_s6 + $0xb0] sm:$0xff]  ;;  %251 = vst [vmem:[%s169_s7 + $0x48] sm:$0xff] %v250_v9 }
  0x1d   : > { %253 = vst [vmem:[%s169_s7 + $0x50] sm:$0xff] %v252_v10  ;;  %255 = vst [vmem:[%s169_s7 + $0x58] sm:$0xff] %v254_v11  ;;  %v256_v12 = vld [vmem:[%s1117_s6 + $0xc0] sm:$0xff]  ;;  %v258_v13 = vld [vmem:[%s1117_s6 + $0xd0] sm:$0xff] }
  0x1e   : > { %v260_v14 = vld [vmem:[%s1117_s6 + $0xe0] sm:$0xff]  ;;  %257 = vst [vmem:[%s169_s7 + $0x60] sm:$0xff] %v256_v12  ;;  %259 = vst [vmem:[%s169_s7 + $0x68] sm:$0xff] %v258_v13  ;;  %v262_v15 = vld [vmem:[%s1117_s6 + $0xf0] sm:$0xff] }
  0x1f   : > { %261 = vst [vmem:[%s169_s7 + $0x70] sm:$0xff] %v260_v14  ;;  %263 = vst [vmem:[%s169_s7 + $0x78] sm:$0xff] %v262_v15 }
  0x20 PF: > { %p775_p7 = scmp.ge.s32.totalorder %s1034_s18, 1  ;;  %p280_p8 = scmp.lt.s32.totalorder %s1034_s18, 9 }
  0x22   : > { %p281_p9 = pnand %p775_p7, %p280_p8 }
  0x23   : > { %s287_s8 = sand.u32 (!%p281_p9), 1, %s1010_s12   ;;  %s777_s9 = sshll.u32 (!%p281_p9), %s1018_s14, 4 }
  0x24   : > { %284 = sbr.rel (%p281_p9) target bundleno = 327 (0x147), region = 66  ;;  %s776_s10 = sshll.u32 (!%p281_p9), %s287_s8, 7 }
  0x25   : > { %p326_p10 = scmp.lt.s32.totalorder (!%p281_p9), %s777_s9, 31  ;;  %s779_s11 = sshll.u32 (!%p281_p9), %s1022_s15, 4 }
  0x26   : > { %p338_p11 = scmp.lt.s32.totalorder (!%p281_p9), %s779_s11, 63  ;;  %s1150_s12 = scalar_lea.vmem (!%p281_p9), [#allocation3], %s776_s10 }
  0x27   : > { %p781_p12 = scmp.ne.s32.totalorder (!%p281_p9), %s1018_s14, 0 }
  0x2b   : > { %s1243_s9 = smov (!%p326_p10, %s777_s9), 31  ;;  %s1245_s11 = smov (!%p338_p11, %s779_s11), 63 }
  0x2c   : > { %s778_s21 = sshll.u32 %s1243_s9, 3  ;;  %s780_s26 = sshll.u32 %s1245_s11, 3  ;;  %v1036_v16 = vmov (!%p781_p12), 0.0  }
  0x2d   : > { %s1143_s24 = scalar_lea.vmem %s1227_s1, %s778_s21  ;;  %s1148_s29 = scalar_lea.vmem %s1229_s3, %s780_s26  ;;  %350 = vst [vmem:[#allocation2] sm:$0xff] (!%p781_p12), %v1036_v16  ;;  %351 = vst [vmem:[#allocation2 + $0x8] sm:$0xff] (!%p781_p12), %v1036_v16 }
  0x2e   : > { %349 = sbr.rel (%p781_p12) target bundleno = 53 (0x35), region = 74  ;;  %352 = vst [vmem:[#allocation2 + $0x10] sm:$0xff] (!%p781_p12), %v1036_v16  ;;  %353 = vst [vmem:[#allocation2 + $0x18] sm:$0xff] (!%p781_p12), %v1036_v16 }
  0x2f   : > { %354 = vst [vmem:[#allocation2 + $0x20] sm:$0xff] (!%p781_p12), %v1036_v16  ;;  %355 = vst [vmem:[#allocation2 + $0x28] sm:$0xff] (!%p781_p12), %v1036_v16 }
  0x30   : > { %356 = vst [vmem:[#allocation2 + $0x30] sm:$0xff] (!%p781_p12), %v1036_v16  ;;  %357 = vst [vmem:[#allocation2 + $0x38] sm:$0xff] (!%p781_p12), %v1036_v16 }
  0x31   : > { %358 = vst [vmem:[#allocation2 + $0x40] sm:$0xff] (!%p781_p12), %v1036_v16  ;;  %359 = vst [vmem:[#allocation2 + $0x48] sm:$0xff] (!%p781_p12), %v1036_v16 }
  0x32   : > { %360 = vst [vmem:[#allocation2 + $0x50] sm:$0xff] (!%p781_p12), %v1036_v16  ;;  %361 = vst [vmem:[#allocation2 + $0x58] sm:$0xff] (!%p781_p12), %v1036_v16 }
  0x33   : > { %362 = vst [vmem:[#allocation2 + $0x60] sm:$0xff] (!%p781_p12), %v1036_v16  ;;  %363 = vst [vmem:[#allocation2 + $0x68] sm:$0xff] (!%p781_p12), %v1036_v16 }
  0x34   : > { %364 = vst [vmem:[#allocation2 + $0x70] sm:$0xff] (!%p781_p12), %v1036_v16  ;;  %365 = vst [vmem:[#allocation2 + $0x78] sm:$0xff] (!%p781_p12), %v1036_v16 }
  0x35 PF: > { %v398_v17 = vld [vmem:[%s1143_s24] sm:$0xff]  ;;  %v399_v18 = vld [vmem:[%s1143_s24 + $0x8] sm:$0xff]  ;;  %v400_v19 = vld [vmem:[%s1143_s24 + $0x10] sm:$0xff]  ;;  %p782_p13 = scmp.ne.s32.totalorder %s1018_s14, 1 }
  0x36   : > { %v875_v20 = vpack.c.bf16 %v399_v18, %v398_v17  ;;  %v401_v21 = vld [vmem:[%s1143_s24 + $0x18] sm:$0xff]  ;;  %v402_v23 = vld [vmem:[%s1143_s24 + $0x20] sm:$0xff]  ;;  %v403_v24 = vld [vmem:[%s1143_s24 + $0x28] sm:$0xff] }
  0x37   : > { %v879_v22 = vpack.c.bf16 %v401_v21, %v400_v19  ;;  %v883_v25 = vpack.c.bf16 %v403_v24, %v402_v23  ;;  %v382_v26 = vld [vmem:[%s1150_s12] sm:$0xff]  ;;  %v404_v28 = vld [vmem:[%s1143_s24 + $0x30] sm:$0xff]  ;;  %v405_v29 = vld [vmem:[%s1143_s24 + $0x38] sm:$0xff] }
  0x38   : > { %876 = vmatprep.subr.bf16.mxu0 %v875_v20  ;;  %907 = vmatprep.subr.bf16.mxu1 %v875_v20  ;;  %v390_v27 = vld [vmem:[%s1150_s12 + $0x40] sm:$0xff]  ;;  %v887_v30 = vpack.c.bf16 %v405_v29, %v404_v28  ;;  %v407_v32 = vld [vmem:[%s1143_s24 + $0x48] sm:$0xff]  ;;  %v408_v34 = vld [vmem:[%s1143_s24 + $0x50] sm:$0xff] }
  0x39   : > { %878 = vmatpush3.bf16.msra.mxu0 %v875_v20  ;;  %915 = vmatpush3.bf16.msra.mxu1 %v875_v20  ;;  %v406_v31 = vld [vmem:[%s1143_s24 + $0x40] sm:$0xff]  ;;  %v409_v35 = vld [vmem:[%s1143_s24 + $0x58] sm:$0xff]  ;;  %v411_v38 = vld [vmem:[%s1143_s24 + $0x68] sm:$0xff] }
  0x3a   : > { %880 = vmatprep.subr.bf16.mxu0 %v879_v22  ;;  %908 = vmatprep.subr.bf16.mxu1 %v879_v22  ;;  %v891_v33 = vpack.c.bf16 %v407_v32, %v406_v31  ;;  %v895_v36 = vpack.c.bf16 %v409_v35, %v408_v34  ;;  %v410_v37 = vld [vmem:[%s1143_s24 + $0x60] sm:$0xff]  ;;  %v412_v40 = vld [vmem:[%s1143_s24 + $0x70] sm:$0xff]  ;;  %v413_v41 = vld [vmem:[%s1143_s24 + $0x78] sm:$0xff] }
  0x3b   : > { %851 = vmatprep.mubr.f32.mxu0 %v382_v26  ;;  %863 = vmatprep.mubr.f32.mxu1 %v390_v27  ;;  %v899_v39 = vpack.c.bf16 %v411_v38, %v410_v37  ;;  %v903_v42 = vpack.c.bf16 %v413_v41, %v412_v40  ;;  %v383_v43 = vld [vmem:[%s1150_s12 + $0x8] sm:$0xff]  ;;  %v384_v45 = vld [vmem:[%s1150_s12 + $0x10] sm:$0xff]  ;;  %v385_v47 = vld [vmem:[%s1150_s12 + $0x18] sm:$0xff] }
  0x3c   : > { %v391_v44 = vld [vmem:[%s1150_s12 + $0x48] sm:$0xff]  ;;  %v392_v46 = vld [vmem:[%s1150_s12 + $0x50] sm:$0xff]  ;;  %v393_v48 = vld [vmem:[%s1150_s12 + $0x58] sm:$0xff] }
  0x3d   : > { %882 = vmatpush3.bf16.msra.mxu0 %v879_v22  ;;  %916 = vmatpush3.bf16.msra.mxu1 %v879_v22  ;;  %v386_v49 = vld [vmem:[%s1150_s12 + $0x20] sm:$0xff]  ;;  %v387_v51 = vld [vmem:[%s1150_s12 + $0x28] sm:$0xff]  ;;  %v388_v53 = vld [vmem:[%s1150_s12 + $0x30] sm:$0xff] }
  0x3e   : > { %884 = vmatprep.subr.bf16.mxu0 %v883_v25  ;;  %909 = vmatprep.subr.bf16.mxu1 %v883_v25  ;;  %v394_v50 = vld [vmem:[%s1150_s12 + $0x60] sm:$0xff]  ;;  %v395_v52 = vld [vmem:[%s1150_s12 + $0x68] sm:$0xff]  ;;  %v396_v54 = vld [vmem:[%s1150_s12 + $0x70] sm:$0xff] }
  0x3f   : > { %v389_v55 = vld [vmem:[%s1150_s12 + $0x38] sm:$0xff]  ;;  %v367_v57 = vld [vmem:[#allocation2 + $0x8] sm:$0xff]  ;;  %v366_v59 = vld [vmem:[#allocation2] sm:$0xff] }
  0x40   : > { %v397_v56 = vld [vmem:[%s1150_s12 + $0x78] sm:$0xff]  ;;  %v375_v58 = vld [vmem:[#allocation2 + $0x48] sm:$0xff]  ;;  %v374_v60 = vld [vmem:[#allocation2 + $0x40] sm:$0xff] }
  0x41   : > { %886 = vmatpush3.bf16.msra.mxu0 %v883_v25  ;;  %917 = vmatpush3.bf16.msra.mxu1 %v883_v25  ;;  %v369_v5 = vld [vmem:[#allocation2 + $0x18] sm:$0xff]  ;;  %v368_v7 = vld [vmem:[#allocation2 + $0x10] sm:$0xff]  ;;  %v371_v17 = vld [vmem:[#allocation2 + $0x28] sm:$0xff] }
  0x42   : > { %888 = vmatprep.subr.bf16.mxu0 %v887_v30  ;;  %910 = vmatprep.subr.bf16.mxu1 %v887_v30  ;;  %v377_v6 = vld [vmem:[#allocation2 + $0x58] sm:$0xff]  ;;  %v376_v8 = vld [vmem:[#allocation2 + $0x50] sm:$0xff]  ;;  %v379_v18 = vld [vmem:[#allocation2 + $0x68] sm:$0xff] }
  0x43   : > { %v370_v19 = vld [vmem:[#allocation2 + $0x20] sm:$0xff]  ;;  %v373_v29 = vld [vmem:[#allocation2 + $0x38] sm:$0xff]  ;;  %v372_v31 = vld [vmem:[#allocation2 + $0x30] sm:$0xff] }
  0x44   : > { %v378_v20 = vld [vmem:[#allocation2 + $0x60] sm:$0xff]  ;;  %v380_v32 = vld [vmem:[#allocation2 + $0x70] sm:$0xff] }
  0x45   : > { %890 = vmatpush3.bf16.msra.mxu0 %v887_v30  ;;  %918 = vmatpush3.bf16.msra.mxu1 %v887_v30  ;;  %v381_v30 = vld [vmem:[#allocation2 + $0x78] sm:$0xff] }
  0x46   : > { %892 = vmatprep.subr.bf16.mxu0 %v891_v33  ;;  %911 = vmatprep.subr.bf16.mxu1 %v891_v33 }
  0x49   : > { %894 = vmatpush3.bf16.msra.mxu0 %v891_v33  ;;  %919 = vmatpush3.bf16.msra.mxu1 %v891_v33 }
  0x4a   : > { %896 = vmatprep.subr.bf16.mxu0 %v895_v36  ;;  %912 = vmatprep.subr.bf16.mxu1 %v895_v36 }
  0x4d   : > { %898 = vmatpush3.bf16.msra.mxu0 %v895_v36  ;;  %920 = vmatpush3.bf16.msra.mxu1 %v895_v36 }
  0x4e   : > { %900 = vmatprep.subr.bf16.mxu0 %v899_v39  ;;  %913 = vmatprep.subr.bf16.mxu1 %v899_v39 }
  0x51   : > { %902 = vmatpush3.bf16.msra.mxu0 %v899_v39  ;;  %921 = vmatpush3.bf16.msra.mxu1 %v899_v39 }
  0x52   : > { %904 = vmatprep.subr.bf16.mxu0 %v903_v42  ;;  %914 = vmatprep.subr.bf16.mxu1 %v903_v42 }
  0x55   : > { %906 = vmatpush3.bf16.msra.mxu0 %v903_v42  ;;  %922 = vmatpush3.bf16.msra.mxu1 %v903_v42  ;;  %v783_v42 = vld [vmem:[%s1228_s2] ss:$0 sm:$0xff] (!%p782_p13) }
  0x58   : > { %852 = vmatmul.mubr.f32.vlgmr.msra.gmra.mrb[0].mxu0 %v383_v43  ;;  %864 = vmatmul.mubr.f32.vlgmr.msra.gmra.mrb[0].mxu1 %v391_v44 }
  0x59   : > { %854 = vmatprep.mubr.f32.mxu0 %v384_v45  ;;  %866 = vmatprep.mubr.f32.mxu1 %v392_v46 }
  0x5c   : > { %855 = vmatmul.mubr.f32.gmra.mrb[2].mxu0 %v385_v47  ;;  %867 = vmatmul.mubr.f32.gmra.mrb[2].mxu1 %v393_v48 }
  0x5d   : > { %857 = vmatprep.mubr.f32.mxu0 %v386_v49  ;;  %869 = vmatprep.mubr.f32.mxu1 %v394_v50 }
  0x60   : > { %858 = vmatmul.mubr.f32.gmra.mrb[4].mxu0 %v387_v51  ;;  %870 = vmatmul.mubr.f32.gmra.mrb[4].mxu1 %v395_v52 }
  0x61   : > { %860 = vmatprep.mubr.f32.mxu0 %v388_v53  ;;  %872 = vmatprep.mubr.f32.mxu1 %v396_v54 }
  0x64   : > { %861 = vmatmul.mubr.f32.gmra.mrb[6].mxu0 %v389_v55  ;;  %873 = vmatmul.mubr.f32.gmra.mrb[6].mxu1 %v397_v56 }
 0x12b   : > { %v853_v61 = vpop.f32.mrb[0].mxu0  ;;  %v865_v62 = vpop.f32.mrb[0].mxu1 }
 0x12c   : > { %v560_v63 = vadd.f32 %v853_v61, %v367_v57  ;;  %v568_v0 = vadd.f32 %v865_v62, %v375_v58  ;;  %v480_v1 = vpop.f32.mrb[1].mxu0  ;;  %v520_v2 = vpop.f32.mrb[1].mxu1 }
 0x12d   : > { %v559_v3 = vadd.f32 %v480_v1, %v366_v59  ;;  %v567_v4 = vadd.f32 %v520_v2, %v374_v60 }
 0x12e   : > { %576 = vst [vmem:[#allocation2 + $0x8] sm:$0xff] %v560_v63  ;;  %584 = vst [vmem:[#allocation2 + $0x48] sm:$0xff] %v568_v0 }
 0x12f   : > { %575 = vst [vmem:[#allocation2] sm:$0xff] %v559_v3  ;;  %583 = vst [vmem:[#allocation2 + $0x40] sm:$0xff] %v567_v4  ;;  %v856_v9 = vpop.f32.mrb[2].mxu0  ;;  %v868_v10 = vpop.f32.mrb[2].mxu1 }
 0x130   : > { %v562_v11 = vadd.f32 %v856_v9, %v369_v5  ;;  %v570_v12 = vadd.f32 %v868_v10, %v377_v6  ;;  %v490_v13 = vpop.f32.mrb[3].mxu0  ;;  %v530_v14 = vpop.f32.mrb[3].mxu1 }
 0x131   : > { %v561_v15 = vadd.f32 %v490_v13, %v368_v7  ;;  %v569_v16 = vadd.f32 %v530_v14, %v376_v8 }
 0x132   : > { %578 = vst [vmem:[#allocation2 + $0x18] sm:$0xff] %v562_v11  ;;  %586 = vst [vmem:[#allocation2 + $0x58] sm:$0xff] %v570_v12 }
 0x133   : > { %577 = vst [vmem:[#allocation2 + $0x10] sm:$0xff] %v561_v15  ;;  %585 = vst [vmem:[#allocation2 + $0x50] sm:$0xff] %v569_v16  ;;  %v859_v21 = vpop.f32.mrb[4].mxu0  ;;  %v871_v22 = vpop.f32.mrb[4].mxu1 }
 0x134   : > { %v564_v23 = vadd.f32 %v859_v21, %v371_v17  ;;  %v572_v24 = vadd.f32 %v871_v22, %v379_v18  ;;  %v500_v25 = vpop.f32.mrb[5].mxu0  ;;  %v540_v26 = vpop.f32.mrb[5].mxu1 }
 0x135   : > { %v563_v27 = vadd.f32 %v500_v25, %v370_v19  ;;  %v571_v28 = vadd.f32 %v540_v26, %v378_v20  ;;  %594 = sbr.rel (%p782_p13) target bundleno = 327 (0x147), region = 78  ;;  %v596_v43 = vld [vmem:[#allocation2 + $0x8] sm:$0xff] (!%p782_p13) }
 0x136   : > { %580 = vst [vmem:[#allocation2 + $0x28] sm:$0xff] %v564_v23  ;;  %588 = vst [vmem:[#allocation2 + $0x68] sm:$0xff] %v572_v24  ;;  %v595_v41 = vld [vmem:[#allocation2] sm:$0xff] (!%p782_p13)  ;;  %v619_v45 = vadd.f32 (!%p782_p13), %v783_v42, %v596_v43  ;;  %v604_v59 = vld [vmem:[#allocation2 + $0x48] sm:$0xff] (!%p782_p13) }
 0x137   : > { %579 = vst [vmem:[#allocation2 + $0x20] sm:$0xff] %v563_v27  ;;  %587 = vst [vmem:[#allocation2 + $0x60] sm:$0xff] %v571_v28  ;;  %v862_v33 = vpop.f32.mrb[6].mxu0  ;;  %v874_v34 = vpop.f32.mrb[6].mxu1  ;;  %v618_v44 = vadd.f32 (!%p782_p13), %v783_v42, %v595_v41  ;;  %v603_v58 = vld [vmem:[#allocation2 + $0x40] sm:$0xff] (!%p782_p13)  ;;  %v627_v62 = vadd.f32 (!%p782_p13), %v783_v42, %v604_v59 }
 0x138   : > { %v566_v35 = vadd.f32 %v862_v33, %v373_v29  ;;  %v574_v36 = vadd.f32 %v874_v34, %v381_v30  ;;  %v510_v37 = vpop.f32.mrb[7].mxu0  ;;  %v550_v38 = vpop.f32.mrb[7].mxu1  ;;  %635 = vst [vmem:[%s1148_s29 + $0x8] sm:$0xff] (!%p782_p13), %v619_v45  ;;  %v626_v61 = vadd.f32 (!%p782_p13), %v783_v42, %v603_v58 }
 0x139   : > { %v565_v39 = vadd.f32 %v510_v37, %v372_v31  ;;  %v573_v40 = vadd.f32 %v550_v38, %v380_v32  ;;  %v598_v47 = vld [vmem:[#allocation2 + $0x18] sm:$0xff] (!%p782_p13)  ;;  %634 = vst [vmem:[%s1148_s29] sm:$0xff] (!%p782_p13), %v618_v44  ;;  %643 = vst [vmem:[%s1148_s29 + $0x48] sm:$0xff] (!%p782_p13), %v627_v62 }
 0x13a   : > { %582 = vst [vmem:[#allocation2 + $0x38] sm:$0xff] %v566_v35  ;;  %590 = vst [vmem:[#allocation2 + $0x78] sm:$0xff] %v574_v36  ;;  %v597_v46 = vld [vmem:[#allocation2 + $0x10] sm:$0xff] (!%p782_p13)  ;;  %v621_v50 = vadd.f32 (!%p782_p13), %v783_v42, %v598_v47  ;;  %v606_v0 = vld [vmem:[#allocation2 + $0x58] sm:$0xff] (!%p782_p13) }
 0x13b   : > { %581 = vst [vmem:[#allocation2 + $0x30] sm:$0xff] %v565_v39  ;;  %589 = vst [vmem:[#allocation2 + $0x70] sm:$0xff] %v573_v40  ;;  %v620_v49 = vadd.f32 (!%p782_p13), %v783_v42, %v597_v46  ;;  %v605_v60 = vld [vmem:[#allocation2 + $0x50] sm:$0xff] (!%p782_p13)  ;;  %v629_v3 = vadd.f32 (!%p782_p13), %v783_v42, %v606_v0 }
 0x13c   : > { %637 = vst [vmem:[%s1148_s29 + $0x18] sm:$0xff] %v621_v50  ;;  %v628_v63 = vadd.f32 %v783_v42, %v605_v60  ;;  %642 = vst [vmem:[%s1148_s29 + $0x40] sm:$0xff] %v626_v61 }
 0x13d   : > { %v600_v52 = vld [vmem:[#allocation2 + $0x28] sm:$0xff]  ;;  %636 = vst [vmem:[%s1148_s29 + $0x10] sm:$0xff] %v620_v49  ;;  %645 = vst [vmem:[%s1148_s29 + $0x58] sm:$0xff] %v629_v3 }
 0x13e   : > { %v599_v48 = vld [vmem:[#allocation2 + $0x20] sm:$0xff]  ;;  %v623_v55 = vadd.f32 %v783_v42, %v600_v52  ;;  %v608_v2 = vld [vmem:[#allocation2 + $0x68] sm:$0xff]  ;;  %644 = vst [vmem:[%s1148_s29 + $0x50] sm:$0xff] %v628_v63 }
 0x13f   : > { %v622_v51 = vadd.f32 %v783_v42, %v599_v48  ;;  %v607_v1 = vld [vmem:[#allocation2 + $0x60] sm:$0xff]  ;;  %v631_v5 = vadd.f32 %v783_v42, %v608_v2 }
 0x140   : > { %639 = vst [vmem:[%s1148_s29 + $0x28] sm:$0xff] %v623_v55  ;;  %v630_v4 = vadd.f32 %v783_v42, %v607_v1 }
 0x141   : > { %v602_v54 = vld [vmem:[#allocation2 + $0x38] sm:$0xff]  ;;  %638 = vst [vmem:[%s1148_s29 + $0x20] sm:$0xff] %v622_v51  ;;  %647 = vst [vmem:[%s1148_s29 + $0x68] sm:$0xff] %v631_v5 }
 0x142   : > { %v601_v53 = vld [vmem:[#allocation2 + $0x30] sm:$0xff]  ;;  %v625_v57 = vadd.f32 %v783_v42, %v602_v54  ;;  %v610_v7 = vld [vmem:[#allocation2 + $0x78] sm:$0xff]  ;;  %646 = vst [vmem:[%s1148_s29 + $0x60] sm:$0xff] %v630_v4 }
 0x143   : > { %v624_v56 = vadd.f32 %v783_v42, %v601_v53  ;;  %v609_v6 = vld [vmem:[#allocation2 + $0x70] sm:$0xff]  ;;  %v633_v9 = vadd.f32 %v783_v42, %v610_v7 }
 0x144   : > { %641 = vst [vmem:[%s1148_s29 + $0x38] sm:$0xff] %v625_v57  ;;  %v632_v8 = vadd.f32 %v783_v42, %v609_v6 }
 0x145   : > { %640 = vst [vmem:[%s1148_s29 + $0x30] sm:$0xff] %v624_v56  ;;  %649 = vst [vmem:[%s1148_s29 + $0x78] sm:$0xff] %v633_v9 }
 0x146   : > { %648 = vst [vmem:[%s1148_s29 + $0x70] sm:$0xff] %v632_v8 }
 0x147 PF: > { %s13_s18 = sadd.s32 1, %s1034_s18   ;;  %s1230_s12 = smov %s1014_s13 }
 0x148   : > { %p10_p0 = scmp.ge.s32.totalorder %s13_s18, 10   ;;  %s1231_s13 = smov %s1108_s25 }
 0x149   : > { %s1232_s14 = smov %s1026_s16  ;;  %s1233_s15 = smov %s1030_s17 }
 0x14a   : > { %s1234_s16 = smov %s1237_s19  ;;  %s1235_s17 = smov %s1241_s20 }
 0x14b   :  { %12 = sbr.rel (!%p10_p0) target bundleno = 4 (0x4), region = 119 }

// kernel: causal_wan_block_pallas.28
= control target key start
LH: loop header
LB: loop body
LE: loop exit
PB: predicated region body
PF: predicated region fallthrough
CT: control target
= control target key end

     0   :  { %s1335_s12 = smov 0   ;;  %s1337_s13 = smov 0   ;;  %s1669_s0 = inlined_call_operand.vmem [shape: f32[512,128], index: 0, kind: input, shape index: {}]   ;;  %s1670_s1 = inlined_call_operand.vmem [shape: f32[128,256], index: 1, kind: input, shape index: {}]   ;;  %s1671_s2 = inlined_call_operand.vmem [shape: f32[1,256], index: 2, kind: input, shape index: {}]   ;;  %s1672_s3 = inlined_call_operand.vmem [shape: f32[512,256], index: 3, kind: output, shape index: {}]  }
   0x1   :  { %s1339_s14 = smov 0   ;;  %s1341_s15 = smov 0  }
   0x2   :  { %s1343_s16 = smov 0   ;;  %s1345_s17 = smov 0  }
   0x3   :  { %s1347_s18 = smov 0   ;;  %s1349_s19 = smov 0  }
   0x4   :  { %s1351_s20 = smov 0  }
   0x5 LB: > { %s984_s21 = sadd.s32 4294967295, %s1313_s20   ;;  %s28_s22 = sadd.s32 1, %s1305_s18  ;;  %s1313_s20 = sphi %s1351_s20, %s13_s20   ;;  %s1309_s19 = sphi %s1349_s19, %s1681_s19   ;;  %s1305_s18 = sphi %s1347_s18, %s1680_s18   ;;  %s1301_s17 = sphi %s1345_s17, %s1679_s17   ;;  %s1297_s16 = sphi %s1343_s16, %s1678_s16   ;;  %s1293_s15 = sphi %s1341_s15, %s1677_s15   ;;  %s1289_s14 = sphi %s1339_s14, %s1676_s14   ;;  %s1285_s13 = sphi %s1337_s13, %s1675_s13   ;;  %s1281_s12 = sphi %s1335_s12, %s1674_s12  }
   0x6   : > { %p30_p0 = scmp.ge.s32.totalorder %s28_s22, 2  ;;  %s32_s23 = sadd.s32 1, %s1309_s19 }
   0x7   : > { %s69_s24 = sadd.s32 1, %s1293_s15  ;;  %p76_p1 = scmp.ne.s32.totalorder %s1293_s15, %s1289_s14 }
   0x8   : > { %s1683_s22 = smov (%p30_p0, %s28_s22), 0  ;;  %s1685_s23 = smov (!%p30_p0, %s32_s23), %s1309_s19 }
   0x9   : > { %s65_s25 = ssub.s32 %s1305_s18, %s1683_s22  ;;  %p77_p2 = scmp.eq.s32.totalorder %s1313_s20, 0 }
   0xa   : > { %p34_p3 = scmp.ge.s32.totalorder %s1685_s23, 4  ;;  %p67_p4 = scmp.eq.s32.totalorder %s65_s25, 0 }
   0xb   : > { %p78_p5 = por %p77_p2, %p76_p1  ;;  %s123_s26 = sadd.s32 1, %s1285_s13 }
   0xc   : > { %s1687_s23 = smov (%p34_p3, %s1685_s23), 0  ;;  %p133_p6 = scmp.ne.s32.totalorder %s1285_s13, %s1281_s12 }
   0xd   : > { %s1396_s27 = scalar_select %p67_p4, %s1293_s15, %s69_s24  }
   0xe   : > { %s118_s28 = ssub.s32 %s1309_s19, %s1687_s23  ;;  %p134_p7 = scmp.eq.s32.totalorder %s984_s21, 7 }
   0xf   : > { %s120_s29 = sor.u32 %s118_s28, %s65_s25  ;;  %p987_p10 = scmp.ge.s32.totalorder %s1313_s20, 8 }
  0x10   : > { %p121_p8 = scmp.eq.s32.totalorder %s120_s29, 0  ;;  %p1402_p9 = por %p134_p7, %p133_p6 }
  0x11   : > { %156 = sbr.rel (%p987_p10) target bundleno = 36 (0x24), region = 16 }
  0x12   : > { %s1407_s4 = scalar_select %p121_p8, %s1285_s13, %s123_s26  }
  0x18   : > { %171 = sbr.rel (!%p78_p5) target bundleno = 36 (0x24), region = 24  ;;  %s173_s5 = sand.u32 (%p78_p5), 1, %s1293_s15  }
  0x19   : > { %s989_s6 = sshll.u32 (%p78_p5), %s1305_s18, 3  ;;  %s988_s7 = sshll.u32 (%p78_p5), %s173_s5, 7 }
  0x1a   : > { %s1415_s10 = scalar_lea.vmem (%p78_p5), %s1670_s1, %s989_s6  ;;  %s175_s11 = scalar_lea.vmem (%p78_p5), [#allocation3], %s988_s7 }
  0x1b   : > { %v238_v0 = vld [vmem:[%s1415_s10] sm:$0xff] (%p78_p5)  ;;  %v240_v1 = vld [vmem:[%s1415_s10 + $0x10] sm:$0xff] (%p78_p5) }
  0x1c   : > { %v242_v2 = vld [vmem:[%s1415_s10 + $0x20] sm:$0xff] (%p78_p5)  ;;  %239 = vst [vmem:[%s175_s11] sm:$0xff] (%p78_p5), %v238_v0  ;;  %241 = vst [vmem:[%s175_s11 + $0x8] sm:$0xff] (%p78_p5), %v240_v1  ;;  %v244_v3 = vld [vmem:[%s1415_s10 + $0x30] sm:$0xff] (%p78_p5) }
  0x1d   : > { %243 = vst [vmem:[%s175_s11 + $0x10] sm:$0xff] (%p78_p5), %v242_v2  ;;  %v246_v4 = vld [vmem:[%s1415_s10 + $0x40] sm:$0xff] (%p78_p5)  ;;  %v248_v5 = vld [vmem:[%s1415_s10 + $0x50] sm:$0xff] (%p78_p5)  ;;  %245 = vst [vmem:[%s175_s11 + $0x18] sm:$0xff] (%p78_p5), %v244_v3 }
  0x1e   : > { %247 = vst [vmem:[%s175_s11 + $0x20] sm:$0xff] (%p78_p5), %v246_v4  ;;  %249 = vst [vmem:[%s175_s11 + $0x28] sm:$0xff] (%p78_p5), %v248_v5  ;;  %v250_v6 = vld [vmem:[%s1415_s10 + $0x60] sm:$0xff] (%p78_p5)  ;;  %v252_v7 = vld [vmem:[%s1415_s10 + $0x70] sm:$0xff] (%p78_p5) }
  0x1f   : > { %v254_v8 = vld [vmem:[%s1415_s10 + $0x80] sm:$0xff]  ;;  %251 = vst [vmem:[%s175_s11 + $0x30] sm:$0xff] %v250_v6  ;;  %253 = vst [vmem:[%s175_s11 + $0x38] sm:$0xff] %v252_v7  ;;  %v256_v9 = vld [vmem:[%s1415_s10 + $0x90] sm:$0xff] }
  0x20   : > { %255 = vst [vmem:[%s175_s11 + $0x40] sm:$0xff] %v254_v8  ;;  %v258_v10 = vld [vmem:[%s1415_s10 + $0xa0] sm:$0xff]  ;;  %v260_v11 = vld [vmem:[%s1415_s10 + $0xb0] sm:$0xff]  ;;  %257 = vst [vmem:[%s175_s11 + $0x48] sm:$0xff] %v256_v9 }
  0x21   : > { %259 = vst [vmem:[%s175_s11 + $0x50] sm:$0xff] %v258_v10  ;;  %261 = vst [vmem:[%s175_s11 + $0x58] sm:$0xff] %v260_v11  ;;  %v262_v12 = vld [vmem:[%s1415_s10 + $0xc0] sm:$0xff]  ;;  %v264_v13 = vld [vmem:[%s1415_s10 + $0xd0] sm:$0xff] }
  0x22   : > { %v266_v14 = vld [vmem:[%s1415_s10 + $0xe0] sm:$0xff]  ;;  %263 = vst [vmem:[%s175_s11 + $0x60] sm:$0xff] %v262_v12  ;;  %265 = vst [vmem:[%s175_s11 + $0x68] sm:$0xff] %v264_v13  ;;  %v268_v15 = vld [vmem:[%s1415_s10 + $0xf0] sm:$0xff] }
  0x23   : > { %267 = vst [vmem:[%s175_s11 + $0x70] sm:$0xff] %v266_v14  ;;  %269 = vst [vmem:[%s175_s11 + $0x78] sm:$0xff] %v268_v15 }
  0x24 PF: > { %p990_p11 = scmp.ge.s32.totalorder %s1313_s20, 1  ;;  %p280_p12 = scmp.lt.s32.totalorder %s1313_s20, 9 }
  0x26   : > { %p281_p13 = pnand %p990_p11, %p280_p12 }
  0x27   : > { %s287_s21 = sand.u32 (!%p281_p13), 1, %s1289_s14   ;;  %s993_s24 = sshll.u32 (!%p281_p13), %s1301_s17, 4 }
  0x28   : > { %284 = sbr.rel (%p281_p13) target bundleno = 353 (0x161), region = 66  ;;  %s991_s25 = sshll.u32 (!%p281_p13), %s287_s21, 7 }
  0x29   : > { %p321_p0 = scmp.lt.s32.totalorder (!%p281_p13), %s993_s24, 63  ;;  %s1437_s26 = scalar_lea.vmem (!%p281_p13), [#allocation3], %s991_s25 }
  0x2a   : > { %v386_v16 = vld [vmem:[%s1437_s26] sm:$0xff] (!%p281_p13)  ;;  %v387_v17 = vld [vmem:[%s1437_s26 + $0x8] sm:$0xff] (!%p281_p13)  ;;  %v388_v18 = vld [vmem:[%s1437_s26 + $0x10] sm:$0xff] (!%p281_p13)  ;;  %p330_p1 = scmp.lt.s32.totalorder (!%p281_p13), %s1297_s16, 1  ;;  %s317_s10 = sand.u32 (!%p281_p13), 1, %s1281_s12  }
  0x2b   : > { %v1091_v19 = vpack.c.bf16 (!%p281_p13), %v387_v17, %v386_v16  ;;  %v389_v20 = vld [vmem:[%s1437_s26 + $0x18] sm:$0xff] (!%p281_p13)  ;;  %v390_v22 = vld [vmem:[%s1437_s26 + $0x20] sm:$0xff] (!%p281_p13)  ;;  %v391_v23 = vld [vmem:[%s1437_s26 + $0x28] sm:$0xff] (!%p281_p13)  ;;  %s992_s12 = sshll.u32 (!%p281_p13), %s317_s10, 7 }
  0x2c   : > { %v1095_v21 = vpack.c.bf16 (!%p281_p13), %v389_v20, %v388_v18  ;;  %v1099_v24 = vpack.c.bf16 (!%p281_p13), %v391_v23, %v390_v22  ;;  %v392_v27 = vld [vmem:[%s1437_s26 + $0x30] sm:$0xff] (!%p281_p13)  ;;  %v393_v28 = vld [vmem:[%s1437_s26 + $0x38] sm:$0xff] (!%p281_p13)  ;;  %v394_v30 = vld [vmem:[%s1437_s26 + $0x40] sm:$0xff] (!%p281_p13)  ;;  %s1571_s11 = scalar_lea.vmem (!%p281_p13), [#allocation4], %s992_s12 }
  0x2d   : > { %1092 = vmatprep.subr.bf16.mxu0 (!%p281_p13), %v1091_v19  ;;  %1123 = vmatprep.subr.bf16.mxu1 (!%p281_p13), %v1091_v19  ;;  %v1103_v29 = vpack.c.bf16 (!%p281_p13), %v393_v28, %v392_v27  ;;  %v395_v31 = vld [vmem:[%s1437_s26 + $0x48] sm:$0xff] (!%p281_p13)  ;;  %v396_v33 = vld [vmem:[%s1437_s26 + $0x50] sm:$0xff] (!%p281_p13)  ;;  %v397_v34 = vld [vmem:[%s1437_s26 + $0x58] sm:$0xff] (!%p281_p13) }
  0x2e   : > { %1094 = vmatpush3.bf16.msra.mxu0 (!%p281_p13), %v1091_v19  ;;  %1131 = vmatpush3.bf16.msra.mxu1 (!%p281_p13), %v1091_v19  ;;  %v1107_v32 = vpack.c.bf16 (!%p281_p13), %v395_v31, %v394_v30  ;;  %v1111_v35 = vpack.c.bf16 (!%p281_p13), %v397_v34, %v396_v33  ;;  %v398_v36 = vld [vmem:[%s1437_s26 + $0x60] sm:$0xff] (!%p281_p13)  ;;  %v399_v37 = vld [vmem:[%s1437_s26 + $0x68] sm:$0xff] (!%p281_p13)  ;;  %v400_v39 = vld [vmem:[%s1437_s26 + $0x70] sm:$0xff] (!%p281_p13) }
  0x2f   : > { %s1689_s24 = smov (!%p321_p0, %s993_s24), 63  ;;  %1096 = vmatprep.subr.bf16.mxu0 %v1095_v21  ;;  %1124 = vmatprep.subr.bf16.mxu1 %v1095_v21  ;;  %v1115_v38 = vpack.c.bf16 %v399_v37, %v398_v36  ;;  %v401_v40 = vld [vmem:[%s1437_s26 + $0x78] sm:$0xff]  ;;  %s1002_s21 = sshll.u32 (%p1402_p9), %s1301_s17, 5 }
  0x30   : > { %s994_s14 = sshll.u32 %s1689_s24, 3  ;;  %v1119_v41 = vpack.c.bf16 %v401_v40, %v400_v39  ;;  %s790_s30 = sadd.s32 (%p1402_p9), %s1297_s16, %s1002_s21 }
  0x31   : > { %s1448_s5 = scalar_lea.vmem %s1669_s0, %s994_s14  ;;  %s999_s24 = sshll.u32 (%p1402_p9), %s790_s30, 3 }
  0x32   : > { %v370_v25 = vld [vmem:[%s1448_s5] sm:$0xff]  ;;  %1098 = vmatpush3.bf16.msra.mxu0 %v1095_v21  ;;  %1132 = vmatpush3.bf16.msra.mxu1 %v1095_v21  ;;  %v371_v42 = vld [vmem:[%s1448_s5 + $0x8] sm:$0xff]  ;;  %v372_v44 = vld [vmem:[%s1448_s5 + $0x10] sm:$0xff]  ;;  %s331_s6 = scalar_select %p330_p1, %s1297_s16, 1 }
  0x33   : > { %v378_v26 = vld [vmem:[%s1448_s5 + $0x40] sm:$0xff]  ;;  %1067 = vmatprep.mubr.f32.mxu0 %v370_v25  ;;  %1100 = vmatprep.subr.bf16.mxu0 %v1099_v24  ;;  %v379_v43 = vld [vmem:[%s1448_s5 + $0x48] sm:$0xff]  ;;  %v380_v45 = vld [vmem:[%s1448_s5 + $0x50] sm:$0xff]  ;;  %s792_s14 = scalar_lea.vmem (%p1402_p9), %s1672_s3, %s999_s24 }
  0x34   : > { %1079 = vmatprep.mubr.f32.mxu1 %v378_v26  ;;  %1125 = vmatprep.subr.bf16.mxu1 %v1099_v24  ;;  %v373_v46 = vld [vmem:[%s1448_s5 + $0x18] sm:$0xff]  ;;  %v374_v48 = vld [vmem:[%s1448_s5 + $0x20] sm:$0xff]  ;;  %v375_v50 = vld [vmem:[%s1448_s5 + $0x28] sm:$0xff]  ;;  %s332_s9 = scalar_lea.vmem %s1671_s2, %s331_s6 }
  0x35   : > { %v381_v47 = vld [vmem:[%s1448_s5 + $0x58] sm:$0xff]  ;;  %v382_v49 = vld [vmem:[%s1448_s5 + $0x60] sm:$0xff]  ;;  %v383_v51 = vld [vmem:[%s1448_s5 + $0x68] sm:$0xff] }
  0x36   : > { %1102 = vmatpush3.bf16.msra.mxu0 %v1099_v24  ;;  %1133 = vmatpush3.bf16.msra.mxu1 %v1099_v24  ;;  %v376_v52 = vld [vmem:[%s1448_s5 + $0x30] sm:$0xff]  ;;  %v377_v54 = vld [vmem:[%s1448_s5 + $0x38] sm:$0xff]  ;;  %v1481_v56 = vld [vmem:[%s332_s9] ss:$0 sm:$0xff] }
  0x37   : > { %1104 = vmatprep.subr.bf16.mxu0 %v1103_v29  ;;  %1126 = vmatprep.subr.bf16.mxu1 %v1103_v29  ;;  %v384_v53 = vld [vmem:[%s1448_s5 + $0x70] sm:$0xff]  ;;  %v385_v55 = vld [vmem:[%s1448_s5 + $0x78] sm:$0xff] }
  0x3a   : > { %1106 = vmatpush3.bf16.msra.mxu0 %v1103_v29  ;;  %1134 = vmatpush3.bf16.msra.mxu1 %v1103_v29 }
  0x3b   : > { %1108 = vmatprep.subr.bf16.mxu0 %v1107_v32  ;;  %1127 = vmatprep.subr.bf16.mxu1 %v1107_v32 }
  0x3e   : > { %1110 = vmatpush3.bf16.msra.mxu0 %v1107_v32  ;;  %1135 = vmatpush3.bf16.msra.mxu1 %v1107_v32 }
  0x3f   : > { %1112 = vmatprep.subr.bf16.mxu0 %v1111_v35  ;;  %1128 = vmatprep.subr.bf16.mxu1 %v1111_v35 }
  0x42   : > { %1114 = vmatpush3.bf16.msra.mxu0 %v1111_v35  ;;  %1136 = vmatpush3.bf16.msra.mxu1 %v1111_v35 }
  0x43   : > { %1116 = vmatprep.subr.bf16.mxu0 %v1115_v38  ;;  %1129 = vmatprep.subr.bf16.mxu1 %v1115_v38 }
  0x46   : > { %1118 = vmatpush3.bf16.msra.mxu0 %v1115_v38  ;;  %1137 = vmatpush3.bf16.msra.mxu1 %v1115_v38 }
  0x47   : > { %1120 = vmatprep.subr.bf16.mxu0 %v1119_v41  ;;  %1130 = vmatprep.subr.bf16.mxu1 %v1119_v41 }
  0x4a   : > { %1122 = vmatpush3.bf16.msra.mxu0 %v1119_v41  ;;  %1138 = vmatpush3.bf16.msra.mxu1 %v1119_v41 }
  0x4d   : > { %1068 = vmatmul.mubr.f32.vlgmr.msra.gmra.mrb[0].mxu0 %v371_v42  ;;  %1080 = vmatmul.mubr.f32.vlgmr.msra.gmra.mrb[0].mxu1 %v379_v43 }
  0x4e   : > { %1070 = vmatprep.mubr.f32.mxu0 %v372_v44  ;;  %1082 = vmatprep.mubr.f32.mxu1 %v380_v45 }
  0x51   : > { %1071 = vmatmul.mubr.f32.gmra.mrb[2].mxu0 %v373_v46  ;;  %1083 = vmatmul.mubr.f32.gmra.mrb[2].mxu1 %v381_v47 }
  0x52   : > { %1073 = vmatprep.mubr.f32.mxu0 %v374_v48  ;;  %1085 = vmatprep.mubr.f32.mxu1 %v382_v49 }
  0x55   : > { %1074 = vmatmul.mubr.f32.gmra.mrb[4].mxu0 %v375_v50  ;;  %1086 = vmatmul.mubr.f32.gmra.mrb[4].mxu1 %v383_v51 }
  0x56   : > { %1076 = vmatprep.mubr.f32.mxu0 %v376_v52  ;;  %1088 = vmatprep.mubr.f32.mxu1 %v384_v53 }
  0x59   : > { %1077 = vmatmul.mubr.f32.gmra.mrb[6].mxu0 %v377_v54  ;;  %1089 = vmatmul.mubr.f32.gmra.mrb[6].mxu1 %v385_v55 }
 0x120   : > { %v1069_v57 = vpop.f32.mrb[0].mxu0  ;;  %v1081_v58 = vpop.f32.mrb[0].mxu1 }
 0x121   : > { %v606_v59 = vadd.f32 %v1069_v57, %v1481_v56  ;;  %v614_v60 = vadd.f32 %v1081_v58, %v1481_v56  ;;  %v468_v61 = vpop.f32.mrb[1].mxu0  ;;  %v508_v62 = vpop.f32.mrb[1].mxu1 }
 0x122   : > { %v1486_v63 = vadd.f32 %v1481_v56, %v468_v61  ;;  %v1489_v0 = vadd.f32 %v1481_v56, %v508_v62 }
 0x123   : > { %v638_v1 = vmul.f32 0.044715, %v606_v59  ;;  %v646_v2 = vmul.f32 0.044715, %v614_v60  ;;  %v622_v52 = vmul.f32 0.5, %v606_v59  ;;  %v630_v55 = vmul.f32 0.5, %v614_v60 }
 0x124   : > { %v637_v3 = vmul.f32 0.044715, %v1486_v63  ;;  %v645_v4 = vmul.f32 0.044715, %v1489_v0  ;;  %v1072_v7 = vpop.f32.mrb[2].mxu0  ;;  %v1084_v8 = vpop.f32.mrb[2].mxu1 }
 0x125   : > { %v654_v5 = vmul.f32 %v638_v1, %v606_v59  ;;  %v662_v6 = vmul.f32 %v646_v2, %v614_v60  ;;  %v1496_v11 = vadd.f32 %v1072_v7, %v1481_v56  ;;  %v1499_v12 = vadd.f32 %v1084_v8, %v1481_v56  ;;  %v478_v13 = vpop.f32.mrb[3].mxu0  ;;  %v518_v14 = vpop.f32.mrb[3].mxu1 }
 0x126   : > { %v653_v9 = vmul.f32 %v637_v3, %v1486_v63  ;;  %v661_v10 = vmul.f32 %v645_v4, %v1489_v0  ;;  %v1502_v17 = vadd.f32 %v1481_v56, %v478_v13  ;;  %v1509_v26 = vadd.f32 %v1481_v56, %v518_v14 }
 0x127   : > { %v670_v15 = vmul.f32 %v654_v5, %v606_v59  ;;  %v678_v16 = vmul.f32 %v662_v6, %v614_v60  ;;  %v640_v20 = vmul.f32 0.044715, %v1496_v11  ;;  %v648_v25 = vmul.f32 0.044715, %v1499_v12 }
 0x128   : > { %v669_v18 = vmul.f32 %v653_v9, %v1486_v63  ;;  %v677_v19 = vmul.f32 %v661_v10, %v1489_v0  ;;  %v1075_v21 = vpop.f32.mrb[4].mxu0  ;;  %v1087_v22 = vpop.f32.mrb[4].mxu1  ;;  %v639_v35 = vmul.f32 0.044715, %v1502_v17  ;;  %v647_v42 = vmul.f32 0.044715, %v1509_v26 }
 0x129   : > { %v686_v23 = vadd.f32 %v670_v15, %v606_v59  ;;  %v694_v24 = vadd.f32 %v678_v16, %v614_v60  ;;  %v488_v27 = vpop.f32.mrb[5].mxu0  ;;  %v528_v28 = vpop.f32.mrb[5].mxu1  ;;  %v656_v31 = vmul.f32 %v640_v20, %v1496_v11  ;;  %v664_v34 = vmul.f32 %v648_v25, %v1499_v12 }
 0x12a   : > { %v685_v29 = vadd.f32 %v669_v18, %v1486_v63  ;;  %v693_v30 = vadd.f32 %v677_v19, %v1489_v0  ;;  %v655_v41 = vmul.f32 %v639_v35, %v1502_v17  ;;  %v1522_v46 = vadd.f32 %v1075_v21, %v1481_v56 }
 0x12b   : > { %v702_v32 = vmul.f32 0.7978846, %v686_v23  ;;  %v710_v33 = vmul.f32 0.7978846, %v694_v24  ;;  %v672_v38 = vmul.f32 %v656_v31, %v1496_v11  ;;  %v680_v40 = vmul.f32 %v664_v34, %v1499_v12 }
 0x12c   : > { %v701_v36 = vmul.f32 0.7978846, %v685_v29  ;;  %v709_v37 = vmul.f32 0.7978846, %v693_v30  ;;  %v1078_v39 = vpop.f32.mrb[6].mxu0  ;;  %v1090_v43 = vpop.f32.mrb[6].mxu1  ;;  %v1525_v47 = vadd.f32 %v1087_v22, %v1481_v56  ;;  %v671_v50 = vmul.f32 %v655_v41, %v1502_v17 }
 0x12d   : > { %1211 = vtanh.f32 %v702_v32  ;;  %v498_v44 = vpop.f32.mrb[7].mxu0  ;;  %v688_v45 = vadd.f32 %v672_v38, %v1496_v11  ;;  %v1527_v48 = vpop.f32.mrb[7].mxu1  ;;  %v696_v49 = vadd.f32 %v680_v40, %v1499_v12  ;;  %v663_v51 = vmul.f32 %v647_v42, %v1509_v26 }
 0x12e   : > { %1213 = vtanh.f32 %v710_v33  ;;  %v642_v54 = vmul.f32 0.044715, %v1522_v46  ;;  %v687_v58 = vadd.f32 %v671_v50, %v1502_v17  ;;  %v650_v1 = vmul.f32 0.044715, %v1525_v47 }
 0x12f   : > { %1215 = vtanh.f32 %v701_v36  ;;  %v704_v53 = vmul.f32 0.7978846, %v688_v45  ;;  %v712_v57 = vmul.f32 0.7978846, %v696_v49  ;;  %v679_v61 = vmul.f32 %v663_v51, %v1509_v26 }
 0x130   : > { %1217 = vtanh.f32 %v709_v37  ;;  %v658_v62 = vmul.f32 %v642_v54, %v1522_v46  ;;  %v1538_v2 = vadd.f32 %v1481_v56, %v488_v27  ;;  %v703_v59 = vmul.f32 0.7978846, %v687_v58 }
 0x131   : > { %1219 = vtanh.f32 %v704_v53  ;;  %v695_v3 = vadd.f32 %v679_v61, %v1509_v26  ;;  %v1543_v60 = vadd.f32 %v1481_v56, %v528_v28  ;;  %v621_v4 = vmul.f32 0.5, %v1486_v63 }
 0x132   : > { %1221 = vtanh.f32 %v712_v57  ;;  %v674_v5 = vmul.f32 %v658_v62, %v1522_v46  ;;  %v666_v6 = vmul.f32 %v650_v1, %v1525_v47  ;;  %v641_v7 = vmul.f32 0.044715, %v1538_v2 }
 0x133   : > { %v629_v8 = vmul.f32 0.5, %v1489_v0  ;;  %1223 = vtanh.f32 %v703_v59  ;;  %v711_v9 = vmul.f32 0.7978846, %v695_v3  ;;  %v649_v10 = vmul.f32 0.044715, %v1543_v60 }
 0x134   : > { %v690_v13 = vadd.f32 %v674_v5, %v1522_v46  ;;  %v682_v14 = vmul.f32 %v666_v6, %v1525_v47  ;;  %v657_v15 = vmul.f32 %v641_v7, %v1538_v2  ;;  %v1555_v63 = vadd.f32 %v1078_v39, %v1481_v56 }
 0x135   : > { %v624_v18 = vmul.f32 0.5, %v1496_v11  ;;  %1225 = vtanh.f32 %v711_v9  ;;  %v665_v0 = vmul.f32 %v649_v10, %v1543_v60  ;;  %v1560_v19 = vadd.f32 %v1090_v43, %v1481_v56 }
 0x136   : > { %v706_v22 = vmul.f32 0.7978846, %v690_v13  ;;  %v698_v23 = vadd.f32 %v682_v14, %v1525_v47  ;;  %v673_v24 = vmul.f32 %v657_v15, %v1538_v2  ;;  %v644_v29 = vmul.f32 0.044715, %v1555_v63 }
 0x137   : > { %v1212_v16 = vpop.eup %1211  ;;  %v681_v28 = vmul.f32 %v665_v0, %v1543_v60  ;;  %v1567_v11 = vadd.f32 %v1481_v56, %v498_v44  ;;  %v632_v40 = vmul.f32 0.5, %v1499_v12  ;;  %v623_v51 = vmul.f32 0.5, %v1502_v17 }
 0x138   : > { %v1214_v20 = vpop.eup %1213  ;;  %v734_v21 = vadd.f32 1.0, %v1212_v16  ;;  %1227 = vtanh.f32 %v706_v22  ;;  %v714_v33 = vmul.f32 0.7978846, %v698_v23  ;;  %v689_v36 = vadd.f32 %v673_v24, %v1538_v2 }
 0x139   : > { %v1216_v25 = vpop.eup %1215  ;;  %v742_v27 = vadd.f32 1.0, %v1214_v20  ;;  %v697_v37 = vadd.f32 %v681_v28, %v1543_v60  ;;  %v660_v41 = vmul.f32 %v644_v29, %v1555_v63  ;;  %v652_v53 = vmul.f32 0.044715, %v1560_v19 }
 0x13a   : > { %v1218_v30 = vpop.eup %1217  ;;  %v750_v31 = vmul.f32 %v734_v21, %v622_v52  ;;  %v733_v32 = vadd.f32 1.0, %v1216_v25  ;;  %1229 = vtanh.f32 %v714_v33  ;;  %v705_v45 = vmul.f32 0.7978846, %v689_v36 }
 0x13b   : > { %v758_v34 = vmul.f32 %v742_v27, %v630_v55  ;;  %v741_v35 = vadd.f32 1.0, %v1218_v30  ;;  %v1220_v38 = vpop.eup %1219  ;;  %v713_v49 = vmul.f32 0.7978846, %v697_v37  ;;  %v676_v52 = vmul.f32 %v660_v41, %v1555_v63 }
 0x13c   : > { %766 = vst [vmem:[%s1571_s11 + $0x8] sm:$0xff] %v750_v31  ;;  %v749_v39 = vmul.f32 %v733_v32, %v621_v4  ;;  %v1222_v42 = vpop.eup %1221  ;;  %v736_v44 = vadd.f32 1.0, %v1220_v38  ;;  %1231 = vtanh.f32 %v705_v45  ;;  %v643_v55 = vmul.f32 0.044715, %v1567_v11 }
 0x13d   : > { %774 = vst [vmem:[%s1571_s11 + $0x48] sm:$0xff] %v758_v34  ;;  %v757_v43 = vmul.f32 %v741_v35, %v629_v8  ;;  %v744_v50 = vadd.f32 1.0, %v1222_v42  ;;  %v1224_v12 = vpop.eup %1223  ;;  %v1585_v57 = vadd.f32 %v1481_v56, %v1527_v48  ;;  %1233 = vtanh.f32 %v713_v49 }
 0x13e   : > { %765 = vst [vmem:[%s1571_s11] sm:$0xff] %v749_v39  ;;  %v752_v54 = vmul.f32 %v736_v44, %v624_v18  ;;  %v735_v61 = vadd.f32 1.0, %v1224_v12  ;;  %v692_v17 = vadd.f32 %v676_v52, %v1555_v63  ;;  %v668_v1 = vmul.f32 %v652_v53, %v1560_v19 }
 0x13f   : > { %773 = vst [vmem:[%s1571_s11 + $0x40] sm:$0xff] %v757_v43  ;;  %v760_v58 = vmul.f32 %v744_v50, %v632_v40  ;;  %v1226_v62 = vpop.eup %1225  ;;  %v659_v59 = vmul.f32 %v643_v55, %v1567_v11  ;;  %v651_v3 = vmul.f32 0.044715, %v1585_v57  ;;  %v631_v5 = vmul.f32 0.5, %v1509_v26 }
 0x140   : > { %768 = vst [vmem:[%s1571_s11 + $0x18] sm:$0xff] %v752_v54  ;;  %v751_v4 = vmul.f32 %v735_v61, %v623_v51  ;;  %v743_v56 = vadd.f32 1.0, %v1226_v62  ;;  %v708_v48 = vmul.f32 0.7978846, %v692_v17  ;;  %v684_v6 = vmul.f32 %v668_v1, %v1560_v19 }
 0x141   : > { %776 = vst [vmem:[%s1571_s11 + $0x58] sm:$0xff] %v760_v58  ;;  %v675_v7 = vmul.f32 %v659_v59, %v1567_v11  ;;  %v667_v8 = vmul.f32 %v651_v3, %v1585_v57  ;;  %v626_v13 = vmul.f32 0.5, %v1522_v46  ;;  %v634_v0 = vmul.f32 0.5, %v1525_v47 }
 0x142   : > { %v1228_v9 = vpop.eup %1227  ;;  %767 = vst [vmem:[%s1571_s11 + $0x10] sm:$0xff] %v751_v4  ;;  %v759_v10 = vmul.f32 %v743_v56, %v631_v5  ;;  %1235 = vtanh.f32 %v708_v48  ;;  %v700_v15 = vadd.f32 %v684_v6, %v1560_v19  ;;  %v625_v28 = vmul.f32 0.5, %v1538_v2 }
 0x143   : > { %v738_v14 = vadd.f32 1.0, %v1228_v9  ;;  %v691_v26 = vadd.f32 %v675_v7, %v1567_v11  ;;  %v683_v16 = vmul.f32 %v667_v8, %v1585_v57  ;;  %v633_v47 = vmul.f32 0.5, %v1543_v60 }
 0x144   : > { %v1230_v18 = vpop.eup %1229  ;;  %775 = vst [vmem:[%s1571_s11 + $0x50] sm:$0xff] %v759_v10  ;;  %v716_v22 = vmul.f32 0.7978846, %v700_v15  ;;  %v628_v35 = vmul.f32 0.5, %v1555_v63  ;;  %v636_v39 = vmul.f32 0.5, %v1560_v19  ;;  %v627_v40 = vmul.f32 0.5, %v1567_v11 }
 0x145   : > { %v754_v20 = vmul.f32 %v738_v14, %v626_v13  ;;  %v746_v21 = vadd.f32 1.0, %v1230_v18  ;;  %v707_v23 = vmul.f32 0.7978846, %v691_v26  ;;  %v699_v24 = vadd.f32 %v683_v16, %v1585_v57  ;;  %v850_v19 = vld [vmem:[%s1571_s11] sm:$0xff] (%p1402_p9)  ;;  %v852_v11 = vld [vmem:[%s1571_s11 + $0x8] sm:$0xff] (%p1402_p9) }
 0x146   : > { %v1232_v46 = vpop.eup %1231  ;;  %1237 = vtanh.f32 %v716_v22  ;;  %v635_v45 = vmul.f32 0.5, %v1585_v57  ;;  %v866_v55 = vld [vmem:[%s1571_s11 + $0x40] sm:$0xff] (%p1402_p9)  ;;  %v868_v57 = vld [vmem:[%s1571_s11 + $0x48] sm:$0xff] (%p1402_p9)  ;;  %851 = vst [vmem:[%s792_s14] sm:$0xff] (%p1402_p9), %v850_v19  ;;  %853 = vst [vmem:[%s792_s14 + $0x10] sm:$0xff] (%p1402_p9), %v852_v11 }
 0x147   : > { %770 = vst [vmem:[%s1571_s11 + $0x28] sm:$0xff] %v754_v20  ;;  %v762_v25 = vmul.f32 %v746_v21, %v634_v0  ;;  %v1234_v27 = vpop.eup %1233  ;;  %v737_v29 = vadd.f32 1.0, %v1232_v46  ;;  %1239 = vtanh.f32 %v707_v23  ;;  %v715_v30 = vmul.f32 0.7978846, %v699_v24  ;;  %v856_v51 = vld [vmem:[%s1571_s11 + $0x18] sm:$0xff] (%p1402_p9)  ;;  %867 = vst [vmem:[%s792_s14 + $0x80] sm:$0xff] (%p1402_p9), %v866_v55 }
 0x148   : > { %v745_v31 = vadd.f32 1.0, %v1234_v27  ;;  %v872_v61 = vld [vmem:[%s1571_s11 + $0x58] sm:$0xff] (%p1402_p9)  ;;  %857 = vst [vmem:[%s792_s14 + $0x30] sm:$0xff] (%p1402_p9), %v856_v51  ;;  %869 = vst [vmem:[%s792_s14 + $0x90] sm:$0xff] (%p1402_p9), %v868_v57 }
 0x149   : > { %778 = vst [vmem:[%s1571_s11 + $0x68] sm:$0xff] %v762_v25  ;;  %v753_v32 = vmul.f32 %v737_v29, %v625_v28  ;;  %1241 = vtanh.f32 %v715_v30  ;;  %v854_v50 = vld [vmem:[%s1571_s11 + $0x10] sm:$0xff] (%p1402_p9)  ;;  %873 = vst [vmem:[%s792_s14 + $0xb0] sm:$0xff] (%p1402_p9), %v872_v61 }
 0x14a   : > { %v761_v33 = vmul.f32 %v745_v31, %v633_v47  ;;  %855 = vst [vmem:[%s792_s14 + $0x20] sm:$0xff] (%p1402_p9), %v854_v50 }
 0x14b   : > { %769 = vst [vmem:[%s1571_s11 + $0x20] sm:$0xff] %v753_v32  ;;  %v870_v58 = vld [vmem:[%s1571_s11 + $0x50] sm:$0xff] (%p1402_p9) }
 0x14c   : > { %v1236_v34 = vpop.eup %1235  ;;  %777 = vst [vmem:[%s1571_s11 + $0x60] sm:$0xff] %v761_v33  ;;  %871 = vst [vmem:[%s792_s14 + $0xa0] sm:$0xff] (%p1402_p9), %v870_v58 }
 0x14d   : > { %v740_v36 = vadd.f32 1.0, %v1236_v34 }
 0x14e   : > { %v860_v53 = vld [vmem:[%s1571_s11 + $0x28] sm:$0xff] (%p1402_p9) }
 0x14f   : > { %v756_v2 = vmul.f32 %v740_v36, %v628_v35  ;;  %861 = vst [vmem:[%s792_s14 + $0x50] sm:$0xff] (%p1402_p9), %v860_v53 }
 0x150   : > { %v1238_v37 = vpop.eup %1237  ;;  %v876_v62 = vld [vmem:[%s1571_s11 + $0x68] sm:$0xff] (%p1402_p9) }
 0x151   : > { %772 = vst [vmem:[%s1571_s11 + $0x38] sm:$0xff] %v756_v2  ;;  %v1240_v38 = vpop.eup %1239  ;;  %v748_v60 = vadd.f32 1.0, %v1238_v37  ;;  %877 = vst [vmem:[%s792_s14 + $0xd0] sm:$0xff] (%p1402_p9), %v876_v62 }
 0x152   : > { %v739_v41 = vadd.f32 1.0, %v1240_v38  ;;  %787 = sbr.rel (!%p1402_p9) target bundleno = 353 (0x161), region = 82  ;;  %v858_v52 = vld [vmem:[%s1571_s11 + $0x20] sm:$0xff] (%p1402_p9) }
 0x153   : > { %v1242_v42 = vpop.eup %1241  ;;  %v764_v43 = vmul.f32 %v748_v60, %v636_v39  ;;  %859 = vst [vmem:[%s792_s14 + $0x40] sm:$0xff] (%p1402_p9), %v858_v52  ;;  %v874_v17 = vld [vmem:[%s1571_s11 + $0x60] sm:$0xff] (%p1402_p9) }
 0x154   : > { %v755_v44 = vmul.f32 %v739_v41, %v627_v40  ;;  %v747_v49 = vadd.f32 1.0, %v1242_v42  ;;  %875 = vst [vmem:[%s792_s14 + $0xc0] sm:$0xff] (%p1402_p9), %v874_v17 }
 0x155   : > { %780 = vst [vmem:[%s1571_s11 + $0x78] sm:$0xff] %v764_v43 }
 0x156   : > { %771 = vst [vmem:[%s1571_s11 + $0x30] sm:$0xff] %v755_v44  ;;  %v763_v63 = vmul.f32 %v747_v49, %v635_v45 }
 0x158   : > { %779 = vst [vmem:[%s1571_s11 + $0x70] sm:$0xff] %v763_v63  ;;  %v864_v54 = vld [vmem:[%s1571_s11 + $0x38] sm:$0xff] (%p1402_p9) }
 0x159   : > { %865 = vst [vmem:[%s792_s14 + $0x70] sm:$0xff] %v864_v54 }
 0x15c   : > { %v880_v59 = vld [vmem:[%s1571_s11 + $0x78] sm:$0xff] }
 0x15d   : > { %v862_v12 = vld [vmem:[%s1571_s11 + $0x30] sm:$0xff]  ;;  %881 = vst [vmem:[%s792_s14 + $0xf0] sm:$0xff] %v880_v59 }
 0x15e   : > { %863 = vst [vmem:[%s792_s14 + $0x60] sm:$0xff] %v862_v12 }
 0x15f   : > { %v878_v1 = vld [vmem:[%s1571_s11 + $0x70] sm:$0xff] }
 0x160   : > { %879 = vst [vmem:[%s792_s14 + $0xe0] sm:$0xff] %v878_v1 }
 0x161 PF: > { %s13_s20 = sadd.s32 1, %s1313_s20   ;;  %s1674_s12 = smov %s1285_s13 }
 0x162   : > { %p10_p2 = scmp.ge.s32.totalorder %s13_s20, 10   ;;  %s1675_s13 = smov %s1407_s4 }
 0x163   : > { %s1676_s14 = smov %s1293_s15  ;;  %s1677_s15 = smov %s1396_s27 }
 0x164   : > { %s1678_s16 = smov %s1305_s18  ;;  %s1679_s17 = smov %s1309_s19 }
 0x165   : > { %s1680_s18 = smov %s1683_s22  ;;  %s1681_s19 = smov %s1687_s23 }
 0x166   :  { %12 = sbr.rel (!%p10_p2) target bundleno = 5 (0x5), region = 157 }

// kernel: causal_wan_block_pallas.25
= control target key start
LH: loop header
LB: loop body
LE: loop exit
PB: predicated region body
PF: predicated region fallthrough
CT: control target
= control target key end

     0   :  { %s2094_s12 = smov 0   ;;  %s2096_s13 = smov 0   ;;  %s2716_s0 = inlined_call_operand.vmem [shape: f32[8,256,32], index: 0, kind: input, shape index: {}]   ;;  %s2717_s1 = inlined_call_operand.vmem [shape: f32[8,128,32], index: 1, kind: input, shape index: {}]   ;;  %s2718_s2 = inlined_call_operand.vmem [shape: f32[8,128,32], index: 2, kind: input, shape index: {}]   ;;  %s2719_s3 = inlined_call_operand.vmem [shape: f32[8,256,32], index: 3, kind: output, shape index: {}]  }
   0x1   :  { %s2098_s14 = smov 0   ;;  %s2100_s15 = smov 0  }
   0x2   :  { %s2102_s16 = smov 0  }
   0x3 LB: > { %s28_s17 = sadd.s32 1, %s2061_s14  ;;  %s32_s18 = sadd.s32 1, %s2065_s15  ;;  %s2069_s16 = sphi %s2102_s16, %s13_s16   ;;  %s2065_s15 = sphi %s2100_s15, %s2729_s15   ;;  %s2061_s14 = sphi %s2098_s14, %s2728_s14   ;;  %s2057_s13 = sphi %s2096_s13, %s2727_s13   ;;  %s2053_s12 = sphi %s2094_s12, %s2726_s12  }
   0x4   : > { %p30_p0 = scmp.ge.s32.totalorder %s28_s17, 2  ;;  %p1587_p1 = scmp.ge.s32.totalorder %s2069_s16, 1 }
   0x5   : > { %p199_p2 = scmp.lt.s32.totalorder %s2069_s16, 17 }
   0x6   : > { %s2731_s17 = smov (%p30_p0, %s28_s17), 0  ;;  %s2733_s18 = smov (!%p30_p0, %s32_s18), %s2065_s15 }
   0x7   : > { %p200_p3 = pnand %p1587_p1, %p199_p2  ;;  %p34_p4 = scmp.ge.s32.totalorder %s2733_s18, 8 }
   0x8   : > { %p250_p5 = scmp.lt.s32.totalorder (!%p200_p3), %s2057_s13, 7  ;;  %s1588_s19 = sshll.u32 (!%p200_p3), %s2053_s12, 4  ;;  %vm326_vm0 = vcmask (!%p200_p3), 261120   ;;  %vm293_vm2 = vcmask (!%p200_p3), 7168   ;;  %v2071_v41 = vmov (!%p200_p3), -inf   ;;  %v2072_v62 = vmov (!%p200_p3), 0  }
   0x9   : > { %s2735_s18 = smov (%p34_p4, %s2733_s18), 0  ;;  %203 = sbr.rel (%p200_p3) target bundleno = 926 (0x39e), region = 32 }
   0xa   : > { %p252_p6 = scmp.lt.s32.totalorder (!%p200_p3), %s1588_s19, 31  ;;  %vm2137_vm1 = vmpackc.low (!%p200_p3), %vm326_vm0, %vm326_vm0  ;;  %294 = vst.msk [vmem:[#allocation2] sm:$0xff] (!%p200_p3), %vm293_vm2, %v2071_v41  ;;  %1933 = vset.pattern.permute.xlu0 (!%p200_p3), %v2072_v62  ;;  %1934 = vset.pattern.permute.xlu1 (!%p200_p3), %v2072_v62 }
   0xb   : > { %295 = vst.msk [vmem:[#allocation2 + $0x8] sm:$0xff] (!%p200_p3), %vm293_vm2, %v2071_v41  ;;  %296 = vst.msk [vmem:[#allocation2 + $0x10] sm:$0xff] (!%p200_p3), %vm293_vm2, %v2071_v41 }
   0xc   : > { %297 = vst.msk [vmem:[#allocation2 + $0x18] sm:$0xff] (!%p200_p3), %vm293_vm2, %v2071_v41  ;;  %298 = vst.msk [vmem:[#allocation2 + $0x20] sm:$0xff] (!%p200_p3), %vm293_vm2, %v2071_v41 }
   0xd   : > { %299 = vst.msk [vmem:[#allocation2 + $0x28] sm:$0xff] (!%p200_p3), %vm293_vm2, %v2071_v41  ;;  %300 = vst.msk [vmem:[#allocation2 + $0x30] sm:$0xff] (!%p200_p3), %vm293_vm2, %v2071_v41 }
   0xe   : > { %301 = vst.msk [vmem:[#allocation2 + $0x38] sm:$0xff] (!%p200_p3), %vm293_vm2, %v2071_v41  ;;  %302 = vst.msk [vmem:[#allocation2 + $0x40] sm:$0xff] (!%p200_p3), %vm293_vm2, %v2071_v41 }
   0xf   : > { %303 = vst.msk [vmem:[#allocation2 + $0x48] sm:$0xff] (!%p200_p3), %vm293_vm2, %v2071_v41  ;;  %304 = vst.msk [vmem:[#allocation2 + $0x50] sm:$0xff] (!%p200_p3), %vm293_vm2, %v2071_v41 }
  0x10   : > { %s2737_s13 = smov (!%p250_p5, %s2057_s13), 7  ;;  %s2739_s19 = smov (!%p252_p6, %s1588_s19), 31  ;;  %305 = vst.msk [vmem:[#allocation2 + $0x58] sm:$0xff] %vm293_vm2, %v2071_v41  ;;  %306 = vst.msk [vmem:[#allocation2 + $0x60] sm:$0xff] %vm293_vm2, %v2071_v41 }
  0x11   : > { %s1632_s20 = sshll.u32 %s2737_s13, 7  ;;  %s1589_s21 = sshll.u32 %s2737_s13, 5  ;;  %307 = vst.msk [vmem:[#allocation2 + $0x68] sm:$0xff] %vm293_vm2, %v2071_v41  ;;  %308 = vst.msk [vmem:[#allocation2 + $0x70] sm:$0xff] %vm293_vm2, %v2071_v41 }
  0x12   : > { %s2133_s24 = scalar_lea.vmem %s2717_s1, %s1632_s20  ;;  %s2141_s25 = sadd.s32 %s1589_s21, %s2739_s19  ;;  %309 = vst.msk [vmem:[#allocation2 + $0x78] sm:$0xff] %vm293_vm2, %v2071_v41 }
  0x13   : > { %v359_v1 = vld [vmem:[%s2133_s24] sm:$0xff]  ;;  %v360_v2 = vld [vmem:[%s2133_s24 + $0x8] sm:$0xff]  ;;  %v361_v3 = vld [vmem:[%s2133_s24 + $0x10] sm:$0xff]  ;;  %s1590_s26 = sshll.u32 %s2141_s25, 3  ;;  %s2332_s5 = scalar_lea.vmem %s2718_s2, %s1632_s20 }
  0x14   : > { %v1810_v4 = vpack.c.bf16 %v360_v2, %v359_v1  ;;  %v362_v5 = vld [vmem:[%s2133_s24 + $0x18] sm:$0xff]  ;;  %s2153_s29 = scalar_lea.vmem %s2716_s0, %s1590_s26  ;;  %v363_v8 = vld [vmem:[%s2133_s24 + $0x20] sm:$0xff]  ;;  %v364_v9 = vld [vmem:[%s2133_s24 + $0x28] sm:$0xff]  ;;  %s2667_s8 = scalar_lea.vmem %s2719_s3, %s1590_s26 }
  0x15   : > { %v1816_v6 = vpack.c.bf16 %v362_v5, %v361_v3  ;;  %v343_v7 = vld [vmem:[%s2153_s29] sm:$0xff]  ;;  %v1822_v10 = vpack.c.bf16 %v364_v9, %v363_v8  ;;  %v365_v11 = vld [vmem:[%s2133_s24 + $0x30] sm:$0xff]  ;;  %v366_v12 = vld [vmem:[%s2133_s24 + $0x38] sm:$0xff] }
  0x16   : > { %1812 = vmatprep.subr.msk.bf16.mxu0 %vm2137_vm1, %v1810_v4  ;;  %1730 = vmatprep.mubr.msk.f32.mxu0 %vm326_vm0, %v343_v7  ;;  %v1828_v13 = vpack.c.bf16 %v366_v12, %v365_v11  ;;  %v367_v14 = vld [vmem:[%s2133_s24 + $0x40] sm:$0xff]  ;;  %v368_v15 = vld [vmem:[%s2133_s24 + $0x48] sm:$0xff]  ;;  %v369_v17 = vld [vmem:[%s2133_s24 + $0x50] sm:$0xff]  ;;  %v2073_v7 = vmov 0.0  }
  0x17   : > { %1815 = vmatpush3.bf16.xpose.msk.msra.mxu0 %vm2137_vm1, %v1810_v4  ;;  %v1834_v16 = vpack.c.bf16 %v368_v15, %v367_v14  ;;  %v370_v18 = vld [vmem:[%s2133_s24 + $0x58] sm:$0xff]  ;;  %v371_v20 = vld [vmem:[%s2133_s24 + $0x60] sm:$0xff]  ;;  %v372_v21 = vld [vmem:[%s2133_s24 + $0x68] sm:$0xff]  ;;  %327 = vst.msk [vmem:[#allocation4] sm:$0xff] %vm326_vm0, %v2073_v7 }
  0x18   : > { %1818 = vmatprep.subr.msk.bf16.mxu0 %vm2137_vm1, %v1816_v6  ;;  %v1840_v19 = vpack.c.bf16 %v370_v18, %v369_v17  ;;  %v1846_v22 = vpack.c.bf16 %v372_v21, %v371_v20  ;;  %v373_v23 = vld [vmem:[%s2133_s24 + $0x70] sm:$0xff]  ;;  %v374_v24 = vld [vmem:[%s2133_s24 + $0x78] sm:$0xff]  ;;  %v344_v26 = vld [vmem:[%s2153_s29 + $0x8] sm:$0xff]  ;;  %310 = vst.msk [vmem:[#allocation3] sm:$0xff] %vm293_vm2, %v2073_v7 }
  0x19   : > { %v1852_v25 = vpack.c.bf16 %v374_v24, %v373_v23  ;;  %v345_v27 = vld [vmem:[%s2153_s29 + $0x10] sm:$0xff]  ;;  %v346_v28 = vld [vmem:[%s2153_s29 + $0x18] sm:$0xff]  ;;  %v347_v29 = vld [vmem:[%s2153_s29 + $0x20] sm:$0xff]  ;;  %311 = vst.msk [vmem:[#allocation3 + $0x8] sm:$0xff] %vm293_vm2, %v2073_v7 }
  0x1a   : > { %v348_v30 = vld [vmem:[%s2153_s29 + $0x28] sm:$0xff]  ;;  %v349_v31 = vld [vmem:[%s2153_s29 + $0x30] sm:$0xff]  ;;  %v350_v32 = vld [vmem:[%s2153_s29 + $0x38] sm:$0xff]  ;;  %312 = vst.msk [vmem:[#allocation3 + $0x10] sm:$0xff] %vm293_vm2, %v2073_v7 }
  0x1b   : > { %v351_v33 = vld [vmem:[%s2153_s29 + $0x40] sm:$0xff]  ;;  %v352_v34 = vld [vmem:[%s2153_s29 + $0x48] sm:$0xff]  ;;  %v353_v35 = vld [vmem:[%s2153_s29 + $0x50] sm:$0xff]  ;;  %313 = vst.msk [vmem:[#allocation3 + $0x18] sm:$0xff] %vm293_vm2, %v2073_v7 }
  0x1c   : > { %v354_v36 = vld [vmem:[%s2153_s29 + $0x58] sm:$0xff]  ;;  %v355_v37 = vld [vmem:[%s2153_s29 + $0x60] sm:$0xff]  ;;  %v356_v38 = vld [vmem:[%s2153_s29 + $0x68] sm:$0xff]  ;;  %314 = vst.msk [vmem:[#allocation3 + $0x20] sm:$0xff] %vm293_vm2, %v2073_v7 }
  0x1d   : > { %v357_v39 = vld [vmem:[%s2153_s29 + $0x70] sm:$0xff]  ;;  %v358_v40 = vld [vmem:[%s2153_s29 + $0x78] sm:$0xff]  ;;  %315 = vst.msk [vmem:[#allocation3 + $0x28] sm:$0xff] %vm293_vm2, %v2073_v7  ;;  %316 = vst.msk [vmem:[#allocation3 + $0x30] sm:$0xff] %vm293_vm2, %v2073_v7 }
  0x1e   : > { %317 = vst.msk [vmem:[#allocation3 + $0x38] sm:$0xff] %vm293_vm2, %v2073_v7  ;;  %318 = vst.msk [vmem:[#allocation3 + $0x40] sm:$0xff] %vm293_vm2, %v2073_v7  ;;  %v1082_v12 = vld [vmem:[%s2332_s5] sm:$0xff]  ;;  %v1084_v14 = vld [vmem:[%s2332_s5 + $0x10] sm:$0xff] }
  0x1f   : > { %1821 = vmatpush3.bf16.xpose.msk.msra.mxu0 %vm2137_vm1, %v1816_v6  ;;  %319 = vst.msk [vmem:[#allocation3 + $0x48] sm:$0xff] %vm293_vm2, %v2073_v7  ;;  %320 = vst.msk [vmem:[#allocation3 + $0x50] sm:$0xff] %vm293_vm2, %v2073_v7  ;;  %v1086_v18 = vld [vmem:[%s2332_s5 + $0x20] sm:$0xff]  ;;  %v1088_v21 = vld [vmem:[%s2332_s5 + $0x30] sm:$0xff] }
  0x20   : > { %1824 = vmatprep.subr.msk.bf16.mxu0 %vm2137_vm1, %v1822_v10  ;;  %321 = vst.msk [vmem:[#allocation3 + $0x58] sm:$0xff] %vm293_vm2, %v2073_v7  ;;  %322 = vst.msk [vmem:[#allocation3 + $0x60] sm:$0xff] %vm293_vm2, %v2073_v7  ;;  %v2342_v24 = vld [vmem:[#allocation2] sm:$0xff] }
  0x21   : > { %323 = vst.msk [vmem:[#allocation3 + $0x68] sm:$0xff] %vm293_vm2, %v2073_v7  ;;  %324 = vst.msk [vmem:[#allocation3 + $0x70] sm:$0xff] %vm293_vm2, %v2073_v7 }
  0x22   : > { %325 = vst.msk [vmem:[#allocation3 + $0x78] sm:$0xff] %vm293_vm2, %v2073_v7 }
  0x23   : > { %328 = vst.msk [vmem:[#allocation4 + $0x8] sm:$0xff] %vm326_vm0, %v2073_v7  ;;  %329 = vst.msk [vmem:[#allocation4 + $0x10] sm:$0xff] %vm326_vm0, %v2073_v7 }
  0x24   : > { %330 = vst.msk [vmem:[#allocation4 + $0x18] sm:$0xff] %vm326_vm0, %v2073_v7  ;;  %331 = vst.msk [vmem:[#allocation4 + $0x20] sm:$0xff] %vm326_vm0, %v2073_v7 }
  0x25   : > { %332 = vst.msk [vmem:[#allocation4 + $0x28] sm:$0xff] %vm326_vm0, %v2073_v7  ;;  %333 = vst.msk [vmem:[#allocation4 + $0x30] sm:$0xff] %vm326_vm0, %v2073_v7 }
  0x26   : > { %334 = vst.msk [vmem:[#allocation4 + $0x38] sm:$0xff] %vm326_vm0, %v2073_v7  ;;  %335 = vst.msk [vmem:[#allocation4 + $0x40] sm:$0xff] %vm326_vm0, %v2073_v7 }
  0x27   : > { %1827 = vmatpush3.bf16.xpose.msk.msra.mxu0 %vm2137_vm1, %v1822_v10  ;;  %336 = vst.msk [vmem:[#allocation4 + $0x48] sm:$0xff] %vm326_vm0, %v2073_v7  ;;  %337 = vst.msk [vmem:[#allocation4 + $0x50] sm:$0xff] %vm326_vm0, %v2073_v7 }
  0x28   : > { %1830 = vmatprep.subr.msk.bf16.mxu0 %vm2137_vm1, %v1828_v13  ;;  %338 = vst.msk [vmem:[#allocation4 + $0x58] sm:$0xff] %vm326_vm0, %v2073_v7  ;;  %339 = vst.msk [vmem:[#allocation4 + $0x60] sm:$0xff] %vm326_vm0, %v2073_v7 }
  0x29   : > { %340 = vst.msk [vmem:[#allocation4 + $0x68] sm:$0xff] %vm326_vm0, %v2073_v7  ;;  %341 = vst.msk [vmem:[#allocation4 + $0x70] sm:$0xff] %vm326_vm0, %v2073_v7 }
  0x2a   : > { %342 = vst.msk [vmem:[#allocation4 + $0x78] sm:$0xff] %vm326_vm0, %v2073_v7 }
  0x2f   : > { %1833 = vmatpush3.bf16.xpose.msk.msra.mxu0 %vm2137_vm1, %v1828_v13  ;;  %v1083_v13 = vld [vmem:[%s2332_s5 + $0x8] sm:$0xff] }
  0x30   : > { %1836 = vmatprep.subr.msk.bf16.mxu0 %vm2137_vm1, %v1834_v16  ;;  %v1858_v15 = vpack.c.bf16 %v1083_v13, %v1082_v12  ;;  %v1097_v12 = vld [vmem:[%s2332_s5 + $0x78] sm:$0xff] }
  0x32   : > { %1859 = vmatprep.subr.bf16.mxu1 %v1858_v15 }
  0x33   : > { %1861 = vmatpush3.bf16.msra.mxu1 %v1858_v15 }
  0x37   : > { %1839 = vmatpush3.bf16.xpose.msk.msra.mxu0 %vm2137_vm1, %v1834_v16  ;;  %v1085_v16 = vld [vmem:[%s2332_s5 + $0x18] sm:$0xff] }
  0x38   : > { %1842 = vmatprep.subr.msk.bf16.mxu0 %vm2137_vm1, %v1840_v19  ;;  %v1862_v17 = vpack.c.bf16 %v1085_v16, %v1084_v14  ;;  %v2414_v16 = vld [vmem:[#allocation2 + $0x48] sm:$0xff] }
  0x3a   : > { %1863 = vmatprep.subr.bf16.mxu1 %v1862_v17 }
  0x3b   : > { %1865 = vmatpush3.bf16.msra.mxu1 %v1862_v17 }
  0x3f   : > { %1845 = vmatpush3.bf16.xpose.msk.msra.mxu0 %vm2137_vm1, %v1840_v19  ;;  %v1087_v19 = vld [vmem:[%s2332_s5 + $0x28] sm:$0xff] }
  0x40   : > { %1848 = vmatprep.subr.msk.bf16.mxu0 %vm2137_vm1, %v1846_v22  ;;  %v1866_v20 = vpack.c.bf16 %v1087_v19, %v1086_v18  ;;  %v2423_v19 = vld [vmem:[#allocation2 + $0x50] sm:$0xff] }
  0x42   : > { %1867 = vmatprep.subr.bf16.mxu1 %v1866_v20 }
  0x43   : > { %1869 = vmatpush3.bf16.msra.mxu1 %v1866_v20 }
  0x47   : > { %1851 = vmatpush3.bf16.xpose.msk.msra.mxu0 %vm2137_vm1, %v1846_v22  ;;  %v1089_v22 = vld [vmem:[%s2332_s5 + $0x38] sm:$0xff] }
  0x48   : > { %1854 = vmatprep.subr.msk.bf16.mxu0 %vm2137_vm1, %v1852_v25  ;;  %v1870_v23 = vpack.c.bf16 %v1089_v22, %v1088_v21 }
  0x4a   : > { %1871 = vmatprep.subr.bf16.mxu1 %v1870_v23 }
  0x4b   : > { %1873 = vmatpush3.bf16.msra.mxu1 %v1870_v23 }
  0x4f   : > { %1857 = vmatpush3.bf16.xpose.msk.msra.mxu0 %vm2137_vm1, %v1852_v25 }
  0x56   : > { %1731 = vmatmul.mubr.msk.f32.vlgmr.msra.gmra.mrb[0].mxu0 %vm326_vm0, %v344_v26 }
  0x57   : > { %1733 = vmatprep.mubr.msk.f32.mxu0 %vm326_vm0, %v345_v27  ;;  %v2347_v27 = vld [vmem:[#allocation2 + $0x18] sm:$0xff] }
  0x5a   : > { %1734 = vmatmul.mubr.msk.f32.gmra.mrb[2].mxu0 %vm326_vm0, %v346_v28  ;;  %v2349_v28 = vld [vmem:[#allocation2 + $0x8] sm:$0xff] }
  0x5b   : > { %1736 = vmatprep.mubr.msk.f32.mxu0 %vm326_vm0, %v347_v29 }
  0x5e   : > { %1737 = vmatmul.mubr.msk.f32.gmra.mrb[4].mxu0 %vm326_vm0, %v348_v30  ;;  %v1090_v30 = vld [vmem:[%s2332_s5 + $0x40] sm:$0xff] }
  0x5f   : > { %1739 = vmatprep.mubr.msk.f32.mxu0 %vm326_vm0, %v349_v31  ;;  %v1091_v31 = vld [vmem:[%s2332_s5 + $0x48] sm:$0xff] }
  0x62   : > { %1740 = vmatmul.mubr.msk.f32.gmra.mrb[6].mxu0 %vm326_vm0, %v350_v32 }
  0x63   : > { %1742 = vmatprep.mubr.msk.f32.mxu0 %vm326_vm0, %v351_v33 }
  0x66   : > { %1743 = vmatmul.mubr.msk.f32.gmra.mrb[8].mxu0 %vm326_vm0, %v352_v34  ;;  %v1874_v34 = vpack.c.bf16 %v1091_v31, %v1090_v30 }
  0x67   : > { %1745 = vmatprep.mubr.msk.f32.mxu0 %vm326_vm0, %v353_v35 }
  0x68   : > { %1875 = vmatprep.subr.bf16.mxu1 %v1874_v34 }
  0x69   : > { %1877 = vmatpush3.bf16.msra.mxu1 %v1874_v34 }
  0x6a   : > { %1746 = vmatmul.mubr.msk.f32.gmra.mrb[10].mxu0 %vm326_vm0, %v354_v36  ;;  %v2362_v36 = vld [vmem:[#allocation2 + $0x10] sm:$0xff] }
  0x6b   : > { %1748 = vmatprep.mubr.msk.f32.mxu0 %vm326_vm0, %v355_v37  ;;  %v2366_v37 = vld [vmem:[#allocation2 + $0x20] sm:$0xff] }
  0x6e   : > { %1749 = vmatmul.mubr.msk.f32.gmra.mrb[12].mxu0 %vm326_vm0, %v356_v38 }
  0x6f   : > { %1751 = vmatprep.mubr.msk.f32.mxu0 %vm326_vm0, %v357_v39  ;;  %v1092_v39 = vld [vmem:[%s2332_s5 + $0x50] sm:$0xff] }
  0x72   : > { %1752 = vmatmul.mubr.msk.f32.gmra.mrb[14].mxu0 %vm326_vm0, %v358_v40  ;;  %v1093_v40 = vld [vmem:[%s2332_s5 + $0x58] sm:$0xff] }
 0x129   : > { %v1732_v42 = vpop.f32.mrb[0].mxu0 }
 0x12a   : > { %v538_v43 = vpop.f32.mrb[1].mxu0  ;;  %v2252_v48 = vmul.f32 0.17677669, %v1732_v42 }
 0x12b   : > { %v2247_v44 = vmul.f32 0.17677669, %v538_v43  ;;  %v1878_v43 = vpack.c.bf16 %v1093_v40, %v1092_v39 }
 0x12d   : > { %649 = vmax.xlane.f32.xlu0 %v2247_v44  ;;  %v1735_v45 = vpop.f32.mrb[2].mxu0  ;;  %1879 = vmatprep.subr.bf16.mxu1 %v1878_v43 }
 0x12e   : > { %v2250_v46 = vmul.f32 0.17677669, %v1735_v45  ;;  %v548_v47 = vpop.f32.mrb[3].mxu0  ;;  %v2376_v45 = vld [vmem:[#allocation2 + $0x28] sm:$0xff]  ;;  %1881 = vmatpush3.bf16.msra.mxu1 %v1878_v43 }
 0x12f   : > { %v2255_v49 = vmul.f32 0.17677669, %v548_v47 }
 0x130   : > { %655 = vmax.xlane.f32.xlu1 %v2250_v46 }
 0x131   : > { %651 = vmax.xlane.f32.xlu0 %v2252_v48  ;;  %v1738_v50 = vpop.f32.mrb[4].mxu0 }
 0x132   : > { %v558_v51 = vpop.f32.mrb[5].mxu0  ;;  %v2261_v53 = vmul.f32 0.17677669, %v1738_v50  ;;  %v2383_v50 = vld [vmem:[#allocation2 + $0x30] sm:$0xff] }
 0x133   : > { %v2258_v52 = vmul.f32 0.17677669, %v558_v51 }
 0x134   : > { %653 = vmax.xlane.f32.xlu1 %v2255_v49 }
 0x135   : > { %v1741_v54 = vpop.f32.mrb[6].mxu0  ;;  %657 = vmax.xlane.f32.xlu0 %v2258_v52 }
 0x136   : > { %v568_v55 = vpop.f32.mrb[7].mxu0  ;;  %v2267_v57 = vmul.f32 0.17677669, %v1741_v54  ;;  %v1094_v54 = vld [vmem:[%s2332_s5 + $0x60] sm:$0xff] }
 0x137   : > { %v2264_v56 = vmul.f32 0.17677669, %v568_v55  ;;  %v1095_v55 = vld [vmem:[%s2332_s5 + $0x68] sm:$0xff] }
 0x138   : > { %659 = vmax.xlane.f32.xlu1 %v2261_v53  ;;  %v1882_v62 = vpack.c.bf16 %v1095_v55, %v1094_v54 }
 0x139   : > { %v1744_v58 = vpop.f32.mrb[8].mxu0  ;;  %661 = vmax.xlane.f32.xlu0 %v2264_v56 }
 0x13a   : > { %v578_v59 = vpop.f32.mrb[9].mxu0  ;;  %v2273_v61 = vmul.f32 0.17677669, %v1744_v58  ;;  %1883 = vmatprep.subr.bf16.mxu1 %v1882_v62 }
 0x13b   : > { %v2270_v60 = vmul.f32 0.17677669, %v578_v59  ;;  %1885 = vmatpush3.bf16.msra.mxu1 %v1882_v62 }
 0x13c   : > { %663 = vmax.xlane.f32.xlu1 %v2267_v57 }
 0x13d   : > { %v1747_v63 = vpop.f32.mrb[10].mxu0  ;;  %665 = vmax.xlane.f32.xlu0 %v2270_v60 }
 0x13e   : > { %v588_v0 = vpop.f32.mrb[11].mxu0  ;;  %v2279_v2 = vmul.f32 0.17677669, %v1747_v63  ;;  %v2393_v63 = vld [vmem:[#allocation2 + $0x38] sm:$0xff] }
 0x13f   : > { %v2276_v1 = vmul.f32 0.17677669, %v588_v0 }
 0x140   : > { %667 = vmax.xlane.f32.xlu1 %v2273_v61 }
 0x141   : > { %v1750_v3 = vpop.f32.mrb[12].mxu0  ;;  %669 = vmax.xlane.f32.xlu0 %v2276_v1 }
 0x142   : > { %v598_v4 = vpop.f32.mrb[13].mxu0  ;;  %v2285_v6 = vmul.f32 0.17677669, %v1750_v3 }
 0x143   : > { %v2282_v5 = vmul.f32 0.17677669, %v598_v4  ;;  %v2402_v4 = vld [vmem:[#allocation2 + $0x40] sm:$0xff] }
 0x144   : > { %671 = vmax.xlane.f32.xlu1 %v2279_v2 }
 0x145   : > { %v1753_v8 = vpop.f32.mrb[14].mxu0  ;;  %673 = vmax.xlane.f32.xlu0 %v2282_v5 }
 0x146   : > { %v608_v9 = vpop.f32.mrb[15].mxu0  ;;  %v2323_v11 = vmul.f32 0.17677669, %v1753_v8 }
 0x147   : > { %v2320_v10 = vmul.f32 0.17677669, %v608_v9  ;;  %v1096_v9 = vld [vmem:[%s2332_s5 + $0x70] sm:$0xff] }
 0x148   : > { %675 = vmax.xlane.f32.xlu1 %v2285_v6  ;;  %v1886_v15 = vpack.c.bf16 %v1097_v12, %v1096_v9 }
 0x149   : > { %677 = vmax.xlane.f32.xlu0 %v2320_v10 }
 0x14a   : > { %1887 = vmatprep.subr.bf16.mxu1 %v1886_v15 }
 0x14b   : > { %1889 = vmatpush3.bf16.msra.mxu1 %v1886_v15 }
 0x14c   : > { %679 = vmax.xlane.f32.xlu1 %v2323_v11 }
 0x1ba   : > { %v650_v25 = vpop.xlane.xlu0 %649 }
 0x1bb   : > { %v2345_v26 = vmax.f32 %v2342_v24, %v650_v25 }
 0x1bd   : > { %1275 = vst.msk [vmem:[#allocation2] sm:$0xff] %vm293_vm2, %v2345_v26  ;;  %v656_v29 = vpop.xlane.xlu1 %655  ;;  %747 = vperm.xlu0 %1933, %v2345_v26   ;;  %v697_v20 = vsub.f32 %v2342_v24, %v2345_v26  ;;  %v2445_v26 = vld [vmem:[#allocation2 + $0x60] sm:$0xff] }
 0x1be   : > { %v2357_v32 = vmax.f32 %v2347_v27, %v656_v29  ;;  %v652_v33 = vpop.xlane.xlu0 %651  ;;  %v2435_v29 = vld [vmem:[#allocation2 + $0x58] sm:$0xff] }
 0x1bf   : > { %v2360_v35 = vmax.f32 %v2349_v28, %v652_v33  ;;  %v713_v31 = vmul.f32 1.442695, %v697_v20 }
 0x1c0   : > { %1278 = vst.msk [vmem:[#allocation2 + $0x18] sm:$0xff] %vm293_vm2, %v2357_v32  ;;  %v700_v33 = vsub.f32 %v2347_v27, %v2357_v32 }
 0x1c1   : > { %1276 = vst.msk [vmem:[#allocation2 + $0x8] sm:$0xff] %vm293_vm2, %v2360_v35  ;;  %v654_v38 = vpop.xlane.xlu1 %653  ;;  %752 = vperm.xlu1 %1934, %v2360_v35   ;;  %1935 = vpow2.f32 %v713_v31  ;;  %v698_v20 = vsub.f32 %v2349_v28, %v2360_v35 }
 0x1c2   : > { %v2374_v41 = vmax.f32 %v2362_v36, %v654_v38  ;;  %v658_v42 = vpop.xlane.xlu0 %657 }
 0x1c3   : > { %v2379_v47 = vmax.f32 %v2366_v37, %v658_v42  ;;  %v2457_v42 = vld [vmem:[#allocation2 + $0x68] sm:$0xff]  ;;  %v715_v31 = vmul.f32 1.442695, %v698_v20 }
 0x1c4   : > { %1277 = vst.msk [vmem:[#allocation2 + $0x10] sm:$0xff] %vm293_vm2, %v2374_v41 }
 0x1c5   : > { %v660_v51 = vpop.xlane.xlu1 %659  ;;  %762 = vperm.xlu1 %1934, %v2357_v32   ;;  %1279 = vst.msk [vmem:[#allocation2 + $0x20] sm:$0xff] %vm293_vm2, %v2379_v47  ;;  %v2467_v32 = vld [vmem:[#allocation2 + $0x70] sm:$0xff]  ;;  %v701_v35 = vsub.f32 %v2366_v37, %v2379_v47 }
 0x1c6   : > { %v2391_v58 = vmax.f32 %v2376_v45, %v660_v51  ;;  %v662_v59 = vpop.xlane.xlu0 %661  ;;  %v719_v51 = vmul.f32 1.442695, %v700_v33  ;;  %v699_v33 = vsub.f32 %v2362_v36, %v2374_v41 }
 0x1c7   : > { %v2396_v0 = vmax.f32 %v2383_v50, %v662_v59 }
 0x1c8   : > { %v702_v3 = vsub.f32 %v2376_v45, %v2391_v58  ;;  %1280 = vst.msk [vmem:[#allocation2 + $0x28] sm:$0xff] %vm293_vm2, %v2391_v58  ;;  %1937 = vpow2.f32 %v719_v51  ;;  %v717_v28 = vmul.f32 1.442695, %v699_v33  ;;  %v721_v51 = vmul.f32 1.442695, %v701_v35 }
 0x1c9   : > { %v664_v7 = vpop.xlane.xlu1 %663  ;;  %757 = vperm.xlu1 %1934, %v2374_v41   ;;  %v703_v8 = vsub.f32 %v2383_v50, %v2396_v0  ;;  %1281 = vst.msk [vmem:[#allocation2 + $0x30] sm:$0xff] %vm293_vm2, %v2396_v0  ;;  %1939 = vpow2.f32 %v715_v31 }
 0x1ca   : > { %v2412_v13 = vmax.f32 %v2393_v63, %v664_v7  ;;  %v666_v14 = vpop.xlane.xlu0 %665  ;;  %v2477_v7 = vld [vmem:[#allocation2 + $0x78] sm:$0xff]  ;;  %1941 = vpow2.f32 %v717_v28 }
 0x1cb   : > { %v2417_v17 = vmax.f32 %v2402_v4, %v666_v14  ;;  %1943 = vpow2.f32 %v721_v51 }
 0x1cc   : > { %v704_v18 = vsub.f32 %v2393_v63, %v2412_v13  ;;  %1282 = vst.msk [vmem:[#allocation2 + $0x38] sm:$0xff] %vm293_vm2, %v2412_v13 }
 0x1cd   : > { %v668_v21 = vpop.xlane.xlu1 %667  ;;  %772 = vperm.xlu1 %1934, %v2391_v58   ;;  %v705_v22 = vsub.f32 %v2402_v4, %v2417_v17  ;;  %1283 = vst.msk [vmem:[#allocation2 + $0x40] sm:$0xff] %vm293_vm2, %v2417_v17 }
 0x1ce   : > { %v2433_v23 = vmax.f32 %v2414_v16, %v668_v21  ;;  %v670_v25 = vpop.xlane.xlu0 %669  ;;  %v727_v50 = vmul.f32 1.442695, %v704_v18 }
 0x1cf   : > { %v2438_v30 = vmax.f32 %v2423_v19, %v670_v25 }
 0x1d0   : > { %v706_v24 = vsub.f32 %v2414_v16, %v2433_v23  ;;  %1284 = vst.msk [vmem:[#allocation2 + $0x48] sm:$0xff] %vm293_vm2, %v2433_v23  ;;  %792 = vperm.xlu0 %1933, %v2433_v23  }
 0x1d1   : > { %v672_v34 = vpop.xlane.xlu1 %671  ;;  %767 = vperm.xlu1 %1934, %v2379_v47   ;;  %v707_v38 = vsub.f32 %v2423_v19, %v2438_v30  ;;  %1285 = vst.msk [vmem:[#allocation2 + $0x50] sm:$0xff] %vm293_vm2, %v2438_v30 }
 0x1d2   : > { %v2455_v39 = vmax.f32 %v2435_v29, %v672_v34  ;;  %v674_v40 = vpop.xlane.xlu0 %673  ;;  %v2505_v34 = vpop.eup %1935  ;;  %v731_v45 = vmul.f32 1.442695, %v706_v24 }
 0x1d3   : > { %v2460_v43 = vmax.f32 %v2445_v26, %v674_v40  ;;  %v2511_v40 = vpop.eup %1937 }
 0x1d4   : > { %1286 = vst.msk [vmem:[#allocation2 + $0x58] sm:$0xff] %vm293_vm2, %v2455_v39  ;;  %802 = vperm.xlu0 %1933, %v2455_v39   ;;  %v2516_v36 = vpop.eup %1939 }
 0x1d5   : > { %v676_v54 = vpop.xlane.xlu1 %675  ;;  %782 = vperm.xlu1 %1934, %v2412_v13   ;;  %v709_v55 = vsub.f32 %v2445_v26, %v2460_v43  ;;  %1287 = vst.msk [vmem:[#allocation2 + $0x60] sm:$0xff] %vm293_vm2, %v2460_v43  ;;  %v2519_v41 = vpop.eup %1941 }
 0x1d6   : > { %v2475_v59 = vmax.f32 %v2457_v42, %v676_v54  ;;  %v678_v62 = vpop.xlane.xlu0 %677  ;;  %v2522_v37 = vpop.eup %1943 }
 0x1d7   : > { %v2480_v9 = vmax.f32 %v2467_v32, %v678_v62 }
 0x1d8   : > { %1288 = vst.msk [vmem:[#allocation2 + $0x68] sm:$0xff] %vm293_vm2, %v2475_v59  ;;  %812 = vperm.xlu0 %1933, %v2475_v59   ;;  %v2724_v18 = vsub.f32 %v2457_v42, %v2475_v59 }
 0x1d9   : > { %777 = vperm.xlu1 %1934, %v2396_v0   ;;  %v680_v14 = vpop.xlane.xlu1 %679  ;;  %1289 = vst.msk [vmem:[#allocation2 + $0x70] sm:$0xff] %vm293_vm2, %v2480_v9  ;;  %v737_v0 = vmul.f32 1.442695, %v709_v55  ;;  %v2722_v58 = vsub.f32 %v2467_v32, %v2480_v9 }
 0x1da   : > { %v2495_v21 = vmax.f32 %v2477_v7, %v680_v14  ;;  %v739_v19 = vmul.f32 1.442695, %v2724_v18 }
 0x1db   : > { %v741_v63 = vmul.f32 1.442695, %v2722_v58 }
 0x1dc   : > { %1290 = vst.msk [vmem:[#allocation2 + $0x78] sm:$0xff] %vm293_vm2, %v2495_v21  ;;  %822 = vperm.xlu0 %1933, %v2495_v21  }
 0x1dd   : > { %787 = vperm.xlu1 %1934, %v2417_v17  }
 0x1e0   : > { %988 = vperm.xlu0 %1933, %v2505_v34  }
 0x1e1   : > { %797 = vperm.xlu1 %1934, %v2438_v30  }
 0x1e4   : > { %1003 = vperm.xlu0 %1933, %v2511_v40  }
 0x1e5   : > { %807 = vperm.xlu1 %1934, %v2460_v43  }
 0x1e9   : > { %817 = vperm.xlu1 %1934, %v2480_v9  }
 0x1ed   : > { %993 = vperm.xlu1 %1934, %v2516_v36  }
 0x1f1   : > { %998 = vperm.xlu1 %1934, %v2519_v41  }
 0x1f5   : > { %1008 = vperm.xlu1 %1934, %v2522_v37  }
 0x23c   : > { %v748_v47 = vpop.permute.xlu0 %747 }
 0x23d   : > { %v825_v54 = vsub.f32 %v2247_v44, %v748_v47 }
 0x23f   : > { %v841_v62 = vmul.f32 1.442695, %v825_v54 }
 0x240   : > { %v753_v14 = vpop.permute.xlu1 %752 }
 0x241   : > { %1945 = vpow2.f32 %v841_v62  ;;  %v826_v20 = vsub.f32 %v2252_v48, %v753_v14 }
 0x243   : > { %v843_v31 = vmul.f32 1.442695, %v826_v20 }
 0x244   : > { %v763_v33 = vpop.permute.xlu1 %762 }
 0x245   : > { %1947 = vpow2.f32 %v843_v31  ;;  %v828_v28 = vsub.f32 %v2250_v46, %v763_v33 }
 0x247   : > { %v847_v35 = vmul.f32 1.442695, %v828_v28 }
 0x248   : > { %v758_v51 = vpop.permute.xlu1 %757 }
 0x249   : > { %1949 = vpow2.f32 %v847_v35  ;;  %v827_v25 = vsub.f32 %v2255_v49, %v758_v51 }
 0x24b   : > { %v1946_v12 = vpop.eup %1945  ;;  %v845_v27 = vmul.f32 1.442695, %v827_v25 }
 0x24c   : > { %v773_v15 = vpop.permute.xlu1 %772  ;;  %905 = vadd.xlane.f32.xlu1 %v1946_v12  ;;  %1786 = vmatprep.mubr.f32.mxu1 %v1946_v12 }
 0x24d   : > { %1951 = vpow2.f32 %v845_v27  ;;  %v830_v44 = vsub.f32 %v2261_v53, %v773_v15 }
 0x24f   : > { %v1948_v47 = vpop.eup %1947  ;;  %v851_v48 = vmul.f32 1.442695, %v830_v44  ;;  %v793_v54 = vpop.permute.xlu0 %792 }
 0x250   : > { %v768_v62 = vpop.permute.xlu1 %767  ;;  %907 = vadd.xlane.f32.xlu0 %v1948_v47  ;;  %1787 = vmatmul.mubr.f32.vlgmr.msra.gmra.mrb[0].mxu1 %v1948_v47  ;;  %v834_v27 = vsub.f32 %v2273_v61, %v793_v54 }
 0x251   : > { %1953 = vpow2.f32 %v851_v48  ;;  %v829_v46 = vsub.f32 %v2258_v52, %v768_v62 }
 0x252   : > { %v859_v52 = vmul.f32 1.442695, %v834_v27 }
 0x253   : > { %v1950_v14 = vpop.eup %1949  ;;  %v849_v20 = vmul.f32 1.442695, %v829_v46  ;;  %v803_v49 = vpop.permute.xlu0 %802 }
 0x254   : > { %v783_v31 = vpop.permute.xlu1 %782  ;;  %911 = vadd.xlane.f32.xlu1 %v1950_v14  ;;  %v836_v35 = vsub.f32 %v2279_v2, %v803_v49 }
 0x255   : > { %1955 = vpow2.f32 %v849_v20  ;;  %v832_v12 = vsub.f32 %v2267_v57, %v783_v31 }
 0x256   : > { %v863_v61 = vmul.f32 1.442695, %v836_v35 }
 0x257   : > { %v1952_v53 = vpop.eup %1951  ;;  %v855_v15 = vmul.f32 1.442695, %v832_v12  ;;  %v813_v33 = vpop.permute.xlu0 %812 }
 0x258   : > { %v778_v25 = vpop.permute.xlu1 %777  ;;  %909 = vadd.xlane.f32.xlu0 %v1952_v53  ;;  %1789 = vmatprep.mubr.f32.mxu1 %v1952_v53  ;;  %v838_v48 = vsub.f32 %v2285_v6, %v813_v33 }
 0x259   : > { %1957 = vpow2.f32 %v855_v15  ;;  %v831_v28 = vsub.f32 %v2264_v56, %v778_v25  ;;  %1790 = vmatmul.mubr.f32.gmra.mrb[2].mxu1 %v1950_v14 }
 0x25a   : > { %v867_v2 = vmul.f32 1.442695, %v838_v48 }
 0x25b   : > { %v1954_v51 = vpop.eup %1953  ;;  %v853_v44 = vmul.f32 1.442695, %v831_v28  ;;  %v823_v62 = vpop.permute.xlu0 %822 }
 0x25c   : > { %v788_v47 = vpop.permute.xlu1 %787  ;;  %915 = vadd.xlane.f32.xlu1 %v1954_v51  ;;  %v840_v14 = vsub.f32 %v2323_v11, %v823_v62 }
 0x25d   : > { %1959 = vpow2.f32 %v853_v44  ;;  %v833_v57 = vsub.f32 %v2270_v60, %v788_v47  ;;  %v725_v44 = vmul.f32 1.442695, %v703_v8  ;;  %v729_v47 = vmul.f32 1.442695, %v705_v22 }
 0x25e   : > { %1961 = vpow2.f32 %v859_v52  ;;  %v871_v12 = vmul.f32 1.442695, %v840_v14  ;;  %v2723_v8 = vsub.f32 %v2435_v29, %v2455_v39  ;;  %v2725_v29 = vsub.f32 %v2477_v7, %v2495_v21  ;;  %v873_v7 = vld [vmem:[#allocation3] sm:$0xff] }
 0x25f   : > { %v1956_v54 = vpop.eup %1955  ;;  %v857_v46 = vmul.f32 1.442695, %v833_v57  ;;  %v723_v57 = vmul.f32 1.442695, %v702_v3  ;;  %v2605_v55 = vpop.permute.xlu0 %988  ;;  %v889_v9 = vmul.f32 %v2505_v34, %v873_v7 }
 0x260   : > { %v798_v20 = vpop.permute.xlu1 %797  ;;  %913 = vadd.xlane.f32.xlu0 %v1956_v54  ;;  %1792 = vmatprep.mubr.f32.mxu1 %v1956_v54  ;;  %v735_v13 = vmul.f32 1.442695, %v2723_v8  ;;  %v743_v30 = vmul.f32 1.442695, %v2725_v29  ;;  %v874_v54 = vld [vmem:[#allocation3 + $0x8] sm:$0xff] }
 0x261   : > { %1963 = vpow2.f32 %v857_v46  ;;  %v835_v56 = vsub.f32 %v2276_v1, %v798_v20  ;;  %1793 = vmatmul.mubr.f32.gmra.mrb[4].mxu1 %v1954_v51  ;;  %v890_v46 = vmul.f32 %v2516_v36, %v874_v54  ;;  %v885_v54 = vld [vmem:[#allocation3 + $0x60] sm:$0xff] }
 0x262   : > { %1965 = vpow2.f32 %v863_v61  ;;  %v733_v61 = vmul.f32 1.442695, %v707_v38 }
 0x263   : > { %v1958_v49 = vpop.eup %1957  ;;  %v861_v60 = vmul.f32 1.442695, %v835_v56  ;;  %v2610_v21 = vpop.permute.xlu0 %1003  ;;  %v876_v56 = vld [vmem:[#allocation3 + $0x18] sm:$0xff] }
 0x264   : > { %v808_v31 = vpop.permute.xlu1 %807  ;;  %919 = vadd.xlane.f32.xlu1 %v1958_v49  ;;  %v892_v14 = vmul.f32 %v2511_v40, %v876_v56 }
 0x265   : > { %1967 = vpow2.f32 %v861_v60  ;;  %v837_v6 = vsub.f32 %v2282_v5, %v808_v31  ;;  %v875_v60 = vld [vmem:[#allocation3 + $0x10] sm:$0xff] }
 0x266   : > { %1969 = vpow2.f32 %v867_v2 }
 0x267   : > { %v1960_v27 = vpop.eup %1959  ;;  %v865_v53 = vmul.f32 1.442695, %v837_v6  ;;  %v891_v6 = vmul.f32 %v2519_v41, %v875_v60 }
 0x268   : > { %v1962_v15 = vpop.eup %1961  ;;  %917 = vadd.xlane.f32.xlu0 %v1960_v27  ;;  %v818_v25 = vpop.permute.xlu1 %817  ;;  %1795 = vmatprep.mubr.f32.mxu1 %v1960_v27  ;;  %v878_v27 = vld [vmem:[#allocation3 + $0x28] sm:$0xff] }
 0x269   : > { %1971 = vpow2.f32 %v865_v53  ;;  %v839_v1 = vsub.f32 %v2320_v10, %v818_v25  ;;  %923 = vadd.xlane.f32.xlu1 %v1962_v15  ;;  %1796 = vmatmul.mubr.f32.gmra.mrb[6].mxu1 %v1958_v49 }
 0x26a   : > { %1973 = vpow2.f32 %v871_v12 }
 0x26b   : > { %v1964_v11 = vpop.eup %1963  ;;  %v869_v33 = vmul.f32 1.442695, %v839_v1  ;;  %v877_v1 = vld [vmem:[#allocation3 + $0x20] sm:$0xff] }
 0x26c   : > { %v1966_v28 = vpop.eup %1965  ;;  %921 = vadd.xlane.f32.xlu0 %v1964_v11  ;;  %1798 = vmatprep.mubr.f32.mxu1 %v1964_v11  ;;  %v2601_v43 = vpop.permute.xlu1 %993 }
 0x26d   : > { %1975 = vpow2.f32 %v869_v33  ;;  %927 = vadd.xlane.f32.xlu1 %v1966_v28  ;;  %1799 = vmatmul.mubr.f32.gmra.mrb[8].mxu1 %v1962_v15  ;;  %v893_v33 = vmul.f32 %v2522_v37, %v877_v1 }
 0x26e   : > { %1977 = vpow2.f32 %v725_v44 }
 0x26f   : > { %v1968_v5 = vpop.eup %1967  ;;  %1979 = vpow2.f32 %v729_v47  ;;  %v882_v47 = vld [vmem:[#allocation3 + $0x48] sm:$0xff] }
 0x270   : > { %v1970_v52 = vpop.eup %1969  ;;  %925 = vadd.xlane.f32.xlu0 %v1968_v5  ;;  %1801 = vmatprep.mubr.f32.mxu1 %v1968_v5  ;;  %1981 = vpow2.f32 %v723_v57  ;;  %v2603_v32 = vpop.permute.xlu1 %998  ;;  %v880_v5 = vld [vmem:[#allocation3 + $0x38] sm:$0xff] }
 0x271   : > { %931 = vadd.xlane.f32.xlu1 %v1970_v52  ;;  %1802 = vmatmul.mubr.f32.gmra.mrb[10].mxu1 %v1966_v28  ;;  %1983 = vpow2.f32 %v733_v61 }
 0x272   : > { %1985 = vpow2.f32 %v727_v50 }
 0x273   : > { %v1972_v35 = vpop.eup %1971  ;;  %1987 = vpow2.f32 %v737_v0  ;;  %v881_v0 = vld [vmem:[#allocation3 + $0x40] sm:$0xff] }
 0x274   : > { %v1974_v51 = vpop.eup %1973  ;;  %929 = vadd.xlane.f32.xlu0 %v1972_v35  ;;  %1804 = vmatprep.mubr.f32.mxu1 %v1972_v35  ;;  %1989 = vpow2.f32 %v731_v45  ;;  %v2607_v59 = vpop.permute.xlu1 %1008 }
 0x275   : > { %935 = vadd.xlane.f32.xlu1 %v1974_v51  ;;  %1805 = vmatmul.mubr.f32.gmra.mrb[12].mxu1 %v1970_v52  ;;  %1991 = vpow2.f32 %v741_v63  ;;  %v884_v63 = vld [vmem:[#allocation3 + $0x58] sm:$0xff] }
 0x276   : > { %1993 = vpow2.f32 %v735_v13 }
 0x277   : > { %v1976_v10 = vpop.eup %1975  ;;  %1995 = vpow2.f32 %v739_v19 }
 0x278   : > { %933 = vadd.xlane.f32.xlu0 %v1976_v10  ;;  %1807 = vmatprep.mubr.f32.mxu1 %v1976_v10  ;;  %v2559_v4 = vpop.eup %1977  ;;  %1997 = vpow2.f32 %v743_v30  ;;  %v879_v10 = vld [vmem:[#allocation3 + $0x30] sm:$0xff]  ;;  %v886_v30 = vld [vmem:[#allocation3 + $0x68] sm:$0xff] }
 0x279   : > { %1808 = vmatmul.mubr.f32.gmra.mrb[14].mxu1 %v1974_v51  ;;  %v2568_v3 = vpop.eup %1979  ;;  %v895_v61 = vmul.f32 %v2559_v4, %v879_v10 }
 0x27a   : > { %v1982_v17 = vpop.eup %1981 }
 0x27b   : > { %v2574_v16 = vpop.eup %1983  ;;  %v894_v15 = vmul.f32 %v1982_v17, %v878_v27 }
 0x27c   : > { %v1986_v22 = vpop.eup %1985 }
 0x27d   : > { %v2580_v23 = vpop.eup %1987  ;;  %v896_v35 = vmul.f32 %v1986_v22, %v880_v5 }
 0x27e   : > { %v2586_v24 = vpop.eup %1989 }
 0x27f   : > { %v2588_v26 = vpop.eup %1991  ;;  %v898_v37 = vmul.f32 %v2586_v24, %v882_v47 }
 0x280   : > { %v2592_v38 = vpop.eup %1993 }
 0x281   : > { %v2595_v39 = vpop.eup %1995  ;;  %v900_v18 = vmul.f32 %v2592_v38, %v884_v63 }
 0x282   : > { %v2598_v42 = vpop.eup %1997 }
 0x286   : > { %1018 = vperm.xlu1 %1934, %v2559_v4   ;;  %v883_v4 = vld [vmem:[#allocation3 + $0x50] sm:$0xff] }
 0x28a   : > { %1028 = vperm.xlu1 %1934, %v2568_v3  }
 0x28e   : > { %1038 = vperm.xlu1 %1934, %v2574_v16   ;;  %1013 = vperm.xlu0 %1933, %v1982_v17   ;;  %v897_v17 = vmul.f32 %v2568_v3, %v881_v0  ;;  %v902_v3 = vmul.f32 %v2595_v39, %v886_v30  ;;  %v974_v0 = vld [vmem:[#allocation4 + $0x20] sm:$0xff]  ;;  %v979_v30 = vld [vmem:[#allocation4 + $0x48] sm:$0xff] }
 0x28f   : > { %v1070_v63 = vmul.f32 %v2607_v59, %v974_v0 }
 0x292   : > { %1048 = vperm.xlu1 %1934, %v2580_v23   ;;  %1023 = vperm.xlu0 %1933, %v1986_v22  }
 0x296   : > { %1058 = vperm.xlu1 %1934, %v2588_v26   ;;  %1033 = vperm.xlu0 %1933, %v2586_v24  }
 0x29a   : > { %1043 = vperm.xlu0 %1933, %v2592_v38  }
 0x29e   : > { %1053 = vperm.xlu0 %1933, %v2595_v39   ;;  %v887_v39 = vld [vmem:[#allocation3 + $0x70] sm:$0xff] }
 0x29f   : > { %v903_v27 = vmul.f32 %v2588_v26, %v887_v39 }
 0x2a2   : > { %1063 = vperm.xlu0 %1933, %v2598_v42  }
 0x2d9   : > { %v906_v48 = vpop.xlane.xlu1 %905 }
 0x2da   : > { %v937_v62 = vadd.f32 %v906_v48, %v889_v9  ;;  %v899_v9 = vmul.f32 %v2574_v16, %v883_v4  ;;  %v976_v4 = vld [vmem:[#allocation4 + $0x30] sm:$0xff] }
 0x2dc   : > { %954 = vst.msk [vmem:[#allocation3] sm:$0xff] %vm293_vm2, %v937_v62 }
 0x2dd   : > { %v908_v20 = vpop.xlane.xlu0 %907 }
 0x2de   : > { %v938_v2 = vadd.f32 %v908_v20, %v890_v46  ;;  %v888_v46 = vld [vmem:[#allocation3 + $0x78] sm:$0xff] }
 0x2df   : > { %v904_v16 = vmul.f32 %v2598_v42, %v888_v46  ;;  %v981_v46 = vld [vmem:[#allocation4 + $0x58] sm:$0xff] }
 0x2e0   : > { %955 = vst.msk [vmem:[#allocation3 + $0x8] sm:$0xff] %vm293_vm2, %v938_v2 }
 0x2e1   : > { %v912_v49 = vpop.xlane.xlu1 %911 }
 0x2e2   : > { %v940_v31 = vadd.f32 %v912_v49, %v892_v14  ;;  %v901_v14 = vmul.f32 %v2580_v23, %v885_v54 }
 0x2e3   : > { %v1310_v34 = vld [vmem:[#allocation3] sm:$0xff] }
 0x2e4   : > { %957 = vst.msk [vmem:[#allocation3 + $0x18] sm:$0xff] %vm293_vm2, %v940_v31  ;;  %1328 = vperm.xlu1 %1934, %v1310_v34  }
 0x2e5   : > { %v910_v12 = vpop.xlane.xlu0 %909 }
 0x2e6   : > { %v939_v53 = vadd.f32 %v910_v12, %v891_v6 }
 0x2e7   : > { %v1311_v36 = vld [vmem:[#allocation3 + $0x8] sm:$0xff] }
 0x2e8   : > { %956 = vst.msk [vmem:[#allocation3 + $0x10] sm:$0xff] %vm293_vm2, %v939_v53  ;;  %1333 = vperm.xlu0 %1933, %v1311_v36  }
 0x2e9   : > { %v916_v25 = vpop.xlane.xlu1 %915 }
 0x2ea   : > { %v942_v40 = vadd.f32 %v916_v25, %v894_v15 }
 0x2eb   : > { %v1313_v11 = vld [vmem:[#allocation3 + $0x18] sm:$0xff] }
 0x2ec   : > { %959 = vst.msk [vmem:[#allocation3 + $0x28] sm:$0xff] %vm293_vm2, %v942_v40  ;;  %1343 = vperm.xlu0 %1933, %v1313_v11   ;;  %v971_v40 = vld [vmem:[#allocation4 + $0x8] sm:$0xff]  ;;  %v970_v11 = vld [vmem:[#allocation4] sm:$0xff] }
 0x2ed   : > { %v914_v28 = vpop.xlane.xlu0 %913  ;;  %v1067_v26 = vmul.f32 %v2601_v43, %v971_v40  ;;  %v984_v40 = vld [vmem:[#allocation4 + $0x70] sm:$0xff] }
 0x2ee   : > { %v941_v41 = vadd.f32 %v914_v28, %v893_v33  ;;  %v1066_v33 = vmul.f32 %v2605_v55, %v970_v11  ;;  %v975_v55 = vld [vmem:[#allocation4 + $0x28] sm:$0xff] }
 0x2ef   : > { %v1312_v52 = vld [vmem:[#allocation3 + $0x10] sm:$0xff] }
 0x2f0   : > { %958 = vst.msk [vmem:[#allocation3 + $0x20] sm:$0xff] %vm293_vm2, %v941_v41  ;;  %1338 = vperm.xlu1 %1934, %v1312_v52  }
 0x2f1   : > { %v920_v51 = vpop.xlane.xlu1 %919 }
 0x2f2   : > { %v944_v44 = vadd.f32 %v920_v51, %v896_v35  ;;  %v973_v35 = vld [vmem:[#allocation4 + $0x18] sm:$0xff]  ;;  %v972_v51 = vld [vmem:[#allocation4 + $0x10] sm:$0xff] }
 0x2f3   : > { %v1315_v57 = vld [vmem:[#allocation3 + $0x28] sm:$0xff]  ;;  %v1068_v47 = vmul.f32 %v2603_v32, %v972_v51 }
 0x2f4   : > { %961 = vst.msk [vmem:[#allocation3 + $0x38] sm:$0xff] %vm293_vm2, %v944_v44  ;;  %1353 = vperm.xlu0 %1933, %v1315_v57   ;;  %v1069_v44 = vmul.f32 %v2610_v21, %v973_v35 }
 0x2f5   : > { %v918_v50 = vpop.xlane.xlu0 %917 }
 0x2f6   : > { %v924_v45 = vpop.xlane.xlu1 %923  ;;  %v943_v58 = vadd.f32 %v918_v50, %v895_v61 }
 0x2f7   : > { %v946_v8 = vadd.f32 %v924_v45, %v898_v37  ;;  %v1314_v13 = vld [vmem:[#allocation3 + $0x20] sm:$0xff] }
 0x2f8   : > { %960 = vst.msk [vmem:[#allocation3 + $0x30] sm:$0xff] %vm293_vm2, %v943_v58  ;;  %1348 = vperm.xlu1 %1934, %v1314_v13  }
 0x2f9   : > { %963 = vst.msk [vmem:[#allocation3 + $0x48] sm:$0xff] %vm293_vm2, %v946_v8  ;;  %v922_v19 = vpop.xlane.xlu0 %921 }
 0x2fa   : > { %v928_v22 = vpop.xlane.xlu1 %927  ;;  %v945_v29 = vadd.f32 %v922_v19, %v897_v17  ;;  %v977_v19 = vld [vmem:[#allocation4 + $0x38] sm:$0xff] }
 0x2fb   : > { %v948_v24 = vadd.f32 %v928_v22, %v900_v18  ;;  %v1317_v7 = vld [vmem:[#allocation3 + $0x38] sm:$0xff] }
 0x2fc   : > { %962 = vst.msk [vmem:[#allocation3 + $0x40] sm:$0xff] %vm293_vm2, %v945_v29  ;;  %1363 = vperm.xlu0 %1933, %v1317_v7  }
 0x2fd   : > { %965 = vst.msk [vmem:[#allocation3 + $0x58] sm:$0xff] %vm293_vm2, %v948_v24  ;;  %v926_v48 = vpop.xlane.xlu0 %925 }
 0x2fe   : > { %v932_v62 = vpop.xlane.xlu1 %931  ;;  %v947_v38 = vadd.f32 %v926_v48, %v899_v9  ;;  %v978_v9 = vld [vmem:[#allocation4 + $0x40] sm:$0xff] }
 0x2ff   : > { %v950_v20 = vadd.f32 %v932_v62, %v902_v3  ;;  %v1316_v56 = vld [vmem:[#allocation3 + $0x30] sm:$0xff] }
 0x300   : > { %964 = vst.msk [vmem:[#allocation3 + $0x50] sm:$0xff] %vm293_vm2, %v947_v38  ;;  %v1319_v2 = vld [vmem:[#allocation3 + $0x48] sm:$0xff]  ;;  %1358 = vperm.xlu1 %1934, %v1316_v56   ;;  %v980_v56 = vld [vmem:[#allocation4 + $0x50] sm:$0xff] }
 0x301   : > { %967 = vst.msk [vmem:[#allocation3 + $0x68] sm:$0xff] %vm293_vm2, %v950_v20  ;;  %1373 = vperm.xlu0 %1933, %v1319_v2   ;;  %v930_v49 = vpop.xlane.xlu0 %929 }
 0x302   : > { %v936_v60 = vpop.xlane.xlu1 %935  ;;  %v949_v31 = vadd.f32 %v930_v49, %v901_v14 }
 0x303   : > { %v952_v34 = vadd.f32 %v936_v60, %v904_v16  ;;  %v1318_v6 = vld [vmem:[#allocation3 + $0x40] sm:$0xff] }
 0x304   : > { %966 = vst.msk [vmem:[#allocation3 + $0x60] sm:$0xff] %vm293_vm2, %v949_v31  ;;  %v1321_v12 = vld [vmem:[#allocation3 + $0x58] sm:$0xff]  ;;  %1368 = vperm.xlu1 %1934, %v1318_v6  }
 0x305   : > { %969 = vst.msk [vmem:[#allocation3 + $0x78] sm:$0xff] %vm293_vm2, %v952_v34  ;;  %1383 = vperm.xlu0 %1933, %v1321_v12   ;;  %v934_v23 = vpop.xlane.xlu0 %933  ;;  %v983_v34 = vld [vmem:[#allocation4 + $0x68] sm:$0xff]  ;;  %v982_v12 = vld [vmem:[#allocation4 + $0x60] sm:$0xff] }
 0x306   : > { %v951_v53 = vadd.f32 %v934_v23, %v903_v27  ;;  %v1019_v45 = vpop.permute.xlu1 %1018 }
 0x307   : > { %v1320_v36 = vld [vmem:[#allocation3 + $0x50] sm:$0xff]  ;;  %v1072_v29 = vmul.f32 %v1019_v45, %v976_v4 }
 0x308   : > { %968 = vst.msk [vmem:[#allocation3 + $0x70] sm:$0xff] %vm293_vm2, %v951_v53  ;;  %v1323_v42 = vld [vmem:[#allocation3 + $0x68] sm:$0xff]  ;;  %1378 = vperm.xlu1 %1934, %v1320_v36  }
 0x309   : > { %1393 = vperm.xlu0 %1933, %v1323_v42  }
 0x30a   : > { %v1029_v18 = vpop.permute.xlu1 %1028 }
 0x30b   : > { %v1322_v15 = vld [vmem:[#allocation3 + $0x60] sm:$0xff]  ;;  %v1074_v38 = vmul.f32 %v1029_v18, %v978_v9 }
 0x30c   : > { %v1325_v25 = vld [vmem:[#allocation3 + $0x78] sm:$0xff]  ;;  %1388 = vperm.xlu1 %1934, %v1322_v15  }
 0x30d   : > { %1403 = vperm.xlu0 %1933, %v1325_v25   ;;  %v1014_v10 = vpop.permute.xlu0 %1013  ;;  %v985_v15 = vld [vmem:[#allocation4 + $0x78] sm:$0xff] }
 0x30e   : > { %v1071_v58 = vmul.f32 %v1014_v10, %v975_v55  ;;  %v1039_v3 = vpop.permute.xlu1 %1038 }
 0x30f   : > { %v1324_v1 = vld [vmem:[#allocation3 + $0x70] sm:$0xff]  ;;  %v1076_v31 = vmul.f32 %v1039_v3, %v980_v56 }
 0x310   : > { %1398 = vperm.xlu1 %1934, %v1324_v1  }
 0x311   : > { %v1024_v50 = vpop.permute.xlu0 %1023 }
 0x312   : > { %v1073_v22 = vmul.f32 %v1024_v50, %v977_v19  ;;  %v1049_v39 = vpop.permute.xlu1 %1048 }
 0x313   : > { %v1078_v42 = vmul.f32 %v1049_v39, %v982_v12 }
 0x315   : > { %v1034_v17 = vpop.permute.xlu0 %1033 }
 0x316   : > { %v1075_v62 = vmul.f32 %v1034_v17, %v979_v30  ;;  %v1059_v11 = vpop.permute.xlu1 %1058 }
 0x319   : > { %v1044_v24 = vpop.permute.xlu0 %1043 }
 0x31a   : > { %v1077_v60 = vmul.f32 %v1044_v24, %v981_v46 }
 0x31d   : > { %v1054_v16 = vpop.permute.xlu0 %1053 }
 0x31e   : > { %v1079_v36 = vmul.f32 %v1054_v16, %v983_v34 }
 0x321   : > { %v1064_v25 = vpop.permute.xlu0 %1063 }
 0x323   : > { %v1788_v28 = vpop.f32.mrb[0].mxu1 }
 0x324   : > { %v1244_v5 = vadd.f32 %v1788_v28, %v1067_v26  ;;  %v1164_v41 = vpop.f32.mrb[1].mxu1 }
 0x325   : > { %v1243_v52 = vadd.f32 %v1164_v41, %v1066_v33  ;;  %v1080_v41 = vmul.f32 %v1059_v11, %v984_v40 }
 0x326   : > { %1260 = vst.msk [vmem:[#allocation4 + $0x8] sm:$0xff] %vm326_vm0, %v1244_v5  ;;  %v1081_v5 = vmul.f32 %v1064_v25, %v985_v15 }
 0x327   : > { %1259 = vst.msk [vmem:[#allocation4] sm:$0xff] %vm326_vm0, %v1243_v52 }
 0x32c   : > { %v1791_v57 = vpop.f32.mrb[2].mxu1 }
 0x32d   : > { %v1246_v61 = vadd.f32 %v1791_v57, %v1069_v44  ;;  %v1174_v43 = vpop.f32.mrb[3].mxu1  ;;  %v1295_v0 = vld [vmem:[#allocation4 + $0x8] sm:$0xff] }
 0x32e   : > { %v1245_v37 = vadd.f32 %v1174_v43, %v1068_v47  ;;  %v1294_v43 = vld [vmem:[#allocation4] sm:$0xff] }
 0x32f   : > { %1262 = vst.msk [vmem:[#allocation4 + $0x18] sm:$0xff] %vm326_vm0, %v1246_v61 }
 0x330   : > { %1261 = vst.msk [vmem:[#allocation4 + $0x10] sm:$0xff] %vm326_vm0, %v1245_v37 }
 0x334   : > { %v1794_v8 = vpop.f32.mrb[4].mxu1 }
 0x335   : > { %v1248_v13 = vadd.f32 %v1794_v8, %v1071_v58  ;;  %v1184_v21 = vpop.f32.mrb[5].mxu1 }
 0x336   : > { %v1247_v32 = vadd.f32 %v1184_v21, %v1070_v63  ;;  %v1297_v8 = vld [vmem:[#allocation4 + $0x18] sm:$0xff] }
 0x337   : > { %1264 = vst.msk [vmem:[#allocation4 + $0x28] sm:$0xff] %vm326_vm0, %v1248_v13 }
 0x338   : > { %1263 = vst.msk [vmem:[#allocation4 + $0x20] sm:$0xff] %vm326_vm0, %v1247_v32  ;;  %v1296_v32 = vld [vmem:[#allocation4 + $0x10] sm:$0xff] }
 0x33c   : > { %v1797_v7 = vpop.f32.mrb[6].mxu1 }
 0x33d   : > { %v1250_v59 = vadd.f32 %v1797_v7, %v1073_v22  ;;  %v1194_v48 = vpop.f32.mrb[7].mxu1 }
 0x33e   : > { %v1249_v54 = vadd.f32 %v1194_v48, %v1072_v29  ;;  %v1299_v22 = vld [vmem:[#allocation4 + $0x28] sm:$0xff] }
 0x33f   : > { %1266 = vst.msk [vmem:[#allocation4 + $0x38] sm:$0xff] %vm326_vm0, %v1250_v59  ;;  %v1298_v9 = vld [vmem:[#allocation4 + $0x20] sm:$0xff] }
 0x340   : > { %1265 = vst.msk [vmem:[#allocation4 + $0x30] sm:$0xff] %vm326_vm0, %v1249_v54  ;;  %v1800_v20 = vpop.f32.mrb[8].mxu1 }
 0x341   : > { %v1252_v2 = vadd.f32 %v1800_v20, %v1075_v62  ;;  %v1204_v14 = vpop.f32.mrb[9].mxu1 }
 0x342   : > { %v1251_v49 = vadd.f32 %v1204_v14, %v1074_v38 }
 0x343   : > { %1268 = vst.msk [vmem:[#allocation4 + $0x48] sm:$0xff] %vm326_vm0, %v1252_v2 }
 0x344   : > { %1267 = vst.msk [vmem:[#allocation4 + $0x40] sm:$0xff] %vm326_vm0, %v1251_v49  ;;  %v1803_v6 = vpop.f32.mrb[10].mxu1 }
 0x345   : > { %v1254_v27 = vadd.f32 %v1803_v6, %v1077_v60  ;;  %v1214_v23 = vpop.f32.mrb[11].mxu1 }
 0x346   : > { %v1253_v53 = vadd.f32 %v1214_v23, %v1076_v31  ;;  %v1301_v62 = vld [vmem:[#allocation4 + $0x38] sm:$0xff] }
 0x347   : > { %1270 = vst.msk [vmem:[#allocation4 + $0x58] sm:$0xff] %vm326_vm0, %v1254_v27  ;;  %v1300_v2 = vld [vmem:[#allocation4 + $0x30] sm:$0xff] }
 0x348   : > { %1269 = vst.msk [vmem:[#allocation4 + $0x50] sm:$0xff] %vm326_vm0, %v1253_v53  ;;  %v1806_v1 = vpop.f32.mrb[12].mxu1 }
 0x349   : > { %v1256_v26 = vadd.f32 %v1806_v1, %v1079_v36  ;;  %v1224_v33 = vpop.f32.mrb[13].mxu1 }
 0x34a   : > { %v1255_v28 = vadd.f32 %v1224_v33, %v1078_v42  ;;  %v1303_v49 = vld [vmem:[#allocation4 + $0x48] sm:$0xff] }
 0x34b   : > { %1272 = vst.msk [vmem:[#allocation4 + $0x68] sm:$0xff] %vm326_vm0, %v1256_v26  ;;  %v1302_v6 = vld [vmem:[#allocation4 + $0x40] sm:$0xff] }
 0x34c   : > { %1271 = vst.msk [vmem:[#allocation4 + $0x60] sm:$0xff] %vm326_vm0, %v1255_v28  ;;  %v1809_v52 = vpop.f32.mrb[14].mxu1 }
 0x34d   : > { %v1258_v35 = vadd.f32 %v1809_v52, %v1081_v5  ;;  %v1234_v51 = vpop.f32.mrb[15].mxu1 }
 0x34e   : > { %v1257_v10 = vadd.f32 %v1234_v51, %v1080_v41  ;;  %v1305_v23 = vld [vmem:[#allocation4 + $0x58] sm:$0xff] }
 0x34f   : > { %1274 = vst.msk [vmem:[#allocation4 + $0x78] sm:$0xff] %vm326_vm0, %v1258_v35  ;;  %v1304_v15 = vld [vmem:[#allocation4 + $0x50] sm:$0xff] }
 0x350   : > { %1273 = vst.msk [vmem:[#allocation4 + $0x70] sm:$0xff] %vm326_vm0, %v1257_v10 }
 0x352   : > { %v1307_v40 = vld [vmem:[#allocation4 + $0x68] sm:$0xff] }
 0x353   : > { %v1306_v33 = vld [vmem:[#allocation4 + $0x60] sm:$0xff] }
 0x356   : > { %v1309_v41 = vld [vmem:[#allocation4 + $0x78] sm:$0xff] }
 0x357   : > { %v1308_v51 = vld [vmem:[#allocation4 + $0x70] sm:$0xff] }
 0x363   : > { %v1329_v44 = vpop.permute.xlu1 %1328 }
 0x364   : > { %1999 = vrcp.f32 %v1329_v44 }
 0x367   : > { %v1334_v47 = vpop.permute.xlu0 %1333 }
 0x368   : > { %2001 = vrcp.f32 %v1334_v47 }
 0x36b   : > { %v1344_v57 = vpop.permute.xlu0 %1343 }
 0x36c   : > { %2003 = vrcp.f32 %v1344_v57 }
 0x36e   : > { %v2000_v61 = vpop.eup %1999 }
 0x36f   : > { %v1407_v37 = vmul.f32 %v2000_v61, %v1294_v43  ;;  %v1339_v55 = vpop.permute.xlu1 %1338 }
 0x370   : > { %2005 = vrcp.f32 %v1339_v55 }
 0x371   : > { %1438 = vst.msk [vmem:[%s2667_s8] sm:$0xff] %vm326_vm0, %v1407_v37 }
 0x372   : > { %v2002_v50 = vpop.eup %2001 }
 0x373   : > { %v1409_v45 = vmul.f32 %v2002_v50, %v1295_v0  ;;  %v1354_v58 = vpop.permute.xlu0 %1353 }
 0x374   : > { %2007 = vrcp.f32 %v1354_v58 }
 0x375   : > { %1439 = vst.msk [vmem:[%s2667_s8 + $0x8] sm:$0xff] %vm326_vm0, %v1409_v45 }
 0x376   : > { %v2004_v63 = vpop.eup %2003 }
 0x377   : > { %v1413_v13 = vmul.f32 %v2004_v63, %v1297_v8  ;;  %v1349_v21 = vpop.permute.xlu1 %1348 }
 0x378   : > { %2009 = vrcp.f32 %v1349_v21 }
 0x379   : > { %1441 = vst.msk [vmem:[%s2667_s8 + $0x18] sm:$0xff] %vm326_vm0, %v1413_v13 }
 0x37a   : > { %v2006_v17 = vpop.eup %2005 }
 0x37b   : > { %v1411_v18 = vmul.f32 %v2006_v17, %v1296_v32  ;;  %v1364_v19 = vpop.permute.xlu0 %1363 }
 0x37c   : > { %2011 = vrcp.f32 %v1364_v19 }
 0x37d   : > { %1440 = vst.msk [vmem:[%s2667_s8 + $0x10] sm:$0xff] %vm326_vm0, %v1411_v18 }
 0x37e   : > { %v2008_v4 = vpop.eup %2007 }
 0x37f   : > { %v1417_v29 = vmul.f32 %v2008_v4, %v1299_v22  ;;  %v1359_v30 = vpop.permute.xlu1 %1358 }
 0x380   : > { %2013 = vrcp.f32 %v1359_v30  ;;  %v1374_v24 = vpop.permute.xlu0 %1373 }
 0x381   : > { %1443 = vst.msk [vmem:[%s2667_s8 + $0x28] sm:$0xff] %vm326_vm0, %v1417_v29  ;;  %2015 = vrcp.f32 %v1374_v24 }
 0x382   : > { %v2010_v7 = vpop.eup %2009 }
 0x383   : > { %v1415_v3 = vmul.f32 %v2010_v7, %v1298_v9  ;;  %v1369_v59 = vpop.permute.xlu1 %1368 }
 0x384   : > { %2017 = vrcp.f32 %v1369_v59  ;;  %v1384_v48 = vpop.permute.xlu0 %1383 }
 0x385   : > { %1442 = vst.msk [vmem:[%s2667_s8 + $0x20] sm:$0xff] %vm326_vm0, %v1415_v3  ;;  %2019 = vrcp.f32 %v1384_v48 }
 0x386   : > { %v2012_v54 = vpop.eup %2011 }
 0x387   : > { %v1421_v38 = vmul.f32 %v2012_v54, %v1301_v62  ;;  %v1379_v46 = vpop.permute.xlu1 %1378 }
 0x388   : > { %2021 = vrcp.f32 %v1379_v46  ;;  %v1394_v20 = vpop.permute.xlu0 %1393 }
 0x389   : > { %1445 = vst.msk [vmem:[%s2667_s8 + $0x38] sm:$0xff] %vm326_vm0, %v1421_v38  ;;  %2023 = vrcp.f32 %v1394_v20 }
 0x38a   : > { %v2014_v56 = vpop.eup %2013 }
 0x38b   : > { %v2016_v14 = vpop.eup %2015  ;;  %v1419_v16 = vmul.f32 %v2014_v56, %v1300_v2  ;;  %v1389_v39 = vpop.permute.xlu1 %1388 }
 0x38c   : > { %v1425_v60 = vmul.f32 %v2016_v14, %v1303_v49  ;;  %2025 = vrcp.f32 %v1389_v39  ;;  %v1404_v31 = vpop.permute.xlu0 %1403 }
 0x38d   : > { %1444 = vst.msk [vmem:[%s2667_s8 + $0x30] sm:$0xff] %vm326_vm0, %v1419_v16  ;;  %2027 = vrcp.f32 %v1404_v31 }
 0x38e   : > { %v2018_v34 = vpop.eup %2017  ;;  %1447 = vst.msk [vmem:[%s2667_s8 + $0x48] sm:$0xff] %vm326_vm0, %v1425_v60 }
 0x38f   : > { %v2020_v12 = vpop.eup %2019  ;;  %v1423_v27 = vmul.f32 %v2018_v34, %v1302_v6  ;;  %v1399_v53 = vpop.permute.xlu1 %1398 }
 0x390   : > { %v1429_v36 = vmul.f32 %v2020_v12, %v1305_v23  ;;  %2029 = vrcp.f32 %v1399_v53 }
 0x391   : > { %1446 = vst.msk [vmem:[%s2667_s8 + $0x40] sm:$0xff] %vm326_vm0, %v1423_v27 }
 0x392   : > { %v2022_v42 = vpop.eup %2021  ;;  %1449 = vst.msk [vmem:[%s2667_s8 + $0x58] sm:$0xff] %vm326_vm0, %v1429_v36 }
 0x393   : > { %v2024_v25 = vpop.eup %2023  ;;  %v1427_v1 = vmul.f32 %v2022_v42, %v1304_v15 }
 0x394   : > { %v1433_v11 = vmul.f32 %v2024_v25, %v1307_v40 }
 0x395   : > { %1448 = vst.msk [vmem:[%s2667_s8 + $0x50] sm:$0xff] %vm326_vm0, %v1427_v1 }
 0x396   : > { %v2026_v26 = vpop.eup %2025  ;;  %1451 = vst.msk [vmem:[%s2667_s8 + $0x68] sm:$0xff] %vm326_vm0, %v1433_v11 }
 0x397   : > { %v2028_v28 = vpop.eup %2027  ;;  %v1431_v5 = vmul.f32 %v2026_v26, %v1306_v33 }
 0x398   : > { %v1437_v52 = vmul.f32 %v2028_v28, %v1309_v41 }
 0x399   : > { %1450 = vst.msk [vmem:[%s2667_s8 + $0x60] sm:$0xff] %vm326_vm0, %v1431_v5 }
 0x39a   : > { %v2030_v35 = vpop.eup %2029  ;;  %1453 = vst.msk [vmem:[%s2667_s8 + $0x78] sm:$0xff] %vm326_vm0, %v1437_v52 }
 0x39b   : > { %v1435_v10 = vmul.f32 %v2030_v35, %v1308_v51 }
 0x39d   : > { %1452 = vst.msk [vmem:[%s2667_s8 + $0x70] sm:$0xff] %vm326_vm0, %v1435_v10 }
 0x39e PF: > { %s13_s16 = sadd.s32 1, %s2069_s16   ;;  %s2726_s12 = smov %s2061_s14 }
 0x39f   : > { %p10_p7 = scmp.ge.s32.totalorder %s13_s16, 18   ;;  %s2727_s13 = smov %s2065_s15 }
 0x3a0   : > { %s2728_s14 = smov %s2731_s17  ;;  %s2729_s15 = smov %s2735_s18 }
 0x3a1   :  { %12 = sbr.rel (!%p10_p7) target bundleno = 3 (0x3), region = 76 }

</bundles_post_ra>
